<compile_context>
chip_gen: v6e
topology: v6e:2x2x1
jax: 0.10.0
libtpu: 0.0.40
codegen_flags: <defaults>
</compile_context>

<pallas_src>
import functools

import jax
import jax.numpy as jnp
import numpy as np
from jax.experimental import pallas as pl
from jax.experimental.pallas import tpu as pltpu


_VMEM_LIMIT = 32 * 1024 * 1024


def _round_up(x, m):
    return (x + m - 1) // m * m


def _pick_tm(M, tm_max=256):
    """M-tile: multiple of 16, and >=2 grid tiles whenever M allows (v7x megacore)."""
    n_tiles = max(2, pl.cdiv(M, tm_max))
    tm = _round_up(pl.cdiv(M, n_tiles), 16)
    return max(16, min(tm, _round_up(M, 16)))


# ---------------------------------------------------------------------------
# Fused GEMM + folded-BatchNorm + ReLU (single full-K contraction per M tile)
# ---------------------------------------------------------------------------
def _gemm_bn_relu_kernel(p_ref, w_ref, s_ref, b_ref, o_ref):
    acc = jnp.dot(p_ref[...], w_ref[...], preferred_element_type=jnp.float32)
    o_ref[...] = jnp.maximum(acc * s_ref[...] + b_ref[...], 0.0).astype(o_ref.dtype)


def conv_bn_relu_gemm(flat, weight, scale, bias, *, out_dtype=jnp.bfloat16, tm_max=256):
    """flat: [M, K] activations/patches, weight: [K, Cout], scale/bias: [1, Cout]."""
    M, K = flat.shape
    Cout = weight.shape[1]
    TM = _pick_tm(M, tm_max)

    return pl.pallas_call(
        _gemm_bn_relu_kernel,
        out_shape=jax.ShapeDtypeStruct((M, Cout), out_dtype),
        grid_spec=pltpu.PrefetchScalarGridSpec(
            num_scalar_prefetch=0,
            grid=(pl.cdiv(M, TM),),
            in_specs=[
                pl.BlockSpec((TM, K), lambda m: (m, 0)),      # activation tile
                pl.BlockSpec((K, Cout), lambda m: (0, 0)),    # weight: VMEM-resident
                pl.BlockSpec((1, Cout), lambda m: (0, 0)),    # folded-BN scale
                pl.BlockSpec((1, Cout), lambda m: (0, 0)),    # folded-BN bias
            ],
            out_specs=pl.BlockSpec((TM, Cout), lambda m: (m, 0)),
        ),
        compiler_params=pltpu.CompilerParams(
            dimension_semantics=("parallel",),
            vmem_limit_bytes=_VMEM_LIMIT),
    )(flat.astype(jnp.bfloat16), weight.astype(jnp.bfloat16), scale, bias)


# ---------------------------------------------------------------------------
# Fused final stage: branch0 conv, branch1 final conv and the maxpool all write
# directly into their channel block of one [M, 3*384] buffer (no concat pass).
# ---------------------------------------------------------------------------
def _fused_final_kernel(p3_ref, p1_ref, w0_ref, s0_ref, b0_ref,
                        w1_ref, s1_ref, b1_ref, o_ref, *, cin, taps):
    """Grid = (M tiles, 3).  j=0: 3x3/s2 conv GEMM, j=1: branch1 final conv GEMM,
    j=2: 3x3/s2 maxpool.  Each j owns one 384-wide channel block of the output."""
    j = pl.program_id(1)

    @pl.when(j == 0)
    def _():
        acc = jnp.dot(p3_ref[...], w0_ref[...], preferred_element_type=jnp.float32)
        o_ref[...] = jnp.maximum(acc * s0_ref[...] + b0_ref[...], 0.0).astype(o_ref.dtype)

    @pl.when(j == 1)
    def _():
        acc = jnp.dot(p1_ref[...], w1_ref[...], preferred_element_type=jnp.float32)
        o_ref[...] = jnp.maximum(acc * s1_ref[...] + b1_ref[...], 0.0).astype(o_ref.dtype)

    @pl.when(j == 2)
    def _():
        r = p3_ref[:, :cin].astype(jnp.float32)
        for t in range(1, taps):
            r = jnp.maximum(r, p3_ref[:, t * cin:(t + 1) * cin].astype(jnp.float32))
        o_ref[...] = jnp.zeros_like(o_ref)          # zero the padded tail lanes
        o_ref[:, :cin] = r.astype(o_ref.dtype)


def fused_branches(p3, p1, w0, s0, b0, w1, s1, b1, cin, *, col_width=384, tm_max=256):
    """p3: [M, 9*Cin] shared stride-2 patches (conv + pool), p1: [M, 9*256] patches.

    Returns [M, 3*col_width] float32: [x0 | x1 | maxpool (zero-padded to col_width)].
    """
    M, K0 = p3.shape
    M1, K1 = p1.shape
    assert M == M1 and K0 % cin == 0
    C0, C1 = w0.shape[1], w1.shape[1]
    assert C0 == col_width and C1 == col_width and cin <= col_width
    taps = K0 // cin
    TM = _pick_tm(M, tm_max)
    total = 3 * col_width

    kernel = functools.partial(_fused_final_kernel, cin=cin, taps=taps)
    return pl.pallas_call(
        kernel,
        out_shape=jax.ShapeDtypeStruct((M, total), jnp.float32),
        grid_spec=pltpu.PrefetchScalarGridSpec(
            num_scalar_prefetch=0,
            grid=(pl.cdiv(M, TM), 3),
            in_specs=[
                pl.BlockSpec((TM, K0), lambda m, j: (m, 0)),   # shared s2 patches
                pl.BlockSpec((TM, K1), lambda m, j: (m, 0)),   # branch1 s2 patches
                pl.BlockSpec((K0, C0), lambda m, j: (0, 0)),   # weights: VMEM-resident
                pl.BlockSpec((1, C0), lambda m, j: (0, 0)),
                pl.BlockSpec((1, C0), lambda m, j: (0, 0)),
                pl.BlockSpec((K1, C1), lambda m, j: (0, 0)),
                pl.BlockSpec((1, C1), lambda m, j: (0, 0)),
                pl.BlockSpec((1, C1), lambda m, j: (0, 0)),
            ],
            out_specs=pl.BlockSpec((TM, col_width), lambda m, j: (m, j)),
        ),
        compiler_params=pltpu.CompilerParams(
            dimension_semantics=("parallel", "arbitrary"),
            vmem_limit_bytes=_VMEM_LIMIT),
    )(p3.astype(jnp.bfloat16), p1.astype(jnp.bfloat16),
      w0.astype(jnp.bfloat16), s0, b0,
      w1.astype(jnp.bfloat16), s1, b1)


# ---------------------------------------------------------------------------
# Plain-JAX glue: im2col patch extraction (zero padding like PyTorch)
# ---------------------------------------------------------------------------
def extract_patches_flat(x_nhwc, ksize, stride, padding):
    """[N,H,W,C] -> flat im2col [N*Ho*Wo, ksize*ksize*C] (tap-major columns), Ho, Wo."""
    N, H, W, C = x_nhwc.shape
    if padding:
        x_nhwc = jnp.pad(
            x_nhwc, ((0, 0), (padding, padding), (padding, padding), (0, 0)))
    Hp, Wp = x_nhwc.shape[1], x_nhwc.shape[2]
    Ho = (Hp - ksize) // stride + 1
    Wo = (Wp - ksize) // stride + 1
    taps = []
    for kh in range(ksize):
        for kw in range(ksize):
            sl = jax.lax.slice(
                x_nhwc,
                (0, kh, kw, 0),
                (N, kh + stride * (Ho - 1) + 1, kw + stride * (Wo - 1) + 1, C),
                (1, stride, stride, 1))
            taps.append(sl.reshape(N * Ho * Wo, C))
    # TODO(synk): fold this im2col into the conv kernels (tap-shifted reads from a
    # VMEM-resident NHWC block) so the 9x patch tensor is never materialized in HBM.
    return jnp.concatenate(taps, axis=1), Ho, Wo


def basic_conv2d(x_nhwc, p, ksize, stride, padding=0):
    N = x_nhwc.shape[0]
    Cout = p["w"].shape[-1]
    if ksize == 1 and stride == 1 and padding == 0:
        flat = x_nhwc.reshape(-1, x_nhwc.shape[-1])       # 1x1 conv: plain GEMM
        Ho, Wo = x_nhwc.shape[1], x_nhwc.shape[2]
    else:
        flat, Ho, Wo = extract_patches_flat(x_nhwc, ksize, stride, padding)
    y = conv_bn_relu_gemm(flat, p["w"].reshape(-1, Cout), p["scale"], p["bias"])
    return y.reshape(N, Ho, Wo, Cout)                     # bf16 intermediate


def mixed_6a(x_nchw, params):
    x = jnp.transpose(x_nchw, (0, 2, 3, 1)).astype(jnp.bfloat16)   # NCHW -> NHWC bf16
    N, H, W, Cin = x.shape

    # Shared 3x3 / stride-2 im2col (branch0's conv and branch2's maxpool).
    p3, Ho, Wo = extract_patches_flat(x, 3, 2, 0)                  # [M, 9*Cin]

    # branch1: 1x1 -> 3x3(pad 1) -> (patches for) 3x3 stride-2; bf16 intermediates.
    y = basic_conv2d(x, params["b1_0"], 1, 1, 0)
    y = basic_conv2d(y, params["b1_1"], 3, 1, 1)
    p1, _, _ = extract_patches_flat(y, 3, 2, 0)                    # [M, 9*256]

    # One fused call: branch0 conv, branch1 final conv and the maxpool each write
    # their own channel block of the [M, 3*384] fused output (no concat pass).
    b0, b12 = params["b0"], params["b1_2"]
    C0, C1 = b0["w"].shape[-1], b12["w"].shape[-1]
    buf = fused_branches(
        p3, p1,
        b0["w"].reshape(-1, C0), b0["scale"], b0["bias"],
        b12["w"].reshape(-1, C1), b12["scale"], b12["bias"],
        Cin)

    out = buf.reshape(N, Ho, Wo, buf.shape[-1])[..., :C0 + C1 + Cin]
    return jnp.transpose(out, (0, 3, 1, 2))                        # NHWC -> NCHW (f32)


# ---------------------------------------------------------------------------
# Deterministic synthetic parameters (BatchNorm in eval mode, folded)
# ---------------------------------------------------------------------------
def init_basic_conv(key, cin, cout, k):
    kw_, kg, kb, km, kv = jax.random.split(key, 5)
    fan_in = cin * k * k
    w = jax.random.normal(kw_, (k * k, cin, cout), jnp.float32) / jnp.sqrt(fan_in)
    gamma = jax.random.uniform(kg, (cout,), jnp.float32, 0.5, 1.5)
    beta = 0.1 * jax.random.normal(kb, (cout,), jnp.float32)
    running_mean = 0.1 * jax.random.normal(km, (cout,), jnp.float32)
    running_var = jax.random.uniform(kv, (cout,), jnp.float32, 0.5, 1.5)
    eps = 1e-3
    scale = gamma / jnp.sqrt(running_var + eps)
    bias = beta - running_mean * scale
    return dict(w=w, scale=scale.reshape(1, cout), bias=bias.reshape(1, cout))


# ---------------------------------------------------------------------------
# Pure-JAX reference (same bf16 cast points, f32 accumulation) for validation
# ---------------------------------------------------------------------------
def reference(x_nchw, params):
    x = jnp.transpose(x_nchw, (0, 2, 3, 1))

    def bcr(xx, p, k, stride, pad):
        cin, cout = p["w"].shape[1], p["w"].shape[2]
        w = p["w"].reshape(k, k, cin, cout).astype(jnp.bfloat16)
        y = jax.lax.conv_general_dilated(
            xx.astype(jnp.bfloat16), w, (stride, stride), [(pad, pad), (pad, pad)],
            dimension_numbers=("NHWC", "HWIO", "NHWC"),
            preferred_element_type=jnp.float32)
        y = y * p["scale"].reshape(1, 1, 1, cout) + p["bias"].reshape(1, 1, 1, cout)
        return jnp.maximum(y, 0.0)

    x0 = bcr(x, params["b0"], 3, 2, 0)
    y = bcr(x, params["b1_0"], 1, 1, 0).astype(jnp.bfloat16)
    y = bcr(y, params["b1_1"], 3, 1, 1).astype(jnp.bfloat16)
    x1 = bcr(y, params["b1_2"], 3, 2, 0)
    xb = x.astype(jnp.bfloat16).astype(jnp.float32)
    x2 = jax.lax.reduce_window(xb, -jnp.inf, jax.lax.max,
                               (1, 3, 3, 1), (1, 2, 2, 1), "VALID")
    out = jnp.concatenate([x0, x1, x2], axis=-1)
    return jnp.transpose(out, (0, 3, 1, 2))


# ---------------------------------------------------------------------------
if __name__ == "__main__":
    key = jax.random.PRNGKey(0)
    kx, k0, k1, k2, k3 = jax.random.split(key, 5)
    params = {
        "b0":   init_basic_conv(k0, 320, 384, 3),
        "b1_0": init_basic_conv(k1, 320, 256, 1),
        "b1_1": init_basic_conv(k2, 256, 256, 3),
        "b1_2": init_basic_conv(k3, 256, 384, 3),
    }
    # Small but module-consistent input: channels are fixed to 320 by the module.
    x = jax.random.normal(kx, (2, 320, 9, 9), jnp.float32)   # NCHW

    fwd = jax.jit(functools.partial(mixed_6a, params=params))
    out = jax.block_until_ready(fwd(x))
    assert out.shape == (2, 384 + 384 + 320, 4, 4), out.shape

    ref = jax.block_until_ready(reference(x, params))
    np.testing.assert_allclose(np.asarray(out), np.asarray(ref),
                               rtol=1e-2, atol=1e-2)
    print("KERNEL_OK")
</pallas_src>

<mosaic_0001>
module attributes {stable_mosaic.version = 11 : i64} {
  func.func @_gemm_bn_relu_kernel(%arg0: i32, %arg1: memref<96x320xbf16, #tpu.memory_space<vmem>>, %arg2: memref<320x256xbf16, #tpu.memory_space<vmem>>, %arg3: memref<1x256xf32, #tpu.memory_space<vmem>>, %arg4: memref<1x256xf32, #tpu.memory_space<vmem>>, %arg5: memref<96x256xbf16, #tpu.memory_space<vmem>>) attributes {dimension_semantics = [#tpu.dimension_semantics<parallel>], iteration_bounds = array<i64: 2>, scalar_prefetch = 0 : i64, scratch_operands = 0 : i64, tpu.core_type = #tpu.core_type<tc>, window_params = [{transform_indices = @transform_0, window_bounds = array<i64: 96, 320>}, {pipeline_mode = #tpu.pipeline_mode<synchronous>, transform_indices = @transform_1, window_bounds = array<i64: 320, 256>}, {pipeline_mode = #tpu.pipeline_mode<synchronous>, transform_indices = @transform_2, window_bounds = array<i64: 1, 256>}, {pipeline_mode = #tpu.pipeline_mode<synchronous>, transform_indices = @transform_3, window_bounds = array<i64: 1, 256>}, {transform_indices = @transform_4, window_bounds = array<i64: 96, 256>}]} {
    %c0 = arith.constant 0 : index
    %c0_0 = arith.constant 0 : index
    %0 = vector.load %arg1[%c0, %c0_0] : memref<96x320xbf16, #tpu.memory_space<vmem>>, vector<96x320xbf16>
    %c0_1 = arith.constant 0 : index
    %c0_2 = arith.constant 0 : index
    %1 = vector.load %arg2[%c0_1, %c0_2] : memref<320x256xbf16, #tpu.memory_space<vmem>>, vector<320x256xbf16>
    %cst = arith.constant dense<0.000000e+00> : vector<96x256xf32>
    %2 = tpu.matmul %0, %1, %cst {dimension_numbers = #tpu.dot_dimension_numbers<[1], [0], [0], [1], [0, 0, 1, 1], [], []>} : vector<96x320xbf16>, vector<320x256xbf16>, vector<96x256xf32> -> vector<96x256xf32>
    %c0_3 = arith.constant 0 : index
    %c0_4 = arith.constant 0 : index
    %3 = vector.load %arg3[%c0_3, %c0_4] : memref<1x256xf32, #tpu.memory_space<vmem>>, vector<1x256xf32>
    %4 = vector.broadcast %3 : vector<1x256xf32> to vector<96x256xf32>
    %5 = arith.mulf %2, %4 : vector<96x256xf32>
    %c0_5 = arith.constant 0 : index
    %c0_6 = arith.constant 0 : index
    %6 = vector.load %arg4[%c0_5, %c0_6] : memref<1x256xf32, #tpu.memory_space<vmem>>, vector<1x256xf32>
    %7 = vector.broadcast %6 : vector<1x256xf32> to vector<96x256xf32>
    %8 = arith.addf %5, %7 : vector<96x256xf32>
    %cst_7 = arith.constant 0.000000e+00 : f32
    %9 = vector.broadcast %cst_7 : f32 to vector<96x256xf32>
    %10 = arith.maximumf %8, %9 : vector<96x256xf32>
    %11 = arith.truncf %10 : vector<96x256xf32> to vector<96x256xbf16>
    %c0_8 = arith.constant 0 : index
    %c0_9 = arith.constant 0 : index
    %12 = vector.load %arg5[%c0_8, %c0_9] : memref<96x256xbf16, #tpu.memory_space<vmem>>, vector<96x256xbf16>
    tpu.vector_store %arg5[%c0_8, %c0_9], %11 {strides = array<i32>} : memref<96x256xbf16, #tpu.memory_space<vmem>>, vector<96x256xbf16>,
    return
  }
  func.func @transform_0(%arg0: i32) -> (i32, i32) {
    %c0_i32 = arith.constant 0 : i32
    %c0_i32_0 = arith.constant 0 : i32
    return %arg0, %c0_i32 : i32, i32
  }
  func.func @transform_1(%arg0: i32) -> (i32, i32) {
    %c0_i32 = arith.constant 0 : i32
    %c0_i32_0 = arith.constant 0 : i32
    %c0_i32_1 = arith.constant 0 : i32
    return %c0_i32, %c0_i32_0 : i32, i32
  }
  func.func @transform_2(%arg0: i32) -> (i32, i32) {
    %c0_i32 = arith.constant 0 : i32
    %c0_i32_0 = arith.constant 0 : i32
    %c0_i32_1 = arith.constant 0 : i32
    return %c0_i32, %c0_i32_0 : i32, i32
  }
  func.func @transform_3(%arg0: i32) -> (i32, i32) {
    %c0_i32 = arith.constant 0 : i32
    %c0_i32_0 = arith.constant 0 : i32
    %c0_i32_1 = arith.constant 0 : i32
    return %c0_i32, %c0_i32_0 : i32, i32
  }
  func.func @transform_4(%arg0: i32) -> (i32, i32) {
    %c0_i32 = arith.constant 0 : i32
    %c0_i32_0 = arith.constant 0 : i32
    return %arg0, %c0_i32 : i32, i32
  }
}

module attributes {stable_mosaic.version = 11 : i64} {
  func.func @_gemm_bn_relu_kernel(%arg0: i32, %arg1: memref<96x2304xbf16, #tpu.memory_space<vmem>>, %arg2: memref<2304x256xbf16, #tpu.memory_space<vmem>>, %arg3: memref<1x256xf32, #tpu.memory_space<vmem>>, %arg4: memref<1x256xf32, #tpu.memory_space<vmem>>, %arg5: memref<96x256xbf16, #tpu.memory_space<vmem>>) attributes {dimension_semantics = [#tpu.dimension_semantics<parallel>], iteration_bounds = array<i64: 2>, scalar_prefetch = 0 : i64, scratch_operands = 0 : i64, tpu.core_type = #tpu.core_type<tc>, window_params = [{transform_indices = @transform_0, window_bounds = array<i64: 96, 2304>}, {pipeline_mode = #tpu.pipeline_mode<synchronous>, transform_indices = @transform_1, window_bounds = array<i64: 2304, 256>}, {pipeline_mode = #tpu.pipeline_mode<synchronous>, transform_indices = @transform_2, window_bounds = array<i64: 1, 256>}, {pipeline_mode = #tpu.pipeline_mode<synchronous>, transform_indices = @transform_3, window_bounds = array<i64: 1, 256>}, {transform_indices = @transform_4, window_bounds = array<i64: 96, 256>}]} {
    %c0 = arith.constant 0 : index
    %c0_0 = arith.constant 0 : index
    %0 = vector.load %arg1[%c0, %c0_0] : memref<96x2304xbf16, #tpu.memory_space<vmem>>, vector<96x2304xbf16>
    %c0_1 = arith.constant 0 : index
    %c0_2 = arith.constant 0 : index
    %1 = vector.load %arg2[%c0_1, %c0_2] : memref<2304x256xbf16, #tpu.memory_space<vmem>>, vector<2304x256xbf16>
    %cst = arith.constant dense<0.000000e+00> : vector<96x256xf32>
    %2 = tpu.matmul %0, %1, %cst {dimension_numbers = #tpu.dot_dimension_numbers<[1], [0], [0], [1], [0, 0, 1, 1], [], []>} : vector<96x2304xbf16>, vector<2304x256xbf16>, vector<96x256xf32> -> vector<96x256xf32>
    %c0_3 = arith.constant 0 : index
    %c0_4 = arith.constant 0 : index
    %3 = vector.load %arg3[%c0_3, %c0_4] : memref<1x256xf32, #tpu.memory_space<vmem>>, vector<1x256xf32>
    %4 = vector.broadcast %3 : vector<1x256xf32> to vector<96x256xf32>
    %5 = arith.mulf %2, %4 : vector<96x256xf32>
    %c0_5 = arith.constant 0 : index
    %c0_6 = arith.constant 0 : index
    %6 = vector.load %arg4[%c0_5, %c0_6] : memref<1x256xf32, #tpu.memory_space<vmem>>, vector<1x256xf32>
    %7 = vector.broadcast %6 : vector<1x256xf32> to vector<96x256xf32>
    %8 = arith.addf %5, %7 : vector<96x256xf32>
    %cst_7 = arith.constant 0.000000e+00 : f32
    %9 = vector.broadcast %cst_7 : f32 to vector<96x256xf32>
    %10 = arith.maximumf %8, %9 : vector<96x256xf32>
    %11 = arith.truncf %10 : vector<96x256xf32> to vector<96x256xbf16>
    %c0_8 = arith.constant 0 : index
    %c0_9 = arith.constant 0 : index
    %12 = vector.load %arg5[%c0_8, %c0_9] : memref<96x256xbf16, #tpu.memory_space<vmem>>, vector<96x256xbf16>
    tpu.vector_store %arg5[%c0_8, %c0_9], %11 {strides = array<i32>} : memref<96x256xbf16, #tpu.memory_space<vmem>>, vector<96x256xbf16>,
    return
  }
  func.func @transform_0(%arg0: i32) -> (i32, i32) {
    %c0_i32 = arith.constant 0 : i32
    %c0_i32_0 = arith.constant 0 : i32
    return %arg0, %c0_i32 : i32, i32
  }
  func.func @transform_1(%arg0: i32) -> (i32, i32) {
    %c0_i32 = arith.constant 0 : i32
    %c0_i32_0 = arith.constant 0 : i32
    %c0_i32_1 = arith.constant 0 : i32
    return %c0_i32, %c0_i32_0 : i32, i32
  }
  func.func @transform_2(%arg0: i32) -> (i32, i32) {
    %c0_i32 = arith.constant 0 : i32
    %c0_i32_0 = arith.constant 0 : i32
    %c0_i32_1 = arith.constant 0 : i32
    return %c0_i32, %c0_i32_0 : i32, i32
  }
  func.func @transform_3(%arg0: i32) -> (i32, i32) {
    %c0_i32 = arith.constant 0 : i32
    %c0_i32_0 = arith.constant 0 : i32
    %c0_i32_1 = arith.constant 0 : i32
    return %c0_i32, %c0_i32_0 : i32, i32
  }
  func.func @transform_4(%arg0: i32) -> (i32, i32) {
    %c0_i32 = arith.constant 0 : i32
    %c0_i32_0 = arith.constant 0 : i32
    return %arg0, %c0_i32 : i32, i32
  }
}

module attributes {stable_mosaic.version = 11 : i64} {
  func.func @_fused_final_kernel(%arg0: i32, %arg1: i32, %arg2: memref<16x2880xbf16, #tpu.memory_space<vmem>>, %arg3: memref<16x2304xbf16, #tpu.memory_space<vmem>>, %arg4: memref<2880x384xbf16, #tpu.memory_space<vmem>>, %arg5: memref<1x384xf32, #tpu.memory_space<vmem>>, %arg6: memref<1x384xf32, #tpu.memory_space<vmem>>, %arg7: memref<2304x384xbf16, #tpu.memory_space<vmem>>, %arg8: memref<1x384xf32, #tpu.memory_space<vmem>>, %arg9: memref<1x384xf32, #tpu.memory_space<vmem>>, %arg10: memref<16x384xf32, #tpu.memory_space<vmem>>) attributes {dimension_semantics = [#tpu.dimension_semantics<parallel>, #tpu.dimension_semantics<arbitrary>], iteration_bounds = array<i64: 2, 3>, scalar_prefetch = 0 : i64, scratch_operands = 0 : i64, tpu.core_type = #tpu.core_type<tc>, window_params = [{transform_indices = @transform_0, window_bounds = array<i64: 16, 2880>}, {transform_indices = @transform_1, window_bounds = array<i64: 16, 2304>}, {pipeline_mode = #tpu.pipeline_mode<synchronous>, transform_indices = @transform_2, window_bounds = array<i64: 2880, 384>}, {pipeline_mode = #tpu.pipeline_mode<synchronous>, transform_indices = @transform_3, window_bounds = array<i64: 1, 384>}, {pipeline_mode = #tpu.pipeline_mode<synchronous>, transform_indices = @transform_4, window_bounds = array<i64: 1, 384>}, {pipeline_mode = #tpu.pipeline_mode<synchronous>, transform_indices = @transform_5, window_bounds = array<i64: 2304, 384>}, {pipeline_mode = #tpu.pipeline_mode<synchronous>, transform_indices = @transform_6, window_bounds = array<i64: 1, 384>}, {pipeline_mode = #tpu.pipeline_mode<synchronous>, transform_indices = @transform_7, window_bounds = array<i64: 1, 384>}, {transform_indices = @transform_8, window_bounds = array<i64: 16, 384>}]} {
    %c0_i32 = arith.constant 0 : i32
    %0 = arith.cmpi eq, %arg1, %c0_i32 : i32
    %1 = arith.extui %0 : i1 to i32
    %c0_i32_0 = arith.constant 0 : i32
    %2 = arith.cmpi ne, %1, %c0_i32_0 : i32
    scf.if %2 {
      %c0 = arith.constant 0 : index
      %c0_3 = arith.constant 0 : index
      %9 = vector.load %arg2[%c0, %c0_3] : memref<16x2880xbf16, #tpu.memory_space<vmem>>, vector<16x2880xbf16>
      %c0_4 = arith.constant 0 : index
      %c0_5 = arith.constant 0 : index
      %10 = vector.load %arg4[%c0_4, %c0_5] : memref<2880x384xbf16, #tpu.memory_space<vmem>>, vector<2880x384xbf16>
      %cst = arith.constant dense<0.000000e+00> : vector<16x384xf32>
      %11 = tpu.matmul %9, %10, %cst {dimension_numbers = #tpu.dot_dimension_numbers<[1], [0], [0], [1], [0, 0, 1, 1], [], []>} : vector<16x2880xbf16>, vector<2880x384xbf16>, vector<16x384xf32> -> vector<16x384xf32>
      %c0_6 = arith.constant 0 : index
      %c0_7 = arith.constant 0 : index
      %12 = vector.load %arg5[%c0_6, %c0_7] : memref<1x384xf32, #tpu.memory_space<vmem>>, vector<1x384xf32>
      %13 = vector.broadcast %12 : vector<1x384xf32> to vector<16x384xf32>
      %14 = arith.mulf %11, %13 : vector<16x384xf32>
      %c0_8 = arith.constant 0 : index
      %c0_9 = arith.constant 0 : index
      %15 = vector.load %arg6[%c0_8, %c0_9] : memref<1x384xf32, #tpu.memory_space<vmem>>, vector<1x384xf32>
      %16 = vector.broadcast %15 : vector<1x384xf32> to vector<16x384xf32>
      %17 = arith.addf %14, %16 : vector<16x384xf32>
      %cst_10 = arith.constant 0.000000e+00 : f32
      %18 = vector.broadcast %cst_10 : f32 to vector<16x384xf32>
      %19 = arith.maximumf %17, %18 : vector<16x384xf32>
      %c0_11 = arith.constant 0 : index
      %c0_12 = arith.constant 0 : index
      %20 = vector.load %arg10[%c0_11, %c0_12] : memref<16x384xf32, #tpu.memory_space<vmem>>, vector<16x384xf32>
      tpu.vector_store %arg10[%c0_11, %c0_12], %19 {strides = array<i32>} : memref<16x384xf32, #tpu.memory_space<vmem>>, vector<16x384xf32>,
    } else {
    }
    %c1_i32 = arith.constant 1 : i32
    %3 = arith.cmpi eq, %arg1, %c1_i32 : i32
    %4 = arith.extui %3 : i1 to i32
    %c0_i32_1 = arith.constant 0 : i32
    %5 = arith.cmpi ne, %4, %c0_i32_1 : i32
    scf.if %5 {
      %c0 = arith.constant 0 : index
      %c0_3 = arith.constant 0 : index
      %9 = vector.load %arg3[%c0, %c0_3] : memref<16x2304xbf16, #tpu.memory_space<vmem>>, vector<16x2304xbf16>
      %c0_4 = arith.constant 0 : index
      %c0_5 = arith.constant 0 : index
      %10 = vector.load %arg7[%c0_4, %c0_5] : memref<2304x384xbf16, #tpu.memory_space<vmem>>, vector<2304x384xbf16>
      %cst = arith.constant dense<0.000000e+00> : vector<16x384xf32>
      %11 = tpu.matmul %9, %10, %cst {dimension_numbers = #tpu.dot_dimension_numbers<[1], [0], [0], [1], [0, 0, 1, 1], [], []>} : vector<16x2304xbf16>, vector<2304x384xbf16>, vector<16x384xf32> -> vector<16x384xf32>
      %c0_6 = arith.constant 0 : index
      %c0_7 = arith.constant 0 : index
      %12 = vector.load %arg8[%c0_6, %c0_7] : memref<1x384xf32, #tpu.memory_space<vmem>>, vector<1x384xf32>
      %13 = vector.broadcast %12 : vector<1x384xf32> to vector<16x384xf32>
      %14 = arith.mulf %11, %13 : vector<16x384xf32>
      %c0_8 = arith.constant 0 : index
      %c0_9 = arith.constant 0 : index
      %15 = vector.load %arg9[%c0_8, %c0_9] : memref<1x384xf32, #tpu.memory_space<vmem>>, vector<1x384xf32>
      %16 = vector.broadcast %15 : vector<1x384xf32> to vector<16x384xf32>
      %17 = arith.addf %14, %16 : vector<16x384xf32>
      %cst_10 = arith.constant 0.000000e+00 : f32
      %18 = vector.broadcast %cst_10 : f32 to vector<16x384xf32>
      %19 = arith.maximumf %17, %18 : vector<16x384xf32>
      %c0_11 = arith.constant 0 : index
      %c0_12 = arith.constant 0 : index
      %20 = vector.load %arg10[%c0_11, %c0_12] : memref<16x384xf32, #tpu.memory_space<vmem>>, vector<16x384xf32>
      tpu.vector_store %arg10[%c0_11, %c0_12], %19 {strides = array<i32>} : memref<16x384xf32, #tpu.memory_space<vmem>>, vector<16x384xf32>,
    } else {
    }
    %c2_i32 = arith.constant 2 : i32
    %6 = arith.cmpi eq, %arg1, %c2_i32 : i32
    %7 = arith.extui %6 : i1 to i32
    %c0_i32_2 = arith.constant 0 : i32
    %8 = arith.cmpi ne, %7, %c0_i32_2 : i32
    scf.if %8 {
      %c0 = arith.constant 0 : index
      %c0_3 = arith.constant 0 : index
      %9 = vector.load %arg2[%c0, %c0_3] : memref<16x2880xbf16, #tpu.memory_space<vmem>>, vector<16x320xbf16>
      %10 = arith.extf %9 : vector<16x320xbf16> to vector<16x320xf32>
      %c0_4 = arith.constant 0 : index
      %c320 = arith.constant 320 : index
      %11 = vector.load %arg2[%c0_4, %c320] : memref<16x2880xbf16, #tpu.memory_space<vmem>>, vector<16x320xbf16>
      %12 = arith.extf %11 : vector<16x320xbf16> to vector<16x320xf32>
      %13 = arith.maximumf %10, %12 : vector<16x320xf32>
      %c0_5 = arith.constant 0 : index
      %c640 = arith.constant 640 : index
      %14 = vector.load %arg2[%c0_5, %c640] : memref<16x2880xbf16, #tpu.memory_space<vmem>>, vector<16x320xbf16>
      %15 = arith.extf %14 : vector<16x320xbf16> to vector<16x320xf32>
      %16 = arith.maximumf %13, %15 : vector<16x320xf32>
      %c0_6 = arith.constant 0 : index
      %c960 = arith.constant 960 : index
      %17 = vector.load %arg2[%c0_6, %c960] : memref<16x2880xbf16, #tpu.memory_space<vmem>>, vector<16x320xbf16>
      %18 = arith.extf %17 : vector<16x320xbf16> to vector<16x320xf32>
      %19 = arith.maximumf %16, %18 : vector<16x320xf32>
      %c0_7 = arith.constant 0 : index
      %c1280 = arith.constant 1280 : index
      %20 = vector.load %arg2[%c0_7, %c1280] : memref<16x2880xbf16, #tpu.memory_space<vmem>>, vector<16x320xbf16>
      %21 = arith.extf %20 : vector<16x320xbf16> to vector<16x320xf32>
      %22 = arith.maximumf %19, %21 : vector<16x320xf32>
      %c0_8 = arith.constant 0 : index
      %c1600 = arith.constant 1600 : index
      %23 = vector.load %arg2[%c0_8, %c1600] : memref<16x2880xbf16, #tpu.memory_space<vmem>>, vector<16x320xbf16>
      %24 = arith.extf %23 : vector<16x320xbf16> to vector<16x320xf32>
      %25 = arith.maximumf %22, %24 : vector<16x320xf32>
      %c0_9 = arith.constant 0 : index
      %c1920 = arith.constant 1920 : index
      %26 = vector.load %arg2[%c0_9, %c1920] : memref<16x2880xbf16, #tpu.memory_space<vmem>>, vector<16x320xbf16>
      %27 = arith.extf %26 : vector<16x320xbf16> to vector<16x320xf32>
      %28 = arith.maximumf %25, %27 : vector<16x320xf32>
      %c0_10 = arith.constant 0 : index
      %c2240 = arith.constant 2240 : index
      %29 = vector.load %arg2[%c0_10, %c2240] : memref<16x2880xbf16, #tpu.memory_space<vmem>>, vector<16x320xbf16>
      %30 = arith.extf %29 : vector<16x320xbf16> to vector<16x320xf32>
      %31 = arith.maximumf %28, %30 : vector<16x320xf32>
      %c0_11 = arith.constant 0 : index
      %c2560 = arith.constant 2560 : index
      %32 = vector.load %arg2[%c0_11, %c2560] : memref<16x2880xbf16, #tpu.memory_space<vmem>>, vector<16x320xbf16>
      %33 = arith.extf %32 : vector<16x320xbf16> to vector<16x320xf32>
      %34 = arith.maximumf %31, %33 : vector<16x320xf32>
      %cst = arith.constant 0.000000e+00 : f32
      %35 = vector.broadcast %cst : f32 to vector<16x384xf32>
      %c0_12 = arith.constant 0 : index
      %c0_13 = arith.constant 0 : index
      %36 = vector.load %arg10[%c0_12, %c0_13] : memref<16x384xf32, #tpu.memory_space<vmem>>, vector<16x384xf32>
      tpu.vector_store %arg10[%c0_12, %c0_13], %35 {strides = array<i32>} : memref<16x384xf32, #tpu.memory_space<vmem>>, vector<16x384xf32>,
      %c0_14 = arith.constant 0 : index
      %c0_15 = arith.constant 0 : index
      %37 = vector.load %arg10[%c0_14, %c0_15] : memref<16x384xf32, #tpu.memory_space<vmem>>, vector<16x320xf32>
      tpu.vector_store %arg10[%c0_14, %c0_15], %34 {strides = array<i32>} : memref<16x384xf32, #tpu.memory_space<vmem>>, vector<16x320xf32>,
    } else {
    }
    return
  }
  func.func @transform_0(%arg0: i32, %arg1: i32) -> (i32, i32) {
    %c0_i32 = arith.constant 0 : i32
    %c0_i32_0 = arith.constant 0 : i32
    return %arg0, %c0_i32 : i32, i32
  }
  func.func @transform_1(%arg0: i32, %arg1: i32) -> (i32, i32) {
    %c0_i32 = arith.constant 0 : i32
    %c0_i32_0 = arith.constant 0 : i32
    return %arg0, %c0_i32 : i32, i32
  }
  func.func @transform_2(%arg0: i32, %arg1: i32) -> (i32, i32) {
    %c0_i32 = arith.constant 0 : i32
    %c0_i32_0 = arith.constant 0 : i32
    %c0_i32_1 = arith.constant 0 : i32
    return %c0_i32, %c0_i32_0 : i32, i32
  }
  func.func @transform_3(%arg0: i32, %arg1: i32) -> (i32, i32) {
    %c0_i32 = arith.constant 0 : i32
    %c0_i32_0 = arith.constant 0 : i32
    %c0_i32_1 = arith.constant 0 : i32
    return %c0_i32, %c0_i32_0 : i32, i32
  }
  func.func @transform_4(%arg0: i32, %arg1: i32) -> (i32, i32) {
    %c0_i32 = arith.constant 0 : i32
    %c0_i32_0 = arith.constant 0 : i32
    %c0_i32_1 = arith.constant 0 : i32
    return %c0_i32, %c0_i32_0 : i32, i32
  }
  func.func @transform_5(%arg0: i32, %arg1: i32) -> (i32, i32) {
    %c0_i32 = arith.constant 0 : i32
    %c0_i32_0 = arith.constant 0 : i32
    %c0_i32_1 = arith.constant 0 : i32
    return %c0_i32, %c0_i32_0 : i32, i32
  }
  func.func @transform_6(%arg0: i32, %arg1: i32) -> (i32, i32) {
    %c0_i32 = arith.constant 0 : i32
    %c0_i32_0 = arith.constant 0 : i32
    %c0_i32_1 = arith.constant 0 : i32
    return %c0_i32, %c0_i32_0 : i32, i32
  }
  func.func @transform_7(%arg0: i32, %arg1: i32) -> (i32, i32) {
    %c0_i32 = arith.constant 0 : i32
    %c0_i32_0 = arith.constant 0 : i32
    %c0_i32_1 = arith.constant 0 : i32
    return %c0_i32, %c0_i32_0 : i32, i32
  }
  func.func @transform_8(%arg0: i32, %arg1: i32) -> (i32, i32) {
    %c0_i32 = arith.constant 0 : i32
    return %arg0, %arg1 : i32, i32
  }
}

</mosaic_0001>

<bundles_post_ra>
// kernel: mixed_6a.3
= control target key start
LH: loop header
LB: loop body
LE: loop exit
PB: predicated region body
PF: predicated region fallthrough
CT: control target
= control target key end

     0   :  { %9 = vsyncpa [#allocation3], 0  ;;  %s2101_s0 = inlined_call_operand.vmem [shape: bf16[162,320], index: 0, kind: input, shape index: {}]   ;;  %s2102_s1 = inlined_call_operand.hbm [shape: bf16[320,256], index: 1, kind: input, shape index: {}]   ;;  %s2103_s2 = inlined_call_operand.hbm [shape: f32[1,256], index: 2, kind: input, shape index: {}]   ;;  %s2104_s3 = inlined_call_operand.hbm [shape: f32[1,256], index: 3, kind: input, shape index: {}]   ;;  %s2105_s4 = inlined_call_operand.vmem [shape: bf16[162,256], index: 4, kind: output, shape index: {}]  }
   0x1   :  { %10 = vsyncpa [#allocation5], 0  ;;  %s1838_s15 = smov 0   ;;  %s1840_s16 = smov 0  }
   0x2   :  { %s1842_s17 = smov 0  }
   0x3 LB: > { %s1851_s18 = sadd.s32 4294967295, %s1773_s17   ;;  %s1853_s19 = sadd.s32 1, %s1773_s17   ;;  %s1773_s17 = sphi %s1842_s17, %s2122_s17   ;;  %s1769_s16 = sphi %s1840_s16, %s2121_s16   ;;  %s1765_s15 = sphi %s1838_s15, %s2120_s15  }
   0x4   : > { %s109_s20 = ssub.s32 %s1773_s17, %s1853_s19  ;;  %s112_s21 = sadd.s32 1, %s1769_s16 }
   0x5   : > { %p110_p0 = scmp.eq.s32.totalorder %s109_s20, 0  ;;  %p122_p1 = scmp.ne.s32.totalorder %s1769_s16, %s1765_s15 }
   0x6   : > { %p123_p2 = scmp.eq.s32.totalorder %s1851_s18, 1  ;;  %p1304_p3 = scmp.ge.s32.totalorder %s1773_s17, 1 }
   0x7   : > { %s1861_s22 = scalar_select %p110_p0, %s1769_s16, %s112_s21  }
   0x8   : > { %p1863_p4 = por %p123_p2, %p122_p1  ;;  %p136_p5 = scmp.lt.s32.totalorder %s1773_s17, 3 }
   0x9   : > { %p2106_p6 = scmp.eq.s32.totalorder %s1851_s18, 0  ;;  %s1807_s25 = smov [#allocation4]  }
   0xa   : > { %s2108_s23 = scalar_select %p1863_p4, 1, 0 }
   0xb   : > { %p1868_p7 = pnand %p1304_p3, %p136_p5  ;;  %s162_s26 = sshll.u32 %s1807_s25, 4  ;;  %s163_s26 = int_to_ptr.vmem [resolvable:$true] %s162_s26 }
   0xc   : > { %s1808_s27 = smov [#allocation2]   ;;  %s1809_s30 = smov [#allocation6]  }
   0xd   : > { %s2109_s24 = scalar_select %p1868_p7, 1, 0 }
   0xe   : > { %p1434_p8 = pneg %p1868_p7  ;;  %s148_s28 = sshll.u32 %s1808_s27, 4  ;;  %s149_s28 = int_to_ptr.vmem [resolvable:$true] %s148_s28 }
   0xf   : > { %s173_s5 = sshll.u32 %s1809_s30, 4  ;;  %s1644_s6 = scalar_lea.vmem %s163_s26, 32  ;;  %s174_s5 = int_to_ptr.vmem [resolvable:$true] %s173_s5 }
  0x10   : > { %p1876_p9 = pnand %p2106_p6, %p1434_p8  ;;  %p1645_p11 = scmp.ne.s32.totalorder %s163_s26, %s1644_s6 }
  0x11   : > { %p1652_p0 = scmp.lt.s32.totalorder %s163_s26, %s163_s26  ;;  %p1653_p1 = scmp.lt.s32.totalorder %s1644_s6, %s1644_s6 }
  0x12   : > { %p1635_p10 = pneg %p1876_p9 }
  0x13   : > { %p1654_p2 = por %p1653_p1, %p1652_p0 }
  0x14   : > { %p1647_p12 = pnand %p1645_p11, %p1635_p10 }
  0x16   : > { %p1648_p13 = pneg %p1647_p12 }
  0x18   : > { %p1655_p3 = pnand %p1654_p2, %p1648_p13 }
  0x1a   : > { %1658 = shalt.err (!%p1655_p3)
}
  0x1b   : > { %1440 = dma.hbm_to_vmem [thread:$0]  (!%p1876_p9), %s2103_s2, 32, %s163_s26, [#allocation5]  }
  0x1c   : > { %s1670_s9 = scalar_lea.vmem %s149_s28, 5120  ;;  %p1678_p11 = scmp.lt.s32.totalorder %s149_s28, %s149_s28 }
  0x1d   : > { %p1671_p5 = scmp.ne.s32.totalorder %s149_s28, %s1670_s9  ;;  %p1679_p12 = scmp.lt.s32.totalorder %s1670_s9, %s1670_s9 }
  0x1f   : > { %p1673_p8 = pnand %p1671_p5, %p1635_p10  ;;  %p1680_p4 = por %p1679_p12, %p1678_p11 }
  0x21   : > { %p1674_p6 = pneg %p1673_p8 }
  0x23   : > { %p1681_p7 = pnand %p1680_p4, %p1674_p6 }
  0x25   : > { %1684 = shalt.err (!%p1681_p7)
}
  0x26   : > { %s1810_s10 = smov 128   ;;  %s1811_s11 = smov 8  }
  0x27   : > { %1437 = dma.hbm_to_vmem [thread:$0]  (!%p1876_p9), %s2102_s1, 5120, %s149_s28, [#allocation3], %s1810_s10, %s1810_s10, %s1811_s11  }
  0x28   : > { %s1696_s14 = scalar_lea.vmem %s174_s5, 32  ;;  %p1704_p2 = scmp.lt.s32.totalorder %s174_s5, %s174_s5 }
  0x29   : > { %p1697_p13 = scmp.ne.s32.totalorder %s174_s5, %s1696_s14  ;;  %p1705_p3 = scmp.lt.s32.totalorder %s1696_s14, %s1696_s14 }
  0x2b   : > { %p1699_p0 = pnand %p1697_p13, %p1635_p10  ;;  %p1706_p4 = por %p1705_p3, %p1704_p2 }
  0x2d   : > { %p1700_p1 = pneg %p1699_p0 }
  0x2f   : > { %p1707_p6 = pnand %p1706_p4, %p1700_p1 }
  0x31   : > { %1710 = shalt.err (!%p1707_p6)
}
  0x32   : > { %1443 = dma.hbm_to_vmem [thread:$0]  (!%p1876_p9), %s2104_s3, 32, %s174_s5, [#allocation5]  }
  0x33   : > { %p2111_p7 = scmp.ne.s32.totalorder %s2109_s24, 0 }
  0x34   : > { %p2112_p5 = scmp.eq.s32.totalorder (!%p2111_p7), %s1851_s18, 0 }
  0x35   : > { %206 = sbr.rel (%p2111_p7) target bundleno = 430 (0x1ae), region = 36 }
  0x3a   : > { %1756 = dma.done.wait (%p2112_p5), [#allocation3], 5120   ;;  %p2113_p10 = pmov %p2112_p5 }
  0x3b   : > { %p2114_p8 = pmov %p2112_p5 }
  0x3c   : > { %1758 = vsyncadd (%p2113_p10), [#allocation3], 4294962176 }
  0x3d   : > { %1760 = dma.done.wait (%p2114_p8), [#allocation5], 64   ;;  %p2115_p11 = pmov %p2112_p5 }
  0x3e   : > { %v1812_v0 = vmov 0   ;;  %v1545_v1 = vld [vmem:[#allocation2 + $0x74] ss:$8 sps:$4 sm:$0xff]   ;;  %v1547_v2 = vld [vmem:[#allocation2 + $0x70] ss:$8 sps:$4 sm:$0xff]   ;;  %s1918_s21 = smul.u32 12, %s1851_s18 }
  0x3f   : > { %1762 = vsyncadd (%p2115_p11), [#allocation5], 4294967232  ;;  %767 = vmatprep.mubr.bf16.mxu1 %v1812_v0  ;;  %642 = vmatprep.subr.bf16.mxu0 %v1545_v1  ;;  %v1548_v3 = vld [vmem:[#allocation2 + $0x64] ss:$8 sps:$4 sm:$0xff]   ;;  %v1550_v4 = vld [vmem:[#allocation2 + $0x60] ss:$8 sps:$4 sm:$0xff]  }
  0x40   : > { %643 = vmatpush1.bf16.msra.mxu0 %v1547_v2  ;;  %v1551_v5 = vld [vmem:[#allocation2 + $0x54] ss:$8 sps:$4 sm:$0xff]   ;;  %v1553_v6 = vld [vmem:[#allocation2 + $0x50] ss:$8 sps:$4 sm:$0xff]   ;;  %v1554_v7 = vld [vmem:[#allocation2 + $0x44] ss:$8 sps:$4 sm:$0xff]  }
  0x41   : > { %644 = vmatprep.subr.bf16.mxu0 %v1548_v3  ;;  %v1556_v8 = vld [vmem:[#allocation2 + $0x40] ss:$8 sps:$4 sm:$0xff]   ;;  %v1557_v9 = vld [vmem:[#allocation2 + $0x34] ss:$8 sps:$4 sm:$0xff]   ;;  %p251_p9 = scmp.lt.s32.totalorder %s1918_s21, 20  ;;  %vm623_vm0 = vcmask 523264   ;;  %v830_v3 = vlaneseq }
  0x42   : > { %v1559_v10 = vld [vmem:[#allocation2 + $0x30] ss:$8 sps:$4 sm:$0xff]   ;;  %v1578_v11 = vld [vmem:[#allocation2 + $0x134] ss:$8 sps:$4 sm:$0xff]   ;;  %v1560_v13 = vld [vmem:[#allocation2 + $0x24] ss:$8 sps:$4 sm:$0xff]  }
  0x43   : > { %v1580_v12 = vld [vmem:[#allocation2 + $0x130] ss:$8 sps:$4 sm:$0xff]   ;;  %s252_s24 = scalar_select %p251_p9, %s1918_s21, 20  ;;  %743 = vmatprep.subr.bf16.mxu1 %v1578_v11  ;;  %v1584_v14 = vld [vmem:[#allocation2 + $0x124] ss:$8 sps:$4 sm:$0xff]  }
  0x44   : > { %645 = vmatpush1.bf16.msra.mxu0 %v1550_v4  ;;  %744 = vmatpush1.bf16.msra.mxu1 %v1580_v12  ;;  %v1586_v15 = vld [vmem:[#allocation2 + $0x120] ss:$8 sps:$4 sm:$0xff]   ;;  %v1563_v17 = vld [vmem:[#allocation2 + $0x14] ss:$8 sps:$4 sm:$0xff]   ;;  %v1592_v19 = vld [vmem:[#allocation2 + $0x110] ss:$8 sps:$4 sm:$0xff]  }
  0x45   : > { %646 = vmatprep.subr.bf16.mxu0 %v1551_v5  ;;  %v1562_v16 = vld [vmem:[#allocation2 + $0x20] ss:$8 sps:$4 sm:$0xff]   ;;  %745 = vmatprep.subr.bf16.mxu1 %v1584_v14  ;;  %v1590_v18 = vld [vmem:[#allocation2 + $0x114] ss:$8 sps:$4 sm:$0xff]   ;;  %s1421_s25 = smul.u32 12, %s252_s24  ;;  %v831_v5 = vshrl.u32 %v830_v3, 7 }
  0x46   : > { %v1565_v20 = vld [vmem:[#allocation2 + $0x10] ss:$8 sps:$4 sm:$0xff]   ;;  %v1596_v21 = vld [vmem:[#allocation2 + $0x104] ss:$8 sps:$4 sm:$0xff]   ;;  %v1598_v23 = vld [vmem:[#allocation2 + $0x100] ss:$8 sps:$4 sm:$0xff]  }
  0x47   : > { %v1566_v22 = vld [vmem:[#allocation2 + $0x4] ss:$8 sps:$4 sm:$0xff]   ;;  %s1925_s28 = scalar_lea.vmem %s2101_s0, %s1421_s25  ;;  %v1568_v24 = vld [vmem:[#allocation2] ss:$8 sps:$4 sm:$0xff]   ;;  %v1569_v25 = vld [vmem:[#allocation2 + $0xf4] ss:$8 sps:$4 sm:$0xff]  }
  0x48   : > { %647 = vmatpush1.bf16.msra.mxu0 %v1553_v6  ;;  %746 = vmatpush1.bf16.msra.mxu1 %v1586_v15  ;;  %v1608_v26 = vld [vmem:[%s1925_s28 + $0x4] ss:$12 sps:$4 sm:$0xff]   ;;  %v1602_v27 = vld [vmem:[%s1925_s28 + $0x8] ss:$12 sps:$4 sm:$0xff]   ;;  %v1609_v32 = vld [vmem:[%s1925_s28 + $0x20] ss:$12 sps:$4 sm:$0xff]  }
  0x49   : > { %648 = vmatprep.subr.bf16.mxu0 %v1554_v7  ;;  %747 = vmatprep.subr.bf16.mxu1 %v1590_v18  ;;  %v1571_v28 = vld [vmem:[#allocation2 + $0xf0] ss:$8 sps:$4 sm:$0xff]   ;;  %v1572_v29 = vld [vmem:[#allocation2 + $0xe4] ss:$8 sps:$4 sm:$0xff]   ;;  %v1574_v30 = vld [vmem:[#allocation2 + $0xe0] ss:$8 sps:$4 sm:$0xff]  }
  0x4a   : > { %674 = vmatprep.mubr.bf16.mxu0 %v1608_v26  ;;  %v1575_v31 = vld [vmem:[#allocation2 + $0xd4] ss:$8 sps:$4 sm:$0xff]   ;;  %v1577_v33 = vld [vmem:[#allocation2 + $0xd0] ss:$8 sps:$4 sm:$0xff]   ;;  %v1581_v34 = vld [vmem:[#allocation2 + $0xc4] ss:$8 sps:$4 sm:$0xff]  }
  0x4b   : > { %v1583_v35 = vld [vmem:[#allocation2 + $0xc0] ss:$8 sps:$4 sm:$0xff]   ;;  %v1587_v36 = vld [vmem:[#allocation2 + $0xb4] ss:$8 sps:$4 sm:$0xff]   ;;  %v1589_v38 = vld [vmem:[#allocation2 + $0xb0] ss:$8 sps:$4 sm:$0xff]  }
  0x4c   : > { %649 = vmatpush1.bf16.msra.mxu0 %v1556_v8  ;;  %748 = vmatpush1.bf16.msra.mxu1 %v1592_v19  ;;  %v1613_v37 = vld [vmem:[%s1925_s28 + $0x38] ss:$12 sps:$4 sm:$0xff]   ;;  %v1593_v39 = vld [vmem:[#allocation2 + $0xa4] ss:$8 sps:$4 sm:$0xff]   ;;  %v1601_v43 = vld [vmem:[#allocation2 + $0x90] ss:$8 sps:$4 sm:$0xff]  }
  0x4d   : > { %650 = vmatprep.subr.bf16.mxu0 %v1557_v9  ;;  %749 = vmatprep.subr.bf16.mxu1 %v1596_v21  ;;  %v1595_v40 = vld [vmem:[#allocation2 + $0xa0] ss:$8 sps:$4 sm:$0xff]   ;;  %v1599_v41 = vld [vmem:[#allocation2 + $0x94] ss:$8 sps:$4 sm:$0xff]   ;;  %v1603_v44 = vld [vmem:[#allocation2 + $0x84] ss:$8 sps:$4 sm:$0xff]  }
  0x4e   : > { %v1617_v42 = vld [vmem:[%s1925_s28 + $0x50] ss:$12 sps:$4 sm:$0xff]   ;;  %v1621_v46 = vld [vmem:[%s1925_s28 + $0x68] ss:$12 sps:$4 sm:$0xff]   ;;  %v1606_v47 = vld [vmem:[%s1925_s28] ss:$12 sps:$4 sm:$0xff]  }
  0x4f   : > { %v1605_v45 = vld [vmem:[#allocation2 + $0x80] ss:$8 sps:$4 sm:$0xff]   ;;  %v1610_v48 = vld [vmem:[%s1925_s28 + $0x1c] ss:$12 sps:$4 sm:$0xff]   ;;  %v1625_v49 = vld [vmem:[%s1925_s28 + $0x80] ss:$12 sps:$4 sm:$0xff]  }
  0x50   : > { %651 = vmatpush1.bf16.msra.mxu0 %v1559_v10  ;;  %750 = vmatpush1.bf16.msra.mxu1 %v1598_v23  ;;  %v1612_v50 = vld [vmem:[%s1925_s28 + $0x18] ss:$12 sps:$4 sm:$0xff]   ;;  %v1614_v51 = vld [vmem:[%s1925_s28 + $0x34] ss:$12 sps:$4 sm:$0xff]   ;;  %v1616_v52 = vld [vmem:[%s1925_s28 + $0x30] ss:$12 sps:$4 sm:$0xff]  }
  0x51   : > { %652 = vmatprep.subr.bf16.mxu0 %v1560_v13  ;;  %v1618_v53 = vld [vmem:[%s1925_s28 + $0x4c] ss:$12 sps:$4 sm:$0xff]   ;;  %v1620_v54 = vld [vmem:[%s1925_s28 + $0x48] ss:$12 sps:$4 sm:$0xff]   ;;  %v1622_v55 = vld [vmem:[%s1925_s28 + $0x64] ss:$12 sps:$4 sm:$0xff]  }
  0x52   : > { %v1624_v56 = vld [vmem:[%s1925_s28 + $0x60] ss:$12 sps:$4 sm:$0xff]   ;;  %v1626_v57 = vld [vmem:[%s1925_s28 + $0x7c] ss:$12 sps:$4 sm:$0xff]   ;;  %v1628_v58 = vld [vmem:[%s1925_s28 + $0x78] ss:$12 sps:$4 sm:$0xff]  }
  0x53   : > { %1372 = vmatmul.mubr.msk.bf16.vlgmr.msra.gmra.mxu1 %vm623_vm0, %v1602_v27  ;;  %v832_v7 = vsub.s32 0, %v831_v5  ;;  %v828_v9 = vld [vmem:[#allocation4] sm:$0x3]  ;;  %v836_v10 = vsub.s32 1, %v831_v5  ;;  %v864_v11 = vld [vmem:[#allocation6] sm:$0x3] }
  0x54   : > { %653 = vmatpush1.bf16.msra.mxu0 %v1562_v16  ;;  %777 = vmatprep.mubr.bf16.mxu1 %v1812_v0  ;;  %s242_s29 = sand.u32 1, %s1765_s15   ;;  %p2116_p12 = scmp.ne.s32.totalorder %s2108_s23, 0 }
  0x55   : > { %654 = vmatprep.subr.bf16.mxu0 %v1563_v17  ;;  %v1960_v12 = vrot.slane %v828_v9, %v832_v7  ;;  %v1964_v16 = vrot.slane %v864_v11, %v832_v7  ;;  %v1966_v17 = vrot.slane %v828_v9, %v836_v10  ;;  %v1970_v21 = vrot.slane %v864_v11, %v836_v10  ;;  %s1420_s30 = smul.u32 96, %s242_s29  ;;  %s1016_s5 = ssub.s32 (%p2116_p12), 21, %s1918_s21 }
  0x56   : > { %s1419_s6 = smul.u32 (%p2116_p12), 96, %s1851_s18  ;;  %p1017_p13 = scmp.lt.s32.totalorder (%p2116_p12), %s1016_s5, 12 }
  0x57   : > { %s1984_s15 = scalar_lea.vmem [#allocation7], %s1420_s30  }
  0x58   : > { %655 = vmatpush1.bf16.msra.mxu0 %v1565_v20  ;;  %s2049_s9 = scalar_lea.vmem (%p2116_p12), %s2105_s4, %s1419_s6  }
  0x59   : > { %656 = vmatprep.subr.bf16.mxu0 %v1566_v22 }
  0x5b   : > { %1373 = vmatmul.mubr.msk.bf16.gmra.mxu1 %vm623_vm0, %v1609_v32 }
  0x5c   : > { %657 = vmatpush1.bf16.msra.mxu0 %v1568_v24  ;;  %787 = vmatprep.mubr.bf16.mxu1 %v1812_v0 }
  0x5d   : > { %658 = vmatprep.subr.bf16.mxu0 %v1569_v25 }
  0x60   : > { %659 = vmatpush2.bf16.msra.mxu0 %v1571_v28 }
  0x61   : > { %660 = vmatprep.subr.bf16.mxu0 %v1572_v29 }
  0x63   : > { %1374 = vmatmul.mubr.msk.bf16.gmra.mxu1 %vm623_vm0, %v1613_v37 }
  0x64   : > { %661 = vmatpush2.bf16.msra.mxu0 %v1574_v30  ;;  %797 = vmatprep.mubr.bf16.mxu1 %v1812_v0 }
  0x65   : > { %662 = vmatprep.subr.bf16.mxu0 %v1575_v31 }
  0x68   : > { %663 = vmatpush2.bf16.msra.mxu0 %v1577_v33 }
  0x69   : > { %664 = vmatprep.subr.bf16.mxu0 %v1581_v34 }
  0x6b   : > { %1375 = vmatmul.mubr.msk.bf16.gmra.mxu1 %vm623_vm0, %v1617_v42 }
  0x6c   : > { %665 = vmatpush2.bf16.msra.mxu0 %v1583_v35  ;;  %807 = vmatprep.mubr.bf16.mxu1 %v1812_v0 }
  0x6d   : > { %666 = vmatprep.subr.bf16.mxu0 %v1587_v36 }
  0x70   : > { %667 = vmatpush2.bf16.msra.mxu0 %v1589_v38 }
  0x71   : > { %668 = vmatprep.subr.bf16.mxu0 %v1593_v39 }
  0x73   : > { %1376 = vmatmul.mubr.msk.bf16.gmra.mxu1 %vm623_vm0, %v1621_v46 }
  0x74   : > { %669 = vmatpush2.bf16.msra.mxu0 %v1595_v40  ;;  %817 = vmatprep.mubr.bf16.mxu1 %v1812_v0 }
  0x75   : > { %670 = vmatprep.subr.bf16.mxu0 %v1599_v41 }
  0x78   : > { %671 = vmatpush2.bf16.msra.mxu0 %v1601_v43 }
  0x79   : > { %672 = vmatprep.subr.bf16.mxu0 %v1603_v44 }
  0x7b   : > { %1377 = vmatmul.mubr.msk.bf16.gmra.mxu1 %vm623_vm0, %v1625_v49 }
  0x7c   : > { %673 = vmatpush2.bf16.msra.mxu0 %v1605_v45 }
  0x7f   : > { %675 = vmatmul.mubr.bf16.vlgmr.msra.gmra.mxu0 %v1606_v47 }
  0x80   : > { %684 = vmatprep.mubr.bf16.mxu0 %v1610_v48 }
  0x87   : > { %685 = vmatmul.mubr.bf16.gmra.mxu0 %v1612_v50 }
  0x88   : > { %694 = vmatprep.mubr.bf16.mxu0 %v1614_v51 }
  0x8f   : > { %695 = vmatmul.mubr.bf16.gmra.mxu0 %v1616_v52 }
  0x90   : > { %704 = vmatprep.mubr.bf16.mxu0 %v1618_v53 }
  0x97   : > { %705 = vmatmul.mubr.bf16.gmra.mxu0 %v1620_v54 }
  0x98   : > { %714 = vmatprep.mubr.bf16.mxu0 %v1622_v55 }
  0x9f   : > { %715 = vmatmul.mubr.bf16.gmra.mxu0 %v1624_v56 }
  0xa0   : > { %724 = vmatprep.mubr.bf16.mxu0 %v1626_v57 }
  0xa7   : > { %725 = vmatmul.mubr.bf16.gmra.mxu0 %v1628_v58 }
 0x113   : > { %v769_v59 = vpop.f32.mrf.mxu1 }
 0x115   : > { %v771_v60 = vpop.f32.mrf.mxu1 }
 0x117   : > { %v773_v61 = vpop.f32.mrf.mxu1 }
 0x119   : > { %v775_v62 = vpop.f32.mrf.mxu1 }
 0x11b   : > { %v779_v63 = vpop.f32.mrf.mxu1 }
 0x11d   : > { %v781_v0 = vpop.f32.mrf.mxu1 }
 0x11f   : > { %v783_v1 = vpop.f32.mrf.mxu1 }
 0x121   : > { %v785_v2 = vpop.f32.mrf.mxu1 }
 0x123   : > { %v789_v4 = vpop.f32.mrf.mxu1 }
 0x125   : > { %v1956_v6 = vpop.f32.mrf.mxu1 }
 0x127   : > { %v1958_v8 = vpop.f32.mrf.mxu1 }
 0x129   : > { %v1962_v13 = vpop.f32.mrf.mxu1 }
 0x12b   : > { %v1972_v22 = vpop.f32.mrf.mxu1 }
 0x12d   : > { %v1978_v31 = vpop.f32.mrf.mxu1 }
 0x12f   : > { %v803_v42 = vpop.f32.mrf.mxu1 }
 0x131   : > { %v805_v54 = vpop.f32.mrf.mxu1 }
 0x13f   : > { %v676_v14 = vpop.f32.mrf.mxu0 }
 0x140   : > { %v770_v15 = vadd.f32 %v769_v59, %v676_v14 }
 0x141   : > { %v678_v18 = vpop.f32.mrf.mxu0 }
 0x142   : > { %v840_v19 = vmul.f32 %v1960_v12, %v770_v15  ;;  %v772_v20 = vadd.f32 %v771_v60, %v678_v18 }
 0x143   : > { %v680_v23 = vpop.f32.mrf.mxu0 }
 0x144   : > { %v876_v24 = vadd.f32 %v1964_v16, %v840_v19  ;;  %v841_v25 = vmul.f32 %v1966_v17, %v772_v20  ;;  %v774_v26 = vadd.f32 %v773_v61, %v680_v23 }
 0x145   : > { %v682_v27 = vpop.f32.mrf.mxu0 }
 0x146   : > { %v877_v28 = vadd.f32 %v1970_v21, %v841_v25  ;;  %v842_v29 = vmul.f32 %v1960_v12, %v774_v26  ;;  %v776_v30 = vadd.f32 %v775_v62, %v682_v27  ;;  %v900_v32 = vmax.f32 %v876_v24, 0.0 }
 0x147   : > { %v686_v33 = vpop.f32.mrf.mxu0 }
 0x148   : > { %v901_v34 = vmax.f32 %v877_v28, 0.0  ;;  %v878_v35 = vadd.f32 %v1964_v16, %v842_v29  ;;  %v843_v36 = vmul.f32 %v1966_v17, %v776_v30  ;;  %v780_v37 = vadd.f32 %v779_v63, %v686_v33 }
 0x149   : > { %v688_v38 = vpop.f32.mrf.mxu0 }
 0x14a   : > { %v1404_v39 = vpack.c.bf16 %v901_v34, %v900_v32  ;;  %v879_v40 = vadd.f32 %v1970_v21, %v843_v36  ;;  %v844_v41 = vmul.f32 %v1960_v12, %v780_v37  ;;  %v782_v43 = vadd.f32 %v781_v0, %v688_v38 }
 0x14b   : > { %v690_v44 = vpop.f32.mrf.mxu0  ;;  %v902_v45 = vmax.f32 %v878_v35, 0.0 }
 0x14c   : > { %996 = vst [vmem:[%s1984_s15] sm:$0xff] %v1404_v39  ;;  %v903_v46 = vmax.f32 %v879_v40, 0.0  ;;  %v784_v47 = vadd.f32 %v783_v1, %v690_v44  ;;  %v880_v48 = vadd.f32 %v1964_v16, %v844_v41  ;;  %v845_v49 = vmul.f32 %v1966_v17, %v782_v43 }
 0x14d   : > { %v692_v50 = vpop.f32.mrf.mxu0 }
 0x14e   : > { %v1405_v51 = vpack.c.bf16 %v903_v46, %v902_v45  ;;  %v846_v52 = vmul.f32 %v1960_v12, %v784_v47  ;;  %v786_v53 = vadd.f32 %v785_v2, %v692_v50  ;;  %v881_v55 = vadd.f32 %v1970_v21, %v845_v49  ;;  %v809_v2 = vpop.f32.mrf.mxu1 }
 0x14f   : > { %v696_v56 = vpop.f32.mrf.mxu0  ;;  %v904_v60 = vmax.f32 %v880_v48, 0.0 }
 0x150   : > { %997 = vst [vmem:[%s1984_s15 + $0x8] sm:$0xff] %v1405_v51  ;;  %v882_v57 = vadd.f32 %v1964_v16, %v846_v52  ;;  %v847_v58 = vmul.f32 %v1966_v17, %v786_v53  ;;  %v790_v59 = vadd.f32 %v789_v4, %v696_v56  ;;  %v905_v61 = vmax.f32 %v881_v55, 0.0 }
 0x151   : > { %v698_v62 = vpop.f32.mrf.mxu0 }
 0x152   : > { %v883_v63 = vadd.f32 %v1970_v21, %v847_v58  ;;  %v848_v0 = vmul.f32 %v1960_v12, %v790_v59  ;;  %v792_v1 = vadd.f32 %v1956_v6, %v698_v62  ;;  %v1406_v3 = vpack.c.bf16 %v905_v61, %v904_v60  ;;  %v811_v6 = vpop.f32.mrf.mxu1 }
 0x153   : > { %v906_v5 = vmax.f32 %v882_v57, 0.0  ;;  %v700_v7 = vpop.f32.mrf.mxu0 }
 0x154   : > { %v907_v9 = vmax.f32 %v883_v63, 0.0  ;;  %v884_v10 = vadd.f32 %v1964_v16, %v848_v0  ;;  %v849_v11 = vmul.f32 %v1966_v17, %v792_v1  ;;  %v794_v4 = vadd.f32 %v1958_v8, %v700_v7  ;;  %998 = vst [vmem:[%s1984_s15 + $0x10] sm:$0xff] %v1406_v3  ;;  %v813_v33 = vpop.f32.mrf.mxu1 }
 0x155   : > { %v702_v14 = vpop.f32.mrf.mxu0 }
 0x156   : > { %v1407_v15 = vpack.c.bf16 %v907_v9, %v906_v5  ;;  %v885_v18 = vadd.f32 %v1970_v21, %v849_v11  ;;  %v850_v19 = vmul.f32 %v1960_v12, %v794_v4  ;;  %v796_v20 = vadd.f32 %v1962_v13, %v702_v14 }
 0x157   : > { %v706_v23 = vpop.f32.mrf.mxu0  ;;  %v908_v24 = vmax.f32 %v884_v10, 0.0 }
 0x158   : > { %999 = vst [vmem:[%s1984_s15 + $0x18] sm:$0xff] %v1407_v15  ;;  %v909_v25 = vmax.f32 %v885_v18, 0.0  ;;  %v800_v26 = vadd.f32 %v1972_v22, %v706_v23  ;;  %v886_v27 = vadd.f32 %v1964_v16, %v850_v19  ;;  %v851_v8 = vmul.f32 %v1966_v17, %v796_v20 }
 0x159   : > { %v708_v28 = vpop.f32.mrf.mxu0 }
 0x15a   : > { %v1408_v29 = vpack.c.bf16 %v909_v25, %v908_v24  ;;  %v852_v30 = vmul.f32 %v1960_v12, %v800_v26  ;;  %v802_v32 = vadd.f32 %v1978_v31, %v708_v28  ;;  %v887_v34 = vadd.f32 %v1970_v21, %v851_v8  ;;  %v815_v31 = vpop.f32.mrf.mxu1 }
 0x15b   : > { %v710_v13 = vpop.f32.mrf.mxu0  ;;  %v910_v37 = vmax.f32 %v886_v27, 0.0 }
 0x15c   : > { %1000 = vst [vmem:[%s1984_s15 + $0x20] sm:$0xff] %v1408_v29  ;;  %v888_v35 = vadd.f32 %v1964_v16, %v852_v30  ;;  %v853_v36 = vmul.f32 %v1966_v17, %v802_v32  ;;  %v804_v22 = vadd.f32 %v803_v42, %v710_v13  ;;  %v911_v38 = vmax.f32 %v887_v34, 0.0  ;;  %v819_v55 = vpop.f32.mrf.mxu1 }
 0x15d   : > { %v712_v39 = vpop.f32.mrf.mxu0 }
 0x15e   : > { %v889_v40 = vadd.f32 %v1970_v21, %v853_v36  ;;  %v854_v41 = vmul.f32 %v1960_v12, %v804_v22  ;;  %v806_v43 = vadd.f32 %v805_v54, %v712_v39  ;;  %v1409_v44 = vpack.c.bf16 %v911_v38, %v910_v37  ;;  %v821_v1 = vpop.f32.mrf.mxu1 }
 0x15f   : > { %v912_v45 = vmax.f32 %v888_v35, 0.0  ;;  %v716_v46 = vpop.f32.mrf.mxu0 }
 0x160   : > { %v913_v47 = vmax.f32 %v889_v40, 0.0  ;;  %v890_v48 = vadd.f32 %v1964_v16, %v854_v41  ;;  %v855_v49 = vmul.f32 %v1966_v17, %v806_v43  ;;  %v810_v50 = vadd.f32 %v809_v2, %v716_v46  ;;  %1001 = vst [vmem:[%s1984_s15 + $0x28] sm:$0xff] %v1409_v44  ;;  %v823_v18 = vpop.f32.mrf.mxu1 }
 0x161   : > { %v718_v42 = vpop.f32.mrf.mxu0 }
 0x162   : > { %v1410_v51 = vpack.c.bf16 %v913_v47, %v912_v45  ;;  %v891_v52 = vadd.f32 %v1970_v21, %v855_v49  ;;  %v856_v53 = vmul.f32 %v1960_v12, %v810_v50  ;;  %v812_v54 = vadd.f32 %v811_v6, %v718_v42  ;;  %v825_v30 = vpop.f32.mrf.mxu1 }
 0x163   : > { %v720_v56 = vpop.f32.mrf.mxu0  ;;  %v914_v57 = vmax.f32 %v890_v48, 0.0 }
 0x164   : > { %1002 = vst [vmem:[%s1984_s15 + $0x30] sm:$0xff] %v1410_v51  ;;  %v915_v58 = vmax.f32 %v891_v52, 0.0  ;;  %v814_v59 = vadd.f32 %v813_v33, %v720_v56  ;;  %v892_v60 = vadd.f32 %v1964_v16, %v856_v53  ;;  %v857_v61 = vmul.f32 %v1966_v17, %v812_v54 }
 0x165   : > { %v722_v62 = vpop.f32.mrf.mxu0 }
 0x166   : > { %v1411_v63 = vpack.c.bf16 %v915_v58, %v914_v57  ;;  %v858_v0 = vmul.f32 %v1960_v12, %v814_v59  ;;  %v816_v2 = vadd.f32 %v815_v31, %v722_v62  ;;  %v893_v3 = vadd.f32 %v1970_v21, %v857_v61 }
 0x167   : > { %v726_v5 = vpop.f32.mrf.mxu0  ;;  %v916_v11 = vmax.f32 %v892_v60, 0.0 }
 0x168   : > { %1003 = vst [vmem:[%s1984_s15 + $0x38] sm:$0xff] %v1411_v63  ;;  %v894_v7 = vadd.f32 %v1964_v16, %v858_v0  ;;  %v859_v9 = vmul.f32 %v1966_v17, %v816_v2  ;;  %v820_v10 = vadd.f32 %v819_v55, %v726_v5  ;;  %v917_v4 = vmax.f32 %v893_v3, 0.0 }
 0x169   : > { %v728_v14 = vpop.f32.mrf.mxu0 }
 0x16a   : > { %v895_v15 = vadd.f32 %v1970_v21, %v859_v9  ;;  %v860_v19 = vmul.f32 %v1960_v12, %v820_v10  ;;  %v822_v6 = vadd.f32 %v821_v1, %v728_v14  ;;  %v1412_v20 = vpack.c.bf16 %v917_v4, %v916_v11 }
 0x16b   : > { %v918_v23 = vmax.f32 %v894_v7, 0.0  ;;  %v730_v24 = vpop.f32.mrf.mxu0 }
 0x16c   : > { %v919_v25 = vmax.f32 %v895_v15, 0.0  ;;  %v896_v26 = vadd.f32 %v1964_v16, %v860_v19  ;;  %v861_v27 = vmul.f32 %v1966_v17, %v822_v6  ;;  %v824_v8 = vadd.f32 %v823_v18, %v730_v24  ;;  %1004 = vst [vmem:[%s1984_s15 + $0x40] sm:$0xff] %v1412_v20 }
 0x16d   : > { %v732_v28 = vpop.f32.mrf.mxu0 }
 0x16e   : > { %v1413_v29 = vpack.c.bf16 %v919_v25, %v918_v23  ;;  %v897_v32 = vadd.f32 %v1970_v21, %v861_v27  ;;  %v862_v33 = vmul.f32 %v1960_v12, %v824_v8  ;;  %v826_v34 = vadd.f32 %v825_v30, %v732_v28 }
 0x16f   : > { %v920_v13 = vmax.f32 %v896_v26, 0.0 }
 0x170   : > { %1005 = vst [vmem:[%s1984_s15 + $0x48] sm:$0xff] %v1413_v29  ;;  %v921_v35 = vmax.f32 %v897_v32, 0.0  ;;  %v898_v36 = vadd.f32 %v1964_v16, %v862_v33  ;;  %v863_v22 = vmul.f32 %v1966_v17, %v826_v34 }
 0x172   : > { %v1414_v37 = vpack.c.bf16 %v921_v35, %v920_v13  ;;  %v899_v38 = vadd.f32 %v1970_v21, %v863_v22  ;;  %v922_v39 = vmax.f32 %v898_v36, 0.0 }
 0x174   : > { %1006 = vst [vmem:[%s1984_s15 + $0x50] sm:$0xff] %v1414_v37  ;;  %v923_v40 = vmax.f32 %v899_v38, 0.0  ;;  %1014 = sbr.rel (!%p2116_p12) target bundleno = 430 (0x1ae), region = 52 }
 0x176   : > { %v1415_v41 = vpack.c.bf16 %v923_v40, %v922_v39 }
 0x178   : > { %1007 = vst [vmem:[%s1984_s15 + $0x58] sm:$0xff] %v1415_v41 }
 0x179   : > { %s2124_s5 = smov (!%p1017_p13, %s1016_s5), 12 }
 0x17a   : > { %s1416_s10 = sshll.u32 %s2124_s5, 7 }
 0x17b   : > { %p1395_p0 = scmp.eq.s32.totalorder %s1416_s10, 0 }
 0x17c   : > { %1629 = sdivrem.u32 (!%p1395_p0), %s2124_s5, 12 }
 0x17d   : > { %1027 = sbr.rel (%p1395_p0) target bundleno = 430 (0x1ae), region = 56 }
 0x185   : > { %s2055_s23 = spop.drf %1629 }
 0x186   : > { %p1396_p1 = scmp.le.s32.totalorder %s2055_s23, 0 }
 0x187   : > { %s2117_s18 = smov (!%p1396_p1), %s2049_s9  ;;  %s2118_s11 = smov (!%p1396_p1), %s1984_s15 }
 0x188   : > { %1232 = sbr.rel (%p1396_p1) target bundleno = 405 (0x195), region = 133  ;;  %s2064_s12 = smov (!%p1396_p1), 0  }
 0x189   : > { %s2066_s13 = smov (!%p1396_p1), 0  }
 0x18d LB: >> { %v1114_v12 = vld [vmem:[%s1781_s11] sm:$0xff]  ;;  %v1116_v16 = vld [vmem:[%s1781_s11 + $0x8] sm:$0xff]  ;;  %v1118_v17 = vld [vmem:[%s1781_s11 + $0x10] sm:$0xff]  ;;  %s1138_s14 = sadd.s32 1, %s1785_s12  ;;  %s1108_s13 = sadd.s32 1, %s1789_s13   ;;  %s1789_s13 = sphi %s2066_s13, %s1108_s13   ;;  %s1785_s12 = sphi %s2064_s12, %s2119_s12   ;;  %s1781_s11 = sphi %s2118_s11, %s1143_s11   ;;  %s1777_s18 = sphi %s2117_s18, %s1144_s18  }
 0x18e   : >> { %1115 = vst [vmem:[%s1777_s18] sm:$0xff] %v1114_v12  ;;  %1117 = vst [vmem:[%s1777_s18 + $0x8] sm:$0xff] %v1116_v16  ;;  %v1120_v21 = vld [vmem:[%s1781_s11 + $0x18] sm:$0xff]  ;;  %v1122_v43 = vld [vmem:[%s1781_s11 + $0x20] sm:$0xff]  ;;  %p1139_p2 = scmp.ge.s32.totalorder %s1138_s14, %s2055_s23  ;;  %p1107_p3 = scmp.ge.s32.totalorder %s1108_s13, %s2055_s23 }
 0x18f   : >> { %1119 = vst [vmem:[%s1777_s18 + $0x10] sm:$0xff] %v1118_v17  ;;  %v1124_v31 = vld [vmem:[%s1781_s11 + $0x28] sm:$0xff]  ;;  %1121 = vst [vmem:[%s1777_s18 + $0x18] sm:$0xff] %v1120_v21  ;;  %v1126_v44 = vld [vmem:[%s1781_s11 + $0x30] sm:$0xff] }
 0x190   : >> { %1123 = vst [vmem:[%s1777_s18 + $0x20] sm:$0xff] %v1122_v43  ;;  %1125 = vst [vmem:[%s1777_s18 + $0x28] sm:$0xff] %v1124_v31  ;;  %v1128_v45 = vld [vmem:[%s1781_s11 + $0x38] sm:$0xff]  ;;  %v1130_v46 = vld [vmem:[%s1781_s11 + $0x40] sm:$0xff]  ;;  %s2126_s14 = smov (%p1139_p2, %s1138_s14), 0  ;;  %1110 = sbr.rel (!%p1107_p3) target bundleno = 397 (0x18d), region = 139 }
 0x191   : >> { %1127 = vst [vmem:[%s1777_s18 + $0x30] sm:$0xff] %v1126_v44  ;;  %1129 = vst [vmem:[%s1777_s18 + $0x38] sm:$0xff] %v1128_v45  ;;  %v1132_v47 = vld [vmem:[%s1781_s11 + $0x48] sm:$0xff]  ;;  %v1134_v48 = vld [vmem:[%s1781_s11 + $0x50] sm:$0xff]  ;;  %s1141_s17 = smul.u32 96, %s2126_s14  ;;  %s2119_s12 = smov %s2126_s14 }
 0x192   : >> { %1131 = vst [vmem:[%s1777_s18 + $0x40] sm:$0xff] %v1130_v46  ;;  %v1136_v49 = vld [vmem:[%s1781_s11 + $0x58] sm:$0xff]  ;;  %1133 = vst [vmem:[%s1777_s18 + $0x48] sm:$0xff] %v1132_v47 }
 0x193   : >> { %1135 = vst [vmem:[%s1777_s18 + $0x50] sm:$0xff] %v1134_v48  ;;  %1137 = vst [vmem:[%s1777_s18 + $0x58] sm:$0xff] %v1136_v49  ;;  %s1143_s11 = scalar_lea.vmem %s1984_s15, %s1141_s17 [#allocation7]   ;;  %s1144_s18 = scalar_lea.vmem %s2049_s9, %s1141_s17  }
 0x195 PF: > { %1631 = sdivrem.u32 %s2124_s5, 12 }
 0x196   : > { %s1397_s20 = smul.u32 96, %s2055_s23 }
 0x198   : > { %s1149_s21 = scalar_lea.vmem %s1984_s15, %s1397_s20 [#allocation7]   ;;  %s1151_s24 = scalar_lea.vmem %s2049_s9, %s1397_s20  }
 0x19e   : > { %s1632_s25 = spop.drf %1631 }
 0x19f   : > { %p1399_p4 = scmp.le.s32.totalorder %s1632_s25, 0 }
 0x1a0   : > { %s1791_s26 = smov (!%p1399_p4), %s1151_s24   ;;  %s1795_s27 = smov (!%p1399_p4), %s1149_s21  }
 0x1a1   : > { %1246 = sbr.rel (%p1399_p4) target bundleno = 430 (0x1ae), region = 144  ;;  %s1799_s28 = smov (!%p1399_p4), 0  }
 0x1a2   : > { %s1803_s29 = smov (!%p1399_p4), 0  }
 0x1a6 LB: >> { %v1161_v50 = vld [vmem:[%s1797_s27] sm:$0xff]  ;;  %s1163_s30 = sadd.s32 1, %s1801_s28  ;;  %s1155_s29 = sadd.s32 1, %s1805_s29   ;;  %s1805_s29 = sphi %s1803_s29, %s1155_s29   ;;  %s1801_s28 = sphi %s1799_s28, %s1800_s28   ;;  %s1797_s27 = sphi %s1795_s27, %s1168_s27   ;;  %s1793_s26 = sphi %s1791_s26, %s1169_s26  }
 0x1a7   : >> { %1162 = vst [vmem:[%s1793_s26] sm:$0xff] %v1161_v50  ;;  %p1164_p6 = scmp.ge.s32.totalorder %s1163_s30, %s1632_s25  ;;  %p1154_p7 = scmp.ge.s32.totalorder %s1155_s29, %s1632_s25 }
 0x1a9   : >> { %s2128_s30 = smov (%p1164_p6, %s1163_s30), 0  ;;  %1157 = sbr.rel (!%p1154_p7) target bundleno = 422 (0x1a6), region = 150 }
 0x1aa   : >> { %s1400_s15 = sshll.u32 %s2128_s30, 3  ;;  %s1800_s28 = smov %s2128_s30  }
 0x1ab   : >> { %s1168_s27 = scalar_lea.vmem %s1149_s21, %s1400_s15 [#allocation7]   ;;  %s1169_s26 = scalar_lea.vmem %s1151_s24, %s1400_s15  }
 0x1ae PF: > { %p13_p5 = scmp.ge.s32.totalorder %s1853_s19, 4   ;;  %s2120_s15 = smov %s1769_s16 }
 0x1af   : > { %s2121_s16 = smov %s1861_s22  ;;  %s2122_s17 = smov %s1853_s19 }
 0x1b0   :  { %15 = sbr.rel (!%p13_p5) target bundleno = 3 (0x3), region = 161 }
 0x1b5   :  { %1185 = vsyncpa [#allocation3], 1 }
 0x1b6   :  { %1187 = vsyncpa [#allocation3 + $0x1], 1 }
 0x1b7   :  { %1188 = vsyncpa [#allocation5], 1 }

// kernel: mixed_6a.4
= control target key start
LH: loop header
LB: loop body
LE: loop exit
PB: predicated region body
PF: predicated region fallthrough
CT: control target
= control target key end

     0   :  { %s5162_s15 = smov 0   ;;  %s5164_s16 = smov 0   ;;  %s6621_s0 = inlined_call_operand.vmem [shape: bf16[162,2304], index: 0, kind: input, shape index: {}]   ;;  %s6622_s1 = inlined_call_operand.vmem [shape: bf16[2304,256], index: 1, kind: input, shape index: {}]   ;;  %s6623_s2 = inlined_call_operand.vmem [shape: f32[1,256], index: 2, kind: input, shape index: {}]   ;;  %s6624_s3 = inlined_call_operand.vmem [shape: f32[1,256], index: 3, kind: input, shape index: {}]   ;;  %s6625_s4 = inlined_call_operand.vmem [shape: bf16[162,256], index: 4, kind: output, shape index: {}]  }
   0x1   :  { %s5166_s17 = smov 0  }
   0x2 LB: > { %s5175_s18 = sadd.s32 4294967295, %s5103_s17   ;;  %s5177_s19 = sadd.s32 1, %s5103_s17   ;;  %s5103_s17 = sphi %s5166_s17, %s6668_s17   ;;  %s5099_s16 = sphi %s5164_s16, %s6667_s16   ;;  %s5095_s15 = sphi %s5162_s15, %s6666_s15  }
   0x3   : > { %s107_s20 = ssub.s32 %s5103_s17, %s5177_s19  ;;  %s110_s21 = sadd.s32 1, %s5099_s16 }
   0x4   : > { %p108_p0 = scmp.eq.s32.totalorder %s107_s20, 0  ;;  %p120_p1 = scmp.ne.s32.totalorder %s5099_s16, %s5095_s15 }
   0x5   : > { %p121_p2 = scmp.eq.s32.totalorder %s5175_s18, 1  ;;  %p3888_p3 = scmp.ge.s32.totalorder %s5103_s17, 1 }
   0x6   : > { %s5185_s22 = scalar_select %p108_p0, %s5099_s16, %s110_s21  }
   0x7   : > { %p5187_p4 = por %p121_p2, %p120_p1  ;;  %p174_p5 = scmp.lt.s32.totalorder %s5103_s17, 3 }
   0x9   : > { %p175_p6 = pnand %p3888_p3, %p174_p5 }
   0xb   : > { %178 = sbr.rel (%p175_p6) target bundleno = 619 (0x26b), region = 36 }
  0x10   : > { %v4451_v0 = vld [vmem:[%s6622_s1 + $0x74] ss:$8 sps:$4 sm:$0xff]   ;;  %v4455_v2 = vld [vmem:[%s6622_s1 + $0x70] ss:$8 sps:$4 sm:$0xff]   ;;  %v4457_v4 = vld [vmem:[%s6622_s1 + $0x64] ss:$8 sps:$4 sm:$0xff]  }
  0x11   : > { %v4453_v1 = vld [vmem:[%s6622_s1 + $0x174] ss:$8 sps:$4 sm:$0xff]   ;;  %2604 = vmatprep.subr.bf16.mxu0 %v4451_v0  ;;  %v4456_v3 = vld [vmem:[%s6622_s1 + $0x170] ss:$8 sps:$4 sm:$0xff]   ;;  %v4459_v5 = vld [vmem:[%s6622_s1 + $0x164] ss:$8 sps:$4 sm:$0xff]  }
  0x12   : > { %2697 = vmatprep.subr.bf16.mxu1 %v4453_v1  ;;  %2605 = vmatpush1.bf16.msra.mxu0 %v4455_v2  ;;  %v4461_v6 = vld [vmem:[%s6622_s1 + $0x60] ss:$8 sps:$4 sm:$0xff]   ;;  %v4463_v8 = vld [vmem:[%s6622_s1 + $0x54] ss:$8 sps:$4 sm:$0xff]   ;;  %v4467_v10 = vld [vmem:[%s6622_s1 + $0x50] ss:$8 sps:$4 sm:$0xff]  }
  0x13   : > { %2698 = vmatpush1.bf16.msra.mxu1 %v4456_v3  ;;  %2606 = vmatprep.subr.bf16.mxu0 %v4457_v4  ;;  %v4462_v7 = vld [vmem:[%s6622_s1 + $0x160] ss:$8 sps:$4 sm:$0xff]   ;;  %v4465_v9 = vld [vmem:[%s6622_s1 + $0x154] ss:$8 sps:$4 sm:$0xff]   ;;  %v4468_v11 = vld [vmem:[%s6622_s1 + $0x150] ss:$8 sps:$4 sm:$0xff]  }
  0x14   : > { %2699 = vmatprep.subr.bf16.mxu1 %v4459_v5  ;;  %v4469_v12 = vld [vmem:[%s6622_s1 + $0x44] ss:$8 sps:$4 sm:$0xff]   ;;  %v4473_v14 = vld [vmem:[%s6622_s1 + $0x40] ss:$8 sps:$4 sm:$0xff]   ;;  %v4475_v16 = vld [vmem:[%s6622_s1 + $0x34] ss:$8 sps:$4 sm:$0xff]  }
  0x15   : > { %v4471_v13 = vld [vmem:[%s6622_s1 + $0x144] ss:$8 sps:$4 sm:$0xff]   ;;  %v4474_v15 = vld [vmem:[%s6622_s1 + $0x140] ss:$8 sps:$4 sm:$0xff]   ;;  %v4477_v17 = vld [vmem:[%s6622_s1 + $0x134] ss:$8 sps:$4 sm:$0xff]  }
  0x16   : > { %2607 = vmatpush1.bf16.msra.mxu0 %v4461_v6  ;;  %v4479_v18 = vld [vmem:[%s6622_s1 + $0x30] ss:$8 sps:$4 sm:$0xff]   ;;  %v4481_v20 = vld [vmem:[%s6622_s1 + $0x24] ss:$8 sps:$4 sm:$0xff]   ;;  %v4485_v22 = vld [vmem:[%s6622_s1 + $0x20] ss:$8 sps:$4 sm:$0xff]  }
  0x17   : > { %2700 = vmatpush1.bf16.msra.mxu1 %v4462_v7  ;;  %2608 = vmatprep.subr.bf16.mxu0 %v4463_v8  ;;  %v4480_v19 = vld [vmem:[%s6622_s1 + $0x130] ss:$8 sps:$4 sm:$0xff]   ;;  %v4483_v21 = vld [vmem:[%s6622_s1 + $0x124] ss:$8 sps:$4 sm:$0xff]   ;;  %v4486_v23 = vld [vmem:[%s6622_s1 + $0x120] ss:$8 sps:$4 sm:$0xff]  }
  0x18   : > { %2701 = vmatprep.subr.bf16.mxu1 %v4465_v9  ;;  %v4487_v24 = vld [vmem:[%s6622_s1 + $0x14] ss:$8 sps:$4 sm:$0xff]   ;;  %v4491_v26 = vld [vmem:[%s6622_s1 + $0x10] ss:$8 sps:$4 sm:$0xff]   ;;  %v4493_v28 = vld [vmem:[%s6622_s1 + $0x4] ss:$8 sps:$4 sm:$0xff]  }
  0x19   : > { %v4489_v25 = vld [vmem:[%s6622_s1 + $0x114] ss:$8 sps:$4 sm:$0xff]   ;;  %v4492_v27 = vld [vmem:[%s6622_s1 + $0x110] ss:$8 sps:$4 sm:$0xff]   ;;  %s5279_s20 = smul.u32 12, %s5175_s18  ;;  %s202_s25 = sand.u32 1, %s5095_s15  }
  0x1a   : > { %2609 = vmatpush1.bf16.msra.mxu0 %v4467_v10  ;;  %v4495_v29 = vld [vmem:[%s6622_s1 + $0x104] ss:$8 sps:$4 sm:$0xff]   ;;  %v4497_v30 = vld [vmem:[%s6622_s1] ss:$8 sps:$4 sm:$0xff]   ;;  %v4499_v32 = vld [vmem:[%s6622_s1 + $0xf4] ss:$8 sps:$4 sm:$0xff]  }
  0x1b   : > { %2702 = vmatpush1.bf16.msra.mxu1 %v4468_v11  ;;  %2610 = vmatprep.subr.bf16.mxu0 %v4469_v12  ;;  %v4498_v31 = vld [vmem:[%s6622_s1 + $0x100] ss:$8 sps:$4 sm:$0xff]   ;;  %p211_p7 = scmp.lt.s32.totalorder %s5279_s20, 20  ;;  %v4501_v33 = vld [vmem:[%s6622_s1 + $0x1f4] ss:$8 sps:$4 sm:$0xff]   ;;  %s6488_s15 = smul.u32 96, %s202_s25 }
  0x1c   : > { %2703 = vmatprep.subr.bf16.mxu1 %v4471_v13  ;;  %v4503_v34 = vld [vmem:[%s6622_s1 + $0xf0] ss:$8 sps:$4 sm:$0xff]   ;;  %v4505_v36 = vld [vmem:[%s6622_s1 + $0xe4] ss:$8 sps:$4 sm:$0xff]   ;;  %v4509_v38 = vld [vmem:[%s6622_s1 + $0xe0] ss:$8 sps:$4 sm:$0xff]  }
  0x1d   : > { %v4504_v35 = vld [vmem:[%s6622_s1 + $0x1f0] ss:$8 sps:$4 sm:$0xff]   ;;  %s212_s13 = scalar_select %p211_p7, %s5279_s20, 20  ;;  %v4507_v37 = vld [vmem:[%s6622_s1 + $0x1e4] ss:$8 sps:$4 sm:$0xff]  }
  0x1e   : > { %2611 = vmatpush1.bf16.msra.mxu0 %v4473_v14  ;;  %v4510_v39 = vld [vmem:[%s6622_s1 + $0x1e0] ss:$8 sps:$4 sm:$0xff]   ;;  %v4511_v40 = vld [vmem:[%s6622_s1 + $0xd4] ss:$8 sps:$4 sm:$0xff]   ;;  %v4515_v42 = vld [vmem:[%s6622_s1 + $0xd0] ss:$8 sps:$4 sm:$0xff]  }
  0x1f   : > { %2704 = vmatpush1.bf16.msra.mxu1 %v4474_v15  ;;  %2612 = vmatprep.subr.bf16.mxu0 %v4475_v16  ;;  %s4361_s29 = smul.u32 72, %s212_s13  ;;  %v4513_v41 = vld [vmem:[%s6622_s1 + $0x1d4] ss:$8 sps:$4 sm:$0xff]   ;;  %v4516_v43 = vld [vmem:[%s6622_s1 + $0x1d0] ss:$8 sps:$4 sm:$0xff]   ;;  %s6504_s26 = scalar_lea.vmem [#allocation2], %s6488_s15  }
  0x20   : > { %2705 = vmatprep.subr.bf16.mxu1 %v4477_v17  ;;  %v4517_v44 = vld [vmem:[%s6622_s1 + $0xc4] ss:$8 sps:$4 sm:$0xff]   ;;  %v4521_v46 = vld [vmem:[%s6622_s1 + $0xc0] ss:$8 sps:$4 sm:$0xff]   ;;  %v4523_v48 = vld [vmem:[%s6622_s1 + $0xb4] ss:$8 sps:$4 sm:$0xff]  }
  0x21   : > { %s5334_s14 = scalar_lea.vmem %s6621_s0, %s4361_s29  ;;  %v4519_v45 = vld [vmem:[%s6622_s1 + $0x1c4] ss:$8 sps:$4 sm:$0xff]   ;;  %v4522_v47 = vld [vmem:[%s6622_s1 + $0x1c0] ss:$8 sps:$4 sm:$0xff]   ;;  %v4525_v50 = vld [vmem:[%s6622_s1 + $0x1b4] ss:$8 sps:$4 sm:$0xff]  }
  0x22   : > { %2613 = vmatpush1.bf16.msra.mxu0 %v4479_v18  ;;  %v4549_v49 = vld [vmem:[%s5334_s14 + $0x4] ss:$72 sps:$4 sm:$0xff]   ;;  %v4527_v52 = vld [vmem:[%s6622_s1 + $0xb0] ss:$8 sps:$4 sm:$0xff]   ;;  %v4533_v56 = vld [vmem:[%s6622_s1 + $0xa0] ss:$8 sps:$4 sm:$0xff]  }
  0x23   : > { %2706 = vmatpush1.bf16.msra.mxu1 %v4480_v19  ;;  %2614 = vmatprep.subr.bf16.mxu0 %v4481_v20  ;;  %v4552_v51 = vld [vmem:[%s5334_s14 + $0xc] ss:$72 sps:$4 sm:$0xff]   ;;  %v4528_v53 = vld [vmem:[%s6622_s1 + $0x1b0] ss:$8 sps:$4 sm:$0xff]   ;;  %v4534_v57 = vld [vmem:[%s6622_s1 + $0x1a0] ss:$8 sps:$4 sm:$0xff]  }
  0x24   : > { %2707 = vmatprep.subr.bf16.mxu1 %v4483_v21  ;;  %2636 = vmatprep.mubr.bf16.mxu0 %v4549_v49  ;;  %v4529_v54 = vld [vmem:[%s6622_s1 + $0xa4] ss:$8 sps:$4 sm:$0xff]   ;;  %v4535_v58 = vld [vmem:[%s6622_s1 + $0x94] ss:$8 sps:$4 sm:$0xff]   ;;  %v4539_v60 = vld [vmem:[%s6622_s1 + $0x90] ss:$8 sps:$4 sm:$0xff]  }
  0x25   : > { %2729 = vmatprep.mubr.bf16.mxu1 %v4552_v51  ;;  %v4531_v55 = vld [vmem:[%s6622_s1 + $0x1a4] ss:$8 sps:$4 sm:$0xff]   ;;  %v4537_v59 = vld [vmem:[%s6622_s1 + $0x194] ss:$8 sps:$4 sm:$0xff]   ;;  %v4540_v61 = vld [vmem:[%s6622_s1 + $0x190] ss:$8 sps:$4 sm:$0xff]  }
  0x26   : > { %2615 = vmatpush1.bf16.msra.mxu0 %v4485_v22  ;;  %v4541_v62 = vld [vmem:[%s6622_s1 + $0x84] ss:$8 sps:$4 sm:$0xff]   ;;  %v4545_v0 = vld [vmem:[%s6622_s1 + $0x80] ss:$8 sps:$4 sm:$0xff]   ;;  %v4555_v2 = vld [vmem:[%s6622_s1 + $0x274] ss:$8 sps:$4 sm:$0xff]  }
  0x27   : > { %2708 = vmatpush1.bf16.msra.mxu1 %v4486_v23  ;;  %2616 = vmatprep.subr.bf16.mxu0 %v4487_v24  ;;  %v4543_v63 = vld [vmem:[%s6622_s1 + $0x184] ss:$8 sps:$4 sm:$0xff]   ;;  %v4546_v1 = vld [vmem:[%s6622_s1 + $0x180] ss:$8 sps:$4 sm:$0xff]   ;;  %v4558_v3 = vld [vmem:[%s6622_s1 + $0x374] ss:$8 sps:$4 sm:$0xff]  }
  0x28   : > { %2709 = vmatprep.subr.bf16.mxu1 %v4489_v25  ;;  %v4547_v4 = vld [vmem:[%s5334_s14] ss:$72 sps:$4 sm:$0xff]   ;;  %v4553_v6 = vld [vmem:[%s6622_s1 + $0x270] ss:$8 sps:$4 sm:$0xff]   ;;  %v4561_v8 = vld [vmem:[%s6622_s1 + $0x264] ss:$8 sps:$4 sm:$0xff]  }
  0x29   : > { %v4550_v5 = vld [vmem:[%s5334_s14 + $0x8] ss:$72 sps:$4 sm:$0xff]   ;;  %v4564_v9 = vld [vmem:[%s6622_s1 + $0x364] ss:$8 sps:$4 sm:$0xff]   ;;  %v4583_v10 = vld [vmem:[%s5334_s14 + $0x94] ss:$72 sps:$4 sm:$0xff]  }
  0x2a   : > { %2617 = vmatpush1.bf16.msra.mxu0 %v4491_v26  ;;  %v4556_v7 = vld [vmem:[%s6622_s1 + $0x370] ss:$8 sps:$4 sm:$0xff]   ;;  %v4585_v11 = vld [vmem:[%s5334_s14 + $0x9c] ss:$72 sps:$4 sm:$0xff]   ;;  %v4559_v12 = vld [vmem:[%s6622_s1 + $0x260] ss:$8 sps:$4 sm:$0xff]  }
  0x2b   : > { %2710 = vmatpush1.bf16.msra.mxu1 %v4492_v27  ;;  %2618 = vmatprep.subr.bf16.mxu0 %v4493_v28  ;;  %v4562_v13 = vld [vmem:[%s6622_s1 + $0x360] ss:$8 sps:$4 sm:$0xff]   ;;  %v4567_v14 = vld [vmem:[%s6622_s1 + $0x254] ss:$8 sps:$4 sm:$0xff]   ;;  %v4565_v16 = vld [vmem:[%s6622_s1 + $0x250] ss:$8 sps:$4 sm:$0xff]  }
  0x2c   : > { %2711 = vmatprep.subr.bf16.mxu1 %v4495_v29  ;;  %v4570_v15 = vld [vmem:[%s6622_s1 + $0x354] ss:$8 sps:$4 sm:$0xff]   ;;  %v4568_v17 = vld [vmem:[%s6622_s1 + $0x350] ss:$8 sps:$4 sm:$0xff]   ;;  %v4573_v20 = vld [vmem:[%s6622_s1 + $0x244] ss:$8 sps:$4 sm:$0xff]  }
  0x2d   : > { %v4587_v18 = vld [vmem:[%s5334_s14 + $0x90] ss:$72 sps:$4 sm:$0xff]   ;;  %v4576_v21 = vld [vmem:[%s6622_s1 + $0x344] ss:$8 sps:$4 sm:$0xff]   ;;  %v4571_v24 = vld [vmem:[%s6622_s1 + $0x240] ss:$8 sps:$4 sm:$0xff]  }
  0x2e   : > { %2619 = vmatpush1.bf16.msra.mxu0 %v4497_v30  ;;  %v4588_v19 = vld [vmem:[%s5334_s14 + $0x98] ss:$72 sps:$4 sm:$0xff]   ;;  %v4601_v22 = vld [vmem:[%s5334_s14 + $0x124] ss:$72 sps:$4 sm:$0xff]   ;;  %v4579_v26 = vld [vmem:[%s6622_s1 + $0x234] ss:$8 sps:$4 sm:$0xff]  }
  0x2f   : > { %2712 = vmatpush1.bf16.msra.mxu1 %v4498_v31  ;;  %2620 = vmatprep.subr.bf16.mxu0 %v4499_v32  ;;  %v4603_v23 = vld [vmem:[%s5334_s14 + $0x12c] ss:$72 sps:$4 sm:$0xff]   ;;  %v4574_v25 = vld [vmem:[%s6622_s1 + $0x340] ss:$8 sps:$4 sm:$0xff]   ;;  %v4577_v28 = vld [vmem:[%s6622_s1 + $0x230] ss:$8 sps:$4 sm:$0xff]  }
  0x30   : > { %2713 = vmatprep.subr.bf16.mxu1 %v4501_v33  ;;  %v4582_v27 = vld [vmem:[%s6622_s1 + $0x334] ss:$8 sps:$4 sm:$0xff]   ;;  %v4580_v29 = vld [vmem:[%s6622_s1 + $0x330] ss:$8 sps:$4 sm:$0xff]   ;;  %v4605_v30 = vld [vmem:[%s5334_s14 + $0x120] ss:$72 sps:$4 sm:$0xff]  }
  0x31   : > { %v4606_v31 = vld [vmem:[%s5334_s14 + $0x128] ss:$72 sps:$4 sm:$0xff]   ;;  %v4591_v32 = vld [vmem:[%s6622_s1 + $0x224] ss:$8 sps:$4 sm:$0xff]   ;;  %v4618_v51 = vld [vmem:[%s6622_s1 + $0x3f4] ss:$8 sps:$4 sm:$0xff]  }
  0x32   : > { %2621 = vmatpush2.bf16.msra.mxu0 %v4503_v34  ;;  %v4594_v33 = vld [vmem:[%s6622_s1 + $0x324] ss:$8 sps:$4 sm:$0xff]   ;;  %v4619_v34 = vld [vmem:[%s5334_s14 + $0x1b4] ss:$72 sps:$4 sm:$0xff]   ;;  %v4610_v49 = vld [vmem:[%s6622_s1 + $0x300] ss:$8 sps:$4 sm:$0xff]  }
  0x33   : > { %2714 = vmatpush2.bf16.msra.mxu1 %v4504_v35  ;;  %2622 = vmatprep.subr.bf16.mxu0 %v4505_v36  ;;  %v4621_v35 = vld [vmem:[%s5334_s14 + $0x1bc] ss:$72 sps:$4 sm:$0xff]   ;;  %v4589_v36 = vld [vmem:[%s6622_s1 + $0x220] ss:$8 sps:$4 sm:$0xff]   ;;  %s3629_s27 = ssub.s32 (%p5187_p4), 21, %s5279_s20  ;;  %s4327_s28 = smul.u32 (%p5187_p4), 96, %s5175_s18 }
  0x34   : > { %2715 = vmatprep.subr.bf16.mxu1 %v4507_v37  ;;  %v4592_v37 = vld [vmem:[%s6622_s1 + $0x320] ss:$8 sps:$4 sm:$0xff]   ;;  %p3630_p8 = scmp.lt.s32.totalorder (%p5187_p4), %s3629_s27, 12 }
  0x35   : > { %s6569_s5 = scalar_lea.vmem (%p5187_p4), %s6625_s4, %s4327_s28  }
  0x36   : > { %2623 = vmatpush2.bf16.msra.mxu0 %v4509_v38  ;;  %v4597_v38 = vld [vmem:[%s6622_s1 + $0x214] ss:$8 sps:$4 sm:$0xff]  }
  0x37   : > { %2716 = vmatpush2.bf16.msra.mxu1 %v4510_v39  ;;  %2624 = vmatprep.subr.bf16.mxu0 %v4511_v40  ;;  %v4600_v39 = vld [vmem:[%s6622_s1 + $0x314] ss:$8 sps:$4 sm:$0xff]   ;;  %v4595_v40 = vld [vmem:[%s6622_s1 + $0x210] ss:$8 sps:$4 sm:$0xff]  }
  0x38   : > { %2717 = vmatprep.subr.bf16.mxu1 %v4513_v41  ;;  %v4598_v41 = vld [vmem:[%s6622_s1 + $0x310] ss:$8 sps:$4 sm:$0xff]  }
  0x3a   : > { %2625 = vmatpush2.bf16.msra.mxu0 %v4515_v42  ;;  %v4623_v42 = vld [vmem:[%s5334_s14 + $0x1b0] ss:$72 sps:$4 sm:$0xff]  }
  0x3b   : > { %2718 = vmatpush2.bf16.msra.mxu1 %v4516_v43  ;;  %2626 = vmatprep.subr.bf16.mxu0 %v4517_v44  ;;  %v4624_v43 = vld [vmem:[%s5334_s14 + $0x1b8] ss:$72 sps:$4 sm:$0xff]   ;;  %v4609_v44 = vld [vmem:[%s6622_s1 + $0x204] ss:$8 sps:$4 sm:$0xff]  }
  0x3c   : > { %2719 = vmatprep.subr.bf16.mxu1 %v4519_v45  ;;  %v4612_v45 = vld [vmem:[%s6622_s1 + $0x304] ss:$8 sps:$4 sm:$0xff]  }
  0x3e   : > { %2627 = vmatpush2.bf16.msra.mxu0 %v4521_v46  ;;  %v4637_v46 = vld [vmem:[%s5334_s14 + $0x244] ss:$72 sps:$4 sm:$0xff]  }
  0x3f   : > { %2720 = vmatpush2.bf16.msra.mxu1 %v4522_v47  ;;  %2628 = vmatprep.subr.bf16.mxu0 %v4523_v48  ;;  %v4639_v47 = vld [vmem:[%s5334_s14 + $0x24c] ss:$72 sps:$4 sm:$0xff]   ;;  %v4607_v48 = vld [vmem:[%s6622_s1 + $0x200] ss:$8 sps:$4 sm:$0xff]  }
  0x40   : > { %2721 = vmatprep.subr.bf16.mxu1 %v4525_v50  ;;  %v4615_v50 = vld [vmem:[%s6622_s1 + $0x2f4] ss:$8 sps:$4 sm:$0xff]  }
  0x42   : > { %2629 = vmatpush2.bf16.msra.mxu0 %v4527_v52  ;;  %v4613_v52 = vld [vmem:[%s6622_s1 + $0x2f0] ss:$8 sps:$4 sm:$0xff]  }
  0x43   : > { %2722 = vmatpush2.bf16.msra.mxu1 %v4528_v53  ;;  %2630 = vmatprep.subr.bf16.mxu0 %v4529_v54  ;;  %v4616_v53 = vld [vmem:[%s6622_s1 + $0x3f0] ss:$8 sps:$4 sm:$0xff]   ;;  %v4641_v54 = vld [vmem:[%s5334_s14 + $0x240] ss:$72 sps:$4 sm:$0xff]  }
  0x44   : > { %2723 = vmatprep.subr.bf16.mxu1 %v4531_v55  ;;  %v4642_v55 = vld [vmem:[%s5334_s14 + $0x248] ss:$72 sps:$4 sm:$0xff]  }
  0x46   : > { %2631 = vmatpush2.bf16.msra.mxu0 %v4533_v56  ;;  %v4627_v56 = vld [vmem:[%s6622_s1 + $0x2e4] ss:$8 sps:$4 sm:$0xff]  }
  0x47   : > { %2724 = vmatpush2.bf16.msra.mxu1 %v4534_v57  ;;  %2632 = vmatprep.subr.bf16.mxu0 %v4535_v58  ;;  %v4630_v57 = vld [vmem:[%s6622_s1 + $0x3e4] ss:$8 sps:$4 sm:$0xff]   ;;  %v4655_v58 = vld [vmem:[%s5334_s14 + $0x2d4] ss:$72 sps:$4 sm:$0xff]  }
  0x48   : > { %2725 = vmatprep.subr.bf16.mxu1 %v4537_v59  ;;  %v4657_v59 = vld [vmem:[%s5334_s14 + $0x2dc] ss:$72 sps:$4 sm:$0xff]  }
  0x4a   : > { %2633 = vmatpush2.bf16.msra.mxu0 %v4539_v60  ;;  %v4625_v60 = vld [vmem:[%s6622_s1 + $0x2e0] ss:$8 sps:$4 sm:$0xff]  }
  0x4b   : > { %2726 = vmatpush2.bf16.msra.mxu1 %v4540_v61  ;;  %2634 = vmatprep.subr.bf16.mxu0 %v4541_v62  ;;  %v4628_v61 = vld [vmem:[%s6622_s1 + $0x3e0] ss:$8 sps:$4 sm:$0xff]   ;;  %v4633_v62 = vld [vmem:[%s6622_s1 + $0x2d4] ss:$8 sps:$4 sm:$0xff]  }
  0x4c   : > { %2727 = vmatprep.subr.bf16.mxu1 %v4543_v63  ;;  %v4636_v63 = vld [vmem:[%s6622_s1 + $0x3d4] ss:$8 sps:$4 sm:$0xff]  }
  0x4e   : > { %2635 = vmatpush2.bf16.msra.mxu0 %v4545_v0  ;;  %v4631_v0 = vld [vmem:[%s6622_s1 + $0x2d0] ss:$8 sps:$4 sm:$0xff]  }
  0x4f   : > { %2728 = vmatpush2.bf16.msra.mxu1 %v4546_v1  ;;  %2790 = vmatprep.subr.bf16.mxu0 %v4555_v2  ;;  %v4634_v1 = vld [vmem:[%s6622_s1 + $0x3d0] ss:$8 sps:$4 sm:$0xff]  }
  0x50   : > { %2883 = vmatprep.subr.bf16.mxu1 %v4558_v3  ;;  %v4659_v2 = vld [vmem:[%s5334_s14 + $0x2d0] ss:$72 sps:$4 sm:$0xff]  }
  0x51   : > { %2637 = vmatmul.mubr.bf16.vlgmr.msra.gmra.mxu0 %v4547_v4  ;;  %v4660_v3 = vld [vmem:[%s5334_s14 + $0x2d8] ss:$72 sps:$4 sm:$0xff]   ;;  %v4645_v4 = vld [vmem:[%s6622_s1 + $0x2c4] ss:$8 sps:$4 sm:$0xff]  }
  0x52   : > { %2730 = vmatmul.mubr.bf16.vlgmr.msra.gmra.mxu1 %v4550_v5  ;;  %2791 = vmatpush1.bf16.msra.mxu0 %v4553_v6  ;;  %v4648_v5 = vld [vmem:[%s6622_s1 + $0x3c4] ss:$8 sps:$4 sm:$0xff]   ;;  %v4681_v6 = vld [vmem:[%s5334_s14 + $0x14] ss:$72 sps:$4 sm:$0xff]  }
  0x53   : > { %2884 = vmatpush1.bf16.msra.mxu1 %v4556_v7  ;;  %2792 = vmatprep.subr.bf16.mxu0 %v4561_v8  ;;  %v4684_v7 = vld [vmem:[%s5334_s14 + $0x1c] ss:$72 sps:$4 sm:$0xff]   ;;  %v4643_v8 = vld [vmem:[%s6622_s1 + $0x2c0] ss:$8 sps:$4 sm:$0xff]  }
  0x54   : > { %2885 = vmatprep.subr.bf16.mxu1 %v4564_v9  ;;  %2646 = vmatprep.mubr.bf16.mxu0 %v4583_v10  ;;  %v4646_v9 = vld [vmem:[%s6622_s1 + $0x3c0] ss:$8 sps:$4 sm:$0xff]   ;;  %v4651_v10 = vld [vmem:[%s6622_s1 + $0x2b4] ss:$8 sps:$4 sm:$0xff]  }
  0x55   : > { %2739 = vmatprep.mubr.bf16.mxu1 %v4585_v11  ;;  %v4654_v11 = vld [vmem:[%s6622_s1 + $0x3b4] ss:$8 sps:$4 sm:$0xff]  }
  0x56   : > { %2793 = vmatpush1.bf16.msra.mxu0 %v4559_v12  ;;  %v4649_v12 = vld [vmem:[%s6622_s1 + $0x2b0] ss:$8 sps:$4 sm:$0xff]  }
  0x57   : > { %2886 = vmatpush1.bf16.msra.mxu1 %v4562_v13  ;;  %2794 = vmatprep.subr.bf16.mxu0 %v4567_v14  ;;  %v4652_v13 = vld [vmem:[%s6622_s1 + $0x3b0] ss:$8 sps:$4 sm:$0xff]   ;;  %v4663_v14 = vld [vmem:[%s6622_s1 + $0x2a4] ss:$8 sps:$4 sm:$0xff]  }
  0x58   : > { %2887 = vmatprep.subr.bf16.mxu1 %v4570_v15  ;;  %v4666_v15 = vld [vmem:[%s6622_s1 + $0x3a4] ss:$8 sps:$4 sm:$0xff]  }
  0x59   : > { %2647 = vmatmul.mubr.bf16.gmra.mxu0 %v4587_v18  ;;  %v4669_v18 = vld [vmem:[%s6622_s1 + $0x294] ss:$8 sps:$4 sm:$0xff]  }
  0x5a   : > { %2740 = vmatmul.mubr.bf16.gmra.mxu1 %v4588_v19  ;;  %2795 = vmatpush1.bf16.msra.mxu0 %v4565_v16  ;;  %v4661_v16 = vld [vmem:[%s6622_s1 + $0x2a0] ss:$8 sps:$4 sm:$0xff]   ;;  %v4672_v19 = vld [vmem:[%s6622_s1 + $0x394] ss:$8 sps:$4 sm:$0xff]  }
  0x5b   : > { %2888 = vmatpush1.bf16.msra.mxu1 %v4568_v17  ;;  %2796 = vmatprep.subr.bf16.mxu0 %v4573_v20  ;;  %v4664_v17 = vld [vmem:[%s6622_s1 + $0x3a0] ss:$8 sps:$4 sm:$0xff]   ;;  %v4667_v20 = vld [vmem:[%s6622_s1 + $0x290] ss:$8 sps:$4 sm:$0xff]  }
  0x5c   : > { %2889 = vmatprep.subr.bf16.mxu1 %v4576_v21  ;;  %2656 = vmatprep.mubr.bf16.mxu0 %v4601_v22  ;;  %v4670_v21 = vld [vmem:[%s6622_s1 + $0x390] ss:$8 sps:$4 sm:$0xff]   ;;  %v4675_v22 = vld [vmem:[%s6622_s1 + $0x284] ss:$8 sps:$4 sm:$0xff]  }
  0x5d   : > { %2749 = vmatprep.mubr.bf16.mxu1 %v4603_v23  ;;  %v4678_v23 = vld [vmem:[%s6622_s1 + $0x384] ss:$8 sps:$4 sm:$0xff]  }
  0x5e   : > { %2797 = vmatpush1.bf16.msra.mxu0 %v4571_v24  ;;  %v4673_v24 = vld [vmem:[%s6622_s1 + $0x280] ss:$8 sps:$4 sm:$0xff]  }
  0x5f   : > { %2890 = vmatpush1.bf16.msra.mxu1 %v4574_v25  ;;  %2798 = vmatprep.subr.bf16.mxu0 %v4579_v26  ;;  %v4676_v25 = vld [vmem:[%s6622_s1 + $0x380] ss:$8 sps:$4 sm:$0xff]   ;;  %v4687_v26 = vld [vmem:[%s6622_s1 + $0x474] ss:$8 sps:$4 sm:$0xff]  }
  0x60   : > { %2891 = vmatprep.subr.bf16.mxu1 %v4582_v27  ;;  %v4690_v27 = vld [vmem:[%s6622_s1 + $0x574] ss:$8 sps:$4 sm:$0xff]  }
  0x61   : > { %2657 = vmatmul.mubr.bf16.gmra.mxu0 %v4605_v30  ;;  %v4685_v30 = vld [vmem:[%s6622_s1 + $0x470] ss:$8 sps:$4 sm:$0xff]  }
  0x62   : > { %2750 = vmatmul.mubr.bf16.gmra.mxu1 %v4606_v31  ;;  %2799 = vmatpush1.bf16.msra.mxu0 %v4577_v28  ;;  %v4679_v28 = vld [vmem:[%s5334_s14 + $0x10] ss:$72 sps:$4 sm:$0xff]  }
  0x63   : > { %2892 = vmatpush1.bf16.msra.mxu1 %v4580_v29  ;;  %2800 = vmatprep.subr.bf16.mxu0 %v4591_v32  ;;  %v4682_v29 = vld [vmem:[%s5334_s14 + $0x18] ss:$72 sps:$4 sm:$0xff]   ;;  %v4693_v32 = vld [vmem:[%s6622_s1 + $0x464] ss:$8 sps:$4 sm:$0xff]  }
  0x64   : > { %2893 = vmatprep.subr.bf16.mxu1 %v4594_v33  ;;  %2666 = vmatprep.mubr.bf16.mxu0 %v4619_v34  ;;  %v4688_v31 = vld [vmem:[%s6622_s1 + $0x570] ss:$8 sps:$4 sm:$0xff]   ;;  %v4696_v33 = vld [vmem:[%s6622_s1 + $0x564] ss:$8 sps:$4 sm:$0xff]  }
  0x65   : > { %2759 = vmatprep.mubr.bf16.mxu1 %v4621_v35  ;;  %v4697_v34 = vld [vmem:[%s5334_s14 + $0xa4] ss:$72 sps:$4 sm:$0xff]  }
  0x66   : > { %2801 = vmatpush1.bf16.msra.mxu0 %v4589_v36  ;;  %v4706_v35 = vld [vmem:[%s5334_s14 + $0xac] ss:$72 sps:$4 sm:$0xff]   ;;  %v4691_v36 = vld [vmem:[%s6622_s1 + $0x460] ss:$8 sps:$4 sm:$0xff]  }
  0x67   : > { %2894 = vmatpush1.bf16.msra.mxu1 %v4592_v37  ;;  %2802 = vmatprep.subr.bf16.mxu0 %v4597_v38  ;;  %v4694_v37 = vld [vmem:[%s6622_s1 + $0x560] ss:$8 sps:$4 sm:$0xff]   ;;  %v4702_v38 = vld [vmem:[%s6622_s1 + $0x454] ss:$8 sps:$4 sm:$0xff]  }
  0x68   : > { %2895 = vmatprep.subr.bf16.mxu1 %v4600_v39  ;;  %v4705_v39 = vld [vmem:[%s6622_s1 + $0x554] ss:$8 sps:$4 sm:$0xff]  }
  0x69   : > { %2667 = vmatmul.mubr.bf16.gmra.mxu0 %v4623_v42  ;;  %v4703_v42 = vld [vmem:[%s6622_s1 + $0x550] ss:$8 sps:$4 sm:$0xff]  }
  0x6a   : > { %2760 = vmatmul.mubr.bf16.gmra.mxu1 %v4624_v43  ;;  %2803 = vmatpush1.bf16.msra.mxu0 %v4595_v40  ;;  %v4699_v40 = vld [vmem:[%s5334_s14 + $0xa0] ss:$72 sps:$4 sm:$0xff]  }
  0x6b   : > { %2896 = vmatpush1.bf16.msra.mxu1 %v4598_v41  ;;  %2804 = vmatprep.subr.bf16.mxu0 %v4609_v44  ;;  %v4700_v41 = vld [vmem:[%s6622_s1 + $0x450] ss:$8 sps:$4 sm:$0xff]   ;;  %v4711_v44 = vld [vmem:[%s6622_s1 + $0x444] ss:$8 sps:$4 sm:$0xff]  }
  0x6c   : > { %2897 = vmatprep.subr.bf16.mxu1 %v4612_v45  ;;  %2676 = vmatprep.mubr.bf16.mxu0 %v4637_v46  ;;  %v4708_v43 = vld [vmem:[%s5334_s14 + $0xa8] ss:$72 sps:$4 sm:$0xff]   ;;  %v4714_v45 = vld [vmem:[%s6622_s1 + $0x544] ss:$8 sps:$4 sm:$0xff]   ;;  %v4715_v46 = vld [vmem:[%s5334_s14 + $0x134] ss:$72 sps:$4 sm:$0xff]  }
  0x6d   : > { %2769 = vmatprep.mubr.bf16.mxu1 %v4639_v47  ;;  %v4724_v47 = vld [vmem:[%s5334_s14 + $0x13c] ss:$72 sps:$4 sm:$0xff]  }
  0x6e   : > { %2805 = vmatpush1.bf16.msra.mxu0 %v4607_v48  ;;  %v4709_v48 = vld [vmem:[%s6622_s1 + $0x440] ss:$8 sps:$4 sm:$0xff]  }
  0x6f   : > { %2898 = vmatpush1.bf16.msra.mxu1 %v4610_v49  ;;  %2806 = vmatprep.subr.bf16.mxu0 %v4615_v50  ;;  %v4712_v49 = vld [vmem:[%s6622_s1 + $0x540] ss:$8 sps:$4 sm:$0xff]   ;;  %v4720_v50 = vld [vmem:[%s6622_s1 + $0x434] ss:$8 sps:$4 sm:$0xff]  }
  0x70   : > { %2899 = vmatprep.subr.bf16.mxu1 %v4618_v51  ;;  %v4723_v51 = vld [vmem:[%s6622_s1 + $0x534] ss:$8 sps:$4 sm:$0xff]  }
  0x71   : > { %2677 = vmatmul.mubr.bf16.gmra.mxu0 %v4641_v54  ;;  %v4721_v54 = vld [vmem:[%s6622_s1 + $0x530] ss:$8 sps:$4 sm:$0xff]  }
  0x72   : > { %2770 = vmatmul.mubr.bf16.gmra.mxu1 %v4642_v55  ;;  %2807 = vmatpush2.bf16.msra.mxu0 %v4613_v52  ;;  %v4717_v52 = vld [vmem:[%s5334_s14 + $0x130] ss:$72 sps:$4 sm:$0xff]  }
  0x73   : > { %2900 = vmatpush2.bf16.msra.mxu1 %v4616_v53  ;;  %2808 = vmatprep.subr.bf16.mxu0 %v4627_v56  ;;  %v4718_v53 = vld [vmem:[%s6622_s1 + $0x430] ss:$8 sps:$4 sm:$0xff]   ;;  %v4729_v56 = vld [vmem:[%s6622_s1 + $0x424] ss:$8 sps:$4 sm:$0xff]  }
  0x74   : > { %2901 = vmatprep.subr.bf16.mxu1 %v4630_v57  ;;  %2686 = vmatprep.mubr.bf16.mxu0 %v4655_v58  ;;  %v4726_v55 = vld [vmem:[%s5334_s14 + $0x138] ss:$72 sps:$4 sm:$0xff]   ;;  %v4732_v57 = vld [vmem:[%s6622_s1 + $0x524] ss:$8 sps:$4 sm:$0xff]  }
  0x75   : > { %2779 = vmatprep.mubr.bf16.mxu1 %v4657_v59  ;;  %v4733_v58 = vld [vmem:[%s5334_s14 + $0x1c4] ss:$72 sps:$4 sm:$0xff]  }
  0x76   : > { %2809 = vmatpush2.bf16.msra.mxu0 %v4625_v60  ;;  %v4742_v59 = vld [vmem:[%s5334_s14 + $0x1cc] ss:$72 sps:$4 sm:$0xff]   ;;  %v4727_v60 = vld [vmem:[%s6622_s1 + $0x420] ss:$8 sps:$4 sm:$0xff]  }
  0x77   : > { %2902 = vmatpush2.bf16.msra.mxu1 %v4628_v61  ;;  %2810 = vmatprep.subr.bf16.mxu0 %v4633_v62  ;;  %v4730_v61 = vld [vmem:[%s6622_s1 + $0x520] ss:$8 sps:$4 sm:$0xff]   ;;  %v4738_v62 = vld [vmem:[%s6622_s1 + $0x414] ss:$8 sps:$4 sm:$0xff]  }
  0x78   : > { %2903 = vmatprep.subr.bf16.mxu1 %v4636_v63  ;;  %v4741_v63 = vld [vmem:[%s6622_s1 + $0x514] ss:$8 sps:$4 sm:$0xff]  }
  0x79   : > { %2687 = vmatmul.mubr.bf16.gmra.mxu0 %v4659_v2  ;;  %v4739_v2 = vld [vmem:[%s6622_s1 + $0x510] ss:$8 sps:$4 sm:$0xff]  }
  0x7a   : > { %2780 = vmatmul.mubr.bf16.gmra.mxu1 %v4660_v3  ;;  %2811 = vmatpush2.bf16.msra.mxu0 %v4631_v0  ;;  %v4735_v0 = vld [vmem:[%s5334_s14 + $0x1c0] ss:$72 sps:$4 sm:$0xff]  }
  0x7b   : > { %2904 = vmatpush2.bf16.msra.mxu1 %v4634_v1  ;;  %2812 = vmatprep.subr.bf16.mxu0 %v4645_v4  ;;  %v4736_v1 = vld [vmem:[%s6622_s1 + $0x410] ss:$8 sps:$4 sm:$0xff]   ;;  %v4747_v4 = vld [vmem:[%s6622_s1 + $0x404] ss:$8 sps:$4 sm:$0xff]  }
  0x7c   : > { %2905 = vmatprep.subr.bf16.mxu1 %v4648_v5  ;;  %2822 = vmatprep.mubr.bf16.mxu0 %v4681_v6  ;;  %v4744_v3 = vld [vmem:[%s5334_s14 + $0x1c8] ss:$72 sps:$4 sm:$0xff]   ;;  %v4750_v5 = vld [vmem:[%s6622_s1 + $0x504] ss:$8 sps:$4 sm:$0xff]   ;;  %v4751_v6 = vld [vmem:[%s5334_s14 + $0x254] ss:$72 sps:$4 sm:$0xff]  }
  0x7d   : > { %2915 = vmatprep.mubr.bf16.mxu1 %v4684_v7  ;;  %v4760_v7 = vld [vmem:[%s5334_s14 + $0x25c] ss:$72 sps:$4 sm:$0xff]  }
  0x7e   : > { %2813 = vmatpush2.bf16.msra.mxu0 %v4643_v8  ;;  %v4745_v8 = vld [vmem:[%s6622_s1 + $0x400] ss:$8 sps:$4 sm:$0xff]  }
  0x7f   : > { %2906 = vmatpush2.bf16.msra.mxu1 %v4646_v9  ;;  %2814 = vmatprep.subr.bf16.mxu0 %v4651_v10  ;;  %v4748_v9 = vld [vmem:[%s6622_s1 + $0x500] ss:$8 sps:$4 sm:$0xff]   ;;  %v4756_v10 = vld [vmem:[%s6622_s1 + $0x4f4] ss:$8 sps:$4 sm:$0xff]  }
  0x80   : > { %2907 = vmatprep.subr.bf16.mxu1 %v4654_v11  ;;  %v4759_v11 = vld [vmem:[%s6622_s1 + $0x5f4] ss:$8 sps:$4 sm:$0xff]  }
  0x82   : > { %2815 = vmatpush2.bf16.msra.mxu0 %v4649_v12  ;;  %v4753_v12 = vld [vmem:[%s5334_s14 + $0x250] ss:$72 sps:$4 sm:$0xff]  }
  0x83   : > { %2908 = vmatpush2.bf16.msra.mxu1 %v4652_v13  ;;  %2816 = vmatprep.subr.bf16.mxu0 %v4663_v14  ;;  %v4754_v13 = vld [vmem:[%s6622_s1 + $0x4f0] ss:$8 sps:$4 sm:$0xff]  }
  0x84   : > { %2909 = vmatprep.subr.bf16.mxu1 %v4666_v15  ;;  %v4757_v14 = vld [vmem:[%s6622_s1 + $0x5f0] ss:$8 sps:$4 sm:$0xff]  }
  0x85   : > { %v4762_v15 = vld [vmem:[%s5334_s14 + $0x258] ss:$72 sps:$4 sm:$0xff]  }
  0x86   : > { %2817 = vmatpush2.bf16.msra.mxu0 %v4661_v16  ;;  %v4765_v16 = vld [vmem:[%s6622_s1 + $0x4e4] ss:$8 sps:$4 sm:$0xff]  }
  0x87   : > { %2910 = vmatpush2.bf16.msra.mxu1 %v4664_v17  ;;  %2818 = vmatprep.subr.bf16.mxu0 %v4669_v18  ;;  %v4768_v17 = vld [vmem:[%s6622_s1 + $0x5e4] ss:$8 sps:$4 sm:$0xff]  }
  0x88   : > { %2911 = vmatprep.subr.bf16.mxu1 %v4672_v19  ;;  %v4769_v18 = vld [vmem:[%s5334_s14 + $0x2e4] ss:$72 sps:$4 sm:$0xff]  }
  0x89   : > { %v4778_v19 = vld [vmem:[%s5334_s14 + $0x2ec] ss:$72 sps:$4 sm:$0xff]  }
  0x8a   : > { %2819 = vmatpush2.bf16.msra.mxu0 %v4667_v20  ;;  %v4763_v20 = vld [vmem:[%s6622_s1 + $0x4e0] ss:$8 sps:$4 sm:$0xff]  }
  0x8b   : > { %2912 = vmatpush2.bf16.msra.mxu1 %v4670_v21  ;;  %2820 = vmatprep.subr.bf16.mxu0 %v4675_v22  ;;  %v4766_v21 = vld [vmem:[%s6622_s1 + $0x5e0] ss:$8 sps:$4 sm:$0xff]   ;;  %v4774_v22 = vld [vmem:[%s6622_s1 + $0x4d4] ss:$8 sps:$4 sm:$0xff]  }
  0x8c   : > { %2913 = vmatprep.subr.bf16.mxu1 %v4678_v23  ;;  %v4777_v23 = vld [vmem:[%s6622_s1 + $0x5d4] ss:$8 sps:$4 sm:$0xff]  }
  0x8e   : > { %2821 = vmatpush2.bf16.msra.mxu0 %v4673_v24  ;;  %v4771_v24 = vld [vmem:[%s5334_s14 + $0x2e0] ss:$72 sps:$4 sm:$0xff]  }
  0x8f   : > { %2914 = vmatpush2.bf16.msra.mxu1 %v4676_v25  ;;  %2976 = vmatprep.subr.bf16.mxu0 %v4687_v26  ;;  %v4772_v25 = vld [vmem:[%s6622_s1 + $0x4d0] ss:$8 sps:$4 sm:$0xff]  }
  0x90   : > { %3069 = vmatprep.subr.bf16.mxu1 %v4690_v27  ;;  %v4775_v26 = vld [vmem:[%s6622_s1 + $0x5d0] ss:$8 sps:$4 sm:$0xff]  }
  0x91   : > { %2823 = vmatmul.mubr.bf16.vlgmr.msra.gmra.mxu0 %v4679_v28  ;;  %v4780_v27 = vld [vmem:[%s5334_s14 + $0x2e8] ss:$72 sps:$4 sm:$0xff]   ;;  %v4783_v28 = vld [vmem:[%s6622_s1 + $0x4c4] ss:$8 sps:$4 sm:$0xff]  }
  0x92   : > { %2916 = vmatmul.mubr.bf16.vlgmr.msra.gmra.mxu1 %v4682_v29  ;;  %2977 = vmatpush1.bf16.msra.mxu0 %v4685_v30  ;;  %v4786_v29 = vld [vmem:[%s6622_s1 + $0x5c4] ss:$8 sps:$4 sm:$0xff]  }
  0x93   : > { %3070 = vmatpush1.bf16.msra.mxu1 %v4688_v31  ;;  %2978 = vmatprep.subr.bf16.mxu0 %v4693_v32  ;;  %v4813_v30 = vld [vmem:[%s5334_s14 + $0x24] ss:$72 sps:$4 sm:$0xff]   ;;  %v4781_v32 = vld [vmem:[%s6622_s1 + $0x4c0] ss:$8 sps:$4 sm:$0xff]  }
  0x94   : > { %3071 = vmatprep.subr.bf16.mxu1 %v4696_v33  ;;  %2832 = vmatprep.mubr.bf16.mxu0 %v4697_v34  ;;  %v4816_v31 = vld [vmem:[%s5334_s14 + $0x2c] ss:$72 sps:$4 sm:$0xff]   ;;  %v4784_v33 = vld [vmem:[%s6622_s1 + $0x5c0] ss:$8 sps:$4 sm:$0xff]  }
  0x95   : > { %2925 = vmatprep.mubr.bf16.mxu1 %v4706_v35  ;;  %v4789_v34 = vld [vmem:[%s6622_s1 + $0x4b4] ss:$8 sps:$4 sm:$0xff]  }
  0x96   : > { %2979 = vmatpush1.bf16.msra.mxu0 %v4691_v36  ;;  %v4792_v35 = vld [vmem:[%s6622_s1 + $0x5b4] ss:$8 sps:$4 sm:$0xff]   ;;  %v4787_v36 = vld [vmem:[%s6622_s1 + $0x4b0] ss:$8 sps:$4 sm:$0xff]  }
  0x97   : > { %3072 = vmatpush1.bf16.msra.mxu1 %v4694_v37  ;;  %2980 = vmatprep.subr.bf16.mxu0 %v4702_v38  ;;  %v4790_v37 = vld [vmem:[%s6622_s1 + $0x5b0] ss:$8 sps:$4 sm:$0xff]   ;;  %v4795_v38 = vld [vmem:[%s6622_s1 + $0x4a4] ss:$8 sps:$4 sm:$0xff]  }
  0x98   : > { %3073 = vmatprep.subr.bf16.mxu1 %v4705_v39  ;;  %v4798_v39 = vld [vmem:[%s6622_s1 + $0x5a4] ss:$8 sps:$4 sm:$0xff]  }
  0x99   : > { %2833 = vmatmul.mubr.bf16.gmra.mxu0 %v4699_v40  ;;  %v4793_v40 = vld [vmem:[%s6622_s1 + $0x4a0] ss:$8 sps:$4 sm:$0xff]  }
  0x9a   : > { %2926 = vmatmul.mubr.bf16.gmra.mxu1 %v4708_v43  ;;  %2981 = vmatpush1.bf16.msra.mxu0 %v4700_v41  ;;  %v4796_v41 = vld [vmem:[%s6622_s1 + $0x5a0] ss:$8 sps:$4 sm:$0xff]   ;;  %v4804_v43 = vld [vmem:[%s6622_s1 + $0x594] ss:$8 sps:$4 sm:$0xff]  }
  0x9b   : > { %3074 = vmatpush1.bf16.msra.mxu1 %v4703_v42  ;;  %2982 = vmatprep.subr.bf16.mxu0 %v4711_v44  ;;  %v4801_v42 = vld [vmem:[%s6622_s1 + $0x494] ss:$8 sps:$4 sm:$0xff]   ;;  %v4799_v44 = vld [vmem:[%s6622_s1 + $0x490] ss:$8 sps:$4 sm:$0xff]  }
  0x9c   : > { %3075 = vmatprep.subr.bf16.mxu1 %v4714_v45  ;;  %2842 = vmatprep.mubr.bf16.mxu0 %v4715_v46  ;;  %v4802_v45 = vld [vmem:[%s6622_s1 + $0x590] ss:$8 sps:$4 sm:$0xff]   ;;  %v4807_v46 = vld [vmem:[%s6622_s1 + $0x484] ss:$8 sps:$4 sm:$0xff]  }
  0x9d   : > { %2935 = vmatprep.mubr.bf16.mxu1 %v4724_v47  ;;  %v4810_v47 = vld [vmem:[%s6622_s1 + $0x584] ss:$8 sps:$4 sm:$0xff]  }
  0x9e   : > { %2983 = vmatpush1.bf16.msra.mxu0 %v4709_v48  ;;  %v4805_v48 = vld [vmem:[%s6622_s1 + $0x480] ss:$8 sps:$4 sm:$0xff]  }
  0x9f   : > { %3076 = vmatpush1.bf16.msra.mxu1 %v4712_v49  ;;  %2984 = vmatprep.subr.bf16.mxu0 %v4720_v50  ;;  %v4808_v49 = vld [vmem:[%s6622_s1 + $0x580] ss:$8 sps:$4 sm:$0xff]   ;;  %v4819_v50 = vld [vmem:[%s6622_s1 + $0x674] ss:$8 sps:$4 sm:$0xff]  }
  0xa0   : > { %3077 = vmatprep.subr.bf16.mxu1 %v4723_v51  ;;  %v4822_v51 = vld [vmem:[%s6622_s1 + $0x774] ss:$8 sps:$4 sm:$0xff]  }
  0xa1   : > { %2843 = vmatmul.mubr.bf16.gmra.mxu0 %v4717_v52  ;;  %v4811_v52 = vld [vmem:[%s5334_s14 + $0x20] ss:$72 sps:$4 sm:$0xff]  }
  0xa2   : > { %2936 = vmatmul.mubr.bf16.gmra.mxu1 %v4726_v55  ;;  %2985 = vmatpush1.bf16.msra.mxu0 %v4718_v53  ;;  %v4814_v53 = vld [vmem:[%s5334_s14 + $0x28] ss:$72 sps:$4 sm:$0xff]  }
  0xa3   : > { %3078 = vmatpush1.bf16.msra.mxu1 %v4721_v54  ;;  %2986 = vmatprep.subr.bf16.mxu0 %v4729_v56  ;;  %v4817_v54 = vld [vmem:[%s6622_s1 + $0x670] ss:$8 sps:$4 sm:$0xff]   ;;  %v4825_v56 = vld [vmem:[%s6622_s1 + $0x664] ss:$8 sps:$4 sm:$0xff]  }
  0xa4   : > { %3079 = vmatprep.subr.bf16.mxu1 %v4732_v57  ;;  %2852 = vmatprep.mubr.bf16.mxu0 %v4733_v58  ;;  %v4820_v55 = vld [vmem:[%s6622_s1 + $0x770] ss:$8 sps:$4 sm:$0xff]   ;;  %v4828_v57 = vld [vmem:[%s6622_s1 + $0x764] ss:$8 sps:$4 sm:$0xff]   ;;  %v4829_v58 = vld [vmem:[%s5334_s14 + $0xb4] ss:$72 sps:$4 sm:$0xff]  }
  0xa5   : > { %2945 = vmatprep.mubr.bf16.mxu1 %v4742_v59  ;;  %v4838_v59 = vld [vmem:[%s5334_s14 + $0xbc] ss:$72 sps:$4 sm:$0xff]  }
  0xa6   : > { %2987 = vmatpush1.bf16.msra.mxu0 %v4727_v60  ;;  %v4823_v60 = vld [vmem:[%s6622_s1 + $0x660] ss:$8 sps:$4 sm:$0xff]  }
  0xa7   : > { %3080 = vmatpush1.bf16.msra.mxu1 %v4730_v61  ;;  %2988 = vmatprep.subr.bf16.mxu0 %v4738_v62  ;;  %v4826_v61 = vld [vmem:[%s6622_s1 + $0x760] ss:$8 sps:$4 sm:$0xff]   ;;  %v4834_v62 = vld [vmem:[%s6622_s1 + $0x654] ss:$8 sps:$4 sm:$0xff]  }
  0xa8   : > { %3081 = vmatprep.subr.bf16.mxu1 %v4741_v63  ;;  %v4837_v63 = vld [vmem:[%s6622_s1 + $0x754] ss:$8 sps:$4 sm:$0xff]  }
  0xa9   : > { %2853 = vmatmul.mubr.bf16.gmra.mxu0 %v4735_v0  ;;  %v4831_v0 = vld [vmem:[%s5334_s14 + $0xb0] ss:$72 sps:$4 sm:$0xff]  }
  0xaa   : > { %2946 = vmatmul.mubr.bf16.gmra.mxu1 %v4744_v3  ;;  %2989 = vmatpush1.bf16.msra.mxu0 %v4736_v1  ;;  %v4832_v1 = vld [vmem:[%s6622_s1 + $0x650] ss:$8 sps:$4 sm:$0xff]  }
  0xab   : > { %3082 = vmatpush1.bf16.msra.mxu1 %v4739_v2  ;;  %2990 = vmatprep.subr.bf16.mxu0 %v4747_v4  ;;  %v4835_v2 = vld [vmem:[%s6622_s1 + $0x750] ss:$8 sps:$4 sm:$0xff]   ;;  %v4843_v4 = vld [vmem:[%s6622_s1 + $0x644] ss:$8 sps:$4 sm:$0xff]  }
  0xac   : > { %3083 = vmatprep.subr.bf16.mxu1 %v4750_v5  ;;  %2862 = vmatprep.mubr.bf16.mxu0 %v4751_v6  ;;  %v4840_v3 = vld [vmem:[%s5334_s14 + $0xb8] ss:$72 sps:$4 sm:$0xff]   ;;  %v4846_v5 = vld [vmem:[%s6622_s1 + $0x744] ss:$8 sps:$4 sm:$0xff]  }
  0xad   : > { %2955 = vmatprep.mubr.bf16.mxu1 %v4760_v7  ;;  %v4847_v6 = vld [vmem:[%s5334_s14 + $0x144] ss:$72 sps:$4 sm:$0xff]  }
  0xae   : > { %2991 = vmatpush1.bf16.msra.mxu0 %v4745_v8  ;;  %v4856_v7 = vld [vmem:[%s5334_s14 + $0x14c] ss:$72 sps:$4 sm:$0xff]   ;;  %v4841_v8 = vld [vmem:[%s6622_s1 + $0x640] ss:$8 sps:$4 sm:$0xff]  }
  0xaf   : > { %3084 = vmatpush1.bf16.msra.mxu1 %v4748_v9  ;;  %2992 = vmatprep.subr.bf16.mxu0 %v4756_v10  ;;  %v4844_v9 = vld [vmem:[%s6622_s1 + $0x740] ss:$8 sps:$4 sm:$0xff]   ;;  %v4852_v10 = vld [vmem:[%s6622_s1 + $0x634] ss:$8 sps:$4 sm:$0xff]  }
  0xb0   : > { %3085 = vmatprep.subr.bf16.mxu1 %v4759_v11  ;;  %v4855_v11 = vld [vmem:[%s6622_s1 + $0x734] ss:$8 sps:$4 sm:$0xff]  }
  0xb1   : > { %2863 = vmatmul.mubr.bf16.gmra.mxu0 %v4753_v12  ;;  %v4849_v12 = vld [vmem:[%s5334_s14 + $0x140] ss:$72 sps:$4 sm:$0xff]  }
  0xb2   : > { %2956 = vmatmul.mubr.bf16.gmra.mxu1 %v4762_v15  ;;  %2993 = vmatpush2.bf16.msra.mxu0 %v4754_v13  ;;  %v4850_v13 = vld [vmem:[%s6622_s1 + $0x630] ss:$8 sps:$4 sm:$0xff]  }
  0xb3   : > { %3086 = vmatpush2.bf16.msra.mxu1 %v4757_v14  ;;  %2994 = vmatprep.subr.bf16.mxu0 %v4765_v16  ;;  %v4853_v14 = vld [vmem:[%s6622_s1 + $0x730] ss:$8 sps:$4 sm:$0xff]   ;;  %v4861_v16 = vld [vmem:[%s6622_s1 + $0x624] ss:$8 sps:$4 sm:$0xff]  }
  0xb4   : > { %3087 = vmatprep.subr.bf16.mxu1 %v4768_v17  ;;  %2872 = vmatprep.mubr.bf16.mxu0 %v4769_v18  ;;  %v4858_v15 = vld [vmem:[%s5334_s14 + $0x148] ss:$72 sps:$4 sm:$0xff]   ;;  %v4864_v17 = vld [vmem:[%s6622_s1 + $0x724] ss:$8 sps:$4 sm:$0xff]   ;;  %v4865_v18 = vld [vmem:[%s5334_s14 + $0x1d4] ss:$72 sps:$4 sm:$0xff]  }
  0xb5   : > { %2965 = vmatprep.mubr.bf16.mxu1 %v4778_v19  ;;  %v4874_v19 = vld [vmem:[%s5334_s14 + $0x1dc] ss:$72 sps:$4 sm:$0xff]  }
  0xb6   : > { %2995 = vmatpush2.bf16.msra.mxu0 %v4763_v20  ;;  %v4859_v20 = vld [vmem:[%s6622_s1 + $0x620] ss:$8 sps:$4 sm:$0xff]  }
  0xb7   : > { %3088 = vmatpush2.bf16.msra.mxu1 %v4766_v21  ;;  %2996 = vmatprep.subr.bf16.mxu0 %v4774_v22  ;;  %v4862_v21 = vld [vmem:[%s6622_s1 + $0x720] ss:$8 sps:$4 sm:$0xff]   ;;  %v4870_v22 = vld [vmem:[%s6622_s1 + $0x614] ss:$8 sps:$4 sm:$0xff]  }
  0xb8   : > { %3089 = vmatprep.subr.bf16.mxu1 %v4777_v23  ;;  %v4873_v23 = vld [vmem:[%s6622_s1 + $0x714] ss:$8 sps:$4 sm:$0xff]  }
  0xb9   : > { %2873 = vmatmul.mubr.bf16.gmra.mxu0 %v4771_v24  ;;  %v4867_v24 = vld [vmem:[%s5334_s14 + $0x1d0] ss:$72 sps:$4 sm:$0xff]  }
  0xba   : > { %2966 = vmatmul.mubr.bf16.gmra.mxu1 %v4780_v27  ;;  %2997 = vmatpush2.bf16.msra.mxu0 %v4772_v25  ;;  %v4868_v25 = vld [vmem:[%s6622_s1 + $0x610] ss:$8 sps:$4 sm:$0xff]  }
  0xbb   : > { %3090 = vmatpush2.bf16.msra.mxu1 %v4775_v26  ;;  %2998 = vmatprep.subr.bf16.mxu0 %v4783_v28  ;;  %v4871_v26 = vld [vmem:[%s6622_s1 + $0x710] ss:$8 sps:$4 sm:$0xff]   ;;  %v4879_v28 = vld [vmem:[%s6622_s1 + $0x604] ss:$8 sps:$4 sm:$0xff]  }
  0xbc   : > { %3091 = vmatprep.subr.bf16.mxu1 %v4786_v29  ;;  %3008 = vmatprep.mubr.bf16.mxu0 %v4813_v30  ;;  %v4876_v27 = vld [vmem:[%s5334_s14 + $0x1d8] ss:$72 sps:$4 sm:$0xff]   ;;  %v4882_v29 = vld [vmem:[%s6622_s1 + $0x704] ss:$8 sps:$4 sm:$0xff]  }
  0xbd   : > { %3101 = vmatprep.mubr.bf16.mxu1 %v4816_v31  ;;  %v4883_v30 = vld [vmem:[%s5334_s14 + $0x264] ss:$72 sps:$4 sm:$0xff]  }
  0xbe   : > { %2999 = vmatpush2.bf16.msra.mxu0 %v4781_v32  ;;  %v4892_v31 = vld [vmem:[%s5334_s14 + $0x26c] ss:$72 sps:$4 sm:$0xff]   ;;  %v4877_v32 = vld [vmem:[%s6622_s1 + $0x600] ss:$8 sps:$4 sm:$0xff]  }
  0xbf   : > { %3092 = vmatpush2.bf16.msra.mxu1 %v4784_v33  ;;  %3000 = vmatprep.subr.bf16.mxu0 %v4789_v34  ;;  %v4880_v33 = vld [vmem:[%s6622_s1 + $0x700] ss:$8 sps:$4 sm:$0xff]   ;;  %v4888_v34 = vld [vmem:[%s6622_s1 + $0x6f4] ss:$8 sps:$4 sm:$0xff]  }
  0xc0   : > { %3093 = vmatprep.subr.bf16.mxu1 %v4792_v35  ;;  %v4891_v35 = vld [vmem:[%s6622_s1 + $0x7f4] ss:$8 sps:$4 sm:$0xff]  }
  0xc2   : > { %3001 = vmatpush2.bf16.msra.mxu0 %v4787_v36  ;;  %v4885_v36 = vld [vmem:[%s5334_s14 + $0x260] ss:$72 sps:$4 sm:$0xff]  }
  0xc3   : > { %3094 = vmatpush2.bf16.msra.mxu1 %v4790_v37  ;;  %3002 = vmatprep.subr.bf16.mxu0 %v4795_v38  ;;  %v4886_v37 = vld [vmem:[%s6622_s1 + $0x6f0] ss:$8 sps:$4 sm:$0xff]  }
  0xc4   : > { %3095 = vmatprep.subr.bf16.mxu1 %v4798_v39  ;;  %v4889_v38 = vld [vmem:[%s6622_s1 + $0x7f0] ss:$8 sps:$4 sm:$0xff]  }
  0xc5   : > { %v4894_v39 = vld [vmem:[%s5334_s14 + $0x268] ss:$72 sps:$4 sm:$0xff]  }
  0xc6   : > { %3003 = vmatpush2.bf16.msra.mxu0 %v4793_v40  ;;  %v4897_v40 = vld [vmem:[%s6622_s1 + $0x6e4] ss:$8 sps:$4 sm:$0xff]  }
  0xc7   : > { %3096 = vmatpush2.bf16.msra.mxu1 %v4796_v41  ;;  %3004 = vmatprep.subr.bf16.mxu0 %v4801_v42  ;;  %v4900_v41 = vld [vmem:[%s6622_s1 + $0x7e4] ss:$8 sps:$4 sm:$0xff]   ;;  %v4901_v42 = vld [vmem:[%s5334_s14 + $0x2f4] ss:$72 sps:$4 sm:$0xff]  }
  0xc8   : > { %3097 = vmatprep.subr.bf16.mxu1 %v4804_v43  ;;  %v4910_v43 = vld [vmem:[%s5334_s14 + $0x2fc] ss:$72 sps:$4 sm:$0xff]  }
  0xca   : > { %3005 = vmatpush2.bf16.msra.mxu0 %v4799_v44  ;;  %v4895_v44 = vld [vmem:[%s6622_s1 + $0x6e0] ss:$8 sps:$4 sm:$0xff]  }
  0xcb   : > { %3098 = vmatpush2.bf16.msra.mxu1 %v4802_v45  ;;  %3006 = vmatprep.subr.bf16.mxu0 %v4807_v46  ;;  %v4898_v45 = vld [vmem:[%s6622_s1 + $0x7e0] ss:$8 sps:$4 sm:$0xff]   ;;  %v4906_v46 = vld [vmem:[%s6622_s1 + $0x6d4] ss:$8 sps:$4 sm:$0xff]  }
  0xcc   : > { %3099 = vmatprep.subr.bf16.mxu1 %v4810_v47  ;;  %v4909_v47 = vld [vmem:[%s6622_s1 + $0x7d4] ss:$8 sps:$4 sm:$0xff]  }
  0xce   : > { %3007 = vmatpush2.bf16.msra.mxu0 %v4805_v48  ;;  %v4903_v48 = vld [vmem:[%s5334_s14 + $0x2f0] ss:$72 sps:$4 sm:$0xff]  }
  0xcf   : > { %3100 = vmatpush2.bf16.msra.mxu1 %v4808_v49  ;;  %3162 = vmatprep.subr.bf16.mxu0 %v4819_v50  ;;  %v4904_v49 = vld [vmem:[%s6622_s1 + $0x6d0] ss:$8 sps:$4 sm:$0xff]  }
  0xd0   : > { %3255 = vmatprep.subr.bf16.mxu1 %v4822_v51  ;;  %v4907_v50 = vld [vmem:[%s6622_s1 + $0x7d0] ss:$8 sps:$4 sm:$0xff]  }
  0xd1   : > { %3009 = vmatmul.mubr.bf16.vlgmr.msra.gmra.mxu0 %v4811_v52  ;;  %v4912_v51 = vld [vmem:[%s5334_s14 + $0x2f8] ss:$72 sps:$4 sm:$0xff]   ;;  %v4915_v52 = vld [vmem:[%s6622_s1 + $0x6c4] ss:$8 sps:$4 sm:$0xff]  }
  0xd2   : > { %3102 = vmatmul.mubr.bf16.vlgmr.msra.gmra.mxu1 %v4814_v53  ;;  %3163 = vmatpush1.bf16.msra.mxu0 %v4817_v54  ;;  %v4918_v53 = vld [vmem:[%s6622_s1 + $0x7c4] ss:$8 sps:$4 sm:$0xff]   ;;  %v4945_v54 = vld [vmem:[%s5334_s14 + $0x34] ss:$72 sps:$4 sm:$0xff]  }
  0xd3   : > { %3256 = vmatpush1.bf16.msra.mxu1 %v4820_v55  ;;  %3164 = vmatprep.subr.bf16.mxu0 %v4825_v56  ;;  %v4948_v55 = vld [vmem:[%s5334_s14 + $0x3c] ss:$72 sps:$4 sm:$0xff]   ;;  %v4913_v56 = vld [vmem:[%s6622_s1 + $0x6c0] ss:$8 sps:$4 sm:$0xff]  }
  0xd4   : > { %3257 = vmatprep.subr.bf16.mxu1 %v4828_v57  ;;  %3018 = vmatprep.mubr.bf16.mxu0 %v4829_v58  ;;  %v4916_v57 = vld [vmem:[%s6622_s1 + $0x7c0] ss:$8 sps:$4 sm:$0xff]   ;;  %v4921_v58 = vld [vmem:[%s6622_s1 + $0x6b4] ss:$8 sps:$4 sm:$0xff]  }
  0xd5   : > { %3111 = vmatprep.mubr.bf16.mxu1 %v4838_v59  ;;  %v4924_v59 = vld [vmem:[%s6622_s1 + $0x7b4] ss:$8 sps:$4 sm:$0xff]  }
  0xd6   : > { %3165 = vmatpush1.bf16.msra.mxu0 %v4823_v60  ;;  %v4919_v60 = vld [vmem:[%s6622_s1 + $0x6b0] ss:$8 sps:$4 sm:$0xff]  }
  0xd7   : > { %3258 = vmatpush1.bf16.msra.mxu1 %v4826_v61  ;;  %3166 = vmatprep.subr.bf16.mxu0 %v4834_v62  ;;  %v4922_v61 = vld [vmem:[%s6622_s1 + $0x7b0] ss:$8 sps:$4 sm:$0xff]   ;;  %v4927_v62 = vld [vmem:[%s6622_s1 + $0x6a4] ss:$8 sps:$4 sm:$0xff]  }
  0xd8   : > { %3259 = vmatprep.subr.bf16.mxu1 %v4837_v63  ;;  %v4930_v63 = vld [vmem:[%s6622_s1 + $0x7a4] ss:$8 sps:$4 sm:$0xff]  }
  0xd9   : > { %3019 = vmatmul.mubr.bf16.gmra.mxu0 %v4831_v0  ;;  %v4925_v0 = vld [vmem:[%s6622_s1 + $0x6a0] ss:$8 sps:$4 sm:$0xff]  }
  0xda   : > { %3112 = vmatmul.mubr.bf16.gmra.mxu1 %v4840_v3  ;;  %3167 = vmatpush1.bf16.msra.mxu0 %v4832_v1  ;;  %v4928_v1 = vld [vmem:[%s6622_s1 + $0x7a0] ss:$8 sps:$4 sm:$0xff]   ;;  %v4936_v3 = vld [vmem:[%s6622_s1 + $0x794] ss:$8 sps:$4 sm:$0xff]  }
  0xdb   : > { %3260 = vmatpush1.bf16.msra.mxu1 %v4835_v2  ;;  %3168 = vmatprep.subr.bf16.mxu0 %v4843_v4  ;;  %v4933_v2 = vld [vmem:[%s6622_s1 + $0x694] ss:$8 sps:$4 sm:$0xff]   ;;  %v4931_v4 = vld [vmem:[%s6622_s1 + $0x690] ss:$8 sps:$4 sm:$0xff]  }
  0xdc   : > { %3261 = vmatprep.subr.bf16.mxu1 %v4846_v5  ;;  %3028 = vmatprep.mubr.bf16.mxu0 %v4847_v6  ;;  %v4934_v5 = vld [vmem:[%s6622_s1 + $0x790] ss:$8 sps:$4 sm:$0xff]   ;;  %v4939_v6 = vld [vmem:[%s6622_s1 + $0x684] ss:$8 sps:$4 sm:$0xff]  }
  0xdd   : > { %3121 = vmatprep.mubr.bf16.mxu1 %v4856_v7  ;;  %v4942_v7 = vld [vmem:[%s6622_s1 + $0x784] ss:$8 sps:$4 sm:$0xff]  }
  0xde   : > { %3169 = vmatpush1.bf16.msra.mxu0 %v4841_v8  ;;  %v4937_v8 = vld [vmem:[%s6622_s1 + $0x680] ss:$8 sps:$4 sm:$0xff]  }
  0xdf   : > { %3262 = vmatpush1.bf16.msra.mxu1 %v4844_v9  ;;  %3170 = vmatprep.subr.bf16.mxu0 %v4852_v10  ;;  %v4940_v9 = vld [vmem:[%s6622_s1 + $0x780] ss:$8 sps:$4 sm:$0xff]   ;;  %v4951_v10 = vld [vmem:[%s6622_s1 + $0x874] ss:$8 sps:$4 sm:$0xff]  }
  0xe0   : > { %3263 = vmatprep.subr.bf16.mxu1 %v4855_v11  ;;  %v4943_v11 = vld [vmem:[%s5334_s14 + $0x30] ss:$72 sps:$4 sm:$0xff]  }
  0xe1   : > { %3029 = vmatmul.mubr.bf16.gmra.mxu0 %v4849_v12  ;;  %v4946_v12 = vld [vmem:[%s5334_s14 + $0x38] ss:$72 sps:$4 sm:$0xff]  }
  0xe2   : > { %3122 = vmatmul.mubr.bf16.gmra.mxu1 %v4858_v15  ;;  %3171 = vmatpush1.bf16.msra.mxu0 %v4850_v13  ;;  %v4949_v13 = vld [vmem:[%s6622_s1 + $0x870] ss:$8 sps:$4 sm:$0xff]   ;;  %v4955_v15 = vld [vmem:[%s5334_s14 + $0xc4] ss:$72 sps:$4 sm:$0xff]  }
  0xe3   : > { %3264 = vmatpush1.bf16.msra.mxu1 %v4853_v14  ;;  %3172 = vmatprep.subr.bf16.mxu0 %v4861_v16  ;;  %v4954_v14 = vld [vmem:[%s6622_s1 + $0x864] ss:$8 sps:$4 sm:$0xff]  }
  0xe4   : > { %3265 = vmatprep.subr.bf16.mxu1 %v4864_v17  ;;  %3038 = vmatprep.mubr.bf16.mxu0 %v4865_v18  ;;  %v4961_v16 = vld [vmem:[%s5334_s14 + $0xcc] ss:$72 sps:$4 sm:$0xff]  }
  0xe5   : > { %3131 = vmatprep.mubr.bf16.mxu1 %v4874_v19 }
  0xe6   : > { %3173 = vmatpush1.bf16.msra.mxu0 %v4859_v20  ;;  %v4952_v20 = vld [vmem:[%s6622_s1 + $0x860] ss:$8 sps:$4 sm:$0xff]  }
  0xe7   : > { %3266 = vmatpush1.bf16.msra.mxu1 %v4862_v21  ;;  %3174 = vmatprep.subr.bf16.mxu0 %v4870_v22 }
  0xe8   : > { %3267 = vmatprep.subr.bf16.mxu1 %v4873_v23  ;;  %v4960_v23 = vld [vmem:[%s6622_s1 + $0x854] ss:$8 sps:$4 sm:$0xff]  }
  0xe9   : > { %3039 = vmatmul.mubr.bf16.gmra.mxu0 %v4867_v24 }
  0xea   : > { %3132 = vmatmul.mubr.bf16.gmra.mxu1 %v4876_v27  ;;  %3175 = vmatpush1.bf16.msra.mxu0 %v4868_v25  ;;  %v4957_v27 = vld [vmem:[%s5334_s14 + $0xc0] ss:$72 sps:$4 sm:$0xff]  }
  0xeb   : > { %3268 = vmatpush1.bf16.msra.mxu1 %v4871_v26  ;;  %3176 = vmatprep.subr.bf16.mxu0 %v4879_v28  ;;  %v4963_v28 = vld [vmem:[%s5334_s14 + $0xc8] ss:$72 sps:$4 sm:$0xff]  }
  0xec   : > { %3269 = vmatprep.subr.bf16.mxu1 %v4882_v29  ;;  %3048 = vmatprep.mubr.bf16.mxu0 %v4883_v30  ;;  %v4958_v30 = vld [vmem:[%s6622_s1 + $0x850] ss:$8 sps:$4 sm:$0xff]  }
  0xed   : > { %3141 = vmatprep.mubr.bf16.mxu1 %v4892_v31 }
  0xee   : > { %3177 = vmatpush1.bf16.msra.mxu0 %v4877_v32 }
  0xef   : > { %3270 = vmatpush1.bf16.msra.mxu1 %v4880_v33  ;;  %3178 = vmatprep.subr.bf16.mxu0 %v4888_v34  ;;  %v4966_v33 = vld [vmem:[%s6622_s1 + $0x844] ss:$8 sps:$4 sm:$0xff]  }
  0xf0   : > { %3271 = vmatprep.subr.bf16.mxu1 %v4891_v35  ;;  %v4967_v35 = vld [vmem:[%s5334_s14 + $0x154] ss:$72 sps:$4 sm:$0xff]  }
  0xf1   : > { %3049 = vmatmul.mubr.bf16.gmra.mxu0 %v4885_v36  ;;  %v4973_v36 = vld [vmem:[%s5334_s14 + $0x15c] ss:$72 sps:$4 sm:$0xff]  }
  0xf2   : > { %3142 = vmatmul.mubr.bf16.gmra.mxu1 %v4894_v39  ;;  %3179 = vmatpush2.bf16.msra.mxu0 %v4886_v37  ;;  %v4964_v39 = vld [vmem:[%s6622_s1 + $0x840] ss:$8 sps:$4 sm:$0xff]  }
  0xf3   : > { %3272 = vmatpush2.bf16.msra.mxu1 %v4889_v38  ;;  %3180 = vmatprep.subr.bf16.mxu0 %v4897_v40 }
  0xf4   : > { %3273 = vmatprep.subr.bf16.mxu1 %v4900_v41  ;;  %3058 = vmatprep.mubr.bf16.mxu0 %v4901_v42  ;;  %v4972_v41 = vld [vmem:[%s6622_s1 + $0x834] ss:$8 sps:$4 sm:$0xff]  }
  0xf5   : > { %3151 = vmatprep.mubr.bf16.mxu1 %v4910_v43 }
  0xf6   : > { %3181 = vmatpush2.bf16.msra.mxu0 %v4895_v44 }
  0xf7   : > { %3274 = vmatpush2.bf16.msra.mxu1 %v4898_v45  ;;  %3182 = vmatprep.subr.bf16.mxu0 %v4906_v46  ;;  %v4969_v45 = vld [vmem:[%s5334_s14 + $0x150] ss:$72 sps:$4 sm:$0xff]  }
  0xf8   : > { %3275 = vmatprep.subr.bf16.mxu1 %v4909_v47  ;;  %v4975_v46 = vld [vmem:[%s5334_s14 + $0x158] ss:$72 sps:$4 sm:$0xff]  }
  0xf9   : > { %3059 = vmatmul.mubr.bf16.gmra.mxu0 %v4903_v48 }
  0xfa   : > { %3152 = vmatmul.mubr.bf16.gmra.mxu1 %v4912_v51  ;;  %3183 = vmatpush2.bf16.msra.mxu0 %v4904_v49  ;;  %v4970_v49 = vld [vmem:[%s6622_s1 + $0x830] ss:$8 sps:$4 sm:$0xff]   ;;  %v4978_v51 = vld [vmem:[%s6622_s1 + $0x824] ss:$8 sps:$4 sm:$0xff]  }
  0xfb   : > { %3276 = vmatpush2.bf16.msra.mxu1 %v4907_v50  ;;  %3184 = vmatprep.subr.bf16.mxu0 %v4915_v52 }
  0xfc   : > { %3277 = vmatprep.subr.bf16.mxu1 %v4918_v53  ;;  %3194 = vmatprep.mubr.bf16.mxu0 %v4945_v54  ;;  %v4979_v54 = vld [vmem:[%s5334_s14 + $0x1e4] ss:$72 sps:$4 sm:$0xff]  }
  0xfd   : > { %3287 = vmatprep.mubr.bf16.mxu1 %v4948_v55 }
  0xfe   : > { %3185 = vmatpush2.bf16.msra.mxu0 %v4913_v56  ;;  %v4985_v56 = vld [vmem:[%s5334_s14 + $0x1ec] ss:$72 sps:$4 sm:$0xff]  }
  0xff   : > { %3278 = vmatpush2.bf16.msra.mxu1 %v4916_v57  ;;  %3186 = vmatprep.subr.bf16.mxu0 %v4921_v58 }
 0x100   : > { %3279 = vmatprep.subr.bf16.mxu1 %v4924_v59  ;;  %v4976_v59 = vld [vmem:[%s6622_s1 + $0x820] ss:$8 sps:$4 sm:$0xff]  }
 0x102   : > { %3187 = vmatpush2.bf16.msra.mxu0 %v4919_v60 }
 0x103   : > { %3280 = vmatpush2.bf16.msra.mxu1 %v4922_v61  ;;  %3188 = vmatprep.subr.bf16.mxu0 %v4927_v62  ;;  %v4984_v61 = vld [vmem:[%s6622_s1 + $0x814] ss:$8 sps:$4 sm:$0xff]  }
 0x104   : > { %3281 = vmatprep.subr.bf16.mxu1 %v4930_v63 }
 0x106   : > { %3189 = vmatpush2.bf16.msra.mxu0 %v4925_v0 }
 0x107   : > { %3282 = vmatpush2.bf16.msra.mxu1 %v4928_v1  ;;  %3190 = vmatprep.subr.bf16.mxu0 %v4933_v2  ;;  %v4981_v1 = vld [vmem:[%s5334_s14 + $0x1e0] ss:$72 sps:$4 sm:$0xff]  }
 0x108   : > { %3283 = vmatprep.subr.bf16.mxu1 %v4936_v3  ;;  %v4987_v2 = vld [vmem:[%s5334_s14 + $0x1e8] ss:$72 sps:$4 sm:$0xff]  }
 0x10a   : > { %3191 = vmatpush2.bf16.msra.mxu0 %v4931_v4 }
 0x10b   : > { %3284 = vmatpush2.bf16.msra.mxu1 %v4934_v5  ;;  %3192 = vmatprep.subr.bf16.mxu0 %v4939_v6  ;;  %v4982_v5 = vld [vmem:[%s6622_s1 + $0x810] ss:$8 sps:$4 sm:$0xff]  }
 0x10c   : > { %3285 = vmatprep.subr.bf16.mxu1 %v4942_v7  ;;  %v4990_v7 = vld [vmem:[%s6622_s1 + $0x804] ss:$8 sps:$4 sm:$0xff]  }
 0x10e   : > { %3193 = vmatpush2.bf16.msra.mxu0 %v4937_v8 }
 0x10f   : > { %3286 = vmatpush2.bf16.msra.mxu1 %v4940_v9  ;;  %3348 = vmatprep.subr.bf16.mxu0 %v4951_v10 }
 0x110   : > { %4328 = vmatprep.subr.bf16.mxu1 %v4951_v10  ;;  %v4991_v10 = vld [vmem:[%s5334_s14 + $0x274] ss:$72 sps:$4 sm:$0xff]  }
 0x111   : > { %v2638_v17 = vpop.f32.mrf.mxu0  ;;  %3195 = vmatmul.mubr.bf16.vlgmr.msra.gmra.mxu0 %v4943_v11 }
 0x112   : > { %v2731_v18 = vpop.f32.mrf.mxu1  ;;  %3288 = vmatmul.mubr.bf16.vlgmr.msra.gmra.mxu1 %v4946_v12  ;;  %3349 = vmatpush1.bf16.msra.mxu0 %v4949_v13  ;;  %v4997_v12 = vld [vmem:[%s5334_s14 + $0x27c] ss:$72 sps:$4 sm:$0xff]  }
 0x113   : > { %v6056_v19 = vadd.f32 %v2731_v18, %v2638_v17  ;;  %4344 = vmatpush1.bf16.msra.mxu1 %v4949_v13  ;;  %v2640_v21 = vpop.f32.mrf.mxu0  ;;  %3350 = vmatprep.subr.bf16.mxu0 %v4954_v14  ;;  %v4996_v17 = vld [vmem:[%s6622_s1 + $0x8f4] ss:$8 sps:$4 sm:$0xff]  }
 0x114   : > { %v2733_v22 = vpop.f32.mrf.mxu1  ;;  %4329 = vmatprep.subr.bf16.mxu1 %v4954_v14  ;;  %3204 = vmatprep.mubr.bf16.mxu0 %v4955_v15  ;;  %v4988_v15 = vld [vmem:[%s6622_s1 + $0x800] ss:$8 sps:$4 sm:$0xff]  }
 0x115   : > { %v6064_v24 = vadd.f32 %v2733_v22, %v2640_v21  ;;  %3297 = vmatprep.mubr.bf16.mxu1 %v4961_v16  ;;  %v2642_v25 = vpop.f32.mrf.mxu0  ;;  %v4993_v22 = vld [vmem:[%s5334_s14 + $0x270] ss:$72 sps:$4 sm:$0xff]  }
 0x116   : > { %v2735_v26 = vpop.f32.mrf.mxu1  ;;  %3351 = vmatpush1.bf16.msra.mxu0 %v4952_v20 }
 0x117   : > { %v6068_v29 = vadd.f32 %v2735_v26, %v2642_v25  ;;  %4345 = vmatpush1.bf16.msra.mxu1 %v4952_v20  ;;  %v2644_v31 = vpop.f32.mrf.mxu0  ;;  %3352 = vmatprep.subr.bf16.mxu0 %v4960_v23 }
 0x118   : > { %v2737_v32 = vpop.f32.mrf.mxu1  ;;  %4330 = vmatprep.subr.bf16.mxu1 %v4960_v23  ;;  %v4999_v23 = vld [vmem:[%s5334_s14 + $0x278] ss:$72 sps:$4 sm:$0xff]  }
 0x119   : > { %v6076_v34 = vadd.f32 %v2737_v32, %v2644_v31  ;;  %3205 = vmatmul.mubr.bf16.gmra.mxu0 %v4957_v27  ;;  %v2648_v37 = vpop.f32.mrf.mxu0  ;;  %v4994_v27 = vld [vmem:[%s6622_s1 + $0x8f0] ss:$8 sps:$4 sm:$0xff]  }
 0x11a   : > { %3298 = vmatmul.mubr.bf16.gmra.mxu1 %v4963_v28  ;;  %v2741_v38 = vpop.f32.mrf.mxu1  ;;  %3353 = vmatpush1.bf16.msra.mxu0 %v4958_v30 }
 0x11b   : > { %4346 = vmatpush1.bf16.msra.mxu1 %v4958_v30  ;;  %v6083_v40 = vadd.f32 %v2741_v38, %v2648_v37  ;;  %3354 = vmatprep.subr.bf16.mxu0 %v4966_v33  ;;  %v2650_v42 = vpop.f32.mrf.mxu0  ;;  %v5002_v30 = vld [vmem:[%s6622_s1 + $0x8e4] ss:$8 sps:$4 sm:$0xff]  }
 0x11c   : > { %4331 = vmatprep.subr.bf16.mxu1 %v4966_v33  ;;  %v2743_v43 = vpop.f32.mrf.mxu1  ;;  %3214 = vmatprep.mubr.bf16.mxu0 %v4967_v35  ;;  %v5003_v33 = vld [vmem:[%s5334_s14 + $0x304] ss:$72 sps:$4 sm:$0xff]  }
 0x11d   : > { %3307 = vmatprep.mubr.bf16.mxu1 %v4973_v36  ;;  %v6088_v44 = vadd.f32 %v2743_v43, %v2650_v42  ;;  %v2652_v47 = vpop.f32.mrf.mxu0  ;;  %v5009_v36 = vld [vmem:[%s5334_s14 + $0x30c] ss:$72 sps:$4 sm:$0xff]  }
 0x11e   : > { %v2745_v48 = vpop.f32.mrf.mxu1  ;;  %3355 = vmatpush1.bf16.msra.mxu0 %v4964_v39  ;;  %v5008_v42 = vld [vmem:[%s6622_s1 + $0x8d4] ss:$8 sps:$4 sm:$0xff]  }
 0x11f   : > { %4347 = vmatpush1.bf16.msra.mxu1 %v4964_v39  ;;  %v6095_v50 = vadd.f32 %v2745_v48, %v2652_v47  ;;  %3356 = vmatprep.subr.bf16.mxu0 %v4972_v41  ;;  %v2654_v52 = vpop.f32.mrf.mxu0  ;;  %v5000_v39 = vld [vmem:[%s6622_s1 + $0x8e0] ss:$8 sps:$4 sm:$0xff]  }
 0x120   : > { %4332 = vmatprep.subr.bf16.mxu1 %v4972_v41  ;;  %v2747_v53 = vpop.f32.mrf.mxu1  ;;  %v5005_v47 = vld [vmem:[%s5334_s14 + $0x300] ss:$72 sps:$4 sm:$0xff]  }
 0x121   : > { %v6101_v55 = vadd.f32 %v2747_v53, %v2654_v52  ;;  %3215 = vmatmul.mubr.bf16.gmra.mxu0 %v4969_v45  ;;  %v2658_v57 = vpop.f32.mrf.mxu0  ;;  %v5011_v48 = vld [vmem:[%s5334_s14 + $0x308] ss:$72 sps:$4 sm:$0xff]  }
 0x122   : > { %3308 = vmatmul.mubr.bf16.gmra.mxu1 %v4975_v46  ;;  %v2751_v58 = vpop.f32.mrf.mxu1  ;;  %3357 = vmatpush1.bf16.msra.mxu0 %v4970_v49  ;;  %v5006_v52 = vld [vmem:[%s6622_s1 + $0x8d0] ss:$8 sps:$4 sm:$0xff]  }
 0x123   : > { %4348 = vmatpush1.bf16.msra.mxu1 %v4970_v49  ;;  %v6107_v60 = vadd.f32 %v2751_v58, %v2658_v57  ;;  %3358 = vmatprep.subr.bf16.mxu0 %v4978_v51  ;;  %v2660_v62 = vpop.f32.mrf.mxu0 }
 0x124   : > { %4333 = vmatprep.subr.bf16.mxu1 %v4978_v51  ;;  %v2753_v63 = vpop.f32.mrf.mxu1  ;;  %3224 = vmatprep.mubr.bf16.mxu0 %v4979_v54  ;;  %v5014_v54 = vld [vmem:[%s6622_s1 + $0x8c4] ss:$8 sps:$4 sm:$0xff]  }
 0x125   : > { %3317 = vmatprep.mubr.bf16.mxu1 %v4985_v56  ;;  %v6112_v0 = vadd.f32 %v2753_v63, %v2660_v62  ;;  %v2662_v3 = vpop.f32.mrf.mxu0 }
 0x126   : > { %v2755_v4 = vpop.f32.mrf.mxu1  ;;  %3359 = vmatpush1.bf16.msra.mxu0 %v4976_v59 }
 0x127   : > { %4349 = vmatpush1.bf16.msra.mxu1 %v4976_v59  ;;  %v6119_v6 = vadd.f32 %v2755_v4, %v2662_v3  ;;  %3360 = vmatprep.subr.bf16.mxu0 %v4984_v61  ;;  %v2664_v8 = vpop.f32.mrf.mxu0  ;;  %v5029_v59 = vld [vmem:[%s5334_s14 + $0x44] ss:$72 sps:$4 sm:$0xff]   ;;  %v5017_v3 = vld [vmem:[%s6622_s1 + $0x8b4] ss:$8 sps:$4 sm:$0xff]  }
 0x128   : > { %4334 = vmatprep.subr.bf16.mxu1 %v4984_v61  ;;  %v2757_v9 = vpop.f32.mrf.mxu1  ;;  %v5032_v61 = vld [vmem:[%s5334_s14 + $0x1f4] ss:$72 sps:$4 sm:$0xff]  }
 0x129   : > { %v6125_v11 = vadd.f32 %v2757_v9, %v2664_v8  ;;  %3225 = vmatmul.mubr.bf16.gmra.mxu0 %v4981_v1  ;;  %v2668_v13 = vpop.f32.mrf.mxu0  ;;  %v5012_v1 = vld [vmem:[%s6622_s1 + $0x8c0] ss:$8 sps:$4 sm:$0xff]  }
 0x12a   : > { %3318 = vmatmul.mubr.bf16.gmra.mxu1 %v4987_v2  ;;  %v2761_v14 = vpop.f32.mrf.mxu1  ;;  %3361 = vmatpush1.bf16.msra.mxu0 %v4982_v5 }
 0x12b   : > { %4350 = vmatpush1.bf16.msra.mxu1 %v4982_v5  ;;  %v6131_v16 = vadd.f32 %v2761_v14, %v2668_v13  ;;  %3362 = vmatprep.subr.bf16.mxu0 %v4990_v7  ;;  %v2670_v18 = vpop.f32.mrf.mxu0  ;;  %v5020_v13 = vld [vmem:[%s6622_s1 + $0x8a4] ss:$8 sps:$4 sm:$0xff]  }
 0x12c   : > { %4335 = vmatprep.subr.bf16.mxu1 %v4990_v7  ;;  %v2763_v20 = vpop.f32.mrf.mxu1  ;;  %3234 = vmatprep.mubr.bf16.mxu0 %v4991_v10  ;;  %v5015_v10 = vld [vmem:[%s6622_s1 + $0x8b0] ss:$8 sps:$4 sm:$0xff]  }
 0x12d   : > { %3327 = vmatprep.mubr.bf16.mxu1 %v4997_v12  ;;  %v6136_v21 = vadd.f32 %v2763_v20, %v2670_v18  ;;  %v2672_v25 = vpop.f32.mrf.mxu0  ;;  %v5018_v18 = vld [vmem:[%s6622_s1 + $0x8a0] ss:$8 sps:$4 sm:$0xff]   ;;  %v5023_v20 = vld [vmem:[%s6622_s1 + $0x894] ss:$8 sps:$4 sm:$0xff]  }
 0x12e   : > { %v2765_v26 = vpop.f32.mrf.mxu1  ;;  %3363 = vmatpush1.bf16.msra.mxu0 %v4988_v15 }
 0x12f   : > { %4351 = vmatpush1.bf16.msra.mxu1 %v4988_v15  ;;  %v6143_v28 = vadd.f32 %v2765_v26, %v2672_v25  ;;  %3364 = vmatprep.subr.bf16.mxu0 %v4996_v17  ;;  %v2674_v31 = vpop.f32.mrf.mxu0  ;;  %v5024_v25 = vld [vmem:[%s6622_s1 + $0x880] ss:$8 sps:$4 sm:$0xff]  }
 0x130   : > { %4336 = vmatprep.subr.bf16.mxu1 %v4996_v17  ;;  %v2767_v32 = vpop.f32.mrf.mxu1  ;;  %v5027_v26 = vld [vmem:[%s5334_s14 + $0x40] ss:$72 sps:$4 sm:$0xff]  }
 0x131   : > { %v6149_v35 = vadd.f32 %v2767_v32, %v2674_v31  ;;  %3235 = vmatmul.mubr.bf16.gmra.mxu0 %v4993_v22  ;;  %v2678_v37 = vpop.f32.mrf.mxu0  ;;  %v5021_v22 = vld [vmem:[%s6622_s1 + $0x890] ss:$8 sps:$4 sm:$0xff]   ;;  %v5035_v31 = vld [vmem:[%s5334_s14 + $0x284] ss:$72 sps:$4 sm:$0xff]  }
 0x132   : > { %3328 = vmatmul.mubr.bf16.gmra.mxu1 %v4999_v23  ;;  %v2771_v38 = vpop.f32.mrf.mxu1  ;;  %3365 = vmatpush2.bf16.msra.mxu0 %v4994_v27  ;;  %v5026_v23 = vld [vmem:[%s6622_s1 + $0x884] ss:$8 sps:$4 sm:$0xff]  }
 0x133   : > { %4352 = vmatpush2.bf16.msra.mxu1 %v4994_v27  ;;  %v6155_v41 = vadd.f32 %v2771_v38, %v2678_v37  ;;  %3366 = vmatprep.subr.bf16.mxu0 %v5002_v30  ;;  %v2680_v43 = vpop.f32.mrf.mxu0  ;;  %v5030_v27 = vld [vmem:[%s5334_s14 + $0x1f0] ss:$72 sps:$4 sm:$0xff]  }
 0x134   : > { %4337 = vmatprep.subr.bf16.mxu1 %v5002_v30  ;;  %v2773_v45 = vpop.f32.mrf.mxu1  ;;  %3244 = vmatprep.mubr.bf16.mxu0 %v5003_v33  ;;  %v5033_v30 = vld [vmem:[%s5334_s14 + $0xd4] ss:$72 sps:$4 sm:$0xff]  }
 0x135   : > { %3337 = vmatprep.mubr.bf16.mxu1 %v5009_v36  ;;  %v6160_v46 = vadd.f32 %v2773_v45, %v2680_v43  ;;  %v2682_v49 = vpop.f32.mrf.mxu0 }
 0x136   : > { %v2775_v51 = vpop.f32.mrf.mxu1  ;;  %3367 = vmatpush2.bf16.msra.mxu0 %v5000_v39 }
 0x137   : > { %4353 = vmatpush2.bf16.msra.mxu1 %v5000_v39  ;;  %v6167_v53 = vadd.f32 %v2775_v51, %v2682_v49  ;;  %3368 = vmatprep.subr.bf16.mxu0 %v5008_v42  ;;  %v2684_v56 = vpop.f32.mrf.mxu0 }
 0x138   : > { %4338 = vmatprep.subr.bf16.mxu1 %v5008_v42  ;;  %v2777_v57 = vpop.f32.mrf.mxu1 }
 0x139   : > { %v6172_v58 = vadd.f32 %v2777_v57, %v2684_v56  ;;  %3245 = vmatmul.mubr.bf16.gmra.mxu0 %v5005_v47  ;;  %v2688_v62 = vpop.f32.mrf.mxu0  ;;  %v5037_v47 = vld [vmem:[%s5334_s14 + $0xd0] ss:$72 sps:$4 sm:$0xff]  }
 0x13a   : > { %3338 = vmatmul.mubr.bf16.gmra.mxu1 %v5011_v48  ;;  %v2781_v63 = vpop.f32.mrf.mxu1  ;;  %3369 = vmatpush2.bf16.msra.mxu0 %v5006_v52  ;;  %v5038_v48 = vld [vmem:[%s5334_s14 + $0x280] ss:$72 sps:$4 sm:$0xff]  }
 0x13b   : > { %4354 = vmatpush2.bf16.msra.mxu1 %v5006_v52  ;;  %v6179_v2 = vadd.f32 %v2781_v63, %v2688_v62  ;;  %3370 = vmatprep.subr.bf16.mxu0 %v5014_v54  ;;  %v2690_v4 = vpop.f32.mrf.mxu0  ;;  %v5039_v52 = vld [vmem:[%s5334_s14 + $0x164] ss:$72 sps:$4 sm:$0xff]  }
 0x13c   : > { %4339 = vmatprep.subr.bf16.mxu1 %v5014_v54  ;;  %v2783_v5 = vpop.f32.mrf.mxu1  ;;  %3380 = vmatprep.mubr.bf16.mxu0 %v5029_v59  ;;  %v5041_v54 = vld [vmem:[%s5334_s14 + $0x314] ss:$72 sps:$4 sm:$0xff]  }
 0x13d   : > { %v6184_v7 = vadd.f32 %v2783_v5, %v2690_v4  ;;  %3410 = vmatprep.mubr.bf16.mxu1 %v5032_v61  ;;  %v2692_v8 = vpop.f32.mrf.mxu0 }
 0x13e   : > { %v2785_v9 = vpop.f32.mrf.mxu1  ;;  %3371 = vmatpush2.bf16.msra.mxu0 %v5012_v1 }
 0x13f   : > { %4355 = vmatpush2.bf16.msra.mxu1 %v5012_v1  ;;  %v6189_v12 = vadd.f32 %v2785_v9, %v2692_v8  ;;  %3372 = vmatprep.subr.bf16.mxu0 %v5017_v3  ;;  %v2694_v14 = vpop.f32.mrf.mxu0  ;;  %v5044_v9 = vld [vmem:[%s5334_s14 + $0x310] ss:$72 sps:$4 sm:$0xff]  }
 0x140   : > { %4340 = vmatprep.subr.bf16.mxu1 %v5017_v3  ;;  %v2787_v15 = vpop.f32.mrf.mxu1 }
 0x141   : > { %v6194_v17 = vadd.f32 %v2787_v15, %v2694_v14 }
 0x142   : > { %3373 = vmatpush2.bf16.msra.mxu0 %v5015_v10 }
 0x143   : > { %4356 = vmatpush2.bf16.msra.mxu1 %v5015_v10  ;;  %3374 = vmatprep.subr.bf16.mxu0 %v5020_v13 }
 0x144   : > { %4341 = vmatprep.subr.bf16.mxu1 %v5020_v13 }
 0x146   : > { %3375 = vmatpush2.bf16.msra.mxu0 %v5018_v18 }
 0x147   : > { %4357 = vmatpush2.bf16.msra.mxu1 %v5018_v18  ;;  %3376 = vmatprep.subr.bf16.mxu0 %v5023_v20 }
 0x148   : > { %4342 = vmatprep.subr.bf16.mxu1 %v5023_v20 }
 0x14a   : > { %3377 = vmatpush2.bf16.msra.mxu0 %v5021_v22 }
 0x14b   : > { %4358 = vmatpush2.bf16.msra.mxu1 %v5021_v22  ;;  %3378 = vmatprep.subr.bf16.mxu0 %v5026_v23 }
 0x14c   : > { %4343 = vmatprep.subr.bf16.mxu1 %v5026_v23 }
 0x14e   : > { %3379 = vmatpush2.bf16.msra.mxu0 %v5024_v25 }
 0x14f   : > { %4359 = vmatpush2.bf16.msra.mxu1 %v5024_v25 }
 0x151   : > { %v2824_v32 = vpop.f32.mrf.mxu0  ;;  %3381 = vmatmul.mubr.bf16.vlgmr.msra.gmra.mxu0 %v5027_v26 }
 0x152   : > { %v2917_v33 = vpop.f32.mrf.mxu1  ;;  %3411 = vmatmul.mubr.bf16.vlgmr.msra.gmra.mxu1 %v5030_v27  ;;  %v2825_v36 = vadd.f32 %v2824_v32, %v6056_v19  ;;  %3390 = vmatprep.mubr.bf16.mxu0 %v5033_v30 }
 0x153   : > { %3420 = vmatprep.mubr.bf16.mxu1 %v5035_v31  ;;  %v2826_v37 = vpop.f32.mrf.mxu0 }
 0x154   : > { %v2919_v38 = vpop.f32.mrf.mxu1  ;;  %v6216_v39 = vadd.f32 %v2917_v33, %v2825_v36  ;;  %v2827_v42 = vadd.f32 %v2826_v37, %v6064_v24 }
 0x155   : > { %v2828_v43 = vpop.f32.mrf.mxu0 }
 0x156   : > { %v2921_v45 = vpop.f32.mrf.mxu1  ;;  %v6221_v49 = vadd.f32 %v2919_v38, %v2827_v42  ;;  %v2829_v51 = vadd.f32 %v2828_v43, %v6068_v29 }
 0x157   : > { %v2830_v56 = vpop.f32.mrf.mxu0 }
 0x158   : > { %v2923_v19 = vpop.f32.mrf.mxu1  ;;  %v6226_v57 = vadd.f32 %v2921_v45, %v2829_v51  ;;  %v2831_v59 = vadd.f32 %v2830_v56, %v6076_v34  ;;  %v5043_v34 = vld [vmem:[%s5334_s14 + $0x160] ss:$72 sps:$4 sm:$0xff]  }
 0x159   : > { %v2834_v61 = vpop.f32.mrf.mxu0  ;;  %3391 = vmatmul.mubr.bf16.gmra.mxu0 %v5037_v47 }
 0x15a   : > { %3421 = vmatmul.mubr.bf16.gmra.mxu1 %v5038_v48  ;;  %v2927_v24 = vpop.f32.mrf.mxu1  ;;  %v6229_v62 = vadd.f32 %v2923_v19, %v2831_v59  ;;  %v2835_v63 = vadd.f32 %v2834_v61, %v6083_v40  ;;  %3400 = vmatprep.mubr.bf16.mxu0 %v5039_v52 }
 0x15b   : > { %3430 = vmatprep.mubr.bf16.mxu1 %v5041_v54  ;;  %v2836_v29 = vpop.f32.mrf.mxu0 }
 0x15c   : > { %v2929_v1 = vpop.f32.mrf.mxu1  ;;  %v2837_v3 = vadd.f32 %v2836_v29, %v6088_v44  ;;  %v6233_v4 = vadd.f32 %v2927_v24, %v2835_v63 }
 0x15d   : > { %v2838_v5 = vpop.f32.mrf.mxu0 }
 0x15e   : > { %v2931_v8 = vpop.f32.mrf.mxu1  ;;  %v2839_v10 = vadd.f32 %v2838_v5, %v6095_v50  ;;  %v6238_v13 = vadd.f32 %v2929_v1, %v2837_v3 }
 0x15f   : > { %v2840_v14 = vpop.f32.mrf.mxu0 }
 0x160   : > { %v2933_v15 = vpop.f32.mrf.mxu1  ;;  %v2841_v40 = vadd.f32 %v2840_v14, %v6101_v55  ;;  %v6241_v18 = vadd.f32 %v2931_v8, %v2839_v10 }
 0x161   : > { %v2844_v20 = vpop.f32.mrf.mxu0  ;;  %3401 = vmatmul.mubr.bf16.gmra.mxu0 %v5043_v34 }
 0x162   : > { %3431 = vmatmul.mubr.bf16.gmra.mxu1 %v5044_v9  ;;  %v2937_v44 = vpop.f32.mrf.mxu1  ;;  %v2845_v22 = vadd.f32 %v2844_v20, %v6107_v60  ;;  %v6244_v23 = vadd.f32 %v2933_v15, %v2841_v40 }
 0x163   : > { %v2846_v25 = vpop.f32.mrf.mxu0 }
 0x164   : > { %v2939_v26 = vpop.f32.mrf.mxu1  ;;  %v2847_v50 = vadd.f32 %v2846_v25, %v6112_v0  ;;  %v6247_v27 = vadd.f32 %v2937_v44, %v2845_v22 }
 0x165   : > { %v2848_v30 = vpop.f32.mrf.mxu0 }
 0x166   : > { %v2941_v31 = vpop.f32.mrf.mxu1  ;;  %v2849_v55 = vadd.f32 %v2848_v30, %v6119_v6  ;;  %v6250_v32 = vadd.f32 %v2939_v26, %v2847_v50 }
 0x167   : > { %v2850_v33 = vpop.f32.mrf.mxu0 }
 0x168   : > { %v2943_v36 = vpop.f32.mrf.mxu1  ;;  %v2851_v37 = vadd.f32 %v2850_v33, %v6125_v11  ;;  %v6253_v38 = vadd.f32 %v2941_v31, %v2849_v55 }
 0x169   : > { %v2854_v60 = vpop.f32.mrf.mxu0 }
 0x16a   : > { %v2947_v42 = vpop.f32.mrf.mxu1  ;;  %v2855_v43 = vadd.f32 %v2854_v60, %v6131_v16  ;;  %v6256_v45 = vadd.f32 %v2943_v36, %v2851_v37 }
 0x16b   : > { %v2856_v0 = vpop.f32.mrf.mxu0 }
 0x16c   : > { %v2949_v47 = vpop.f32.mrf.mxu1  ;;  %v2857_v48 = vadd.f32 %v2856_v0, %v6136_v21  ;;  %v6259_v51 = vadd.f32 %v2947_v42, %v2855_v43 }
 0x16d   : > { %v2858_v6 = vpop.f32.mrf.mxu0 }
 0x16e   : > { %v2951_v52 = vpop.f32.mrf.mxu1  ;;  %v2859_v54 = vadd.f32 %v2858_v6, %v6143_v28  ;;  %v6262_v56 = vadd.f32 %v2949_v47, %v2857_v48 }
 0x16f   : > { %v2860_v11 = vpop.f32.mrf.mxu0 }
 0x170   : > { %v2953_v19 = vpop.f32.mrf.mxu1  ;;  %v2861_v59 = vadd.f32 %v2860_v11, %v6149_v35  ;;  %v6265_v61 = vadd.f32 %v2951_v52, %v2859_v54 }
 0x171   : > { %v2864_v16 = vpop.f32.mrf.mxu0 }
 0x172   : > { %v2957_v24 = vpop.f32.mrf.mxu1  ;;  %v2865_v63 = vadd.f32 %v2864_v16, %v6155_v41  ;;  %v6268_v29 = vadd.f32 %v2953_v19, %v2861_v59 }
 0x173   : > { %v2866_v21 = vpop.f32.mrf.mxu0 }
 0x174   : > { %v2959_v1 = vpop.f32.mrf.mxu1  ;;  %v2867_v3 = vadd.f32 %v2866_v21, %v6160_v46  ;;  %v6271_v5 = vadd.f32 %v2957_v24, %v2865_v63 }
 0x175   : > { %v2868_v28 = vpop.f32.mrf.mxu0 }
 0x176   : > { %v2961_v8 = vpop.f32.mrf.mxu1  ;;  %v2869_v34 = vadd.f32 %v2868_v28, %v6167_v53  ;;  %v6274_v9 = vadd.f32 %v2959_v1, %v2867_v3 }
 0x177   : > { %v2870_v35 = vpop.f32.mrf.mxu0 }
 0x178   : > { %v2963_v10 = vpop.f32.mrf.mxu1  ;;  %v2871_v14 = vadd.f32 %v2870_v35, %v6172_v58  ;;  %v6277_v15 = vadd.f32 %v2961_v8, %v2869_v34 }
 0x179   : > { %v2874_v41 = vpop.f32.mrf.mxu0 }
 0x17a   : > { %v2967_v40 = vpop.f32.mrf.mxu1  ;;  %v2875_v20 = vadd.f32 %v2874_v41, %v6179_v2  ;;  %v6280_v44 = vadd.f32 %v2963_v10, %v2871_v14 }
 0x17b   : > { %v2876_v46 = vpop.f32.mrf.mxu0 }
 0x17c   : > { %v2969_v22 = vpop.f32.mrf.mxu1  ;;  %v2877_v25 = vadd.f32 %v2876_v46, %v6184_v7  ;;  %v6283_v26 = vadd.f32 %v2967_v40, %v2875_v20 }
 0x17d   : > { %v2878_v53 = vpop.f32.mrf.mxu0 }
 0x17e   : > { %v2971_v50 = vpop.f32.mrf.mxu1  ;;  %v2879_v30 = vadd.f32 %v2878_v53, %v6189_v12  ;;  %v6286_v31 = vadd.f32 %v2969_v22, %v2877_v25 }
 0x17f   : > { %v2880_v58 = vpop.f32.mrf.mxu0 }
 0x180   : > { %v2973_v55 = vpop.f32.mrf.mxu1  ;;  %v2881_v33 = vadd.f32 %v2880_v58, %v6194_v17  ;;  %v6289_v36 = vadd.f32 %v2971_v50, %v2879_v30 }
 0x182   : > { %v6291_v2 = vadd.f32 %v2973_v55, %v2881_v33 }
 0x191   : > { %v3010_v37 = vpop.f32.mrf.mxu0 }
 0x192   : > { %v3103_v60 = vpop.f32.mrf.mxu1  ;;  %v3011_v7 = vadd.f32 %v3010_v37, %v6216_v39 }
 0x193   : > { %v3012_v42 = vpop.f32.mrf.mxu0 }
 0x194   : > { %v3105_v43 = vpop.f32.mrf.mxu1  ;;  %v6294_v0 = vadd.f32 %v3103_v60, %v3011_v7  ;;  %v3013_v12 = vadd.f32 %v3012_v42, %v6221_v49 }
 0x195   : > { %v3014_v47 = vpop.f32.mrf.mxu0 }
 0x196   : > { %v3107_v48 = vpop.f32.mrf.mxu1  ;;  %v6297_v6 = vadd.f32 %v3105_v43, %v3013_v12  ;;  %v3015_v17 = vadd.f32 %v3014_v47, %v6226_v57 }
 0x197   : > { %v3016_v52 = vpop.f32.mrf.mxu0 }
 0x198   : > { %v3109_v54 = vpop.f32.mrf.mxu1  ;;  %v6300_v11 = vadd.f32 %v3107_v48, %v3015_v17  ;;  %v3017_v19 = vadd.f32 %v3016_v52, %v6229_v62 }
 0x199   : > { %v3020_v59 = vpop.f32.mrf.mxu0 }
 0x19a   : > { %v3113_v39 = vpop.f32.mrf.mxu1  ;;  %v6303_v16 = vadd.f32 %v3109_v54, %v3017_v19  ;;  %v3021_v24 = vadd.f32 %v3020_v59, %v6233_v4 }
 0x19b   : > { %v3022_v63 = vpop.f32.mrf.mxu0 }
 0x19c   : > { %v3115_v49 = vpop.f32.mrf.mxu1  ;;  %v3023_v21 = vadd.f32 %v3022_v63, %v6238_v13  ;;  %v6307_v1 = vadd.f32 %v3113_v39, %v3021_v24 }
 0x19d   : > { %v3024_v3 = vpop.f32.mrf.mxu0 }
 0x19e   : > { %v3117_v57 = vpop.f32.mrf.mxu1  ;;  %v3025_v28 = vadd.f32 %v3024_v3, %v6241_v18  ;;  %v6310_v8 = vadd.f32 %v3115_v49, %v3023_v21 }
 0x19f   : > { %v3026_v34 = vpop.f32.mrf.mxu0 }
 0x1a0   : > { %v3119_v62 = vpop.f32.mrf.mxu1  ;;  %v3027_v35 = vadd.f32 %v3026_v34, %v6244_v23  ;;  %v6313_v10 = vadd.f32 %v3117_v57, %v3025_v28 }
 0x1a1   : > { %v3030_v14 = vpop.f32.mrf.mxu0 }
 0x1a2   : > { %v3123_v4 = vpop.f32.mrf.mxu1  ;;  %v3031_v41 = vadd.f32 %v3030_v14, %v6247_v27  ;;  %v6316_v40 = vadd.f32 %v3119_v62, %v3027_v35 }
 0x1a3   : > { %v3032_v13 = vpop.f32.mrf.mxu0 }
 0x1a4   : > { %v3125_v20 = vpop.f32.mrf.mxu1  ;;  %v3033_v46 = vadd.f32 %v3032_v13, %v6250_v32  ;;  %v6319_v22 = vadd.f32 %v3123_v4, %v3031_v41 }
 0x1a5   : > { %v3034_v18 = vpop.f32.mrf.mxu0 }
 0x1a6   : > { %v3127_v25 = vpop.f32.mrf.mxu1  ;;  %v3035_v53 = vadd.f32 %v3034_v18, %v6253_v38  ;;  %v6322_v50 = vadd.f32 %v3125_v20, %v3033_v46 }
 0x1a7   : > { %v3036_v23 = vpop.f32.mrf.mxu0 }
 0x1a8   : > { %v3129_v30 = vpop.f32.mrf.mxu1  ;;  %v3037_v58 = vadd.f32 %v3036_v23, %v6256_v45  ;;  %v6325_v55 = vadd.f32 %v3127_v25, %v3035_v53 }
 0x1a9   : > { %v3040_v27 = vpop.f32.mrf.mxu0 }
 0x1aa   : > { %v3133_v33 = vpop.f32.mrf.mxu1  ;;  %v3041_v37 = vadd.f32 %v3040_v27, %v6259_v51  ;;  %v6328_v60 = vadd.f32 %v3129_v30, %v3037_v58 }
 0x1ab   : > { %v3042_v32 = vpop.f32.mrf.mxu0 }
 0x1ac   : > { %v3135_v7 = vpop.f32.mrf.mxu1  ;;  %v3043_v42 = vadd.f32 %v3042_v32, %v6262_v56  ;;  %v6331_v43 = vadd.f32 %v3133_v33, %v3041_v37 }
 0x1ad   : > { %v3044_v38 = vpop.f32.mrf.mxu0 }
 0x1ae   : > { %v3137_v12 = vpop.f32.mrf.mxu1  ;;  %v3045_v47 = vadd.f32 %v3044_v38, %v6265_v61  ;;  %v6334_v48 = vadd.f32 %v3135_v7, %v3043_v42 }
 0x1af   : > { %v3046_v45 = vpop.f32.mrf.mxu0 }
 0x1b0   : > { %v3139_v17 = vpop.f32.mrf.mxu1  ;;  %v3047_v52 = vadd.f32 %v3046_v45, %v6268_v29  ;;  %v6337_v54 = vadd.f32 %v3137_v12, %v3045_v47 }
 0x1b1   : > { %v3050_v51 = vpop.f32.mrf.mxu0 }
 0x1b2   : > { %v3143_v19 = vpop.f32.mrf.mxu1  ;;  %v3051_v59 = vadd.f32 %v3050_v51, %v6271_v5  ;;  %v6340_v39 = vadd.f32 %v3139_v17, %v3047_v52 }
 0x1b3   : > { %v3052_v56 = vpop.f32.mrf.mxu0 }
 0x1b4   : > { %v3145_v24 = vpop.f32.mrf.mxu1  ;;  %v3053_v63 = vadd.f32 %v3052_v56, %v6274_v9  ;;  %v6343_v49 = vadd.f32 %v3143_v19, %v3051_v59 }
 0x1b5   : > { %v3054_v61 = vpop.f32.mrf.mxu0 }
 0x1b6   : > { %v3147_v21 = vpop.f32.mrf.mxu1  ;;  %v3055_v3 = vadd.f32 %v3054_v61, %v6277_v15  ;;  %v6346_v57 = vadd.f32 %v3145_v24, %v3053_v63 }
 0x1b7   : > { %v3056_v29 = vpop.f32.mrf.mxu0 }
 0x1b8   : > { %v3149_v28 = vpop.f32.mrf.mxu1  ;;  %v3057_v34 = vadd.f32 %v3056_v29, %v6280_v44  ;;  %v6349_v62 = vadd.f32 %v3147_v21, %v3055_v3 }
 0x1b9   : > { %v3060_v5 = vpop.f32.mrf.mxu0 }
 0x1ba   : > { %6627 = vst [vmem:[#allocation3_spill] sm:$0xff] %v6349_v62  ;;  %v3153_v35 = vpop.f32.mrf.mxu1  ;;  %v3061_v14 = vadd.f32 %v3060_v5, %v6283_v26  ;;  %v6352_v4 = vadd.f32 %v3149_v28, %v3057_v34 }
 0x1bb   : > { %v3062_v9 = vpop.f32.mrf.mxu0 }
 0x1bc   : > { %6628 = vst [vmem:[#allocation4_spill] sm:$0xff] %v6352_v4  ;;  %v3155_v41 = vpop.f32.mrf.mxu1  ;;  %v3063_v13 = vadd.f32 %v3062_v9, %v6286_v31  ;;  %v6355_v20 = vadd.f32 %v3153_v35, %v3061_v14 }
 0x1bd   : > { %v3064_v15 = vpop.f32.mrf.mxu0 }
 0x1be   : > { %6629 = vst [vmem:[#allocation5_spill] sm:$0xff] %v6355_v20  ;;  %v3157_v46 = vpop.f32.mrf.mxu1  ;;  %v3065_v18 = vadd.f32 %v3064_v15, %v6289_v36  ;;  %v6358_v25 = vadd.f32 %v3155_v41, %v3063_v13 }
 0x1bf   : > { %v3066_v44 = vpop.f32.mrf.mxu0 }
 0x1c0   : > { %6630 = vst [vmem:[#allocation6_spill] sm:$0xff] %v6358_v25  ;;  %v3159_v53 = vpop.f32.mrf.mxu1  ;;  %v3067_v23 = vadd.f32 %v3066_v44, %v6291_v2  ;;  %v6361_v30 = vadd.f32 %v3157_v46, %v3065_v18 }
 0x1c2   : > { %6631 = vst [vmem:[#allocation7_spill] sm:$0xff] %v6361_v30  ;;  %v6363_v26 = vadd.f32 %v3159_v53, %v3067_v23  ;;  %v3443_v53 = vlaneseq }
 0x1c4   : > { %6632 = vst [vmem:[#allocation8_spill] sm:$0xff] %v6363_v26  ;;  %v3444_v26 = vshrl.u32 %v3443_v53, 7 }
 0x1d1   : > { %v3196_v58 = vpop.f32.mrf.mxu0 }
 0x1d2   : > { %v3289_v27 = vpop.f32.mrf.mxu1 }
 0x1d3   : > { %v3198_v33 = vpop.f32.mrf.mxu0 }
 0x1d4   : > { %v6365_v31 = vpop.f32.mrf.mxu1  ;;  %v3199_v53 = vadd.f32 %v3198_v33, %v6297_v6 }
 0x1d5   : > { %v3200_v37 = vpop.f32.mrf.mxu0 }
 0x1d6   : > { %v6367_v32 = vpop.f32.mrf.mxu1 }
 0x1d7   : > { %v3202_v7 = vpop.f32.mrf.mxu0 }
 0x1d8   : > { %v6369_v36 = vpop.f32.mrf.mxu1 }
 0x1d9   : > { %v3206_v42 = vpop.f32.mrf.mxu0 }
 0x1da   : > { %v6371_v38 = vpop.f32.mrf.mxu1 }
 0x1db   : > { %v3208_v12 = vpop.f32.mrf.mxu0 }
 0x1dc   : > { %v3301_v2 = vpop.f32.mrf.mxu1 }
 0x1dd   : > { %v3210_v47 = vpop.f32.mrf.mxu0 }
 0x1de   : > { %v3303_v45 = vpop.f32.mrf.mxu1 }
 0x1df   : > { %v3212_v17 = vpop.f32.mrf.mxu0 }
 0x1e0   : > { %v3305_v52 = vpop.f32.mrf.mxu1  ;;  %v3213_v4 = vadd.f32 %v3212_v17, %v6316_v40  ;;  %v6647_v17 = vld [vmem:[#allocation3_spill] sm:$0xff] }
 0x1e1   : > { %v3216_v51 = vpop.f32.mrf.mxu0 }
 0x1e2   : > { %v3309_v19 = vpop.f32.mrf.mxu1 }
 0x1e3   : > { %v3218_v59 = vpop.f32.mrf.mxu0 }
 0x1e4   : > { %v6373_v56 = vpop.f32.mrf.mxu1 }
 0x1e5   : > { %v3220_v24 = vpop.f32.mrf.mxu0 }
 0x1e6   : > { %v6375_v63 = vpop.f32.mrf.mxu1 }
 0x1e7   : > { %6633 = vst [vmem:[#allocation9_spill] sm:$0xff] %v6375_v63  ;;  %v6377_v61 = vpop.f32.mrf.mxu0 }
 0x1e8   : > { %6634 = vst [vmem:[#allocation10_spill] sm:$0xff] %v6377_v61  ;;  %v6379_v21 = vpop.f32.mrf.mxu1 }
 0x1e9   : > { %6635 = vst [vmem:[#allocation11_spill] sm:$0xff] %v6379_v21  ;;  %v3226_v3 = vpop.f32.mrf.mxu0 }
 0x1ea   : > { %v3319_v29 = vpop.f32.mrf.mxu1  ;;  %v3227_v40 = vadd.f32 %v3226_v3, %v6331_v43 }
 0x1eb   : > { %v3228_v28 = vpop.f32.mrf.mxu0 }
 0x1ec   : > { %v6381_v34 = vpop.f32.mrf.mxu1 }
 0x1ed   : > { %6636 = vst [vmem:[#allocation12_spill] sm:$0xff] %v6381_v34  ;;  %v3230_v5 = vpop.f32.mrf.mxu0 }
 0x1ee   : > { %v6383_v35 = vpop.f32.mrf.mxu1 }
 0x1ef   : > { %6637 = vst [vmem:[#allocation13_spill] sm:$0xff] %v6383_v35  ;;  %v3232_v14 = vpop.f32.mrf.mxu0  ;;  %v3445_v35 = vsub.s32 0, %v3444_v26 }
 0x1f0   : > { %v6385_v9 = vpop.f32.mrf.mxu1  ;;  %v3233_v43 = vadd.f32 %v3232_v14, %v6340_v39 }
 0x1f1   : > { %6638 = vst [vmem:[#allocation14_spill] sm:$0xff] %v6385_v9  ;;  %v3236_v41 = vpop.f32.mrf.mxu0  ;;  %v3197_v9 = vadd.f32 %v3196_v58, %v6294_v0  ;;  %v3207_v0 = vadd.f32 %v3206_v42, %v6307_v1  ;;  %v3209_v58 = vadd.f32 %v3208_v12, %v6310_v8  ;;  %v3292_v1 = vadd.f32 %v6365_v31, %v3199_v53 }
 0x1f2   : > { %v6387_v13 = vpop.f32.mrf.mxu1  ;;  %v3219_v8 = vadd.f32 %v3218_v59, %v6322_v50  ;;  %v6435_v12 = vadd.f32 %v3305_v52, %v3213_v4  ;;  %v3229_v31 = vadd.f32 %v3228_v28, %v6334_v48  ;;  %v3231_v50 = vadd.f32 %v3230_v5, %v6337_v54  ;;  %v6645_v4 = vld [vmem:[#allocation10_spill] sm:$0xff]  ;;  %v6646_v48 = vld [vmem:[#allocation9_spill] sm:$0xff]  ;;  %v6648_v52 = vld [vmem:[#allocation4_spill] sm:$0xff] }
 0x1f3   : > { %6639 = vst [vmem:[#allocation15_spill] sm:$0xff] %v6387_v13  ;;  %v3238_v15 = vpop.f32.mrf.mxu0  ;;  %v3449_v13 = vsub.s32 1, %v3444_v26  ;;  %v3290_v61 = vadd.f32 %v3289_v27, %v3197_v9  ;;  %v3217_v26 = vadd.f32 %v3216_v51, %v6319_v22  ;;  %v6429_v22 = vadd.f32 %v6371_v38, %v3207_v0  ;;  %v6649_v51 = vld [vmem:[#allocation5_spill] sm:$0xff] }
 0x1f4   : > { %v6389_v46 = vpop.f32.mrf.mxu1 }
 0x1f5   : > { %6640 = vst [vmem:[#allocation16_spill] sm:$0xff] %v6389_v46  ;;  %v3240_v18 = vpop.f32.mrf.mxu0  ;;  %v3441_v46 = vld [vmem:[%s6623_s2] sm:$0x3] }
 0x1f6   : > { %v6391_v44 = vpop.f32.mrf.mxu1  ;;  %v6413_v62 = vrot.slane %v3441_v46, %v3445_v35  ;;  %v3241_v39 = vadd.f32 %v3240_v18, %v6647_v17  ;;  %v6652_v28 = vld [vmem:[#allocation13_spill] sm:$0xff] }
 0x1f7   : > { %6641 = vst [vmem:[#allocation17_spill] sm:$0xff] %v6391_v44  ;;  %v3242_v23 = vpop.f32.mrf.mxu0  ;;  %v3477_v44 = vld [vmem:[%s6624_s3] sm:$0x3] }
 0x1f8   : > { %v6393_v21 = vpop.f32.mrf.mxu1  ;;  %v6415_v63 = vrot.slane %v3477_v44, %v3445_v35  ;;  %v6653_v35 = vld [vmem:[#allocation14_spill] sm:$0xff] }
 0x1f9   : > { %6642 = vst [vmem:[#allocation18_spill] sm:$0xff] %v6393_v21  ;;  %v3246_v30 = vpop.f32.mrf.mxu0  ;;  %v3201_v21 = vadd.f32 %v3200_v37, %v6300_v11  ;;  %v6418_v11 = vrot.slane %v3441_v46, %v3449_v13  ;;  %v3326_v14 = vadd.f32 %v6653_v35, %v3233_v43 }
 0x1fa   : > { %v6395_v34 = vpop.f32.mrf.mxu1 }
 0x1fb   : > { %6643 = vst [vmem:[#allocation19_spill] sm:$0xff] %v6395_v34  ;;  %v3248_v25 = vpop.f32.mrf.mxu0  ;;  %v3203_v34 = vadd.f32 %v3202_v7, %v6303_v16  ;;  %v6420_v16 = vrot.slane %v3477_v44, %v3449_v13  ;;  %v3294_v37 = vadd.f32 %v6367_v32, %v3201_v21  ;;  %v6431_v7 = vadd.f32 %v3301_v2, %v3209_v58  ;;  %v6651_v21 = vld [vmem:[#allocation12_spill] sm:$0xff] }
 0x1fc   : > { %v6398_v20 = vpop.f32.mrf.mxu1  ;;  %v3237_v32 = vadd.f32 %v3236_v41, %v6343_v49  ;;  %v6451_v2 = vadd.f32 %v6645_v4, %v6328_v60  ;;  %v3243_v49 = vadd.f32 %v3242_v23, %v6648_v52  ;;  %v3322_v3 = vadd.f32 %v6651_v21, %v3229_v31  ;;  %v6655_v41 = vld [vmem:[#allocation16_spill] sm:$0xff] }
 0x1fd   : > { %6644 = vst [vmem:[#allocation20_spill] sm:$0xff] %v6398_v20  ;;  %v3211_v20 = vadd.f32 %v3210_v47, %v6313_v10  ;;  %v3250_v6 = vpop.f32.mrf.mxu0  ;;  %v3221_v10 = vadd.f32 %v3220_v24, %v6325_v55  ;;  %v3296_v27 = vadd.f32 %v6369_v36, %v3203_v34  ;;  %v6439_v55 = vadd.f32 %v3309_v19, %v3217_v26  ;;  %v6650_v19 = vld [vmem:[#allocation6_spill] sm:$0xff]  ;;  %v6661_v4 = vld [vmem:[#allocation8_spill] sm:$0xff] }
 0x1fe   : > { %v3343_v33 = vpop.f32.mrf.mxu1  ;;  %v3239_v36 = vadd.f32 %v3238_v15, %v6346_v57  ;;  %v3247_v57 = vadd.f32 %v3246_v30, %v6649_v51  ;;  %v3249_v59 = vadd.f32 %v3248_v25, %v6650_v19  ;;  %v3324_v60 = vadd.f32 %v6652_v28, %v3231_v50  ;;  %v6656_v15 = vld [vmem:[#allocation7_spill] sm:$0xff]  ;;  %v6657_v0 = vld [vmem:[#allocation17_spill] sm:$0xff] }
 0x1ff   : > { %v6433_v42 = vadd.f32 %v3303_v45, %v3211_v20  ;;  %v3252_v38 = vpop.f32.mrf.mxu0  ;;  %v6447_v20 = vadd.f32 %v6373_v56, %v3219_v8  ;;  %v6454_v54 = vadd.f32 %v6646_v48, %v3221_v10  ;;  %v3320_v45 = vadd.f32 %v3319_v29, %v3227_v40  ;;  %v6654_v29 = vld [vmem:[#allocation15_spill] sm:$0xff] }
 0x200   : > { %v6444_v47 = vpop.f32.mrf.mxu1  ;;  %v3330_v9 = vadd.f32 %v6654_v29, %v3237_v32  ;;  %v3332_v13 = vadd.f32 %v6655_v41, %v3239_v36  ;;  %v3251_v46 = vadd.f32 %v3250_v6, %v6656_v15  ;;  %v6658_v58 = vld [vmem:[#allocation18_spill] sm:$0xff]  ;;  %v6484_v48 = vadd.f32 %v3252_v38, %v6661_v4 }
 0x201   : > { %v6471_v26 = vadd.f32 %v6658_v58, %v3243_v49 }
 0x202   : > { %v6659_v8 = vld [vmem:[#allocation19_spill] sm:$0xff] }
 0x203   : > { %v6474_v10 = vadd.f32 %v6659_v8, %v3247_v57 }
 0x204   : > { %v6660_v40 = vld [vmem:[#allocation20_spill] sm:$0xff] }
 0x205   : > { %v6477_v31 = vadd.f32 %v6660_v40, %v3249_v59 }
 0x211   : > { %v3382_v24 = vpop.f32.mrf.mxu0 }
 0x212   : > { %v3412_v56 = vpop.f32.mrf.mxu1  ;;  %v3383_v34 = vadd.f32 %v3382_v24, %v3290_v61  ;;  %v3334_v61 = vadd.f32 %v6657_v0, %v3241_v39 }
 0x213   : > { %v3413_v5 = vadd.f32 %v3412_v56, %v3320_v45  ;;  %v3384_v30 = vpop.f32.mrf.mxu0  ;;  %v6486_v45 = vadd.f32 %v3343_v33, %v3251_v46 }
 0x214   : > { %v3414_v18 = vpop.f32.mrf.mxu1  ;;  %v3453_v25 = vmul.f32 %v6413_v62, %v3383_v34  ;;  %v3385_v23 = vadd.f32 %v3384_v30, %v3292_v1 }
 0x215   : > { %v3465_v44 = vmul.f32 %v6413_v62, %v3413_v5  ;;  %v3415_v53 = vadd.f32 %v3414_v18, %v3322_v3  ;;  %v3386_v6 = vpop.f32.mrf.mxu0 }
 0x216   : > { %v3416_v50 = vpop.f32.mrf.mxu1  ;;  %v3489_v43 = vadd.f32 %v6415_v63, %v3453_v25  ;;  %v3454_v1 = vmul.f32 %v6418_v11, %v3385_v23  ;;  %v3387_v17 = vadd.f32 %v3386_v6, %v3294_v37 }
 0x217   : > { %v3501_v32 = vadd.f32 %v6415_v63, %v3465_v44  ;;  %v3466_v36 = vmul.f32 %v6418_v11, %v3415_v53  ;;  %v3417_v39 = vadd.f32 %v3416_v50, %v3324_v60  ;;  %v3388_v52 = vpop.f32.mrf.mxu0 }
 0x218   : > { %v3418_v49 = vpop.f32.mrf.mxu1  ;;  %v3513_v51 = vmax.f32 %v3489_v43, 0.0  ;;  %v3490_v19 = vadd.f32 %v6420_v16, %v3454_v1  ;;  %v3455_v24 = vmul.f32 %v6413_v62, %v3387_v17  ;;  %v3389_v38 = vadd.f32 %v3388_v52, %v3296_v27 }
 0x219   : > { %v3525_v57 = vmax.f32 %v3501_v32, 0.0  ;;  %v3502_v59 = vadd.f32 %v6420_v16, %v3466_v36  ;;  %v3467_v56 = vmul.f32 %v6413_v62, %v3417_v39  ;;  %v3419_v21 = vadd.f32 %v3418_v49, %v3326_v14  ;;  %v3392_v33 = vpop.f32.mrf.mxu0 }
 0x21a   : > { %v3422_v3 = vpop.f32.mrf.mxu1  ;;  %v3514_v28 = vmax.f32 %v3490_v19, 0.0  ;;  %v3393_v37 = vadd.f32 %v3392_v33, %v6429_v22  ;;  %v3491_v5 = vadd.f32 %v6415_v63, %v3455_v24  ;;  %v3456_v29 = vmul.f32 %v6418_v11, %v3389_v38 }
 0x21b   : > { %v3526_v34 = vmax.f32 %v3502_v59, 0.0  ;;  %v3423_v60 = vadd.f32 %v3422_v3, %v3330_v9  ;;  %v3503_v35 = vadd.f32 %v6415_v63, %v3467_v56  ;;  %v3468_v41 = vmul.f32 %v6418_v11, %v3419_v21  ;;  %v3394_v15 = vpop.f32.mrf.mxu0 }
 0x21c   : > { %v3424_v46 = vpop.f32.mrf.mxu1  ;;  %v4312_v27 = vpack.c.bf16 %v3514_v28, %v3513_v51  ;;  %v3457_v30 = vmul.f32 %v6413_v62, %v3393_v37  ;;  %v3515_v25 = vmax.f32 %v3491_v5, 0.0  ;;  %v3492_v9 = vadd.f32 %v6420_v16, %v3456_v29 }
 0x21d   : > { %v4318_v14 = vpack.c.bf16 %v3526_v34, %v3525_v57  ;;  %v3469_v18 = vmul.f32 %v6413_v62, %v3423_v60  ;;  %v3527_v22 = vmax.f32 %v3503_v35, 0.0  ;;  %v3504_v44 = vadd.f32 %v6420_v16, %v3468_v41  ;;  %v3396_v23 = vpop.f32.mrf.mxu0 }
 0x21e   : > { %v3426_v53 = vpop.f32.mrf.mxu1  ;;  %3609 = vst [vmem:[%s6504_s26] sm:$0xff] %v4312_v27  ;;  %v3493_v0 = vadd.f32 %v6415_v63, %v3457_v30  ;;  %v3395_v8 = vadd.f32 %v3394_v15, %v6431_v7  ;;  %v3425_v40 = vadd.f32 %v3424_v46, %v3332_v13  ;;  %v3516_v6 = vmax.f32 %v3492_v9, 0.0 }
 0x21f   : > { %3615 = vst [vmem:[%s6504_s26 + $0x30] sm:$0xff] %v4318_v14  ;;  %v3505_v58 = vadd.f32 %v6415_v63, %v3469_v18  ;;  %v3528_v50 = vmax.f32 %v3504_v44, 0.0  ;;  %v3397_v43 = vadd.f32 %v3396_v23, %v6433_v42  ;;  %v3427_v32 = vadd.f32 %v3426_v53, %v3334_v61  ;;  %v3398_v1 = vpop.f32.mrf.mxu0 }
 0x220   : > { %v3428_v36 = vpop.f32.mrf.mxu1  ;;  %v3517_v4 = vmax.f32 %v3493_v0, 0.0  ;;  %v3458_v39 = vmul.f32 %v6418_v11, %v3395_v8  ;;  %v3470_v52 = vmul.f32 %v6418_v11, %v3425_v40  ;;  %v4313_v49 = vpack.c.bf16 %v3516_v6, %v3515_v25 }
 0x221   : > { %v3529_v17 = vmax.f32 %v3505_v58, 0.0  ;;  %v4319_v51 = vpack.c.bf16 %v3528_v50, %v3527_v22  ;;  %v3459_v7 = vmul.f32 %v6413_v62, %v3397_v43  ;;  %v3471_v13 = vmul.f32 %v6413_v62, %v3427_v32  ;;  %v3402_v57 = vpop.f32.mrf.mxu0  ;;  %v6662_v58 = vld [vmem:[#allocation11_spill] sm:$0xff] }
 0x222   : > { %v3432_v19 = vpop.f32.mrf.mxu1  ;;  %v3494_v42 = vadd.f32 %v6420_v16, %v3458_v39  ;;  %v3506_v61 = vadd.f32 %v6420_v16, %v3470_v52  ;;  %v3399_v59 = vadd.f32 %v3398_v1, %v6435_v12  ;;  %v3429_v24 = vadd.f32 %v3428_v36, %v6471_v26  ;;  %3610 = vst [vmem:[%s6504_s26 + $0x8] sm:$0xff] %v4313_v49 }
 0x223   : > { %3616 = vst [vmem:[%s6504_s26 + $0x38] sm:$0xff] %v4319_v51  ;;  %v3495_v56 = vadd.f32 %v6415_v63, %v3459_v7  ;;  %v3507_v38 = vadd.f32 %v6415_v63, %v3471_v13  ;;  %v3403_v21 = vadd.f32 %v3402_v57, %v6439_v55  ;;  %v3433_v33 = vadd.f32 %v3432_v19, %v6474_v10  ;;  %v3404_v3 = vpop.f32.mrf.mxu0 }
 0x224   : > { %v3434_v28 = vpop.f32.mrf.mxu1  ;;  %v3518_v34 = vmax.f32 %v3494_v42, 0.0  ;;  %v3530_v37 = vmax.f32 %v3506_v61, 0.0  ;;  %v3460_v60 = vmul.f32 %v6418_v11, %v3399_v59  ;;  %v3472_v12 = vmul.f32 %v6418_v11, %v3429_v24 }
 0x225   : > { %v3519_v26 = vmax.f32 %v3495_v56, 0.0  ;;  %v3531_v5 = vmax.f32 %v3507_v38, 0.0  ;;  %v3461_v35 = vmul.f32 %v6413_v62, %v3403_v21  ;;  %v3473_v29 = vmul.f32 %v6413_v62, %v3433_v33  ;;  %v3406_v41 = vpop.f32.mrf.mxu0 }
 0x226   : > { %v3436_v55 = vpop.f32.mrf.mxu1  ;;  %v4314_v15 = vpack.c.bf16 %v3518_v34, %v3517_v4  ;;  %v4320_v10 = vpack.c.bf16 %v3530_v37, %v3529_v17  ;;  %v3496_v46 = vadd.f32 %v6420_v16, %v3460_v60  ;;  %v3508_v27 = vadd.f32 %v6420_v16, %v3472_v12 }
 0x227   : > { %v3497_v14 = vadd.f32 %v6415_v63, %v3461_v35  ;;  %v3509_v30 = vadd.f32 %v6415_v63, %v3473_v29  ;;  %v3405_v18 = vadd.f32 %v3404_v3, %v6447_v20  ;;  %v3435_v25 = vadd.f32 %v3434_v28, %v6477_v31  ;;  %v3408_v53 = vpop.f32.mrf.mxu0 }
 0x228   : > { %3611 = vst [vmem:[%s6504_s26 + $0x10] sm:$0xff] %v4314_v15  ;;  %3617 = vst [vmem:[%s6504_s26 + $0x40] sm:$0xff] %v4320_v10  ;;  %v3520_v22 = vmax.f32 %v3496_v46, 0.0  ;;  %v3532_v9 = vmax.f32 %v3508_v27, 0.0  ;;  %v3407_v44 = vadd.f32 %v3406_v41, %v6454_v54  ;;  %v3437_v23 = vadd.f32 %v3436_v55, %v6486_v45  ;;  %v3438_v0 = vpop.f32.mrf.mxu1 }
 0x229   : > { %v3316_v8 = vadd.f32 %v6662_v58, %v6451_v2  ;;  %v3346_v20 = vadd.f32 %v6444_v47, %v6484_v48  ;;  %v3462_v31 = vmul.f32 %v6418_v11, %v3405_v18  ;;  %v3474_v40 = vmul.f32 %v6418_v11, %v3435_v25 }
 0x22a   : > { %v4315_v6 = vpack.c.bf16 %v3520_v22, %v3519_v26  ;;  %v4321_v50 = vpack.c.bf16 %v3532_v9, %v3531_v5  ;;  %v3463_v54 = vmul.f32 %v6413_v62, %v3407_v44  ;;  %v3475_v43 = vmul.f32 %v6413_v62, %v3437_v23 }
 0x22b   : > { %v3498_v45 = vadd.f32 %v6420_v16, %v3462_v31  ;;  %v3510_v32 = vadd.f32 %v6420_v16, %v3474_v40  ;;  %v3409_v1 = vadd.f32 %v3408_v53, %v3316_v8  ;;  %v3439_v2 = vadd.f32 %v3438_v0, %v3346_v20 }
 0x22c   : > { %3612 = vst [vmem:[%s6504_s26 + $0x18] sm:$0xff] %v4315_v6  ;;  %3618 = vst [vmem:[%s6504_s26 + $0x48] sm:$0xff] %v4321_v50  ;;  %v3521_v47 = vmax.f32 %v3497_v14, 0.0  ;;  %v3533_v48 = vmax.f32 %v3509_v30, 0.0  ;;  %v3499_v36 = vadd.f32 %v6415_v63, %v3463_v54  ;;  %v3511_v4 = vadd.f32 %v6415_v63, %v3475_v43 }
 0x22d   : > { %v3522_v17 = vmax.f32 %v3498_v45, 0.0  ;;  %v3534_v39 = vmax.f32 %v3510_v32, 0.0  ;;  %v3464_v62 = vmul.f32 %v6418_v11, %v3409_v1  ;;  %v3476_v52 = vmul.f32 %v6418_v11, %v3439_v2 }
 0x22e   : > { %v3523_v57 = vmax.f32 %v3499_v36, 0.0  ;;  %v3535_v19 = vmax.f32 %v3511_v4, 0.0 }
 0x22f   : > { %v4316_v49 = vpack.c.bf16 %v3522_v17, %v3521_v47  ;;  %v4322_v51 = vpack.c.bf16 %v3534_v39, %v3533_v48  ;;  %v3500_v7 = vadd.f32 %v6420_v16, %v3464_v62  ;;  %v3512_v13 = vadd.f32 %v6420_v16, %v3476_v52 }
 0x231   : > { %3613 = vst [vmem:[%s6504_s26 + $0x20] sm:$0xff] %v4316_v49  ;;  %3619 = vst [vmem:[%s6504_s26 + $0x50] sm:$0xff] %v4322_v51  ;;  %v3524_v42 = vmax.f32 %v3500_v7, 0.0  ;;  %v3536_v63 = vmax.f32 %v3512_v13, 0.0  ;;  %3627 = sbr.rel (!%p5187_p4) target bundleno = 619 (0x26b), region = 40 }
 0x233   : > { %v4317_v61 = vpack.c.bf16 %v3524_v42, %v3523_v57  ;;  %v4323_v59 = vpack.c.bf16 %v3536_v63, %v3535_v19 }
 0x235   : > { %3614 = vst [vmem:[%s6504_s26 + $0x28] sm:$0xff] %v4317_v61  ;;  %3620 = vst [vmem:[%s6504_s26 + $0x58] sm:$0xff] %v4323_v59 }
 0x236   : > { %s6670_s27 = smov (!%p3630_p8, %s3629_s27), 12 }
 0x237   : > { %s4324_s6 = sshll.u32 %s6670_s27, 7 }
 0x238   : > { %p4303_p9 = scmp.eq.s32.totalorder %s4324_s6, 0 }
 0x239   : > { %5045 = sdivrem.u32 (!%p4303_p9), %s6670_s27, 12 }
 0x23a   : > { %3640 = sbr.rel (%p4303_p9) target bundleno = 619 (0x26b), region = 44 }
 0x242   : > { %s6575_s23 = spop.drf %5045 }
 0x243   : > { %p4304_p10 = scmp.le.s32.totalorder %s6575_s23, 0 }
 0x244   : > { %s6663_s18 = smov (!%p4304_p10), %s6569_s5  ;;  %s6664_s20 = smov (!%p4304_p10), %s6504_s26 }
 0x245   : > { %3841 = sbr.rel (%p4304_p10) target bundleno = 594 (0x252), region = 120  ;;  %s6584_s7 = smov (!%p4304_p10), 0  }
 0x246   : > { %s6586_s8 = smov (!%p4304_p10), 0  }
 0x24a LB: >> { %v3727_v11 = vld [vmem:[%s5111_s20] sm:$0xff]  ;;  %v3729_v16 = vld [vmem:[%s5111_s20 + $0x8] sm:$0xff]  ;;  %v3731_v24 = vld [vmem:[%s5111_s20 + $0x10] sm:$0xff]  ;;  %s3751_s9 = sadd.s32 1, %s5115_s7  ;;  %s3721_s8 = sadd.s32 1, %s5119_s8   ;;  %s5119_s8 = sphi %s6586_s8, %s3721_s8   ;;  %s5115_s7 = sphi %s6584_s7, %s6665_s7   ;;  %s5111_s20 = sphi %s6664_s20, %s3756_s20   ;;  %s5107_s18 = sphi %s6663_s18, %s3757_s18  }
 0x24b   : >> { %3728 = vst [vmem:[%s5107_s18] sm:$0xff] %v3727_v11  ;;  %3730 = vst [vmem:[%s5107_s18 + $0x8] sm:$0xff] %v3729_v16  ;;  %v3733_v56 = vld [vmem:[%s5111_s20 + $0x18] sm:$0xff]  ;;  %v3735_v38 = vld [vmem:[%s5111_s20 + $0x20] sm:$0xff]  ;;  %p3752_p11 = scmp.ge.s32.totalorder %s3751_s9, %s6575_s23  ;;  %p3720_p12 = scmp.ge.s32.totalorder %s3721_s8, %s6575_s23 }
 0x24c   : >> { %3732 = vst [vmem:[%s5107_s18 + $0x10] sm:$0xff] %v3731_v24  ;;  %v3737_v21 = vld [vmem:[%s5111_s20 + $0x28] sm:$0xff]  ;;  %3734 = vst [vmem:[%s5107_s18 + $0x18] sm:$0xff] %v3733_v56  ;;  %v3739_v33 = vld [vmem:[%s5111_s20 + $0x30] sm:$0xff] }
 0x24d   : >> { %3736 = vst [vmem:[%s5107_s18 + $0x20] sm:$0xff] %v3735_v38  ;;  %3738 = vst [vmem:[%s5107_s18 + $0x28] sm:$0xff] %v3737_v21  ;;  %v3741_v3 = vld [vmem:[%s5111_s20 + $0x38] sm:$0xff]  ;;  %v3743_v28 = vld [vmem:[%s5111_s20 + $0x40] sm:$0xff]  ;;  %s6672_s9 = smov (%p3752_p11, %s3751_s9), 0  ;;  %3723 = sbr.rel (!%p3720_p12) target bundleno = 586 (0x24a), region = 126 }
 0x24e   : >> { %3740 = vst [vmem:[%s5107_s18 + $0x30] sm:$0xff] %v3739_v33  ;;  %3742 = vst [vmem:[%s5107_s18 + $0x38] sm:$0xff] %v3741_v3  ;;  %v3745_v34 = vld [vmem:[%s5111_s20 + $0x48] sm:$0xff]  ;;  %v3747_v37 = vld [vmem:[%s5111_s20 + $0x50] sm:$0xff]  ;;  %s3754_s10 = smul.u32 96, %s6672_s9  ;;  %s6665_s7 = smov %s6672_s9 }
 0x24f   : >> { %3744 = vst [vmem:[%s5107_s18 + $0x40] sm:$0xff] %v3743_v28  ;;  %v3749_v60 = vld [vmem:[%s5111_s20 + $0x58] sm:$0xff]  ;;  %3746 = vst [vmem:[%s5107_s18 + $0x48] sm:$0xff] %v3745_v34 }
 0x250   : >> { %3748 = vst [vmem:[%s5107_s18 + $0x50] sm:$0xff] %v3747_v37  ;;  %3750 = vst [vmem:[%s5107_s18 + $0x58] sm:$0xff] %v3749_v60  ;;  %s3756_s20 = scalar_lea.vmem %s6504_s26, %s3754_s10 [#allocation2]   ;;  %s3757_s18 = scalar_lea.vmem %s6569_s5, %s3754_s10  }
 0x252 PF: > { %5047 = sdivrem.u32 %s6670_s27, 12 }
 0x253   : > { %s4305_s11 = smul.u32 96, %s6575_s23 }
 0x255   : > { %s3762_s12 = scalar_lea.vmem %s6504_s26, %s4305_s11 [#allocation2]   ;;  %s3764_s13 = scalar_lea.vmem %s6569_s5, %s4305_s11  }
 0x25b   : > { %s5048_s14 = spop.drf %5047 }
 0x25c   : > { %p4307_p13 = scmp.le.s32.totalorder %s5048_s14, 0 }
 0x25d   : > { %s5121_s17 = smov (!%p4307_p13), %s3764_s13   ;;  %s5125_s21 = smov (!%p4307_p13), %s3762_s12  }
 0x25e   : > { %3855 = sbr.rel (%p4307_p13) target bundleno = 619 (0x26b), region = 131  ;;  %s5129_s24 = smov (!%p4307_p13), 0  }
 0x25f   : > { %s5133_s25 = smov (!%p4307_p13), 0  }
 0x263 LB: >> { %v3774_v12 = vld [vmem:[%s5127_s21] sm:$0xff]  ;;  %s3776_s15 = sadd.s32 1, %s5131_s24  ;;  %s3768_s25 = sadd.s32 1, %s5135_s25   ;;  %s5135_s25 = sphi %s5133_s25, %s3768_s25   ;;  %s5131_s24 = sphi %s5129_s24, %s5130_s24   ;;  %s5127_s21 = sphi %s5125_s21, %s3781_s21   ;;  %s5123_s17 = sphi %s5121_s17, %s3782_s17  }
 0x264   : >> { %3775 = vst [vmem:[%s5123_s17] sm:$0xff] %v3774_v12  ;;  %p3777_p0 = scmp.ge.s32.totalorder %s3776_s15, %s5048_s14  ;;  %p3767_p1 = scmp.ge.s32.totalorder %s3768_s25, %s5048_s14 }
 0x266   : >> { %s6674_s15 = smov (%p3777_p0, %s3776_s15), 0  ;;  %3770 = sbr.rel (!%p3767_p1) target bundleno = 611 (0x263), region = 137 }
 0x267   : >> { %s4308_s26 = sshll.u32 %s6674_s15, 3  ;;  %s5130_s24 = smov %s6674_s15  }
 0x268   : >> { %s3781_s21 = scalar_lea.vmem %s3762_s12, %s4308_s26 [#allocation2]   ;;  %s3782_s17 = scalar_lea.vmem %s3764_s13, %s4308_s26  }
 0x26b PF: > { %p11_p2 = scmp.ge.s32.totalorder %s5177_s19, 4   ;;  %s6666_s15 = smov %s5099_s16 }
 0x26c   : > { %s6667_s16 = smov %s5185_s22  ;;  %s6668_s17 = smov %s5177_s19 }
 0x26d   :  { %13 = sbr.rel (!%p11_p2) target bundleno = 2 (0x2), region = 148 }

// kernel: mixed_6a.5
= control target key start
LH: loop header
LB: loop body
LE: loop exit
PB: predicated region body
PF: predicated region fallthrough
CT: control target
= control target key end

     0   :  { %s12466_s27 = smov 0   ;;  %s12468_s28 = smov 0   ;;  %s15834_s0 = inlined_call_operand.vmem [shape: bf16[32,2880], index: 0, kind: input, shape index: {}]   ;;  %s15835_s1 = inlined_call_operand.vmem [shape: bf16[32,2304], index: 1, kind: input, shape index: {}]   ;;  %s15836_s2 = inlined_call_operand.vmem [shape: bf16[2880,384], index: 2, kind: input, shape index: {}]   ;;  %s15837_s3 = inlined_call_operand.vmem [shape: f32[1,384], index: 3, kind: input, shape index: {}]   ;;  %s15838_s4 = inlined_call_operand.vmem [shape: f32[1,384], index: 4, kind: input, shape index: {}]   ;;  %s15839_s5 = inlined_call_operand.vmem [shape: bf16[2304,384], index: 5, kind: input, shape index: {}]   ;;  %s15840_s6 = inlined_call_operand.vmem [shape: f32[1,384], index: 6, kind: input, shape index: {}]   ;;  %s15841_s7 = inlined_call_operand.vmem [shape: f32[1,384], index: 7, kind: input, shape index: {}]   ;;  %s15842_s8 = inlined_call_operand.vmem [shape: f32[32,1152], index: 8, kind: output, shape index: {}]  }
   0x1   :  { %s12470_s29 = smov 0   ;;  %s12472_s30 = smov 0  }
   0x2   :  { %s12474_s9 = smov 0   ;;  %s12476_s10 = smov 0  }
   0x3   :  { %s12478_s11 = smov 0  }
   0x4 LB: > { %s27_s12 = sadd.s32 1, %s12406_s9  ;;  %s30_s13 = sadd.s32 1, %s12410_s10  ;;  %s12414_s11 = sphi %s12478_s11, %s18_s11   ;;  %s12410_s10 = sphi %s12476_s10, %s15855_s10   ;;  %s12406_s9 = sphi %s12474_s9, %s15854_s9   ;;  %s12402_s30 = sphi %s12472_s30, %s15853_s30   ;;  %s12398_s29 = sphi %s12470_s29, %s15852_s29   ;;  %s12394_s28 = sphi %s12468_s28, %s15851_s28   ;;  %s12390_s27 = sphi %s12466_s27, %s15850_s27  }
   0x5   : > { %p28_p0 = scmp.ge.s32.totalorder %s27_s12, 3  ;;  %s9350_s14 = sadd.s32 4294967295, %s12414_s11  }
   0x6   : > { %p227_p1 = scmp.ne.s32.totalorder %s12394_s28, %s12390_s27  ;;  %p228_p2 = scmp.eq.s32.totalorder %s9350_s14, 5 }
   0x7   : > { %s15857_s12 = smov (%p28_p0, %s27_s12), 0  ;;  %s15859_s13 = smov (!%p28_p0, %s30_s13), %s12410_s10 }
   0x8   : > { %15845 = sst [smem:[#allocation3_spill]] %s15857_s12  ;;  %s213_s15 = ssub.s32 %s12406_s9, %s15857_s12 }
   0x9   : > { %p32_p3 = scmp.ge.s32.totalorder %s15859_s13, 2  ;;  %p9354_p4 = scmp.ge.s32.totalorder %s12414_s11, 1 }
   0xa   : > { %p12512_p5 = por %p228_p2, %p227_p1  ;;  %p290_p6 = scmp.lt.s32.totalorder %s12414_s11, 7 }
   0xb   : > { %s15861_s13 = smov (%p32_p3, %s15859_s13), 0  ;;  %s217_s19 = sadd.s32 1, %s12394_s28 }
   0xc   : > { %15847 = sst [smem:[#allocation4_spill]] %s15861_s13  ;;  %p291_p7 = pnand %p9354_p4, %p290_p6 }
   0xd   : > { %s212_s17 = ssub.s32 %s12410_s10, %s15861_s13  ;;  %s327_s21 = sand.u32 (!%p291_p7), 1, %s12390_s27  }
   0xe   : > { %s214_s18 = sor.u32 %s213_s15, %s212_s17  ;;  %294 = sbr.rel (%p291_p7) target bundleno = 1617 (0x651), region = 52 }
   0xf   : > { %p215_p8 = scmp.eq.s32.totalorder %s214_s18, 0  ;;  %s9355_s22 = sshll.u32 (!%p291_p7), %s12402_s30, 1 }
  0x10   : > { %s10839_s23 = smul.u32 (!%p291_p7), 48, %s327_s21  ;;  %p331_p9 = scmp.lt.s32.totalorder (!%p291_p7), %s9355_s22, 3 }
  0x11   : > { %s12523_s20 = scalar_select %p215_p8, %s12394_s28, %s217_s19  }
  0x12   : > { %s12537_s19 = scalar_lea.vmem (!%p291_p7), [#allocation2], %s10839_s23  ;;  %p9359_p10 = scmp.ne.s32.totalorder (!%p291_p7), %s12398_s29, 0 }
  0x13   : > { %s15863_s22 = smov (!%p331_p9, %s9355_s22), 3 }
  0x14   : > { %s10840_s24 = smul.u32 92, %s15863_s22 }
  0x15   : > { %s10841_s25 = smul.u32 72, %s15863_s22 }
  0x16   : > { %s12530_s12 = scalar_lea.vmem %s15834_s0, %s10840_s24  ;;  %350 = sbr.rel (%p9359_p10) target bundleno = 784 (0x310), region = 56 }
  0x17   : > { %s12535_s18 = scalar_lea.vmem %s15835_s1, %s10841_s25 }
  0x1b   : > { %v10904_v0 = vld [vmem:[%s15836_s2 + $0xac] ss:$12 sps:$4 sm:$0xff]   ;;  %v10908_v2 = vld [vmem:[%s15836_s2 + $0xa8] ss:$12 sps:$4 sm:$0xff]   ;;  %v10914_v6 = vld [vmem:[%s15836_s2 + $0x90] ss:$12 sps:$4 sm:$0xff]  }
  0x1c   : > { %v10906_v1 = vld [vmem:[%s15836_s2 + $0x22c] ss:$12 sps:$4 sm:$0xff]   ;;  %4094 = vmatprep.subr.bf16.mxu0 %v10904_v0  ;;  %v10909_v3 = vld [vmem:[%s15836_s2 + $0x228] ss:$12 sps:$4 sm:$0xff]   ;;  %v10915_v7 = vld [vmem:[%s15836_s2 + $0x210] ss:$12 sps:$4 sm:$0xff]  }
  0x1d   : > { %4137 = vmatprep.subr.bf16.mxu1 %v10906_v1  ;;  %v10910_v4 = vld [vmem:[%s15836_s2 + $0x94] ss:$12 sps:$4 sm:$0xff]   ;;  %4095 = vmatpush1.bf16.msra.mxu0 %v10908_v2  ;;  %v10916_v8 = vld [vmem:[%s15836_s2 + $0x7c] ss:$12 sps:$4 sm:$0xff]   ;;  %v10920_v10 = vld [vmem:[%s15836_s2 + $0x78] ss:$12 sps:$4 sm:$0xff]  }
  0x1e   : > { %4138 = vmatpush1.bf16.msra.mxu1 %v10909_v3  ;;  %v10912_v5 = vld [vmem:[%s15836_s2 + $0x214] ss:$12 sps:$4 sm:$0xff]   ;;  %4096 = vmatprep.subr.bf16.mxu0 %v10910_v4  ;;  %v10918_v9 = vld [vmem:[%s15836_s2 + $0x1fc] ss:$12 sps:$4 sm:$0xff]   ;;  %v10921_v11 = vld [vmem:[%s15836_s2 + $0x1f8] ss:$12 sps:$4 sm:$0xff]  }
  0x1f   : > { %4139 = vmatprep.subr.bf16.mxu1 %v10912_v5  ;;  %v10922_v12 = vld [vmem:[%s15836_s2 + $0x64] ss:$12 sps:$4 sm:$0xff]   ;;  %v10926_v14 = vld [vmem:[%s15836_s2 + $0x60] ss:$12 sps:$4 sm:$0xff]   ;;  %v10932_v18 = vld [vmem:[%s15836_s2 + $0x48] ss:$12 sps:$4 sm:$0xff]  }
  0x20   : > { %v10924_v13 = vld [vmem:[%s15836_s2 + $0x1e4] ss:$12 sps:$4 sm:$0xff]   ;;  %v10927_v15 = vld [vmem:[%s15836_s2 + $0x1e0] ss:$12 sps:$4 sm:$0xff]   ;;  %v10933_v19 = vld [vmem:[%s15836_s2 + $0x1c8] ss:$12 sps:$4 sm:$0xff]  }
  0x21   : > { %4097 = vmatpush1.bf16.msra.mxu0 %v10914_v6  ;;  %v10928_v16 = vld [vmem:[%s15836_s2 + $0x4c] ss:$12 sps:$4 sm:$0xff]   ;;  %v10934_v20 = vld [vmem:[%s15836_s2 + $0x34] ss:$12 sps:$4 sm:$0xff]   ;;  %v10938_v22 = vld [vmem:[%s15836_s2 + $0x30] ss:$12 sps:$4 sm:$0xff]  }
  0x22   : > { %4140 = vmatpush1.bf16.msra.mxu1 %v10915_v7  ;;  %4098 = vmatprep.subr.bf16.mxu0 %v10916_v8  ;;  %v10930_v17 = vld [vmem:[%s15836_s2 + $0x1cc] ss:$12 sps:$4 sm:$0xff]   ;;  %v10936_v21 = vld [vmem:[%s15836_s2 + $0x1b4] ss:$12 sps:$4 sm:$0xff]   ;;  %v10939_v23 = vld [vmem:[%s15836_s2 + $0x1b0] ss:$12 sps:$4 sm:$0xff]  }
  0x23   : > { %4141 = vmatprep.subr.bf16.mxu1 %v10918_v9  ;;  %v10940_v24 = vld [vmem:[%s15836_s2 + $0x1c] ss:$12 sps:$4 sm:$0xff]   ;;  %v10944_v26 = vld [vmem:[%s15836_s2 + $0x18] ss:$12 sps:$4 sm:$0xff]   ;;  %v10950_v30 = vld [vmem:[%s15836_s2] ss:$12 sps:$4 sm:$0xff]  }
  0x24   : > { %v10942_v25 = vld [vmem:[%s15836_s2 + $0x19c] ss:$12 sps:$4 sm:$0xff]   ;;  %v10945_v27 = vld [vmem:[%s15836_s2 + $0x198] ss:$12 sps:$4 sm:$0xff]   ;;  %v10951_v31 = vld [vmem:[%s15836_s2 + $0x180] ss:$12 sps:$4 sm:$0xff]  }
  0x25   : > { %4099 = vmatpush1.bf16.msra.mxu0 %v10920_v10  ;;  %v10946_v28 = vld [vmem:[%s15836_s2 + $0x4] ss:$12 sps:$4 sm:$0xff]   ;;  %v10952_v32 = vld [vmem:[%s15836_s2 + $0x16c] ss:$12 sps:$4 sm:$0xff]   ;;  %v10956_v34 = vld [vmem:[%s15836_s2 + $0x168] ss:$12 sps:$4 sm:$0xff]  }
  0x26   : > { %4142 = vmatpush1.bf16.msra.mxu1 %v10921_v11  ;;  %4100 = vmatprep.subr.bf16.mxu0 %v10922_v12  ;;  %v10948_v29 = vld [vmem:[%s15836_s2 + $0x184] ss:$12 sps:$4 sm:$0xff]   ;;  %v10954_v33 = vld [vmem:[%s15836_s2 + $0x2ec] ss:$12 sps:$4 sm:$0xff]   ;;  %v10957_v35 = vld [vmem:[%s15836_s2 + $0x2e8] ss:$12 sps:$4 sm:$0xff]  }
  0x27   : > { %4143 = vmatprep.subr.bf16.mxu1 %v10924_v13  ;;  %v10958_v36 = vld [vmem:[%s15836_s2 + $0x154] ss:$12 sps:$4 sm:$0xff]   ;;  %v10962_v38 = vld [vmem:[%s15836_s2 + $0x150] ss:$12 sps:$4 sm:$0xff]   ;;  %v10968_v42 = vld [vmem:[%s15836_s2 + $0x138] ss:$12 sps:$4 sm:$0xff]  }
  0x28   : > { %v10960_v37 = vld [vmem:[%s15836_s2 + $0x2d4] ss:$12 sps:$4 sm:$0xff]   ;;  %v10963_v39 = vld [vmem:[%s15836_s2 + $0x2d0] ss:$12 sps:$4 sm:$0xff]   ;;  %v10969_v43 = vld [vmem:[%s15836_s2 + $0x2b8] ss:$12 sps:$4 sm:$0xff]  }
  0x29   : > { %4101 = vmatpush1.bf16.msra.mxu0 %v10926_v14  ;;  %v10964_v40 = vld [vmem:[%s15836_s2 + $0x13c] ss:$12 sps:$4 sm:$0xff]   ;;  %v10970_v44 = vld [vmem:[%s15836_s2 + $0x124] ss:$12 sps:$4 sm:$0xff]   ;;  %v10974_v46 = vld [vmem:[%s15836_s2 + $0x120] ss:$12 sps:$4 sm:$0xff]  }
  0x2a   : > { %4144 = vmatpush1.bf16.msra.mxu1 %v10927_v15  ;;  %4102 = vmatprep.subr.bf16.mxu0 %v10928_v16  ;;  %v10966_v41 = vld [vmem:[%s15836_s2 + $0x2bc] ss:$12 sps:$4 sm:$0xff]   ;;  %v10972_v45 = vld [vmem:[%s15836_s2 + $0x2a4] ss:$12 sps:$4 sm:$0xff]   ;;  %v10975_v47 = vld [vmem:[%s15836_s2 + $0x2a0] ss:$12 sps:$4 sm:$0xff]  }
  0x2b   : > { %4145 = vmatprep.subr.bf16.mxu1 %v10930_v17  ;;  %v10976_v48 = vld [vmem:[%s15836_s2 + $0x10c] ss:$12 sps:$4 sm:$0xff]   ;;  %v11002_v49 = vld [vmem:[%s12530_s12 + $0x4] ss:$92 sps:$4 sm:$0xff]   ;;  %v10980_v52 = vld [vmem:[%s15836_s2 + $0x108] ss:$12 sps:$4 sm:$0xff]  }
  0x2c   : > { %v10978_v50 = vld [vmem:[%s15836_s2 + $0x28c] ss:$12 sps:$4 sm:$0xff]   ;;  %4126 = vmatprep.mubr.bf16.mxu0 %v11002_v49  ;;  %v10981_v53 = vld [vmem:[%s15836_s2 + $0x288] ss:$12 sps:$4 sm:$0xff]   ;;  %v10986_v56 = vld [vmem:[%s15836_s2 + $0xf0] ss:$12 sps:$4 sm:$0xff]  }
  0x2d   : > { %4103 = vmatpush1.bf16.msra.mxu0 %v10932_v18  ;;  %v11005_v51 = vld [vmem:[%s12530_s12 + $0xc] ss:$92 sps:$4 sm:$0xff]   ;;  %v10982_v54 = vld [vmem:[%s15836_s2 + $0xf4] ss:$12 sps:$4 sm:$0xff]   ;;  %v10987_v57 = vld [vmem:[%s15836_s2 + $0x270] ss:$12 sps:$4 sm:$0xff]  }
  0x2e   : > { %4146 = vmatpush1.bf16.msra.mxu1 %v10933_v19  ;;  %4104 = vmatprep.subr.bf16.mxu0 %v10934_v20  ;;  %v10984_v55 = vld [vmem:[%s15836_s2 + $0x274] ss:$12 sps:$4 sm:$0xff]   ;;  %v10988_v58 = vld [vmem:[%s15836_s2 + $0xdc] ss:$12 sps:$4 sm:$0xff]   ;;  %v10992_v60 = vld [vmem:[%s15836_s2 + $0xd8] ss:$12 sps:$4 sm:$0xff]  }
  0x2f   : > { %4147 = vmatprep.subr.bf16.mxu1 %v10936_v21  ;;  %4169 = vmatprep.mubr.bf16.mxu1 %v11005_v51  ;;  %v10990_v59 = vld [vmem:[%s15836_s2 + $0x25c] ss:$12 sps:$4 sm:$0xff]   ;;  %v10993_v61 = vld [vmem:[%s15836_s2 + $0x258] ss:$12 sps:$4 sm:$0xff]   ;;  %v10998_v0 = vld [vmem:[%s15836_s2 + $0xc0] ss:$12 sps:$4 sm:$0xff]  }
  0x30   : > { %v10994_v62 = vld [vmem:[%s15836_s2 + $0xc4] ss:$12 sps:$4 sm:$0xff]   ;;  %v10999_v1 = vld [vmem:[%s15836_s2 + $0x240] ss:$12 sps:$4 sm:$0xff]   ;;  %v11006_v6 = vld [vmem:[%s15836_s2 + $0x3a8] ss:$12 sps:$4 sm:$0xff]  }
  0x31   : > { %4105 = vmatpush1.bf16.msra.mxu0 %v10938_v22  ;;  %v10996_v63 = vld [vmem:[%s15836_s2 + $0x244] ss:$12 sps:$4 sm:$0xff]   ;;  %v11008_v2 = vld [vmem:[%s15836_s2 + $0x3ac] ss:$12 sps:$4 sm:$0xff]   ;;  %v11000_v4 = vld [vmem:[%s12530_s12] ss:$92 sps:$4 sm:$0xff]  }
  0x32   : > { %4148 = vmatpush1.bf16.msra.mxu1 %v10939_v23  ;;  %4106 = vmatprep.subr.bf16.mxu0 %v10940_v24  ;;  %v11011_v3 = vld [vmem:[%s15836_s2 + $0x52c] ss:$12 sps:$4 sm:$0xff]   ;;  %v11003_v5 = vld [vmem:[%s12530_s12 + $0x8] ss:$92 sps:$4 sm:$0xff]   ;;  %v11014_v8 = vld [vmem:[%s15836_s2 + $0x394] ss:$12 sps:$4 sm:$0xff]  }
  0x33   : > { %4149 = vmatprep.subr.bf16.mxu1 %v10942_v25  ;;  %v11009_v7 = vld [vmem:[%s15836_s2 + $0x528] ss:$12 sps:$4 sm:$0xff]   ;;  %v11012_v10 = vld [vmem:[%s15836_s2 + $0x390] ss:$12 sps:$4 sm:$0xff]   ;;  %v11018_v14 = vld [vmem:[%s15836_s2 + $0x378] ss:$12 sps:$4 sm:$0xff]  }
  0x34   : > { %v11017_v9 = vld [vmem:[%s15836_s2 + $0x514] ss:$12 sps:$4 sm:$0xff]   ;;  %v11015_v11 = vld [vmem:[%s15836_s2 + $0x510] ss:$12 sps:$4 sm:$0xff]   ;;  %v11021_v15 = vld [vmem:[%s15836_s2 + $0x4f8] ss:$12 sps:$4 sm:$0xff]  }
  0x35   : > { %4107 = vmatpush1.bf16.msra.mxu0 %v10944_v26  ;;  %v11020_v12 = vld [vmem:[%s15836_s2 + $0x37c] ss:$12 sps:$4 sm:$0xff]   ;;  %v11026_v16 = vld [vmem:[%s15836_s2 + $0x364] ss:$12 sps:$4 sm:$0xff]   ;;  %v11024_v18 = vld [vmem:[%s15836_s2 + $0x360] ss:$12 sps:$4 sm:$0xff]  }
  0x36   : > { %4150 = vmatpush1.bf16.msra.mxu1 %v10945_v27  ;;  %4108 = vmatprep.subr.bf16.mxu0 %v10946_v28  ;;  %v11023_v13 = vld [vmem:[%s15836_s2 + $0x4fc] ss:$12 sps:$4 sm:$0xff]   ;;  %v11029_v17 = vld [vmem:[%s15836_s2 + $0x4e4] ss:$12 sps:$4 sm:$0xff]   ;;  %v11027_v19 = vld [vmem:[%s15836_s2 + $0x4e0] ss:$12 sps:$4 sm:$0xff]  }
  0x37   : > { %4151 = vmatprep.subr.bf16.mxu1 %v10948_v29  ;;  %v11032_v20 = vld [vmem:[%s15836_s2 + $0x34c] ss:$12 sps:$4 sm:$0xff]   ;;  %v11030_v22 = vld [vmem:[%s15836_s2 + $0x348] ss:$12 sps:$4 sm:$0xff]   ;;  %v11036_v26 = vld [vmem:[%s15836_s2 + $0x330] ss:$12 sps:$4 sm:$0xff]  }
  0x38   : > { %v11035_v21 = vld [vmem:[%s15836_s2 + $0x4cc] ss:$12 sps:$4 sm:$0xff]   ;;  %v11033_v23 = vld [vmem:[%s15836_s2 + $0x4c8] ss:$12 sps:$4 sm:$0xff]   ;;  %v11039_v27 = vld [vmem:[%s15836_s2 + $0x4b0] ss:$12 sps:$4 sm:$0xff]  }
  0x39   : > { %4109 = vmatpush1.bf16.msra.mxu0 %v10950_v30  ;;  %v11038_v24 = vld [vmem:[%s15836_s2 + $0x334] ss:$12 sps:$4 sm:$0xff]   ;;  %v11044_v28 = vld [vmem:[%s15836_s2 + $0x31c] ss:$12 sps:$4 sm:$0xff]   ;;  %v11042_v30 = vld [vmem:[%s15836_s2 + $0x318] ss:$12 sps:$4 sm:$0xff]  }
  0x3a   : > { %4152 = vmatpush1.bf16.msra.mxu1 %v10951_v31  ;;  %4110 = vmatprep.subr.bf16.mxu0 %v10952_v32  ;;  %v11041_v25 = vld [vmem:[%s15836_s2 + $0x4b4] ss:$12 sps:$4 sm:$0xff]   ;;  %v11047_v29 = vld [vmem:[%s15836_s2 + $0x49c] ss:$12 sps:$4 sm:$0xff]   ;;  %v11045_v31 = vld [vmem:[%s15836_s2 + $0x498] ss:$12 sps:$4 sm:$0xff]  }
  0x3b   : > { %4153 = vmatprep.subr.bf16.mxu1 %v10954_v33  ;;  %v11050_v32 = vld [vmem:[%s15836_s2 + $0x304] ss:$12 sps:$4 sm:$0xff]   ;;  %vm4090_vm0 = vcmask 523264   ;;  %vm12418_vm1 = vmmov 0  }
  0x3c   : > { %v11053_v33 = vld [vmem:[%s15836_s2 + $0x484] ss:$12 sps:$4 sm:$0xff]  }
  0x3d   : > { %4111 = vmatpush2.bf16.msra.mxu0 %v10956_v34  ;;  %v11104_v34 = vld [vmem:[%s12530_s12 + $0x14] ss:$92 sps:$4 sm:$0xff]   ;;  %v11069_v49 = vld [vmem:[%s15836_s2 + $0x5b8] ss:$12 sps:$4 sm:$0xff]  }
  0x3e   : > { %4154 = vmatpush2.bf16.msra.mxu1 %v10957_v35  ;;  %4112 = vmatprep.subr.bf16.mxu0 %v10958_v36  ;;  %v11107_v35 = vld [vmem:[%s12530_s12 + $0x1c] ss:$92 sps:$4 sm:$0xff]   ;;  %v11048_v36 = vld [vmem:[%s15836_s2 + $0x300] ss:$12 sps:$4 sm:$0xff]   ;;  %v11077_v51 = vld [vmem:[%s15836_s2 + $0x5a4] ss:$12 sps:$4 sm:$0xff]  }
  0x3f   : > { %4155 = vmatprep.subr.bf16.mxu1 %v10960_v37  ;;  %v11051_v37 = vld [vmem:[%s15836_s2 + $0x480] ss:$12 sps:$4 sm:$0xff]  }
  0x41   : > { %4113 = vmatpush2.bf16.msra.mxu0 %v10962_v38  ;;  %v11056_v38 = vld [vmem:[%s15836_s2 + $0x46c] ss:$12 sps:$4 sm:$0xff]  }
  0x42   : > { %4156 = vmatpush2.bf16.msra.mxu1 %v10963_v39  ;;  %4114 = vmatprep.subr.bf16.mxu0 %v10964_v40  ;;  %v11059_v39 = vld [vmem:[%s15836_s2 + $0x5ec] ss:$12 sps:$4 sm:$0xff]   ;;  %v11054_v40 = vld [vmem:[%s15836_s2 + $0x468] ss:$12 sps:$4 sm:$0xff]  }
  0x43   : > { %4157 = vmatprep.subr.bf16.mxu1 %v10966_v41  ;;  %v11057_v41 = vld [vmem:[%s15836_s2 + $0x5e8] ss:$12 sps:$4 sm:$0xff]  }
  0x45   : > { %4115 = vmatpush2.bf16.msra.mxu0 %v10968_v42  ;;  %v11062_v42 = vld [vmem:[%s15836_s2 + $0x454] ss:$12 sps:$4 sm:$0xff]  }
  0x46   : > { %4158 = vmatpush2.bf16.msra.mxu1 %v10969_v43  ;;  %4116 = vmatprep.subr.bf16.mxu0 %v10970_v44  ;;  %v11065_v43 = vld [vmem:[%s15836_s2 + $0x5d4] ss:$12 sps:$4 sm:$0xff]   ;;  %v11060_v44 = vld [vmem:[%s15836_s2 + $0x450] ss:$12 sps:$4 sm:$0xff]  }
  0x47   : > { %4159 = vmatprep.subr.bf16.mxu1 %v10972_v45  ;;  %v11063_v45 = vld [vmem:[%s15836_s2 + $0x5d0] ss:$12 sps:$4 sm:$0xff]  }
  0x49   : > { %4117 = vmatpush2.bf16.msra.mxu0 %v10974_v46  ;;  %v11068_v46 = vld [vmem:[%s15836_s2 + $0x43c] ss:$12 sps:$4 sm:$0xff]  }
  0x4a   : > { %4160 = vmatpush2.bf16.msra.mxu1 %v10975_v47  ;;  %4118 = vmatprep.subr.bf16.mxu0 %v10976_v48  ;;  %v11071_v47 = vld [vmem:[%s15836_s2 + $0x5bc] ss:$12 sps:$4 sm:$0xff]   ;;  %v11066_v48 = vld [vmem:[%s15836_s2 + $0x438] ss:$12 sps:$4 sm:$0xff]  }
  0x4b   : > { %4161 = vmatprep.subr.bf16.mxu1 %v10978_v50  ;;  %v11074_v50 = vld [vmem:[%s15836_s2 + $0x424] ss:$12 sps:$4 sm:$0xff]  }
  0x4d   : > { %4119 = vmatpush2.bf16.msra.mxu0 %v10980_v52  ;;  %v11072_v52 = vld [vmem:[%s15836_s2 + $0x420] ss:$12 sps:$4 sm:$0xff]  }
  0x4e   : > { %4162 = vmatpush2.bf16.msra.mxu1 %v10981_v53  ;;  %4120 = vmatprep.subr.bf16.mxu0 %v10982_v54  ;;  %v11075_v53 = vld [vmem:[%s15836_s2 + $0x5a0] ss:$12 sps:$4 sm:$0xff]  }
  0x4f   : > { %4163 = vmatprep.subr.bf16.mxu1 %v10984_v55  ;;  %v11080_v54 = vld [vmem:[%s15836_s2 + $0x40c] ss:$12 sps:$4 sm:$0xff]  }
  0x50   : > { %v11083_v55 = vld [vmem:[%s15836_s2 + $0x58c] ss:$12 sps:$4 sm:$0xff]  }
  0x51   : > { %4121 = vmatpush2.bf16.msra.mxu0 %v10986_v56  ;;  %v11078_v56 = vld [vmem:[%s15836_s2 + $0x408] ss:$12 sps:$4 sm:$0xff]  }
  0x52   : > { %4164 = vmatpush2.bf16.msra.mxu1 %v10987_v57  ;;  %4122 = vmatprep.subr.bf16.mxu0 %v10988_v58  ;;  %v11081_v57 = vld [vmem:[%s15836_s2 + $0x588] ss:$12 sps:$4 sm:$0xff]  }
  0x53   : > { %4165 = vmatprep.subr.bf16.mxu1 %v10990_v59  ;;  %v11086_v58 = vld [vmem:[%s15836_s2 + $0x3f4] ss:$12 sps:$4 sm:$0xff]  }
  0x54   : > { %v11089_v59 = vld [vmem:[%s15836_s2 + $0x574] ss:$12 sps:$4 sm:$0xff]  }
  0x55   : > { %4123 = vmatpush2.bf16.msra.mxu0 %v10992_v60  ;;  %v11084_v60 = vld [vmem:[%s15836_s2 + $0x3f0] ss:$12 sps:$4 sm:$0xff]  }
  0x56   : > { %4166 = vmatpush2.bf16.msra.mxu1 %v10993_v61  ;;  %4124 = vmatprep.subr.bf16.mxu0 %v10994_v62  ;;  %v11087_v61 = vld [vmem:[%s15836_s2 + $0x570] ss:$12 sps:$4 sm:$0xff]  }
  0x57   : > { %4167 = vmatprep.subr.bf16.mxu1 %v10996_v63  ;;  %v11092_v62 = vld [vmem:[%s15836_s2 + $0x3dc] ss:$12 sps:$4 sm:$0xff]  }
  0x58   : > { %v11095_v63 = vld [vmem:[%s15836_s2 + $0x55c] ss:$12 sps:$4 sm:$0xff]  }
  0x59   : > { %4125 = vmatpush2.bf16.msra.mxu0 %v10998_v0  ;;  %v11090_v0 = vld [vmem:[%s15836_s2 + $0x3d8] ss:$12 sps:$4 sm:$0xff]  }
  0x5a   : > { %4168 = vmatpush2.bf16.msra.mxu1 %v10999_v1  ;;  %4180 = vmatprep.subr.bf16.mxu0 %v11008_v2  ;;  %v11093_v1 = vld [vmem:[%s15836_s2 + $0x558] ss:$12 sps:$4 sm:$0xff]  }
  0x5b   : > { %4223 = vmatprep.subr.bf16.mxu1 %v11011_v3  ;;  %v11098_v2 = vld [vmem:[%s15836_s2 + $0x3c4] ss:$12 sps:$4 sm:$0xff]  }
  0x5c   : > { %4127 = vmatmul.mubr.bf16.vlgmr.msra.gmra.mxu0 %v11000_v4  ;;  %v11101_v3 = vld [vmem:[%s15836_s2 + $0x544] ss:$12 sps:$4 sm:$0xff]   ;;  %v11096_v4 = vld [vmem:[%s15836_s2 + $0x3c0] ss:$12 sps:$4 sm:$0xff]  }
  0x5d   : > { %4170 = vmatmul.mubr.bf16.vlgmr.msra.gmra.mxu1 %v11003_v5  ;;  %4181 = vmatpush1.bf16.msra.mxu0 %v11006_v6  ;;  %v11099_v5 = vld [vmem:[%s15836_s2 + $0x540] ss:$12 sps:$4 sm:$0xff]  }
  0x5e   : > { %4224 = vmatpush1.bf16.msra.mxu1 %v11009_v7  ;;  %4182 = vmatprep.subr.bf16.mxu0 %v11014_v8  ;;  %v11110_v6 = vld [vmem:[%s15836_s2 + $0x6ac] ss:$12 sps:$4 sm:$0xff]  }
  0x5f   : > { %4225 = vmatprep.subr.bf16.mxu1 %v11017_v9  ;;  %4212 = vmatprep.mubr.bf16.mxu0 %v11104_v34  ;;  %v11113_v7 = vld [vmem:[%s15836_s2 + $0x82c] ss:$12 sps:$4 sm:$0xff]   ;;  %v11146_v34 = vld [vmem:[%s15836_s2 + $0x61c] ss:$12 sps:$4 sm:$0xff]  }
  0x60   : > { %4255 = vmatprep.mubr.bf16.mxu1 %v11107_v35  ;;  %v11102_v8 = vld [vmem:[%s12530_s12 + $0x10] ss:$92 sps:$4 sm:$0xff]   ;;  %v11105_v9 = vld [vmem:[%s12530_s12 + $0x18] ss:$92 sps:$4 sm:$0xff]   ;;  %v11149_v35 = vld [vmem:[%s15836_s2 + $0x79c] ss:$12 sps:$4 sm:$0xff]  }
  0x61   : > { %4183 = vmatpush1.bf16.msra.mxu0 %v11012_v10  ;;  %v11108_v10 = vld [vmem:[%s15836_s2 + $0x6a8] ss:$12 sps:$4 sm:$0xff]  }
  0x62   : > { %4226 = vmatpush1.bf16.msra.mxu1 %v11015_v11  ;;  %4184 = vmatprep.subr.bf16.mxu0 %v11020_v12  ;;  %v11111_v11 = vld [vmem:[%s15836_s2 + $0x828] ss:$12 sps:$4 sm:$0xff]  }
  0x63   : > { %4227 = vmatprep.subr.bf16.mxu1 %v11023_v13  ;;  %v11116_v12 = vld [vmem:[%s15836_s2 + $0x694] ss:$12 sps:$4 sm:$0xff]  }
  0x64   : > { %v11119_v13 = vld [vmem:[%s15836_s2 + $0x814] ss:$12 sps:$4 sm:$0xff]  }
  0x65   : > { %4185 = vmatpush1.bf16.msra.mxu0 %v11018_v14  ;;  %v11114_v14 = vld [vmem:[%s15836_s2 + $0x690] ss:$12 sps:$4 sm:$0xff]  }
  0x66   : > { %4228 = vmatpush1.bf16.msra.mxu1 %v11021_v15  ;;  %4186 = vmatprep.subr.bf16.mxu0 %v11026_v16  ;;  %v11117_v15 = vld [vmem:[%s15836_s2 + $0x810] ss:$12 sps:$4 sm:$0xff]  }
  0x67   : > { %4229 = vmatprep.subr.bf16.mxu1 %v11029_v17  ;;  %v11122_v16 = vld [vmem:[%s15836_s2 + $0x67c] ss:$12 sps:$4 sm:$0xff]  }
  0x68   : > { %v11125_v17 = vld [vmem:[%s15836_s2 + $0x7fc] ss:$12 sps:$4 sm:$0xff]  }
  0x69   : > { %4187 = vmatpush1.bf16.msra.mxu0 %v11024_v18  ;;  %v11120_v18 = vld [vmem:[%s15836_s2 + $0x678] ss:$12 sps:$4 sm:$0xff]  }
  0x6a   : > { %4230 = vmatpush1.bf16.msra.mxu1 %v11027_v19  ;;  %4188 = vmatprep.subr.bf16.mxu0 %v11032_v20  ;;  %v11206_v19 = vld [vmem:[%s12530_s12 + $0x24] ss:$92 sps:$4 sm:$0xff]  }
  0x6b   : > { %4231 = vmatprep.subr.bf16.mxu1 %v11035_v21  ;;  %v11123_v20 = vld [vmem:[%s15836_s2 + $0x7f8] ss:$12 sps:$4 sm:$0xff]   ;;  %v11209_v21 = vld [vmem:[%s12530_s12 + $0x2c] ss:$92 sps:$4 sm:$0xff]  }
  0x6d   : > { %4189 = vmatpush1.bf16.msra.mxu0 %v11030_v22  ;;  %v11128_v22 = vld [vmem:[%s15836_s2 + $0x664] ss:$12 sps:$4 sm:$0xff]  }
  0x6e   : > { %4232 = vmatpush1.bf16.msra.mxu1 %v11033_v23  ;;  %4190 = vmatprep.subr.bf16.mxu0 %v11038_v24  ;;  %v11131_v23 = vld [vmem:[%s15836_s2 + $0x7e4] ss:$12 sps:$4 sm:$0xff]   ;;  %v11126_v24 = vld [vmem:[%s15836_s2 + $0x660] ss:$12 sps:$4 sm:$0xff]  }
  0x6f   : > { %4233 = vmatprep.subr.bf16.mxu1 %v11041_v25  ;;  %v11129_v25 = vld [vmem:[%s15836_s2 + $0x7e0] ss:$12 sps:$4 sm:$0xff]  }
  0x71   : > { %4191 = vmatpush1.bf16.msra.mxu0 %v11036_v26  ;;  %v11134_v26 = vld [vmem:[%s15836_s2 + $0x64c] ss:$12 sps:$4 sm:$0xff]  }
  0x72   : > { %4234 = vmatpush1.bf16.msra.mxu1 %v11039_v27  ;;  %4192 = vmatprep.subr.bf16.mxu0 %v11044_v28  ;;  %v11137_v27 = vld [vmem:[%s15836_s2 + $0x7cc] ss:$12 sps:$4 sm:$0xff]   ;;  %v11132_v28 = vld [vmem:[%s15836_s2 + $0x648] ss:$12 sps:$4 sm:$0xff]  }
  0x73   : > { %4235 = vmatprep.subr.bf16.mxu1 %v11047_v29  ;;  %v11135_v29 = vld [vmem:[%s15836_s2 + $0x7c8] ss:$12 sps:$4 sm:$0xff]  }
  0x75   : > { %4193 = vmatpush1.bf16.msra.mxu0 %v11042_v30  ;;  %v11140_v30 = vld [vmem:[%s15836_s2 + $0x634] ss:$12 sps:$4 sm:$0xff]  }
  0x76   : > { %4236 = vmatpush1.bf16.msra.mxu1 %v11045_v31  ;;  %4194 = vmatprep.subr.bf16.mxu0 %v11050_v32  ;;  %v11143_v31 = vld [vmem:[%s15836_s2 + $0x7b4] ss:$12 sps:$4 sm:$0xff]   ;;  %v11138_v32 = vld [vmem:[%s15836_s2 + $0x630] ss:$12 sps:$4 sm:$0xff]  }
  0x77   : > { %4237 = vmatprep.subr.bf16.mxu1 %v11053_v33  ;;  %v11141_v33 = vld [vmem:[%s15836_s2 + $0x7b0] ss:$12 sps:$4 sm:$0xff]  }
  0x79   : > { %4195 = vmatpush1.bf16.msra.mxu0 %v11048_v36  ;;  %v11144_v36 = vld [vmem:[%s15836_s2 + $0x618] ss:$12 sps:$4 sm:$0xff]  }
  0x7a   : > { %4238 = vmatpush1.bf16.msra.mxu1 %v11051_v37  ;;  %4196 = vmatprep.subr.bf16.mxu0 %v11056_v38  ;;  %v11147_v37 = vld [vmem:[%s15836_s2 + $0x798] ss:$12 sps:$4 sm:$0xff]  }
  0x7b   : > { %4239 = vmatprep.subr.bf16.mxu1 %v11059_v39  ;;  %v11152_v38 = vld [vmem:[%s15836_s2 + $0x604] ss:$12 sps:$4 sm:$0xff]  }
  0x7c   : > { %v11155_v39 = vld [vmem:[%s15836_s2 + $0x784] ss:$12 sps:$4 sm:$0xff]  }
  0x7d   : > { %4197 = vmatpush2.bf16.msra.mxu0 %v11054_v40  ;;  %v11150_v40 = vld [vmem:[%s15836_s2 + $0x600] ss:$12 sps:$4 sm:$0xff]  }
  0x7e   : > { %4240 = vmatpush2.bf16.msra.mxu1 %v11057_v41  ;;  %4198 = vmatprep.subr.bf16.mxu0 %v11062_v42  ;;  %v11153_v41 = vld [vmem:[%s15836_s2 + $0x780] ss:$12 sps:$4 sm:$0xff]  }
  0x7f   : > { %4241 = vmatprep.subr.bf16.mxu1 %v11065_v43  ;;  %v11158_v42 = vld [vmem:[%s15836_s2 + $0x76c] ss:$12 sps:$4 sm:$0xff]  }
  0x80   : > { %v11161_v43 = vld [vmem:[%s15836_s2 + $0x8ec] ss:$12 sps:$4 sm:$0xff]  }
  0x81   : > { %4199 = vmatpush2.bf16.msra.mxu0 %v11060_v44  ;;  %v11156_v44 = vld [vmem:[%s15836_s2 + $0x768] ss:$12 sps:$4 sm:$0xff]  }
  0x82   : > { %4242 = vmatpush2.bf16.msra.mxu1 %v11063_v45  ;;  %4200 = vmatprep.subr.bf16.mxu0 %v11068_v46  ;;  %v11159_v45 = vld [vmem:[%s15836_s2 + $0x8e8] ss:$12 sps:$4 sm:$0xff]  }
  0x83   : > { %4243 = vmatprep.subr.bf16.mxu1 %v11071_v47  ;;  %v11164_v46 = vld [vmem:[%s15836_s2 + $0x754] ss:$12 sps:$4 sm:$0xff]  }
  0x84   : > { %v11167_v47 = vld [vmem:[%s15836_s2 + $0x8d4] ss:$12 sps:$4 sm:$0xff]  }
  0x85   : > { %4201 = vmatpush2.bf16.msra.mxu0 %v11066_v48  ;;  %v11162_v48 = vld [vmem:[%s15836_s2 + $0x750] ss:$12 sps:$4 sm:$0xff]  }
  0x86   : > { %4244 = vmatpush2.bf16.msra.mxu1 %v11069_v49  ;;  %4202 = vmatprep.subr.bf16.mxu0 %v11074_v50  ;;  %v11165_v49 = vld [vmem:[%s15836_s2 + $0x8d0] ss:$12 sps:$4 sm:$0xff]  }
  0x87   : > { %4245 = vmatprep.subr.bf16.mxu1 %v11077_v51  ;;  %v11170_v50 = vld [vmem:[%s15836_s2 + $0x73c] ss:$12 sps:$4 sm:$0xff]  }
  0x88   : > { %v11173_v51 = vld [vmem:[%s15836_s2 + $0x8bc] ss:$12 sps:$4 sm:$0xff]  }
  0x89   : > { %4203 = vmatpush2.bf16.msra.mxu0 %v11072_v52  ;;  %v11168_v52 = vld [vmem:[%s15836_s2 + $0x738] ss:$12 sps:$4 sm:$0xff]  }
  0x8a   : > { %4246 = vmatpush2.bf16.msra.mxu1 %v11075_v53  ;;  %4204 = vmatprep.subr.bf16.mxu0 %v11080_v54  ;;  %v11171_v53 = vld [vmem:[%s15836_s2 + $0x8b8] ss:$12 sps:$4 sm:$0xff]  }
  0x8b   : > { %4247 = vmatprep.subr.bf16.mxu1 %v11083_v55  ;;  %v11176_v54 = vld [vmem:[%s15836_s2 + $0x724] ss:$12 sps:$4 sm:$0xff]  }
  0x8c   : > { %v11179_v55 = vld [vmem:[%s15836_s2 + $0x8a4] ss:$12 sps:$4 sm:$0xff]  }
  0x8d   : > { %4205 = vmatpush2.bf16.msra.mxu0 %v11078_v56  ;;  %v11174_v56 = vld [vmem:[%s15836_s2 + $0x720] ss:$12 sps:$4 sm:$0xff]  }
  0x8e   : > { %4248 = vmatpush2.bf16.msra.mxu1 %v11081_v57  ;;  %4206 = vmatprep.subr.bf16.mxu0 %v11086_v58  ;;  %v11177_v57 = vld [vmem:[%s15836_s2 + $0x8a0] ss:$12 sps:$4 sm:$0xff]  }
  0x8f   : > { %4249 = vmatprep.subr.bf16.mxu1 %v11089_v59  ;;  %v11182_v58 = vld [vmem:[%s15836_s2 + $0x70c] ss:$12 sps:$4 sm:$0xff]  }
  0x90   : > { %v11185_v59 = vld [vmem:[%s15836_s2 + $0x88c] ss:$12 sps:$4 sm:$0xff]  }
  0x91   : > { %4207 = vmatpush2.bf16.msra.mxu0 %v11084_v60  ;;  %v11180_v60 = vld [vmem:[%s15836_s2 + $0x708] ss:$12 sps:$4 sm:$0xff]  }
  0x92   : > { %4250 = vmatpush2.bf16.msra.mxu1 %v11087_v61  ;;  %4208 = vmatprep.subr.bf16.mxu0 %v11092_v62  ;;  %v11183_v61 = vld [vmem:[%s15836_s2 + $0x888] ss:$12 sps:$4 sm:$0xff]  }
  0x93   : > { %4251 = vmatprep.subr.bf16.mxu1 %v11095_v63  ;;  %v11188_v62 = vld [vmem:[%s15836_s2 + $0x6f4] ss:$12 sps:$4 sm:$0xff]  }
  0x94   : > { %v11191_v63 = vld [vmem:[%s15836_s2 + $0x874] ss:$12 sps:$4 sm:$0xff]  }
  0x95   : > { %4209 = vmatpush2.bf16.msra.mxu0 %v11090_v0  ;;  %v11186_v0 = vld [vmem:[%s15836_s2 + $0x6f0] ss:$12 sps:$4 sm:$0xff]  }
  0x96   : > { %4252 = vmatpush2.bf16.msra.mxu1 %v11093_v1  ;;  %4210 = vmatprep.subr.bf16.mxu0 %v11098_v2  ;;  %v11189_v1 = vld [vmem:[%s15836_s2 + $0x870] ss:$12 sps:$4 sm:$0xff]  }
  0x97   : > { %4253 = vmatprep.subr.bf16.mxu1 %v11101_v3  ;;  %v11194_v2 = vld [vmem:[%s15836_s2 + $0x6dc] ss:$12 sps:$4 sm:$0xff]  }
  0x98   : > { %v11197_v3 = vld [vmem:[%s15836_s2 + $0x85c] ss:$12 sps:$4 sm:$0xff]  }
  0x99   : > { %4211 = vmatpush2.bf16.msra.mxu0 %v11096_v4  ;;  %v11192_v4 = vld [vmem:[%s15836_s2 + $0x6d8] ss:$12 sps:$4 sm:$0xff]  }
  0x9a   : > { %4254 = vmatpush2.bf16.msra.mxu1 %v11099_v5  ;;  %4266 = vmatprep.subr.bf16.mxu0 %v11110_v6  ;;  %v11195_v5 = vld [vmem:[%s15836_s2 + $0x858] ss:$12 sps:$4 sm:$0xff]  }
  0x9b   : > { %4309 = vmatprep.subr.bf16.mxu1 %v11113_v7  ;;  %v11200_v6 = vld [vmem:[%s15836_s2 + $0x6c4] ss:$12 sps:$4 sm:$0xff]  }
  0x9c   : > { %4213 = vmatmul.mubr.bf16.vlgmr.msra.gmra.mxu0 %v11102_v8  ;;  %v11203_v7 = vld [vmem:[%s15836_s2 + $0x844] ss:$12 sps:$4 sm:$0xff]   ;;  %v11198_v8 = vld [vmem:[%s15836_s2 + $0x6c0] ss:$12 sps:$4 sm:$0xff]  }
  0x9d   : > { %4256 = vmatmul.mubr.bf16.vlgmr.msra.gmra.mxu1 %v11105_v9  ;;  %4267 = vmatpush1.bf16.msra.mxu0 %v11108_v10  ;;  %v11201_v9 = vld [vmem:[%s15836_s2 + $0x840] ss:$12 sps:$4 sm:$0xff]  }
  0x9e   : > { %4310 = vmatpush1.bf16.msra.mxu1 %v11111_v11  ;;  %4268 = vmatprep.subr.bf16.mxu0 %v11116_v12  ;;  %v11212_v10 = vld [vmem:[%s15836_s2 + $0x9ac] ss:$12 sps:$4 sm:$0xff]   ;;  %v11204_v12 = vld [vmem:[%s12530_s12 + $0x20] ss:$92 sps:$4 sm:$0xff]  }
  0x9f   : > { %4311 = vmatprep.subr.bf16.mxu1 %v11119_v13  ;;  %4298 = vmatprep.mubr.bf16.mxu0 %v11206_v19  ;;  %v11215_v11 = vld [vmem:[%s15836_s2 + $0xb2c] ss:$12 sps:$4 sm:$0xff]   ;;  %v11207_v13 = vld [vmem:[%s12530_s12 + $0x28] ss:$92 sps:$4 sm:$0xff]  }
  0xa0   : > { %4341 = vmatprep.mubr.bf16.mxu1 %v11209_v21  ;;  %v11311_v19 = vld [vmem:[%s12530_s12 + $0x3c] ss:$92 sps:$4 sm:$0xff]  }
  0xa1   : > { %4269 = vmatpush1.bf16.msra.mxu0 %v11114_v14  ;;  %v11210_v14 = vld [vmem:[%s15836_s2 + $0x9a8] ss:$12 sps:$4 sm:$0xff]   ;;  %v11219_v21 = vld [vmem:[%s15836_s2 + $0xb10] ss:$12 sps:$4 sm:$0xff]  }
  0xa2   : > { %4312 = vmatpush1.bf16.msra.mxu1 %v11117_v15  ;;  %4270 = vmatprep.subr.bf16.mxu0 %v11122_v16  ;;  %v11213_v15 = vld [vmem:[%s15836_s2 + $0xb28] ss:$12 sps:$4 sm:$0xff]  }
  0xa3   : > { %4313 = vmatprep.subr.bf16.mxu1 %v11125_v17  ;;  %v11218_v16 = vld [vmem:[%s15836_s2 + $0x994] ss:$12 sps:$4 sm:$0xff]  }
  0xa4   : > { %v11221_v17 = vld [vmem:[%s15836_s2 + $0xb14] ss:$12 sps:$4 sm:$0xff]  }
  0xa5   : > { %4271 = vmatpush1.bf16.msra.mxu0 %v11120_v18  ;;  %v11308_v18 = vld [vmem:[%s12530_s12 + $0x34] ss:$92 sps:$4 sm:$0xff]  }
  0xa6   : > { %4314 = vmatpush1.bf16.msra.mxu1 %v11123_v20  ;;  %4272 = vmatprep.subr.bf16.mxu0 %v11128_v22  ;;  %v11216_v20 = vld [vmem:[%s15836_s2 + $0x990] ss:$12 sps:$4 sm:$0xff]  }
  0xa7   : > { %4315 = vmatprep.subr.bf16.mxu1 %v11131_v23  ;;  %v11224_v22 = vld [vmem:[%s15836_s2 + $0x97c] ss:$12 sps:$4 sm:$0xff]  }
  0xa8   : > { %v11227_v23 = vld [vmem:[%s15836_s2 + $0xafc] ss:$12 sps:$4 sm:$0xff]  }
  0xa9   : > { %4273 = vmatpush1.bf16.msra.mxu0 %v11126_v24  ;;  %v11222_v24 = vld [vmem:[%s15836_s2 + $0x978] ss:$12 sps:$4 sm:$0xff]  }
  0xaa   : > { %4316 = vmatpush1.bf16.msra.mxu1 %v11129_v25  ;;  %4274 = vmatprep.subr.bf16.mxu0 %v11134_v26  ;;  %v11225_v25 = vld [vmem:[%s15836_s2 + $0xaf8] ss:$12 sps:$4 sm:$0xff]  }
  0xab   : > { %4317 = vmatprep.subr.bf16.mxu1 %v11137_v27  ;;  %v11230_v26 = vld [vmem:[%s15836_s2 + $0x964] ss:$12 sps:$4 sm:$0xff]  }
  0xac   : > { %v11233_v27 = vld [vmem:[%s15836_s2 + $0xae4] ss:$12 sps:$4 sm:$0xff]  }
  0xad   : > { %4275 = vmatpush1.bf16.msra.mxu0 %v11132_v28  ;;  %v11228_v28 = vld [vmem:[%s15836_s2 + $0x960] ss:$12 sps:$4 sm:$0xff]  }
  0xae   : > { %4318 = vmatpush1.bf16.msra.mxu1 %v11135_v29  ;;  %4276 = vmatprep.subr.bf16.mxu0 %v11140_v30  ;;  %v11231_v29 = vld [vmem:[%s15836_s2 + $0xae0] ss:$12 sps:$4 sm:$0xff]  }
  0xaf   : > { %4319 = vmatprep.subr.bf16.mxu1 %v11143_v31  ;;  %v11236_v30 = vld [vmem:[%s15836_s2 + $0x94c] ss:$12 sps:$4 sm:$0xff]  }
  0xb0   : > { %v11239_v31 = vld [vmem:[%s15836_s2 + $0xacc] ss:$12 sps:$4 sm:$0xff]  }
  0xb1   : > { %4277 = vmatpush1.bf16.msra.mxu0 %v11138_v32  ;;  %v11234_v32 = vld [vmem:[%s15836_s2 + $0x948] ss:$12 sps:$4 sm:$0xff]  }
  0xb2   : > { %4320 = vmatpush1.bf16.msra.mxu1 %v11141_v33  ;;  %4278 = vmatprep.subr.bf16.mxu0 %v11146_v34  ;;  %v11237_v33 = vld [vmem:[%s15836_s2 + $0xac8] ss:$12 sps:$4 sm:$0xff]  }
  0xb3   : > { %4321 = vmatprep.subr.bf16.mxu1 %v11149_v35  ;;  %v11242_v34 = vld [vmem:[%s15836_s2 + $0x934] ss:$12 sps:$4 sm:$0xff]  }
  0xb4   : > { %v11245_v35 = vld [vmem:[%s15836_s2 + $0xab4] ss:$12 sps:$4 sm:$0xff]  }
  0xb5   : > { %4279 = vmatpush1.bf16.msra.mxu0 %v11144_v36  ;;  %v11240_v36 = vld [vmem:[%s15836_s2 + $0x930] ss:$12 sps:$4 sm:$0xff]  }
  0xb6   : > { %4322 = vmatpush1.bf16.msra.mxu1 %v11147_v37  ;;  %4280 = vmatprep.subr.bf16.mxu0 %v11152_v38  ;;  %v11243_v37 = vld [vmem:[%s15836_s2 + $0xab0] ss:$12 sps:$4 sm:$0xff]  }
  0xb7   : > { %4323 = vmatprep.subr.bf16.mxu1 %v11155_v39  ;;  %v11248_v38 = vld [vmem:[%s15836_s2 + $0x91c] ss:$12 sps:$4 sm:$0xff]  }
  0xb8   : > { %v11251_v39 = vld [vmem:[%s15836_s2 + $0xa9c] ss:$12 sps:$4 sm:$0xff]  }
  0xb9   : > { %4281 = vmatpush1.bf16.msra.mxu0 %v11150_v40  ;;  %v11246_v40 = vld [vmem:[%s15836_s2 + $0x918] ss:$12 sps:$4 sm:$0xff]  }
  0xba   : > { %4324 = vmatpush1.bf16.msra.mxu1 %v11153_v41  ;;  %4282 = vmatprep.subr.bf16.mxu0 %v11158_v42  ;;  %v11249_v41 = vld [vmem:[%s15836_s2 + $0xa98] ss:$12 sps:$4 sm:$0xff]  }
  0xbb   : > { %4325 = vmatprep.subr.bf16.mxu1 %v11161_v43  ;;  %v11254_v42 = vld [vmem:[%s15836_s2 + $0x904] ss:$12 sps:$4 sm:$0xff]  }
  0xbc   : > { %v11257_v43 = vld [vmem:[%s15836_s2 + $0xa84] ss:$12 sps:$4 sm:$0xff]  }
  0xbd   : > { %4283 = vmatpush2.bf16.msra.mxu0 %v11156_v44  ;;  %v11252_v44 = vld [vmem:[%s15836_s2 + $0x900] ss:$12 sps:$4 sm:$0xff]  }
  0xbe   : > { %4326 = vmatpush2.bf16.msra.mxu1 %v11159_v45  ;;  %4284 = vmatprep.subr.bf16.mxu0 %v11164_v46  ;;  %v11255_v45 = vld [vmem:[%s15836_s2 + $0xa80] ss:$12 sps:$4 sm:$0xff]  }
  0xbf   : > { %4327 = vmatprep.subr.bf16.mxu1 %v11167_v47  ;;  %v11260_v46 = vld [vmem:[%s15836_s2 + $0xa6c] ss:$12 sps:$4 sm:$0xff]  }
  0xc0   : > { %v11263_v47 = vld [vmem:[%s15836_s2 + $0xbec] ss:$12 sps:$4 sm:$0xff]  }
  0xc1   : > { %4285 = vmatpush2.bf16.msra.mxu0 %v11162_v48  ;;  %v11258_v48 = vld [vmem:[%s15836_s2 + $0xa68] ss:$12 sps:$4 sm:$0xff]  }
  0xc2   : > { %4328 = vmatpush2.bf16.msra.mxu1 %v11165_v49  ;;  %4286 = vmatprep.subr.bf16.mxu0 %v11170_v50  ;;  %v11261_v49 = vld [vmem:[%s15836_s2 + $0xbe8] ss:$12 sps:$4 sm:$0xff]  }
  0xc3   : > { %4329 = vmatprep.subr.bf16.mxu1 %v11173_v51  ;;  %v11266_v50 = vld [vmem:[%s15836_s2 + $0xa54] ss:$12 sps:$4 sm:$0xff]  }
  0xc4   : > { %v11269_v51 = vld [vmem:[%s15836_s2 + $0xbd4] ss:$12 sps:$4 sm:$0xff]  }
  0xc5   : > { %4287 = vmatpush2.bf16.msra.mxu0 %v11168_v52  ;;  %v11264_v52 = vld [vmem:[%s15836_s2 + $0xa50] ss:$12 sps:$4 sm:$0xff]  }
  0xc6   : > { %4330 = vmatpush2.bf16.msra.mxu1 %v11171_v53  ;;  %4288 = vmatprep.subr.bf16.mxu0 %v11176_v54  ;;  %v11267_v53 = vld [vmem:[%s15836_s2 + $0xbd0] ss:$12 sps:$4 sm:$0xff]  }
  0xc7   : > { %4331 = vmatprep.subr.bf16.mxu1 %v11179_v55  ;;  %v11272_v54 = vld [vmem:[%s15836_s2 + $0xa3c] ss:$12 sps:$4 sm:$0xff]  }
  0xc8   : > { %v11275_v55 = vld [vmem:[%s15836_s2 + $0xbbc] ss:$12 sps:$4 sm:$0xff]  }
  0xc9   : > { %4289 = vmatpush2.bf16.msra.mxu0 %v11174_v56  ;;  %v11270_v56 = vld [vmem:[%s15836_s2 + $0xa38] ss:$12 sps:$4 sm:$0xff]  }
  0xca   : > { %4332 = vmatpush2.bf16.msra.mxu1 %v11177_v57  ;;  %4290 = vmatprep.subr.bf16.mxu0 %v11182_v58  ;;  %v11273_v57 = vld [vmem:[%s15836_s2 + $0xbb8] ss:$12 sps:$4 sm:$0xff]  }
  0xcb   : > { %4333 = vmatprep.subr.bf16.mxu1 %v11185_v59  ;;  %v11278_v58 = vld [vmem:[%s15836_s2 + $0xa24] ss:$12 sps:$4 sm:$0xff]  }
  0xcc   : > { %v11281_v59 = vld [vmem:[%s15836_s2 + $0xba4] ss:$12 sps:$4 sm:$0xff]  }
  0xcd   : > { %4291 = vmatpush2.bf16.msra.mxu0 %v11180_v60  ;;  %v11276_v60 = vld [vmem:[%s15836_s2 + $0xa20] ss:$12 sps:$4 sm:$0xff]  }
  0xce   : > { %4334 = vmatpush2.bf16.msra.mxu1 %v11183_v61  ;;  %4292 = vmatprep.subr.bf16.mxu0 %v11188_v62  ;;  %v11279_v61 = vld [vmem:[%s15836_s2 + $0xba0] ss:$12 sps:$4 sm:$0xff]  }
  0xcf   : > { %4335 = vmatprep.subr.bf16.mxu1 %v11191_v63  ;;  %v11284_v62 = vld [vmem:[%s15836_s2 + $0xa0c] ss:$12 sps:$4 sm:$0xff]  }
  0xd0   : > { %v11287_v63 = vld [vmem:[%s15836_s2 + $0xb8c] ss:$12 sps:$4 sm:$0xff]  }
  0xd1   : > { %4293 = vmatpush2.bf16.msra.mxu0 %v11186_v0  ;;  %v11282_v0 = vld [vmem:[%s15836_s2 + $0xa08] ss:$12 sps:$4 sm:$0xff]  }
  0xd2   : > { %4336 = vmatpush2.bf16.msra.mxu1 %v11189_v1  ;;  %4294 = vmatprep.subr.bf16.mxu0 %v11194_v2  ;;  %v11285_v1 = vld [vmem:[%s15836_s2 + $0xb88] ss:$12 sps:$4 sm:$0xff]  }
  0xd3   : > { %4337 = vmatprep.subr.bf16.mxu1 %v11197_v3  ;;  %v11290_v2 = vld [vmem:[%s15836_s2 + $0x9f4] ss:$12 sps:$4 sm:$0xff]  }
  0xd4   : > { %v11293_v3 = vld [vmem:[%s15836_s2 + $0xb74] ss:$12 sps:$4 sm:$0xff]  }
  0xd5   : > { %4295 = vmatpush2.bf16.msra.mxu0 %v11192_v4  ;;  %v11288_v4 = vld [vmem:[%s15836_s2 + $0x9f0] ss:$12 sps:$4 sm:$0xff]  }
  0xd6   : > { %4338 = vmatpush2.bf16.msra.mxu1 %v11195_v5  ;;  %4296 = vmatprep.subr.bf16.mxu0 %v11200_v6  ;;  %v11291_v5 = vld [vmem:[%s15836_s2 + $0xb70] ss:$12 sps:$4 sm:$0xff]  }
  0xd7   : > { %4339 = vmatprep.subr.bf16.mxu1 %v11203_v7  ;;  %v11296_v6 = vld [vmem:[%s15836_s2 + $0x9dc] ss:$12 sps:$4 sm:$0xff]  }
  0xd8   : > { %v11299_v7 = vld [vmem:[%s15836_s2 + $0xb5c] ss:$12 sps:$4 sm:$0xff]  }
  0xd9   : > { %4297 = vmatpush2.bf16.msra.mxu0 %v11198_v8  ;;  %v11294_v8 = vld [vmem:[%s15836_s2 + $0x9d8] ss:$12 sps:$4 sm:$0xff]  }
  0xda   : > { %4340 = vmatpush2.bf16.msra.mxu1 %v11201_v9  ;;  %4352 = vmatprep.subr.bf16.mxu0 %v11212_v10  ;;  %v11297_v9 = vld [vmem:[%s15836_s2 + $0xb58] ss:$12 sps:$4 sm:$0xff]  }
  0xdb   : > { %4395 = vmatprep.subr.bf16.mxu1 %v11215_v11  ;;  %v11302_v10 = vld [vmem:[%s15836_s2 + $0x9c4] ss:$12 sps:$4 sm:$0xff]  }
  0xdc   : > { %4299 = vmatmul.mubr.bf16.vlgmr.msra.gmra.mxu0 %v11204_v12  ;;  %v11305_v11 = vld [vmem:[%s15836_s2 + $0xb44] ss:$12 sps:$4 sm:$0xff]   ;;  %v11300_v12 = vld [vmem:[%s15836_s2 + $0x9c0] ss:$12 sps:$4 sm:$0xff]  }
  0xdd   : > { %4342 = vmatmul.mubr.bf16.vlgmr.msra.gmra.mxu1 %v11207_v13  ;;  %4353 = vmatpush1.bf16.msra.mxu0 %v11210_v14  ;;  %v11303_v13 = vld [vmem:[%s15836_s2 + $0xb40] ss:$12 sps:$4 sm:$0xff]  }
  0xde   : > { %4396 = vmatpush1.bf16.msra.mxu1 %v11213_v15  ;;  %4354 = vmatprep.subr.bf16.mxu0 %v11218_v16  ;;  %v11314_v14 = vld [vmem:[%s15836_s2 + $0xcac] ss:$12 sps:$4 sm:$0xff]  }
  0xdf   : > { %4397 = vmatprep.subr.bf16.mxu1 %v11221_v17  ;;  %4384 = vmatprep.mubr.bf16.mxu0 %v11308_v18  ;;  %v11306_v15 = vld [vmem:[%s12530_s12 + $0x30] ss:$92 sps:$4 sm:$0xff]   ;;  %v11309_v16 = vld [vmem:[%s12530_s12 + $0x38] ss:$92 sps:$4 sm:$0xff]  }
  0xe0   : > { %4427 = vmatprep.mubr.bf16.mxu1 %v11311_v19  ;;  %v11317_v17 = vld [vmem:[%s15836_s2 + $0xe2c] ss:$12 sps:$4 sm:$0xff]   ;;  %v11312_v18 = vld [vmem:[%s15836_s2 + $0xca8] ss:$12 sps:$4 sm:$0xff]  }
  0xe1   : > { %4355 = vmatpush1.bf16.msra.mxu0 %v11216_v20  ;;  %v11315_v19 = vld [vmem:[%s15836_s2 + $0xe28] ss:$12 sps:$4 sm:$0xff]  }
  0xe2   : > { %4398 = vmatpush1.bf16.msra.mxu1 %v11219_v21  ;;  %4356 = vmatprep.subr.bf16.mxu0 %v11224_v22  ;;  %v11320_v20 = vld [vmem:[%s15836_s2 + $0xc94] ss:$12 sps:$4 sm:$0xff]  }
  0xe3   : > { %4399 = vmatprep.subr.bf16.mxu1 %v11227_v23  ;;  %v11323_v21 = vld [vmem:[%s15836_s2 + $0xe14] ss:$12 sps:$4 sm:$0xff]   ;;  %v11413_v23 = vld [vmem:[%s12530_s12 + $0x4c] ss:$92 sps:$4 sm:$0xff]  }
  0xe4   : > { %v11410_v22 = vld [vmem:[%s12530_s12 + $0x44] ss:$92 sps:$4 sm:$0xff]  }
  0xe5   : > { %4357 = vmatpush1.bf16.msra.mxu0 %v11222_v24  ;;  %v11318_v24 = vld [vmem:[%s15836_s2 + $0xc90] ss:$12 sps:$4 sm:$0xff]  }
  0xe6   : > { %4400 = vmatpush1.bf16.msra.mxu1 %v11225_v25  ;;  %4358 = vmatprep.subr.bf16.mxu0 %v11230_v26  ;;  %v11321_v25 = vld [vmem:[%s15836_s2 + $0xe10] ss:$12 sps:$4 sm:$0xff]  }
  0xe7   : > { %4401 = vmatprep.subr.bf16.mxu1 %v11233_v27  ;;  %v11326_v26 = vld [vmem:[%s15836_s2 + $0xc7c] ss:$12 sps:$4 sm:$0xff]  }
  0xe8   : > { %v11329_v27 = vld [vmem:[%s15836_s2 + $0xdfc] ss:$12 sps:$4 sm:$0xff]  }
  0xe9   : > { %4359 = vmatpush1.bf16.msra.mxu0 %v11228_v28  ;;  %v11324_v28 = vld [vmem:[%s15836_s2 + $0xc78] ss:$12 sps:$4 sm:$0xff]  }
  0xea   : > { %4402 = vmatpush1.bf16.msra.mxu1 %v11231_v29  ;;  %4360 = vmatprep.subr.bf16.mxu0 %v11236_v30  ;;  %v11327_v29 = vld [vmem:[%s15836_s2 + $0xdf8] ss:$12 sps:$4 sm:$0xff]  }
  0xeb   : > { %4403 = vmatprep.subr.bf16.mxu1 %v11239_v31  ;;  %v11332_v30 = vld [vmem:[%s15836_s2 + $0xc64] ss:$12 sps:$4 sm:$0xff]  }
  0xec   : > { %v11335_v31 = vld [vmem:[%s15836_s2 + $0xde4] ss:$12 sps:$4 sm:$0xff]  }
  0xed   : > { %4361 = vmatpush1.bf16.msra.mxu0 %v11234_v32  ;;  %v11330_v32 = vld [vmem:[%s15836_s2 + $0xc60] ss:$12 sps:$4 sm:$0xff]  }
  0xee   : > { %4404 = vmatpush1.bf16.msra.mxu1 %v11237_v33  ;;  %4362 = vmatprep.subr.bf16.mxu0 %v11242_v34  ;;  %v11333_v33 = vld [vmem:[%s15836_s2 + $0xde0] ss:$12 sps:$4 sm:$0xff]  }
  0xef   : > { %4405 = vmatprep.subr.bf16.mxu1 %v11245_v35  ;;  %v11338_v34 = vld [vmem:[%s15836_s2 + $0xc4c] ss:$12 sps:$4 sm:$0xff]  }
  0xf0   : > { %v11341_v35 = vld [vmem:[%s15836_s2 + $0xdcc] ss:$12 sps:$4 sm:$0xff]  }
  0xf1   : > { %4363 = vmatpush1.bf16.msra.mxu0 %v11240_v36  ;;  %v11336_v36 = vld [vmem:[%s15836_s2 + $0xc48] ss:$12 sps:$4 sm:$0xff]  }
  0xf2   : > { %4406 = vmatpush1.bf16.msra.mxu1 %v11243_v37  ;;  %4364 = vmatprep.subr.bf16.mxu0 %v11248_v38  ;;  %v11339_v37 = vld [vmem:[%s15836_s2 + $0xdc8] ss:$12 sps:$4 sm:$0xff]  }
  0xf3   : > { %4407 = vmatprep.subr.bf16.mxu1 %v11251_v39  ;;  %v11344_v38 = vld [vmem:[%s15836_s2 + $0xc34] ss:$12 sps:$4 sm:$0xff]  }
  0xf4   : > { %v11347_v39 = vld [vmem:[%s15836_s2 + $0xdb4] ss:$12 sps:$4 sm:$0xff]  }
  0xf5   : > { %4365 = vmatpush1.bf16.msra.mxu0 %v11246_v40  ;;  %v11342_v40 = vld [vmem:[%s15836_s2 + $0xc30] ss:$12 sps:$4 sm:$0xff]  }
  0xf6   : > { %4408 = vmatpush1.bf16.msra.mxu1 %v11249_v41  ;;  %4366 = vmatprep.subr.bf16.mxu0 %v11254_v42  ;;  %v11345_v41 = vld [vmem:[%s15836_s2 + $0xdb0] ss:$12 sps:$4 sm:$0xff]  }
  0xf7   : > { %4409 = vmatprep.subr.bf16.mxu1 %v11257_v43  ;;  %v11350_v42 = vld [vmem:[%s15836_s2 + $0xc1c] ss:$12 sps:$4 sm:$0xff]  }
  0xf8   : > { %v11353_v43 = vld [vmem:[%s15836_s2 + $0xd9c] ss:$12 sps:$4 sm:$0xff]  }
  0xf9   : > { %4367 = vmatpush1.bf16.msra.mxu0 %v11252_v44  ;;  %v11348_v44 = vld [vmem:[%s15836_s2 + $0xc18] ss:$12 sps:$4 sm:$0xff]  }
  0xfa   : > { %4410 = vmatpush1.bf16.msra.mxu1 %v11255_v45  ;;  %4368 = vmatprep.subr.bf16.mxu0 %v11260_v46  ;;  %v11351_v45 = vld [vmem:[%s15836_s2 + $0xd98] ss:$12 sps:$4 sm:$0xff]  }
  0xfb   : > { %4411 = vmatprep.subr.bf16.mxu1 %v11263_v47  ;;  %v11356_v46 = vld [vmem:[%s15836_s2 + $0xc04] ss:$12 sps:$4 sm:$0xff]  }
  0xfc   : > { %v11359_v47 = vld [vmem:[%s15836_s2 + $0xd84] ss:$12 sps:$4 sm:$0xff]  }
  0xfd   : > { %4369 = vmatpush2.bf16.msra.mxu0 %v11258_v48  ;;  %v11354_v48 = vld [vmem:[%s15836_s2 + $0xc00] ss:$12 sps:$4 sm:$0xff]  }
  0xfe   : > { %4412 = vmatpush2.bf16.msra.mxu1 %v11261_v49  ;;  %4370 = vmatprep.subr.bf16.mxu0 %v11266_v50  ;;  %v11357_v49 = vld [vmem:[%s15836_s2 + $0xd80] ss:$12 sps:$4 sm:$0xff]  }
  0xff   : > { %4413 = vmatprep.subr.bf16.mxu1 %v11269_v51  ;;  %v11362_v50 = vld [vmem:[%s15836_s2 + $0xd6c] ss:$12 sps:$4 sm:$0xff]  }
 0x100   : > { %v11365_v51 = vld [vmem:[%s15836_s2 + $0xeec] ss:$12 sps:$4 sm:$0xff]  }
 0x101   : > { %4371 = vmatpush2.bf16.msra.mxu0 %v11264_v52  ;;  %v11360_v52 = vld [vmem:[%s15836_s2 + $0xd68] ss:$12 sps:$4 sm:$0xff]  }
 0x102   : > { %4414 = vmatpush2.bf16.msra.mxu1 %v11267_v53  ;;  %4372 = vmatprep.subr.bf16.mxu0 %v11272_v54  ;;  %v11363_v53 = vld [vmem:[%s15836_s2 + $0xee8] ss:$12 sps:$4 sm:$0xff]  }
 0x103   : > { %4415 = vmatprep.subr.bf16.mxu1 %v11275_v55  ;;  %v11368_v54 = vld [vmem:[%s15836_s2 + $0xd54] ss:$12 sps:$4 sm:$0xff]  }
 0x104   : > { %v11371_v55 = vld [vmem:[%s15836_s2 + $0xed4] ss:$12 sps:$4 sm:$0xff]  }
 0x105   : > { %4373 = vmatpush2.bf16.msra.mxu0 %v11270_v56  ;;  %v11366_v56 = vld [vmem:[%s15836_s2 + $0xd50] ss:$12 sps:$4 sm:$0xff]  }
 0x106   : > { %4416 = vmatpush2.bf16.msra.mxu1 %v11273_v57  ;;  %4374 = vmatprep.subr.bf16.mxu0 %v11278_v58  ;;  %v11369_v57 = vld [vmem:[%s15836_s2 + $0xed0] ss:$12 sps:$4 sm:$0xff]  }
 0x107   : > { %4417 = vmatprep.subr.bf16.mxu1 %v11281_v59  ;;  %v11374_v58 = vld [vmem:[%s15836_s2 + $0xd3c] ss:$12 sps:$4 sm:$0xff]  }
 0x108   : > { %v11377_v59 = vld [vmem:[%s15836_s2 + $0xebc] ss:$12 sps:$4 sm:$0xff]  }
 0x109   : > { %4375 = vmatpush2.bf16.msra.mxu0 %v11276_v60  ;;  %v11372_v60 = vld [vmem:[%s15836_s2 + $0xd38] ss:$12 sps:$4 sm:$0xff]  }
 0x10a   : > { %4418 = vmatpush2.bf16.msra.mxu1 %v11279_v61  ;;  %4376 = vmatprep.subr.bf16.mxu0 %v11284_v62  ;;  %v11375_v61 = vld [vmem:[%s15836_s2 + $0xeb8] ss:$12 sps:$4 sm:$0xff]  }
 0x10b   : > { %4419 = vmatprep.subr.bf16.mxu1 %v11287_v63  ;;  %v11380_v62 = vld [vmem:[%s15836_s2 + $0xd24] ss:$12 sps:$4 sm:$0xff]  }
 0x10c   : > { %v11383_v63 = vld [vmem:[%s15836_s2 + $0xea4] ss:$12 sps:$4 sm:$0xff]  }
 0x10d   : > { %4377 = vmatpush2.bf16.msra.mxu0 %v11282_v0  ;;  %v11378_v0 = vld [vmem:[%s15836_s2 + $0xd20] ss:$12 sps:$4 sm:$0xff]  }
 0x10e   : > { %4420 = vmatpush2.bf16.msra.mxu1 %v11285_v1  ;;  %4378 = vmatprep.subr.bf16.mxu0 %v11290_v2  ;;  %v11381_v1 = vld [vmem:[%s15836_s2 + $0xea0] ss:$12 sps:$4 sm:$0xff]  }
 0x10f   : > { %4421 = vmatprep.subr.bf16.mxu1 %v11293_v3  ;;  %v11386_v2 = vld [vmem:[%s15836_s2 + $0xd0c] ss:$12 sps:$4 sm:$0xff]  }
 0x110   : > { %v11389_v3 = vld [vmem:[%s15836_s2 + $0xe8c] ss:$12 sps:$4 sm:$0xff]  }
 0x111   : > { %4379 = vmatpush2.bf16.msra.mxu0 %v11288_v4  ;;  %v11384_v4 = vld [vmem:[%s15836_s2 + $0xd08] ss:$12 sps:$4 sm:$0xff]  }
 0x112   : > { %4422 = vmatpush2.bf16.msra.mxu1 %v11291_v5  ;;  %4380 = vmatprep.subr.bf16.mxu0 %v11296_v6  ;;  %v11387_v5 = vld [vmem:[%s15836_s2 + $0xe88] ss:$12 sps:$4 sm:$0xff]  }
 0x113   : > { %4423 = vmatprep.subr.bf16.mxu1 %v11299_v7  ;;  %v11392_v6 = vld [vmem:[%s15836_s2 + $0xcf4] ss:$12 sps:$4 sm:$0xff]  }
 0x114   : > { %v11395_v7 = vld [vmem:[%s15836_s2 + $0xe74] ss:$12 sps:$4 sm:$0xff]  }
 0x115   : > { %4381 = vmatpush2.bf16.msra.mxu0 %v11294_v8  ;;  %v11390_v8 = vld [vmem:[%s15836_s2 + $0xcf0] ss:$12 sps:$4 sm:$0xff]  }
 0x116   : > { %4424 = vmatpush2.bf16.msra.mxu1 %v11297_v9  ;;  %4382 = vmatprep.subr.bf16.mxu0 %v11302_v10  ;;  %v11393_v9 = vld [vmem:[%s15836_s2 + $0xe70] ss:$12 sps:$4 sm:$0xff]  }
 0x117   : > { %4425 = vmatprep.subr.bf16.mxu1 %v11305_v11  ;;  %v11398_v10 = vld [vmem:[%s15836_s2 + $0xcdc] ss:$12 sps:$4 sm:$0xff]  }
 0x118   : > { %v11401_v11 = vld [vmem:[%s15836_s2 + $0xe5c] ss:$12 sps:$4 sm:$0xff]  }
 0x119   : > { %4383 = vmatpush2.bf16.msra.mxu0 %v11300_v12  ;;  %v11396_v12 = vld [vmem:[%s15836_s2 + $0xcd8] ss:$12 sps:$4 sm:$0xff]  }
 0x11a   : > { %4426 = vmatpush2.bf16.msra.mxu1 %v11303_v13  ;;  %4438 = vmatprep.subr.bf16.mxu0 %v11314_v14  ;;  %v11399_v13 = vld [vmem:[%s15836_s2 + $0xe58] ss:$12 sps:$4 sm:$0xff]  }
 0x11b   : > { %4481 = vmatprep.subr.bf16.mxu1 %v11317_v17  ;;  %v11404_v14 = vld [vmem:[%s15836_s2 + $0xcc4] ss:$12 sps:$4 sm:$0xff]   ;;  %v11405_v17 = vld [vmem:[%s15836_s2 + $0xe40] ss:$12 sps:$4 sm:$0xff]  }
 0x11c   : > { %4385 = vmatmul.mubr.bf16.vlgmr.msra.gmra.mxu0 %v11306_v15  ;;  %v11407_v15 = vld [vmem:[%s15836_s2 + $0xe44] ss:$12 sps:$4 sm:$0xff]  }
 0x11d   : > { %4428 = vmatmul.mubr.bf16.vlgmr.msra.gmra.mxu1 %v11309_v16  ;;  %4439 = vmatpush1.bf16.msra.mxu0 %v11312_v18  ;;  %v11402_v16 = vld [vmem:[%s15836_s2 + $0xcc0] ss:$12 sps:$4 sm:$0xff]  }
 0x11e   : > { %4482 = vmatpush1.bf16.msra.mxu1 %v11315_v19  ;;  %4440 = vmatprep.subr.bf16.mxu0 %v11320_v20  ;;  %v11416_v18 = vld [vmem:[%s15836_s2 + $0xfac] ss:$12 sps:$4 sm:$0xff]   ;;  %v11408_v19 = vld [vmem:[%s12530_s12 + $0x40] ss:$92 sps:$4 sm:$0xff]   ;;  %v11411_v20 = vld [vmem:[%s12530_s12 + $0x48] ss:$92 sps:$4 sm:$0xff]  }
 0x11f   : > { %4483 = vmatprep.subr.bf16.mxu1 %v11323_v21  ;;  %4470 = vmatprep.mubr.bf16.mxu0 %v11410_v22  ;;  %v11419_v21 = vld [vmem:[%s15836_s2 + $0x10cc] ss:$12 sps:$4 sm:$0xff]   ;;  %v11414_v22 = vld [vmem:[%s15836_s2 + $0xfa8] ss:$12 sps:$4 sm:$0xff]  }
 0x120   : > { %4513 = vmatprep.mubr.bf16.mxu1 %v11413_v23  ;;  %v11417_v23 = vld [vmem:[%s15836_s2 + $0x10c8] ss:$12 sps:$4 sm:$0xff]  }
 0x121   : > { %4441 = vmatpush1.bf16.msra.mxu0 %v11318_v24  ;;  %v11422_v24 = vld [vmem:[%s15836_s2 + $0xf94] ss:$12 sps:$4 sm:$0xff]  }
 0x122   : > { %4484 = vmatpush1.bf16.msra.mxu1 %v11321_v25  ;;  %4442 = vmatprep.subr.bf16.mxu0 %v11326_v26  ;;  %v11425_v25 = vld [vmem:[%s15836_s2 + $0x10b4] ss:$12 sps:$4 sm:$0xff]   ;;  %v11420_v26 = vld [vmem:[%s15836_s2 + $0xf90] ss:$12 sps:$4 sm:$0xff]  }
 0x123   : > { %4485 = vmatprep.subr.bf16.mxu1 %v11329_v27  ;;  %v11501_v27 = vld [vmem:[%s12530_s12 + $0x54] ss:$92 sps:$4 sm:$0xff]  }
 0x125   : > { %4443 = vmatpush1.bf16.msra.mxu0 %v11324_v28  ;;  %v11423_v28 = vld [vmem:[%s15836_s2 + $0x10b0] ss:$12 sps:$4 sm:$0xff]  }
 0x126   : > { %4486 = vmatpush1.bf16.msra.mxu1 %v11327_v29  ;;  %4444 = vmatprep.subr.bf16.mxu0 %v11332_v30  ;;  %v11428_v29 = vld [vmem:[%s15836_s2 + $0xf7c] ss:$12 sps:$4 sm:$0xff]  }
 0x127   : > { %4487 = vmatprep.subr.bf16.mxu1 %v11335_v31  ;;  %v11431_v30 = vld [vmem:[%s15836_s2 + $0x109c] ss:$12 sps:$4 sm:$0xff]   ;;  %v11426_v31 = vld [vmem:[%s15836_s2 + $0xf78] ss:$12 sps:$4 sm:$0xff]  }
 0x129   : > { %4445 = vmatpush1.bf16.msra.mxu0 %v11330_v32  ;;  %v12416_v32 = vmov 0  }
 0x12a   : > { %4488 = vmatpush1.bf16.msra.mxu1 %v11333_v33  ;;  %4446 = vmatprep.subr.bf16.mxu0 %v11338_v34  ;;  %v11429_v33 = vld [vmem:[%s15836_s2 + $0x1098] ss:$12 sps:$4 sm:$0xff]  }
 0x12b   : > { %4489 = vmatprep.subr.bf16.mxu1 %v11341_v35  ;;  %v11434_v34 = vld [vmem:[%s15836_s2 + $0xf64] ss:$12 sps:$4 sm:$0xff]  }
 0x12c   : > { %v11437_v35 = vld [vmem:[%s15836_s2 + $0x1084] ss:$12 sps:$4 sm:$0xff]  }
 0x12d   : > { %4447 = vmatpush1.bf16.msra.mxu0 %v11336_v36  ;;  %v11432_v36 = vld [vmem:[%s15836_s2 + $0xf60] ss:$12 sps:$4 sm:$0xff]  }
 0x12e   : > { %4490 = vmatpush1.bf16.msra.mxu1 %v11339_v37  ;;  %4448 = vmatprep.subr.bf16.mxu0 %v11344_v38  ;;  %v11435_v37 = vld [vmem:[%s15836_s2 + $0x1080] ss:$12 sps:$4 sm:$0xff]  }
 0x12f   : > { %4491 = vmatprep.subr.bf16.mxu1 %v11347_v39  ;;  %v11440_v38 = vld [vmem:[%s15836_s2 + $0xf4c] ss:$12 sps:$4 sm:$0xff]   ;;  %v11441_v39 = vld [vmem:[%s15836_s2 + $0x170] ss:$12 sps:$4 sm:$0xff]  }
 0x131   : > { %4449 = vmatpush1.bf16.msra.mxu0 %v11342_v40  ;;  %v11438_v40 = vld [vmem:[%s15836_s2 + $0xf48] ss:$12 sps:$4 sm:$0xff]  }
 0x132   : > { %4492 = vmatpush1.bf16.msra.mxu1 %v11345_v41  ;;  %4450 = vmatprep.subr.bf16.mxu0 %v11350_v42  ;;  %v11442_v41 = vld [vmem:[%s12530_s12 + $0x58] ss:$92 sps:$4 sm:$0xff]   ;;  %v11443_v42 = vld [vmem:[%s15836_s2 + $0xb0] ss:$12 sps:$4 sm:$0xff]  }
 0x133   : > { %4493 = vmatprep.subr.bf16.mxu1 %v11353_v43  ;;  %v11446_v43 = vld [vmem:[%s15836_s2 + $0xf34] ss:$12 sps:$4 sm:$0xff]  }
 0x135   : > { %4451 = vmatpush1.bf16.msra.mxu0 %v11348_v44  ;;  %v11447_v44 = vld [vmem:[%s15836_s2 + $0x158] ss:$12 sps:$4 sm:$0xff]  }
 0x136   : > { %4494 = vmatpush1.bf16.msra.mxu1 %v11351_v45  ;;  %4452 = vmatprep.subr.bf16.mxu0 %v11356_v46  ;;  %v11444_v45 = vld [vmem:[%s15836_s2 + $0xf30] ss:$12 sps:$4 sm:$0xff]   ;;  %v11448_v46 = vld [vmem:[%s15836_s2 + $0x98] ss:$12 sps:$4 sm:$0xff]  }
 0x137   : > { %4495 = vmatprep.subr.bf16.mxu1 %v11359_v47  ;;  %v11451_v47 = vld [vmem:[%s15836_s2 + $0xf1c] ss:$12 sps:$4 sm:$0xff]  }
 0x139   : > { %4453 = vmatpush1.bf16.msra.mxu0 %v11354_v48  ;;  %v11452_v48 = vld [vmem:[%s15836_s2 + $0x140] ss:$12 sps:$4 sm:$0xff]  }
 0x13a   : > { %4496 = vmatpush1.bf16.msra.mxu1 %v11357_v49  ;;  %4454 = vmatprep.subr.bf16.mxu0 %v11362_v50  ;;  %v11449_v49 = vld [vmem:[%s15836_s2 + $0xf18] ss:$12 sps:$4 sm:$0xff]  }
 0x13b   : > { %4497 = vmatprep.subr.bf16.mxu1 %v11365_v51  ;;  %v11658_v50 = vld [vmem:[%s12530_s12 + $0x4] ss:$92 sps:$4 sm:$0xff]  }
 0x13c   : > { %v11453_v51 = vld [vmem:[%s15836_s2 + $0x80] ss:$12 sps:$4 sm:$0xff]  }
 0x13d   : > { %4455 = vmatpush2.bf16.msra.mxu0 %v11360_v52  ;;  %v11456_v52 = vld [vmem:[%s15836_s2 + $0xf04] ss:$12 sps:$4 sm:$0xff]  }
 0x13e   : > { %4498 = vmatpush2.bf16.msra.mxu1 %v11363_v53  ;;  %4456 = vmatprep.subr.bf16.mxu0 %v11368_v54  ;;  %v11457_v53 = vld [vmem:[%s15836_s2 + $0x128] ss:$12 sps:$4 sm:$0xff]   ;;  %v11454_v54 = vld [vmem:[%s15836_s2 + $0xf00] ss:$12 sps:$4 sm:$0xff]  }
 0x13f   : > { %4499 = vmatprep.subr.bf16.mxu1 %v11371_v55  ;;  %v11458_v55 = vld [vmem:[%s15836_s2 + $0x68] ss:$12 sps:$4 sm:$0xff]  }
 0x141   : > { %4457 = vmatpush2.bf16.msra.mxu0 %v11366_v56  ;;  %v11461_v56 = vld [vmem:[%s15836_s2 + $0x106c] ss:$12 sps:$4 sm:$0xff]  }
 0x142   : > { %4500 = vmatpush2.bf16.msra.mxu1 %v11369_v57  ;;  %4458 = vmatprep.subr.bf16.mxu0 %v11374_v58  ;;  %v11462_v57 = vld [vmem:[%s15836_s2 + $0x110] ss:$12 sps:$4 sm:$0xff]   ;;  %v11459_v58 = vld [vmem:[%s15836_s2 + $0x1068] ss:$12 sps:$4 sm:$0xff]  }
 0x143   : > { %4501 = vmatprep.subr.bf16.mxu1 %v11377_v59  ;;  %v11463_v59 = vld [vmem:[%s15836_s2 + $0x50] ss:$12 sps:$4 sm:$0xff]  }
 0x145   : > { %4459 = vmatpush2.bf16.msra.mxu0 %v11372_v60  ;;  %v11466_v60 = vld [vmem:[%s15836_s2 + $0x1054] ss:$12 sps:$4 sm:$0xff]  }
 0x146   : > { %4502 = vmatpush2.bf16.msra.mxu1 %v11375_v61  ;;  %4460 = vmatprep.subr.bf16.mxu0 %v11380_v62  ;;  %v11467_v61 = vld [vmem:[%s15836_s2 + $0xf8] ss:$12 sps:$4 sm:$0xff]   ;;  %v11464_v62 = vld [vmem:[%s15836_s2 + $0x1050] ss:$12 sps:$4 sm:$0xff]  }
 0x147   : > { %4503 = vmatprep.subr.bf16.mxu1 %v11383_v63  ;;  %v11468_v63 = vld [vmem:[%s15836_s2 + $0x38] ss:$12 sps:$4 sm:$0xff]  }
 0x149   : > { %4461 = vmatpush2.bf16.msra.mxu0 %v11378_v0  ;;  %v11471_v0 = vld [vmem:[%s15836_s2 + $0x103c] ss:$12 sps:$4 sm:$0xff]  }
 0x14a   : > { %4504 = vmatpush2.bf16.msra.mxu1 %v11381_v1  ;;  %4462 = vmatprep.subr.bf16.mxu0 %v11386_v2  ;;  %v11472_v1 = vld [vmem:[%s15836_s2 + $0xe0] ss:$12 sps:$4 sm:$0xff]   ;;  %v11469_v2 = vld [vmem:[%s15836_s2 + $0x1038] ss:$12 sps:$4 sm:$0xff]  }
 0x14b   : > { %4505 = vmatprep.subr.bf16.mxu1 %v11389_v3  ;;  %v11473_v3 = vld [vmem:[%s15836_s2 + $0x20] ss:$12 sps:$4 sm:$0xff]  }
 0x14d   : > { %4463 = vmatpush2.bf16.msra.mxu0 %v11384_v4  ;;  %v11476_v4 = vld [vmem:[%s15836_s2 + $0x1024] ss:$12 sps:$4 sm:$0xff]  }
 0x14e   : > { %4506 = vmatpush2.bf16.msra.mxu1 %v11387_v5  ;;  %4464 = vmatprep.subr.bf16.mxu0 %v11392_v6  ;;  %v11477_v5 = vld [vmem:[%s15836_s2 + $0xc8] ss:$12 sps:$4 sm:$0xff]   ;;  %v11474_v6 = vld [vmem:[%s15836_s2 + $0x1020] ss:$12 sps:$4 sm:$0xff]  }
 0x14f   : > { %4507 = vmatprep.subr.bf16.mxu1 %v11395_v7  ;;  %v11478_v7 = vld [vmem:[%s15836_s2 + $0x8] ss:$12 sps:$4 sm:$0xff]  }
 0x151   : > { %4465 = vmatpush2.bf16.msra.mxu0 %v11390_v8  ;;  %v11481_v8 = vld [vmem:[%s15836_s2 + $0x100c] ss:$12 sps:$4 sm:$0xff]  }
 0x152   : > { %4508 = vmatpush2.bf16.msra.mxu1 %v11393_v9  ;;  %4466 = vmatprep.subr.bf16.mxu0 %v11398_v10  ;;  %v11482_v9 = vld [vmem:[%s15836_s2 + $0x2f0] ss:$12 sps:$4 sm:$0xff]   ;;  %v11479_v10 = vld [vmem:[%s15836_s2 + $0x1008] ss:$12 sps:$4 sm:$0xff]  }
 0x153   : > { %4509 = vmatprep.subr.bf16.mxu1 %v11401_v11  ;;  %v11483_v11 = vld [vmem:[%s15836_s2 + $0x230] ss:$12 sps:$4 sm:$0xff]  }
 0x155   : > { %4467 = vmatpush2.bf16.msra.mxu0 %v11396_v12  ;;  %v11486_v12 = vld [vmem:[%s15836_s2 + $0xff4] ss:$12 sps:$4 sm:$0xff]  }
 0x156   : > { %4510 = vmatpush2.bf16.msra.mxu1 %v11399_v13  ;;  %4468 = vmatprep.subr.bf16.mxu0 %v11404_v14  ;;  %v11487_v13 = vld [vmem:[%s15836_s2 + $0x2d8] ss:$12 sps:$4 sm:$0xff]   ;;  %v11484_v14 = vld [vmem:[%s15836_s2 + $0xff0] ss:$12 sps:$4 sm:$0xff]  }
 0x157   : > { %4511 = vmatprep.subr.bf16.mxu1 %v11407_v15  ;;  %v11659_v15 = vld [vmem:[%s12530_s12] ss:$92 sps:$4 sm:$0xff]  }
 0x159   : > { %4469 = vmatpush2.bf16.msra.mxu0 %v11402_v16  ;;  %v11488_v16 = vld [vmem:[%s15836_s2 + $0x218] ss:$12 sps:$4 sm:$0xff]  }
 0x15a   : > { %4512 = vmatpush2.bf16.msra.mxu1 %v11405_v17  ;;  %4524 = vmatprep.subr.bf16.mxu0 %v11416_v18  ;;  %v11491_v17 = vld [vmem:[%s15836_s2 + $0xfdc] ss:$12 sps:$4 sm:$0xff]   ;;  %v11492_v18 = vld [vmem:[%s15836_s2 + $0x2c0] ss:$12 sps:$4 sm:$0xff]  }
 0x15b   : > { %4575 = vmatprep.subr.bf16.mxu1 %v11419_v21  ;;  %v11493_v21 = vld [vmem:[%s15836_s2 + $0x200] ss:$12 sps:$4 sm:$0xff]  }
 0x15c   : > { %4471 = vmatmul.mubr.bf16.vlgmr.msra.gmra.mxu0 %v11408_v19  ;;  %v11489_v19 = vld [vmem:[%s15836_s2 + $0xfd8] ss:$12 sps:$4 sm:$0xff]  }
 0x15d   : > { %4514 = vmatmul.mubr.bf16.vlgmr.msra.gmra.mxu1 %v11411_v20  ;;  %4525 = vmatpush1.bf16.msra.mxu0 %v11414_v22  ;;  %v11660_v20 = vld [vmem:[%s12530_s12 + $0xc] ss:$92 sps:$4 sm:$0xff]   ;;  %v11496_v22 = vld [vmem:[%s15836_s2 + $0xfc4] ss:$12 sps:$4 sm:$0xff]  }
 0x15e   : > { %4576 = vmatpush1.bf16.msra.mxu1 %v11417_v23  ;;  %4526 = vmatprep.subr.bf16.mxu0 %v11422_v24  ;;  %v11497_v23 = vld [vmem:[%s15836_s2 + $0x2a8] ss:$12 sps:$4 sm:$0xff]   ;;  %v11494_v24 = vld [vmem:[%s15836_s2 + $0xfc0] ss:$12 sps:$4 sm:$0xff]  }
 0x15f   : > { %4577 = vmatprep.subr.bf16.mxu1 %v11425_v25  ;;  %4599 = vmatprep.mubr.bf16.mxu1 %v12416_v32  ;;  %v11498_v25 = vld [vmem:[%s15836_s2 + $0x1e8] ss:$12 sps:$4 sm:$0xff]   ;;  %v11507_v32 = vld [vmem:[%s15836_s2 + $0x458] ss:$12 sps:$4 sm:$0xff]  }
 0x160   : > { %4556 = vmatprep.mubr.bf16.mxu0 %v11501_v27  ;;  %v13722_v27 = vld [vmem:[%s12530_s12 + $0x50] ss:$92 sps:$4 sm:$0xff]  }
 0x161   : > { %4527 = vmatpush1.bf16.msra.mxu0 %v11420_v26  ;;  %v11502_v26 = vld [vmem:[%s15836_s2 + $0x290] ss:$12 sps:$4 sm:$0xff]  }
 0x162   : > { %4578 = vmatpush1.bf16.msra.mxu1 %v11423_v28  ;;  %4528 = vmatprep.subr.bf16.mxu0 %v11428_v29  ;;  %v11503_v28 = vld [vmem:[%s15836_s2 + $0x470] ss:$12 sps:$4 sm:$0xff]  }
 0x163   : > { %4579 = vmatprep.subr.bf16.mxu1 %v11431_v30  ;;  %v11504_v29 = vld [vmem:[%s15836_s2 + $0x1d0] ss:$12 sps:$4 sm:$0xff]  }
 0x164   : > { %v11505_v30 = vld [vmem:[%s15836_s2 + $0x3b0] ss:$12 sps:$4 sm:$0xff]  }
 0x165   : > { %4529 = vmatpush1.bf16.msra.mxu0 %v11426_v31  ;;  %v11506_v31 = vld [vmem:[%s15836_s2 + $0x278] ss:$12 sps:$4 sm:$0xff]  }
 0x166   : > { %4580 = vmatpush1.bf16.msra.mxu1 %v11429_v33  ;;  %4530 = vmatprep.subr.bf16.mxu0 %v11434_v34  ;;  %v11508_v33 = vld [vmem:[%s15836_s2 + $0x1b8] ss:$12 sps:$4 sm:$0xff]  }
 0x167   : > { %4581 = vmatprep.subr.bf16.mxu1 %v11437_v35  ;;  %v11509_v34 = vld [vmem:[%s15836_s2 + $0x398] ss:$12 sps:$4 sm:$0xff]   ;;  %v11510_v35 = vld [vmem:[%s15836_s2 + $0x260] ss:$12 sps:$4 sm:$0xff]  }
 0x169   : > { %4531 = vmatpush1.bf16.msra.mxu0 %v11432_v36  ;;  %v11511_v36 = vld [vmem:[%s15836_s2 + $0x440] ss:$12 sps:$4 sm:$0xff]  }
 0x16a   : > { %4582 = vmatpush1.bf16.msra.mxu1 %v11435_v37  ;;  %4532 = vmatprep.subr.bf16.mxu0 %v11440_v38  ;;  %v11512_v37 = vld [vmem:[%s15836_s2 + $0x1a0] ss:$12 sps:$4 sm:$0xff]   ;;  %v11661_v38 = vld [vmem:[%s12530_s12 + $0x14] ss:$92 sps:$4 sm:$0xff]  }
 0x16b   : > { %10382 = vmatprep.subr.bf16.mxu1 %v11441_v39  ;;  %v11513_v39 = vld [vmem:[%s15836_s2 + $0x380] ss:$12 sps:$4 sm:$0xff]  }
 0x16d   : > { %9923 = vmatmul.mubr.msk.bf16.vlgmr.msra.gmra.mxu1 %vm4090_vm0, %v11442_v41  ;;  %4533 = vmatpush1.bf16.msra.mxu0 %v11438_v40  ;;  %v11514_v40 = vld [vmem:[%s15836_s2 + $0x248] ss:$12 sps:$4 sm:$0xff]  }
 0x16e   : > { %10383 = vmatpush3.bf16.msra.mxu1 %v11443_v42  ;;  %4534 = vmatprep.subr.bf16.mxu0 %v11446_v43  ;;  %v11515_v41 = vld [vmem:[%s15836_s2 + $0x428] ss:$12 sps:$4 sm:$0xff]  }
 0x16f   : > { %10384 = vmatprep.subr.bf16.mxu1 %v11447_v44  ;;  %4642 = vmatprep.mubr.bf16.mxu1 %v11658_v50  ;;  %v11516_v42 = vld [vmem:[%s15836_s2 + $0x188] ss:$12 sps:$4 sm:$0xff]   ;;  %v11518_v44 = vld [vmem:[%s15836_s2 + $0x410] ss:$12 sps:$4 sm:$0xff]   ;;  %v11524_v50 = vld [vmem:[%s15836_s2 + $0x338] ss:$12 sps:$4 sm:$0xff]  }
 0x170   : > { %v11517_v43 = vld [vmem:[%s15836_s2 + $0x368] ss:$12 sps:$4 sm:$0xff]  }
 0x171   : > { %4535 = vmatpush1.bf16.msra.mxu0 %v11444_v45  ;;  %v11519_v45 = vld [vmem:[%s15836_s2 + $0x5f0] ss:$12 sps:$4 sm:$0xff]  }
 0x172   : > { %10385 = vmatpush3.bf16.msra.mxu1 %v11448_v46  ;;  %4536 = vmatprep.subr.bf16.mxu0 %v11451_v47  ;;  %v11520_v46 = vld [vmem:[%s15836_s2 + $0x350] ss:$12 sps:$4 sm:$0xff]  }
 0x173   : > { %10386 = vmatprep.subr.bf16.mxu1 %v11452_v48  ;;  %v11521_v47 = vld [vmem:[%s15836_s2 + $0x530] ss:$12 sps:$4 sm:$0xff]   ;;  %v11522_v48 = vld [vmem:[%s15836_s2 + $0x3f8] ss:$12 sps:$4 sm:$0xff]  }
 0x175   : > { %4537 = vmatpush1.bf16.msra.mxu0 %v11449_v49  ;;  %v11523_v49 = vld [vmem:[%s15836_s2 + $0x5d8] ss:$12 sps:$4 sm:$0xff]  }
 0x176   : > { %10387 = vmatpush3.bf16.msra.mxu1 %v11453_v51  ;;  %4538 = vmatprep.subr.bf16.mxu0 %v11456_v52  ;;  %v11662_v51 = vld [vmem:[%s12530_s12 + $0x8] ss:$92 sps:$4 sm:$0xff]  }
 0x177   : > { %10388 = vmatprep.subr.bf16.mxu1 %v11457_v53  ;;  %v11525_v52 = vld [vmem:[%s15836_s2 + $0x518] ss:$12 sps:$4 sm:$0xff]   ;;  %v11526_v53 = vld [vmem:[%s15836_s2 + $0x3e0] ss:$12 sps:$4 sm:$0xff]  }
 0x179   : > { %4539 = vmatpush1.bf16.msra.mxu0 %v11454_v54  ;;  %v11527_v54 = vld [vmem:[%s15836_s2 + $0x5c0] ss:$12 sps:$4 sm:$0xff]  }
 0x17a   : > { %10389 = vmatpush3.bf16.msra.mxu1 %v11458_v55  ;;  %4540 = vmatprep.subr.bf16.mxu0 %v11461_v56  ;;  %v11528_v55 = vld [vmem:[%s15836_s2 + $0x320] ss:$12 sps:$4 sm:$0xff]   ;;  %v11663_v56 = vld [vmem:[%s12530_s12 + $0x1c] ss:$92 sps:$4 sm:$0xff]  }
 0x17b   : > { %10390 = vmatprep.subr.bf16.mxu1 %v11462_v57  ;;  %v11529_v57 = vld [vmem:[%s15836_s2 + $0x500] ss:$12 sps:$4 sm:$0xff]  }
 0x17d   : > { %4541 = vmatpush2.bf16.msra.mxu0 %v11459_v58  ;;  %v11530_v58 = vld [vmem:[%s15836_s2 + $0x3c8] ss:$12 sps:$4 sm:$0xff]  }
 0x17e   : > { %10391 = vmatpush3.bf16.msra.mxu1 %v11463_v59  ;;  %4542 = vmatprep.subr.bf16.mxu0 %v11466_v60  ;;  %v11531_v59 = vld [vmem:[%s15836_s2 + $0x5a8] ss:$12 sps:$4 sm:$0xff]  }
 0x17f   : > { %10392 = vmatprep.subr.bf16.mxu1 %v11467_v61  ;;  %v11532_v60 = vld [vmem:[%s15836_s2 + $0x308] ss:$12 sps:$4 sm:$0xff]  }
 0x180   : > { %v11533_v61 = vld [vmem:[%s15836_s2 + $0x4e8] ss:$12 sps:$4 sm:$0xff]  }
 0x181   : > { %4543 = vmatpush2.bf16.msra.mxu0 %v11464_v62  ;;  %v11534_v62 = vld [vmem:[%s15836_s2 + $0x590] ss:$12 sps:$4 sm:$0xff]  }
 0x182   : > { %10393 = vmatpush3.bf16.msra.mxu1 %v11468_v63  ;;  %4544 = vmatprep.subr.bf16.mxu0 %v11471_v0  ;;  %v11535_v63 = vld [vmem:[%s15836_s2 + $0x770] ss:$12 sps:$4 sm:$0xff]  }
 0x183   : > { %10394 = vmatprep.subr.bf16.mxu1 %v11472_v1  ;;  %v11536_v0 = vld [vmem:[%s15836_s2 + $0x4d0] ss:$12 sps:$4 sm:$0xff]  }
 0x184   : > { %v11537_v1 = vld [vmem:[%s15836_s2 + $0x6b0] ss:$12 sps:$4 sm:$0xff]  }
 0x185   : > { %4545 = vmatpush2.bf16.msra.mxu0 %v11469_v2  ;;  %v11538_v2 = vld [vmem:[%s15836_s2 + $0x578] ss:$12 sps:$4 sm:$0xff]  }
 0x186   : > { %10395 = vmatpush3.bf16.msra.mxu1 %v11473_v3  ;;  %4546 = vmatprep.subr.bf16.mxu0 %v11476_v4  ;;  %v11539_v3 = vld [vmem:[%s15836_s2 + $0x758] ss:$12 sps:$4 sm:$0xff]  }
 0x187   : > { %10396 = vmatprep.subr.bf16.mxu1 %v11477_v5  ;;  %v11540_v4 = vld [vmem:[%s15836_s2 + $0x4b8] ss:$12 sps:$4 sm:$0xff]   ;;  %v11664_v5 = vld [vmem:[%s12530_s12 + $0x10] ss:$92 sps:$4 sm:$0xff]  }
 0x189   : > { %4547 = vmatpush2.bf16.msra.mxu0 %v11474_v6  ;;  %v11541_v6 = vld [vmem:[%s15836_s2 + $0x698] ss:$12 sps:$4 sm:$0xff]  }
 0x18a   : > { %10397 = vmatpush3.bf16.msra.mxu1 %v11478_v7  ;;  %4548 = vmatprep.subr.bf16.mxu0 %v11481_v8  ;;  %v11542_v7 = vld [vmem:[%s15836_s2 + $0x560] ss:$12 sps:$4 sm:$0xff]  }
 0x18b   : > { %10404 = vmatprep.subr.bf16.mxu1 %v11482_v9  ;;  %v11543_v8 = vld [vmem:[%s15836_s2 + $0x740] ss:$12 sps:$4 sm:$0xff]  }
 0x18c   : > { %v11665_v9 = vld [vmem:[%s12530_s12 + $0x24] ss:$92 sps:$4 sm:$0xff]  }
 0x18d   : > { %4643 = vmatmul.mubr.bf16.vlgmr.msra.gmra.mxu1 %v11659_v15  ;;  %4549 = vmatpush2.bf16.msra.mxu0 %v11479_v10  ;;  %v11544_v10 = vld [vmem:[%s15836_s2 + $0x4a0] ss:$12 sps:$4 sm:$0xff]   ;;  %v11549_v15 = vld [vmem:[%s15836_s2 + $0x668] ss:$12 sps:$4 sm:$0xff]  }
 0x18e   : > { %10405 = vmatpush3.bf16.msra.mxu1 %v11483_v11  ;;  %4550 = vmatprep.subr.bf16.mxu0 %v11486_v12  ;;  %v11545_v11 = vld [vmem:[%s15836_s2 + $0x680] ss:$12 sps:$4 sm:$0xff]   ;;  %v11546_v12 = vld [vmem:[%s15836_s2 + $0x548] ss:$12 sps:$4 sm:$0xff]  }
 0x18f   : > { %10406 = vmatprep.subr.bf16.mxu1 %v11487_v13  ;;  %4683 = vmatprep.mubr.bf16.mxu1 %v11660_v20  ;;  %v11547_v13 = vld [vmem:[%s15836_s2 + $0x728] ss:$12 sps:$4 sm:$0xff]   ;;  %v11554_v20 = vld [vmem:[%s15836_s2 + $0x6f8] ss:$12 sps:$4 sm:$0xff]  }
 0x191   : > { %4551 = vmatpush2.bf16.msra.mxu0 %v11484_v14  ;;  %v11548_v14 = vld [vmem:[%s15836_s2 + $0x488] ss:$12 sps:$4 sm:$0xff]  }
 0x192   : > { %10407 = vmatpush3.bf16.msra.mxu1 %v11488_v16  ;;  %4552 = vmatprep.subr.bf16.mxu0 %v11491_v17  ;;  %v11550_v16 = vld [vmem:[%s15836_s2 + $0x710] ss:$12 sps:$4 sm:$0xff]  }
 0x193   : > { %10408 = vmatprep.subr.bf16.mxu1 %v11492_v18  ;;  %v11551_v17 = vld [vmem:[%s15836_s2 + $0x8f0] ss:$12 sps:$4 sm:$0xff]  }
 0x194   : > { %v11552_v18 = vld [vmem:[%s15836_s2 + $0x650] ss:$12 sps:$4 sm:$0xff]  }
 0x195   : > { %4553 = vmatpush2.bf16.msra.mxu0 %v11489_v19  ;;  %v11553_v19 = vld [vmem:[%s15836_s2 + $0x830] ss:$12 sps:$4 sm:$0xff]  }
 0x196   : > { %10409 = vmatpush3.bf16.msra.mxu1 %v11493_v21  ;;  %4554 = vmatprep.subr.bf16.mxu0 %v11496_v22  ;;  %v11555_v21 = vld [vmem:[%s15836_s2 + $0x8d8] ss:$12 sps:$4 sm:$0xff]  }
 0x197   : > { %10410 = vmatprep.subr.bf16.mxu1 %v11497_v23  ;;  %v11666_v22 = vld [vmem:[%s12530_s12 + $0x18] ss:$92 sps:$4 sm:$0xff]  }
 0x198   : > { %v11556_v23 = vld [vmem:[%s15836_s2 + $0x638] ss:$12 sps:$4 sm:$0xff]  }
 0x199   : > { %4555 = vmatpush2.bf16.msra.mxu0 %v11494_v24  ;;  %v11557_v24 = vld [vmem:[%s15836_s2 + $0x818] ss:$12 sps:$4 sm:$0xff]  }
 0x19a   : > { %10411 = vmatpush3.bf16.msra.mxu1 %v11498_v25  ;;  %10426 = vmatprep.subr.bf16.mxu0 %v11503_v28  ;;  %v11558_v25 = vld [vmem:[%s15836_s2 + $0x6e0] ss:$12 sps:$4 sm:$0xff]  }
 0x19b   : > { %10412 = vmatprep.subr.bf16.mxu1 %v11502_v26  ;;  %v11559_v26 = vld [vmem:[%s15836_s2 + $0x8c0] ss:$12 sps:$4 sm:$0xff]  }
 0x19c   : > { %4557 = vmatmul.mubr.bf16.vlgmr.msra.gmra.mxu0 %v13722_v27  ;;  %v11667_v28 = vld [vmem:[%s12530_s12 + $0x2c] ss:$92 sps:$4 sm:$0xff]  }
 0x19d   : > { %10427 = vmatpush3.bf16.msra.mxu0 %v11505_v30  ;;  %4724 = vmatprep.mubr.bf16.mxu0 %v11661_v38  ;;  %v11561_v30 = vld [vmem:[%s15836_s2 + $0x800] ss:$12 sps:$4 sm:$0xff]   ;;  %v11569_v38 = vld [vmem:[%s15836_s2 + $0x9b0] ss:$12 sps:$4 sm:$0xff]  }
 0x19e   : > { %10413 = vmatpush3.bf16.msra.mxu1 %v11504_v29  ;;  %10428 = vmatprep.subr.bf16.mxu0 %v11507_v32  ;;  %v11560_v29 = vld [vmem:[%s15836_s2 + $0x620] ss:$12 sps:$4 sm:$0xff]   ;;  %v11563_v32 = vld [vmem:[%s15836_s2 + $0x8a8] ss:$12 sps:$4 sm:$0xff]  }
 0x19f   : > { %10414 = vmatprep.subr.bf16.mxu1 %v11506_v31  ;;  %v11562_v31 = vld [vmem:[%s15836_s2 + $0x6c8] ss:$12 sps:$4 sm:$0xff]  }
 0x1a1   : > { %10429 = vmatpush3.bf16.msra.mxu0 %v11509_v34  ;;  %v11565_v34 = vld [vmem:[%s15836_s2 + $0x7e8] ss:$12 sps:$4 sm:$0xff]  }
 0x1a2   : > { %10415 = vmatpush3.bf16.msra.mxu1 %v11508_v33  ;;  %10430 = vmatprep.subr.bf16.mxu0 %v11511_v36  ;;  %v11564_v33 = vld [vmem:[%s15836_s2 + $0x608] ss:$12 sps:$4 sm:$0xff]   ;;  %v11567_v36 = vld [vmem:[%s15836_s2 + $0xa70] ss:$12 sps:$4 sm:$0xff]  }
 0x1a3   : > { %10416 = vmatprep.subr.bf16.mxu1 %v11510_v35  ;;  %v11566_v35 = vld [vmem:[%s15836_s2 + $0x890] ss:$12 sps:$4 sm:$0xff]  }
 0x1a5   : > { %10431 = vmatpush3.bf16.msra.mxu0 %v11513_v39  ;;  %v11570_v39 = vld [vmem:[%s15836_s2 + $0x878] ss:$12 sps:$4 sm:$0xff]  }
 0x1a6   : > { %10417 = vmatpush3.bf16.msra.mxu1 %v11512_v37  ;;  %10432 = vmatprep.subr.bf16.mxu0 %v11515_v41  ;;  %v11568_v37 = vld [vmem:[%s15836_s2 + $0x7d0] ss:$12 sps:$4 sm:$0xff]  }
 0x1a7   : > { %10418 = vmatprep.subr.bf16.mxu1 %v11514_v40  ;;  %v11571_v40 = vld [vmem:[%s15836_s2 + $0xa58] ss:$12 sps:$4 sm:$0xff]   ;;  %v11668_v41 = vld [vmem:[%s12530_s12 + $0x20] ss:$92 sps:$4 sm:$0xff]  }
 0x1a9   : > { %10433 = vmatpush3.bf16.msra.mxu0 %v11517_v43  ;;  %v11573_v43 = vld [vmem:[%s15836_s2 + $0x998] ss:$12 sps:$4 sm:$0xff]  }
 0x1aa   : > { %10419 = vmatpush3.bf16.msra.mxu1 %v11516_v42  ;;  %10434 = vmatprep.subr.bf16.mxu0 %v11518_v44  ;;  %v11572_v42 = vld [vmem:[%s15836_s2 + $0x7b8] ss:$12 sps:$4 sm:$0xff]   ;;  %v11574_v44 = vld [vmem:[%s15836_s2 + $0x860] ss:$12 sps:$4 sm:$0xff]  }
 0x1ab   : > { %10448 = vmatprep.subr.bf16.mxu1 %v11519_v45  ;;  %v11575_v45 = vld [vmem:[%s15836_s2 + $0xa40] ss:$12 sps:$4 sm:$0xff]  }
 0x1ad   : > { %4684 = vmatmul.mubr.bf16.vlgmr.msra.gmra.mxu1 %v11662_v51  ;;  %10435 = vmatpush3.bf16.msra.mxu0 %v11520_v46  ;;  %v11669_v46 = vld [vmem:[%s12530_s12 + $0x34] ss:$92 sps:$4 sm:$0xff]  }
 0x1ae   : > { %10449 = vmatpush3.bf16.msra.mxu1 %v11521_v47  ;;  %10436 = vmatprep.subr.bf16.mxu0 %v11522_v48  ;;  %v11576_v47 = vld [vmem:[%s15836_s2 + $0x7a0] ss:$12 sps:$4 sm:$0xff]   ;;  %v11580_v51 = vld [vmem:[%s15836_s2 + $0x788] ss:$12 sps:$4 sm:$0xff]  }
 0x1af   : > { %10450 = vmatprep.subr.bf16.mxu1 %v11523_v49  ;;  %4765 = vmatprep.mubr.bf16.mxu1 %v11663_v56  ;;  %v11577_v48 = vld [vmem:[%s15836_s2 + $0x980] ss:$12 sps:$4 sm:$0xff]   ;;  %v11578_v49 = vld [vmem:[%s15836_s2 + $0x848] ss:$12 sps:$4 sm:$0xff]   ;;  %v11585_v56 = vld [vmem:[%s15836_s2 + $0xb30] ss:$12 sps:$4 sm:$0xff]  }
 0x1b1   : > { %10437 = vmatpush3.bf16.msra.mxu0 %v11524_v50  ;;  %v11579_v50 = vld [vmem:[%s15836_s2 + $0xa28] ss:$12 sps:$4 sm:$0xff]  }
 0x1b2   : > { %10451 = vmatpush3.bf16.msra.mxu1 %v11525_v52  ;;  %10438 = vmatprep.subr.bf16.mxu0 %v11526_v53  ;;  %v11581_v52 = vld [vmem:[%s15836_s2 + $0x968] ss:$12 sps:$4 sm:$0xff]   ;;  %v11582_v53 = vld [vmem:[%s15836_s2 + $0xa10] ss:$12 sps:$4 sm:$0xff]  }
 0x1b3   : > { %10452 = vmatprep.subr.bf16.mxu1 %v11527_v54  ;;  %v11583_v54 = vld [vmem:[%s15836_s2 + $0xbf0] ss:$12 sps:$4 sm:$0xff]  }
 0x1b5   : > { %10439 = vmatpush3.bf16.msra.mxu0 %v11528_v55  ;;  %v11584_v55 = vld [vmem:[%s15836_s2 + $0x950] ss:$12 sps:$4 sm:$0xff]  }
 0x1b6   : > { %10453 = vmatpush3.bf16.msra.mxu1 %v11529_v57  ;;  %10440 = vmatprep.subr.bf16.mxu0 %v11530_v58  ;;  %v11586_v57 = vld [vmem:[%s15836_s2 + $0x9f8] ss:$12 sps:$4 sm:$0xff]  }
 0x1b7   : > { %10454 = vmatprep.subr.bf16.mxu1 %v11531_v59  ;;  %v11587_v58 = vld [vmem:[%s15836_s2 + $0xbd8] ss:$12 sps:$4 sm:$0xff]  }
 0x1b8   : > { %v11670_v59 = vld [vmem:[%s12530_s12 + $0x28] ss:$92 sps:$4 sm:$0xff]  }
 0x1b9   : > { %10441 = vmatpush3.bf16.msra.mxu0 %v11532_v60  ;;  %v11588_v60 = vld [vmem:[%s15836_s2 + $0x938] ss:$12 sps:$4 sm:$0xff]  }
 0x1ba   : > { %10455 = vmatpush3.bf16.msra.mxu1 %v11533_v61  ;;  %10470 = vmatprep.subr.bf16.mxu0 %v11535_v63  ;;  %v11589_v61 = vld [vmem:[%s15836_s2 + $0xb18] ss:$12 sps:$4 sm:$0xff]   ;;  %v11591_v63 = vld [vmem:[%s15836_s2 + $0xbc0] ss:$12 sps:$4 sm:$0xff]  }
 0x1bb   : > { %10456 = vmatprep.subr.bf16.mxu1 %v11534_v62  ;;  %v11590_v62 = vld [vmem:[%s15836_s2 + $0x9e0] ss:$12 sps:$4 sm:$0xff]  }
 0x1bc   : > { %4725 = vmatmul.mubr.bf16.vlgmr.msra.gmra.mxu0 %v11664_v5  ;;  %v11596_v5 = vld [vmem:[%s15836_s2 + $0x908] ss:$12 sps:$4 sm:$0xff]  }
 0x1bd   : > { %10471 = vmatpush3.bf16.msra.mxu0 %v11537_v1  ;;  %4806 = vmatprep.mubr.bf16.mxu0 %v11665_v9  ;;  %v11592_v1 = vld [vmem:[%s15836_s2 + $0x920] ss:$12 sps:$4 sm:$0xff]   ;;  %v11600_v9 = vld [vmem:[%s15836_s2 + $0xad0] ss:$12 sps:$4 sm:$0xff]  }
 0x1be   : > { %10457 = vmatpush3.bf16.msra.mxu1 %v11536_v0  ;;  %10472 = vmatprep.subr.bf16.mxu0 %v11539_v3  ;;  %v11671_v0 = vld [vmem:[%s12530_s12 + $0x3c] ss:$92 sps:$4 sm:$0xff]   ;;  %v11594_v3 = vld [vmem:[%s15836_s2 + $0x9c8] ss:$12 sps:$4 sm:$0xff]  }
 0x1bf   : > { %10458 = vmatprep.subr.bf16.mxu1 %v11538_v2  ;;  %v11593_v2 = vld [vmem:[%s15836_s2 + $0xb00] ss:$12 sps:$4 sm:$0xff]  }
 0x1c1   : > { %10473 = vmatpush3.bf16.msra.mxu0 %v11541_v6  ;;  %v11597_v6 = vld [vmem:[%s15836_s2 + $0xae8] ss:$12 sps:$4 sm:$0xff]  }
 0x1c2   : > { %10459 = vmatpush3.bf16.msra.mxu1 %v11540_v4  ;;  %10474 = vmatprep.subr.bf16.mxu0 %v11543_v8  ;;  %v11595_v4 = vld [vmem:[%s15836_s2 + $0xba8] ss:$12 sps:$4 sm:$0xff]   ;;  %v11599_v8 = vld [vmem:[%s15836_s2 + $0xd70] ss:$12 sps:$4 sm:$0xff]  }
 0x1c3   : > { %10460 = vmatprep.subr.bf16.mxu1 %v11542_v7  ;;  %v11598_v7 = vld [vmem:[%s15836_s2 + $0xb90] ss:$12 sps:$4 sm:$0xff]  }
 0x1c5   : > { %10475 = vmatpush3.bf16.msra.mxu0 %v11545_v11  ;;  %v11602_v11 = vld [vmem:[%s15836_s2 + $0xb78] ss:$12 sps:$4 sm:$0xff]  }
 0x1c6   : > { %10461 = vmatpush3.bf16.msra.mxu1 %v11544_v10  ;;  %10476 = vmatprep.subr.bf16.mxu0 %v11547_v13  ;;  %v11601_v10 = vld [vmem:[%s15836_s2 + $0xcb0] ss:$12 sps:$4 sm:$0xff]  }
 0x1c7   : > { %10462 = vmatprep.subr.bf16.mxu1 %v11546_v12  ;;  %v11603_v12 = vld [vmem:[%s15836_s2 + $0xd58] ss:$12 sps:$4 sm:$0xff]   ;;  %v11672_v13 = vld [vmem:[%s12530_s12 + $0x30] ss:$92 sps:$4 sm:$0xff]  }
 0x1c9   : > { %10477 = vmatpush3.bf16.msra.mxu0 %v11549_v15  ;;  %v11605_v15 = vld [vmem:[%s15836_s2 + $0xc98] ss:$12 sps:$4 sm:$0xff]  }
 0x1ca   : > { %10463 = vmatpush3.bf16.msra.mxu1 %v11548_v14  ;;  %10478 = vmatprep.subr.bf16.mxu0 %v11550_v16  ;;  %v11604_v14 = vld [vmem:[%s15836_s2 + $0xab8] ss:$12 sps:$4 sm:$0xff]   ;;  %v11606_v16 = vld [vmem:[%s15836_s2 + $0xb60] ss:$12 sps:$4 sm:$0xff]  }
 0x1cb   : > { %10492 = vmatprep.subr.bf16.mxu1 %v11551_v17  ;;  %v11607_v17 = vld [vmem:[%s15836_s2 + $0xd40] ss:$12 sps:$4 sm:$0xff]  }
 0x1cd   : > { %4766 = vmatmul.mubr.bf16.vlgmr.msra.gmra.mxu1 %v11666_v22  ;;  %10479 = vmatpush3.bf16.msra.mxu0 %v11552_v18  ;;  %v11673_v18 = vld [vmem:[%s12530_s12 + $0x44] ss:$92 sps:$4 sm:$0xff]   ;;  %v11611_v22 = vld [vmem:[%s15836_s2 + $0xd28] ss:$12 sps:$4 sm:$0xff]  }
 0x1ce   : > { %10493 = vmatpush3.bf16.msra.mxu1 %v11553_v19  ;;  %10480 = vmatprep.subr.bf16.mxu0 %v11554_v20  ;;  %v11608_v19 = vld [vmem:[%s15836_s2 + $0xaa0] ss:$12 sps:$4 sm:$0xff]  }
 0x1cf   : > { %10494 = vmatprep.subr.bf16.mxu1 %v11555_v21  ;;  %4847 = vmatprep.mubr.bf16.mxu1 %v11667_v28  ;;  %v11609_v20 = vld [vmem:[%s15836_s2 + $0xc80] ss:$12 sps:$4 sm:$0xff]   ;;  %v11610_v21 = vld [vmem:[%s15836_s2 + $0xb48] ss:$12 sps:$4 sm:$0xff]   ;;  %v11616_v28 = vld [vmem:[%s15836_s2 + $0xc50] ss:$12 sps:$4 sm:$0xff]  }
 0x1d1   : > { %10481 = vmatpush3.bf16.msra.mxu0 %v11556_v23  ;;  %v11612_v23 = vld [vmem:[%s15836_s2 + $0xa88] ss:$12 sps:$4 sm:$0xff]  }
 0x1d2   : > { %10495 = vmatpush3.bf16.msra.mxu1 %v11557_v24  ;;  %10482 = vmatprep.subr.bf16.mxu0 %v11558_v25  ;;  %v11613_v24 = vld [vmem:[%s15836_s2 + $0xc68] ss:$12 sps:$4 sm:$0xff]   ;;  %v11614_v25 = vld [vmem:[%s15836_s2 + $0xd10] ss:$12 sps:$4 sm:$0xff]  }
 0x1d3   : > { %10496 = vmatprep.subr.bf16.mxu1 %v11559_v26  ;;  %v11615_v26 = vld [vmem:[%s15836_s2 + $0xef0] ss:$12 sps:$4 sm:$0xff]  }
 0x1d5   : > { %10483 = vmatpush3.bf16.msra.mxu0 %v11560_v29  ;;  %v11617_v29 = vld [vmem:[%s15836_s2 + $0xe30] ss:$12 sps:$4 sm:$0xff]  }
 0x1d6   : > { %10497 = vmatpush3.bf16.msra.mxu1 %v11561_v30  ;;  %10484 = vmatprep.subr.bf16.mxu0 %v11562_v31  ;;  %v11618_v30 = vld [vmem:[%s15836_s2 + $0xcf8] ss:$12 sps:$4 sm:$0xff]  }
 0x1d7   : > { %10498 = vmatprep.subr.bf16.mxu1 %v11563_v32  ;;  %v11619_v31 = vld [vmem:[%s15836_s2 + $0xed8] ss:$12 sps:$4 sm:$0xff]  }
 0x1d8   : > { %v11674_v32 = vld [vmem:[%s12530_s12 + $0x38] ss:$92 sps:$4 sm:$0xff]  }
 0x1d9   : > { %10485 = vmatpush3.bf16.msra.mxu0 %v11564_v33  ;;  %v11620_v33 = vld [vmem:[%s15836_s2 + $0xc38] ss:$12 sps:$4 sm:$0xff]  }
 0x1da   : > { %10499 = vmatpush3.bf16.msra.mxu1 %v11565_v34  ;;  %10514 = vmatprep.subr.bf16.mxu0 %v11567_v36  ;;  %v11621_v34 = vld [vmem:[%s15836_s2 + $0xe18] ss:$12 sps:$4 sm:$0xff]   ;;  %v11623_v36 = vld [vmem:[%s15836_s2 + $0xec0] ss:$12 sps:$4 sm:$0xff]  }
 0x1db   : > { %10500 = vmatprep.subr.bf16.mxu1 %v11566_v35  ;;  %v11622_v35 = vld [vmem:[%s15836_s2 + $0xce0] ss:$12 sps:$4 sm:$0xff]  }
 0x1dc   : > { %4807 = vmatmul.mubr.bf16.vlgmr.msra.gmra.mxu0 %v11668_v41  ;;  %v11626_v41 = vld [vmem:[%s15836_s2 + $0xcc8] ss:$12 sps:$4 sm:$0xff]  }
 0x1dd   : > { %10515 = vmatpush3.bf16.msra.mxu0 %v11569_v38  ;;  %4888 = vmatprep.mubr.bf16.mxu0 %v11669_v46  ;;  %v11624_v38 = vld [vmem:[%s15836_s2 + $0xc20] ss:$12 sps:$4 sm:$0xff]  }
 0x1de   : > { %10501 = vmatpush3.bf16.msra.mxu1 %v11568_v37  ;;  %10516 = vmatprep.subr.bf16.mxu0 %v11571_v40  ;;  %v11675_v37 = vld [vmem:[%s12530_s12 + $0x4c] ss:$92 sps:$4 sm:$0xff]   ;;  %v14109_v40 = vpop.f32.mrf.mxu1 }
 0x1df   : > { %10502 = vmatprep.subr.bf16.mxu1 %v11570_v39  ;;  %v11625_v39 = vld [vmem:[%s15836_s2 + $0xe00] ss:$12 sps:$4 sm:$0xff]  }
 0x1e0   : > { %v14125_v46 = vpop.f32.mrf.mxu1 }
 0x1e1   : > { %10517 = vmatpush3.bf16.msra.mxu0 %v11573_v43  ;;  %v11628_v43 = vld [vmem:[%s15836_s2 + $0xc08] ss:$12 sps:$4 sm:$0xff]  }
 0x1e2   : > { %10503 = vmatpush3.bf16.msra.mxu1 %v11572_v42  ;;  %10518 = vmatprep.subr.bf16.mxu0 %v11575_v45  ;;  %v11627_v42 = vld [vmem:[%s15836_s2 + $0xea8] ss:$12 sps:$4 sm:$0xff]   ;;  %v14123_v45 = vpop.f32.mrf.mxu0 }
 0x1e3   : > { %10504 = vmatprep.subr.bf16.mxu1 %v11574_v44  ;;  %v11629_v44 = vld [vmem:[%s15836_s2 + $0xde8] ss:$12 sps:$4 sm:$0xff]  }
 0x1e5   : > { %10519 = vmatpush3.bf16.msra.mxu0 %v11577_v48  ;;  %v11631_v48 = vld [vmem:[%s15836_s2 + $0x1070] ss:$12 sps:$4 sm:$0xff]  }
 0x1e6   : > { %10505 = vmatpush3.bf16.msra.mxu1 %v11576_v47  ;;  %10520 = vmatprep.subr.bf16.mxu0 %v11579_v50  ;;  %v11630_v47 = vld [vmem:[%s15836_s2 + $0xe90] ss:$12 sps:$4 sm:$0xff]  }
 0x1e7   : > { %10506 = vmatprep.subr.bf16.mxu1 %v11578_v49  ;;  %v11632_v49 = vld [vmem:[%s15836_s2 + $0xdd0] ss:$12 sps:$4 sm:$0xff]  }
 0x1e8   : > { %v11633_v50 = vld [vmem:[%s15836_s2 + $0xfb0] ss:$12 sps:$4 sm:$0xff]  }
 0x1e9   : > { %10521 = vmatpush3.bf16.msra.mxu0 %v11581_v52  ;;  %v14141_v52 = vpop.f32.mrf.mxu1 }
 0x1ea   : > { %10507 = vmatpush3.bf16.msra.mxu1 %v11580_v51  ;;  %10522 = vmatprep.subr.bf16.mxu0 %v11582_v53  ;;  %v14139_v51 = vpop.f32.mrf.mxu0  ;;  %v11634_v53 = vld [vmem:[%s15836_s2 + $0xe78] ss:$12 sps:$4 sm:$0xff]  }
 0x1eb   : > { %10536 = vmatprep.subr.bf16.mxu1 %v11583_v54  ;;  %v11635_v54 = vld [vmem:[%s15836_s2 + $0x1058] ss:$12 sps:$4 sm:$0xff]  }
 0x1ed   : > { %4848 = vmatmul.mubr.bf16.vlgmr.msra.gmra.mxu1 %v11670_v59  ;;  %10523 = vmatpush3.bf16.msra.mxu0 %v11584_v55  ;;  %v11676_v55 = vld [vmem:[%s12530_s12 + $0x40] ss:$92 sps:$4 sm:$0xff]   ;;  %v14158_v59 = vpop.f32.mrf.mxu1 }
 0x1ee   : > { %10537 = vmatpush3.bf16.msra.mxu1 %v11585_v56  ;;  %10524 = vmatprep.subr.bf16.mxu0 %v11586_v57  ;;  %v11636_v56 = vld [vmem:[%s15836_s2 + $0xdb8] ss:$12 sps:$4 sm:$0xff]  }
 0x1ef   : > { %10538 = vmatprep.subr.bf16.mxu1 %v11587_v58  ;;  %4929 = vmatprep.mubr.bf16.mxu1 %v11671_v0  ;;  %v11637_v57 = vld [vmem:[%s15836_s2 + $0xf98] ss:$12 sps:$4 sm:$0xff]   ;;  %v14156_v58 = vpop.f32.mrf.mxu0  ;;  %v11640_v0 = vld [vmem:[%s15836_s2 + $0xda0] ss:$12 sps:$4 sm:$0xff]  }
 0x1f1   : > { %10525 = vmatpush3.bf16.msra.mxu0 %v11588_v60  ;;  %v11638_v60 = vld [vmem:[%s15836_s2 + $0xe60] ss:$12 sps:$4 sm:$0xff]  }
 0x1f2   : > { %10539 = vmatpush3.bf16.msra.mxu1 %v11589_v61  ;;  %10526 = vmatprep.subr.bf16.mxu0 %v11590_v62  ;;  %v11639_v61 = vld [vmem:[%s15836_s2 + $0x1040] ss:$12 sps:$4 sm:$0xff]   ;;  %v11677_v62 = vld [vmem:[%s12530_s12 + $0x54] ss:$92 sps:$4 sm:$0xff]  }
 0x1f3   : > { %10540 = vmatprep.subr.bf16.mxu1 %v11591_v63  ;;  %v14167_v63 = vpop.f32.mrf.mxu1 }
 0x1f5   : > { %10527 = vmatpush3.bf16.msra.mxu0 %v11592_v1  ;;  %v11641_v1 = vld [vmem:[%s15836_s2 + $0xf80] ss:$12 sps:$4 sm:$0xff]  }
 0x1f6   : > { %10541 = vmatpush3.bf16.msra.mxu1 %v11593_v2  ;;  %10528 = vmatprep.subr.bf16.mxu0 %v11594_v3  ;;  %v14175_v2 = vpop.f32.mrf.mxu0  ;;  %v11642_v3 = vld [vmem:[%s15836_s2 + $0xe48] ss:$12 sps:$4 sm:$0xff]  }
 0x1f7   : > { %10542 = vmatprep.subr.bf16.mxu1 %v11595_v4  ;;  %v11643_v4 = vld [vmem:[%s15836_s2 + $0x1028] ss:$12 sps:$4 sm:$0xff]  }
 0x1f9   : > { %10529 = vmatpush3.bf16.msra.mxu0 %v11596_v5  ;;  %v14183_v5 = vpop.f32.mrf.mxu0 }
 0x1fa   : > { %10543 = vmatpush3.bf16.msra.mxu1 %v11597_v6  ;;  %10558 = vmatprep.subr.bf16.mxu0 %v11599_v8  ;;  %v14185_v6 = vpop.f32.mrf.mxu1  ;;  %v11645_v8 = vld [vmem:[%s15836_s2 + $0xf68] ss:$12 sps:$4 sm:$0xff]  }
 0x1fb   : > { %10544 = vmatprep.subr.bf16.mxu1 %v11598_v7  ;;  %v11644_v7 = vld [vmem:[%s15836_s2 + $0xd88] ss:$12 sps:$4 sm:$0xff]  }
 0x1fc   : > { %4889 = vmatmul.mubr.bf16.vlgmr.msra.gmra.mxu0 %v11672_v13  ;;  %v11648_v13 = vld [vmem:[%s15836_s2 + $0x10d0] ss:$12 sps:$4 sm:$0xff]  }
 0x1fd   : > { %10559 = vmatpush3.bf16.msra.mxu0 %v11601_v10  ;;  %4970 = vmatprep.mubr.bf16.mxu0 %v11673_v18  ;;  %v4216_v10 = vpop.f32.mrf.mxu0  ;;  %v11678_v18 = vld [vmem:[%s12530_s12 + $0x48] ss:$92 sps:$4 sm:$0xff]  }
 0x1fe   : > { %10545 = vmatpush3.bf16.msra.mxu1 %v11600_v9  ;;  %10560 = vmatprep.subr.bf16.mxu0 %v11603_v12  ;;  %v11646_v9 = vld [vmem:[%s15836_s2 + $0x1010] ss:$12 sps:$4 sm:$0xff]  }
 0x1ff   : > { %10546 = vmatprep.subr.bf16.mxu1 %v11602_v11  ;;  %v14196_v11 = vpop.f32.mrf.mxu1  ;;  %v11647_v12 = vld [vmem:[%s15836_s2 + $0xf50] ss:$12 sps:$4 sm:$0xff]  }
 0x201   : > { %10561 = vmatpush3.bf16.msra.mxu0 %v11605_v15  ;;  %v11649_v15 = vld [vmem:[%s15836_s2 + $0xff8] ss:$12 sps:$4 sm:$0xff]  }
 0x202   : > { %10547 = vmatpush3.bf16.msra.mxu1 %v11604_v14  ;;  %10562 = vmatprep.subr.bf16.mxu0 %v11607_v17  ;;  %v12417_v14 = vmov 0.0   ;;  %v14207_v17 = vpop.f32.mrf.mxu1 }
 0x203   : > { %10548 = vmatprep.subr.bf16.mxu1 %v11606_v16  ;;  %v4218_v16 = vpop.f32.mrf.mxu0 }
 0x205   : > { %10563 = vmatpush3.bf16.msra.mxu0 %v11609_v20  ;;  %v11651_v20 = vld [vmem:[%s15836_s2 + $0x10b8] ss:$12 sps:$4 sm:$0xff]  }
 0x206   : > { %10549 = vmatpush3.bf16.msra.mxu1 %v11608_v19  ;;  %10564 = vmatprep.subr.bf16.mxu0 %v11611_v22  ;;  %v11650_v19 = vld [vmem:[%s15836_s2 + $0xf38] ss:$12 sps:$4 sm:$0xff]   ;;  %v11652_v22 = vld [vmem:[%s15836_s2 + $0xfe0] ss:$12 sps:$4 sm:$0xff]  }
 0x207   : > { %10550 = vmatprep.subr.bf16.mxu1 %v11610_v21  ;;  %v4343_v21 = vpop.f32.mrf.mxu1 }
 0x209   : > { %10565 = vmatpush3.bf16.msra.mxu0 %v11613_v24  ;;  %v11653_v24 = vld [vmem:[%s15836_s2 + $0xf20] ss:$12 sps:$4 sm:$0xff]  }
 0x20a   : > { %10551 = vmatpush3.bf16.msra.mxu1 %v11612_v23  ;;  %10566 = vmatprep.subr.bf16.mxu0 %v11614_v25  ;;  %v4220_v23 = vpop.f32.mrf.mxu0  ;;  %v11654_v25 = vld [vmem:[%s15836_s2 + $0x10a0] ss:$12 sps:$4 sm:$0xff]  }
 0x20b   : > { %10580 = vmatprep.subr.bf16.mxu1 %v11615_v26 }
 0x20c   : > { %v4300_v26 = vpop.f32.mrf.mxu0 }
 0x20d   : > { %4930 = vmatmul.mubr.bf16.vlgmr.msra.gmra.mxu1 %v11674_v32  ;;  %10567 = vmatpush3.bf16.msra.mxu0 %v11616_v28  ;;  %v4345_v28 = vpop.f32.mrf.mxu1 }
 0x20e   : > { %10581 = vmatpush3.bf16.msra.mxu1 %v11617_v29  ;;  %10568 = vmatprep.subr.bf16.mxu0 %v11618_v30  ;;  %v11655_v29 = vld [vmem:[%s15836_s2 + $0xfc8] ss:$12 sps:$4 sm:$0xff]   ;;  %v4302_v32 = vpop.f32.mrf.mxu0 }
 0x20f   : > { %10582 = vmatprep.subr.bf16.mxu1 %v11619_v31  ;;  %5011 = vmatprep.mubr.bf16.mxu1 %v11675_v37  ;;  %v11656_v30 = vld [vmem:[%s15836_s2 + $0xf08] ss:$12 sps:$4 sm:$0xff]  }
 0x210   : > { %v11657_v31 = vld [vmem:[%s15836_s2 + $0x1088] ss:$12 sps:$4 sm:$0xff]  }
 0x211   : > { %10569 = vmatpush3.bf16.msra.mxu0 %v11620_v33  ;;  %v4347_v33 = vpop.f32.mrf.mxu1  ;;  %v11679_v37 = vld [vmem:[%s12530_s12 + $0x58] ss:$92 sps:$4 sm:$0xff]  }
 0x212   : > { %10583 = vmatpush3.bf16.msra.mxu1 %v11621_v34  ;;  %10570 = vmatprep.subr.bf16.mxu0 %v11622_v35  ;;  %v4304_v34 = vpop.f32.mrf.mxu0 }
 0x213   : > { %10584 = vmatprep.subr.bf16.mxu1 %v11623_v36  ;;  %v4349_v35 = vpop.f32.mrf.mxu1 }
 0x215   : > { %10571 = vmatpush3.bf16.msra.mxu0 %v11624_v38  ;;  %v4429_v36 = vpop.f32.mrf.mxu1  ;;  %v4306_v38 = vpop.f32.mrf.mxu0 }
 0x216   : > { %10585 = vmatpush3.bf16.msra.mxu1 %v11625_v39  ;;  %10572 = vmatprep.subr.bf16.mxu0 %v11626_v41 }
 0x217   : > { %10586 = vmatprep.subr.bf16.mxu1 %v11627_v42  ;;  %v4386_v39 = vpop.f32.mrf.mxu0  ;;  %v4431_v41 = vpop.f32.mrf.mxu1  ;;  %v4172_v42 = vadd.f32 %v14109_v40, %v14123_v45 }
 0x219   : > { %10573 = vmatpush3.bf16.msra.mxu0 %v11628_v43  ;;  %v4388_v43 = vpop.f32.mrf.mxu0 }
 0x21a   : > { %10587 = vmatpush3.bf16.msra.mxu1 %v11629_v44  ;;  %10602 = vmatprep.subr.bf16.mxu0 %v11631_v48  ;;  %v4433_v44 = vpop.f32.mrf.mxu1  ;;  %v4215_v48 = vadd.f32 %v14183_v5, %v4172_v42 }
 0x21b   : > { %10588 = vmatprep.subr.bf16.mxu1 %v11630_v47  ;;  %v4174_v47 = vadd.f32 %v14125_v46, %v14139_v51 }
 0x21c   : > { %4971 = vmatmul.mubr.bf16.vlgmr.msra.gmra.mxu0 %v11676_v55  ;;  %v4258_v55 = vadd.f32 %v14167_v63, %v4215_v48  ;;  %v5104_v63 = vlaneseq }
 0x21d   : > { %10603 = vmatpush3.bf16.msra.mxu0 %v11633_v50  ;;  %5052 = vmatprep.mubr.bf16.mxu0 %v11677_v62  ;;  %v4390_v50 = vpop.f32.mrf.mxu0 }
 0x21e   : > { %10589 = vmatpush3.bf16.msra.mxu1 %v11632_v49  ;;  %10604 = vmatprep.subr.bf16.mxu0 %v11635_v54  ;;  %v4176_v49 = vadd.f32 %v14141_v52, %v14156_v58  ;;  %v4178_v54 = vadd.f32 %v14158_v59, %v14175_v2 }
 0x21f   : > { %10590 = vmatprep.subr.bf16.mxu1 %v11634_v53  ;;  %v4435_v53 = vpop.f32.mrf.mxu1  ;;  %v4392_v46 = vpop.f32.mrf.mxu0 }
 0x221   : > { %10605 = vmatpush3.bf16.msra.mxu0 %v11637_v57  ;;  %v4515_v40 = vpop.f32.mrf.mxu1  ;;  %v4221_v57 = vadd.f32 %v4220_v23, %v4178_v54  ;;  %v4472_v62 = vpop.f32.mrf.mxu0 }
 0x222   : > { %10591 = vmatpush3.bf16.msra.mxu1 %v11636_v56  ;;  %10606 = vmatprep.subr.bf16.mxu0 %v11639_v61  ;;  %v4219_v56 = vadd.f32 %v4218_v16, %v4176_v49 }
 0x223   : > { %10592 = vmatprep.subr.bf16.mxu1 %v11638_v60  ;;  %v4301_v60 = vadd.f32 %v4300_v26, %v4258_v55  ;;  %v4517_v52 = vpop.f32.mrf.mxu1  ;;  %v4264_v58 = vadd.f32 %v14207_v17, %v4221_v57  ;;  %v14261_v26 = vld [vmem:[%s15838_s4] sm:$0x7] }
 0x224   : > { %v4262_v51 = vadd.f32 %v14196_v11, %v4219_v56 }
 0x225   : > { %10607 = vmatpush3.bf16.msra.mxu0 %v11641_v1  ;;  %v4307_v59 = vadd.f32 %v4306_v38, %v4264_v58  ;;  %v4519_v5 = vpop.f32.mrf.mxu1 }
 0x226   : > { %10593 = vmatpush3.bf16.msra.mxu1 %v11640_v0  ;;  %10608 = vmatprep.subr.bf16.mxu0 %v11643_v4  ;;  %v4344_v0 = vadd.f32 %v4343_v21, %v4301_v60  ;;  %v4305_v1 = vadd.f32 %v4304_v34, %v4262_v51  ;;  %v4474_v4 = vpop.f32.mrf.mxu0 }
 0x227   : > { %10594 = vmatprep.subr.bf16.mxu1 %v11642_v3 }
 0x228   : > { %v4387_v2 = vadd.f32 %v4386_v39, %v4344_v0  ;;  %v4476_v11 = vpop.f32.mrf.mxu0 }
 0x229   : > { %10609 = vmatpush3.bf16.msra.mxu0 %v11645_v8  ;;  %v4350_v8 = vadd.f32 %v4349_v35, %v4307_v59 }
 0x22a   : > { %10595 = vmatpush3.bf16.msra.mxu1 %v11644_v7  ;;  %10610 = vmatprep.subr.bf16.mxu0 %v11646_v9  ;;  %v4348_v7 = vadd.f32 %v4347_v33, %v4305_v1  ;;  %v4430_v9 = vadd.f32 %v4429_v36, %v4387_v2  ;;  %v4478_v21 = vpop.f32.mrf.mxu0 }
 0x22b   : > { %10827 = vmatprep.subr.bf16.mxu1 %v12417_v14 }
 0x22c   : > { %v4473_v16 = vadd.f32 %v4472_v62, %v4430_v9 }
 0x22d   : > { %5012 = vmatmul.mubr.bf16.vlgmr.msra.gmra.mxu1 %v11678_v18  ;;  %10611 = vmatpush3.bf16.msra.mxu0 %v11647_v12  ;;  %v14250_v12 = vshrl.u32 %v5104_v63, 7 }
 0x22e   : > { %10828 = vmatpush3.bf16.msra.mxu1 %v11648_v13  ;;  %10612 = vmatprep.subr.bf16.mxu0 %v11649_v15  ;;  %v4521_v13 = vpop.f32.mrf.mxu1  ;;  %v4393_v15 = vadd.f32 %v4392_v46, %v4350_v8 }
 0x22f   : > { %10829 = vmatprep.subr.bf16.mxu1 %v12417_v14  ;;  %10835 = vmatprep.mubr.msk.bf16.mxu1 %vm12418_vm1, %v12417_v14 }
 0x230   : > { %v4601_v17 = vpop.f32.mrf.mxu1  ;;  %v4436_v23 = vadd.f32 %v4435_v53, %v4393_v15 }
 0x231   : > { %10613 = vmatpush3.bf16.msra.mxu0 %v11650_v19 }
 0x232   : > { %10830 = vmatpush3.bf16.msra.mxu1 %v11651_v20  ;;  %10614 = vmatprep.subr.bf16.mxu0 %v11652_v22  ;;  %v5106_v20 = vsub.s32 0, %v14250_v12  ;;  %v14256_v22 = vld [vmem:[%s15837_s3] sm:$0x7] }
 0x233   : > { %10831 = vmatprep.subr.bf16.mxu1 %v12417_v14 }
 0x234   : > { %v5107_v34 = vrot.slane %v14256_v22, %v5106_v20  ;;  %v5130_v35 = vrot.slane %v14261_v26, %v5106_v20 }
 0x235   : > { %10615 = vmatpush3.bf16.msra.mxu0 %v11653_v24  ;;  %v4516_v24 = vadd.f32 %v4515_v40, %v4473_v16 }
 0x236   : > { %10832 = vmatpush3.bf16.msra.mxu1 %v11654_v25  ;;  %10616 = vmatprep.subr.bf16.mxu0 %v11655_v29  ;;  %v4603_v29 = vpop.f32.mrf.mxu1 }
 0x237   : > { %10833 = vmatprep.subr.bf16.mxu1 %v12417_v14 }
 0x238   : > { %v4605_v42 = vpop.f32.mrf.mxu1 }
 0x239   : > { %10617 = vmatpush3.bf16.msra.mxu0 %v11656_v30 }
 0x23a   : > { %10834 = vmatpush3.bf16.msra.mxu1 %v11657_v31  ;;  %v4607_v40 = vpop.f32.mrf.mxu1 }
 0x23c   : > { %5053 = vmatmul.mubr.bf16.vlgmr.msra.gmra.mxu0 %v13722_v27  ;;  %v4217_v27 = vadd.f32 %v4216_v10, %v4174_v47  ;;  %v4391_v10 = vadd.f32 %v4390_v50, %v4348_v7 }
 0x23d   : > { %10836 = vmatmul.mubr.msk.bf16.vlgmr.msra.gmra.mxu1 %vm4090_vm0, %v11679_v37 }
 0x23e   : > { %v4260_v45 = vadd.f32 %v14185_v6, %v4217_v27  ;;  %v4434_v18 = vadd.f32 %v4433_v44, %v4391_v10 }
 0x240   : > { %v4303_v61 = vadd.f32 %v4302_v32, %v4260_v45  ;;  %v4477_v25 = vadd.f32 %v4476_v11, %v4434_v18  ;;  %v4479_v32 = vadd.f32 %v4478_v21, %v4436_v23 }
 0x242   : > { %v4346_v3 = vadd.f32 %v4345_v28, %v4303_v61  ;;  %v5110_v28 = vsub.s32 1, %v14250_v12  ;;  %v4520_v37 = vadd.f32 %v4519_v5, %v4477_v25  ;;  %v4522_v47 = vadd.f32 %v4521_v13, %v4479_v32 }
 0x244   : > { %v4389_v6 = vadd.f32 %v4388_v43, %v4346_v3  ;;  %v5134_v43 = vrot.slane %v14261_v26, %v5110_v28 }
 0x246   : > { %v4432_v14 = vadd.f32 %v4431_v41, %v4389_v6  ;;  %v5111_v41 = vrot.slane %v14256_v22, %v5110_v28 }
 0x248   : > { %v4475_v19 = vadd.f32 %v4474_v4, %v4432_v14 }
 0x24a   : > { %v4518_v31 = vadd.f32 %v4517_v52, %v4475_v19 }
 0x24d   : > { %v10398_v1 = vpop.f32.mrf.mxu1 }
 0x24f   : > { %v10399_v3 = vpop.f32.mrf.mxu1 }
 0x251   : > { %v10401_v59 = vpop.f32.mrf.mxu1 }
 0x253   : > { %v10402_v2 = vpop.f32.mrf.mxu1 }
 0x25c   : > { %v4558_v30 = vpop.f32.mrf.mxu0 }
 0x25d   : > { %v4559_v33 = vadd.f32 %v4558_v30, %v4516_v24 }
 0x25e   : > { %v4560_v36 = vpop.f32.mrf.mxu0 }
 0x25f   : > { %v4602_v38 = vadd.f32 %v4601_v17, %v4559_v33  ;;  %v4561_v39 = vadd.f32 %v4560_v36, %v4518_v31  ;;  %v10400_v36 = vadd.f32 %v10399_v3, %v10398_v1 }
 0x260   : > { %v4562_v44 = vpop.f32.mrf.mxu0 }
 0x261   : > { %v5119_v48 = vmul.f32 %v5107_v34, %v4602_v38  ;;  %v4604_v49 = vadd.f32 %v4603_v29, %v4561_v39  ;;  %v4563_v27 = vadd.f32 %v4562_v44, %v4520_v37  ;;  %v10403_v44 = vadd.f32 %v10402_v2, %v10401_v59 }
 0x262   : > { %v4564_v50 = vpop.f32.mrf.mxu0 }
 0x263   : > { %v5142_v53 = vadd.f32 %v5130_v35, %v5119_v48  ;;  %v5120_v54 = vmul.f32 %v5111_v41, %v4604_v49  ;;  %v4606_v55 = vadd.f32 %v4605_v42, %v4563_v27  ;;  %v4565_v56 = vadd.f32 %v4564_v50, %v4522_v47 }
 0x265   : > { %v5148_v45 = vmax.f32 %v5142_v53, 0.0  ;;  %v5143_v57 = vadd.f32 %v5134_v43, %v5120_v54  ;;  %v5122_v60 = vmul.f32 %v5107_v34, %v4606_v55  ;;  %v4608_v46 = vadd.f32 %v4607_v40, %v4565_v56 }
 0x267   : > { %5154 = vst [vmem:[%s12537_s19] sm:$0xff] %v5148_v45  ;;  %v5149_v51 = vmax.f32 %v5143_v57, 0.0  ;;  %v5145_v61 = vadd.f32 %v5130_v35, %v5122_v60  ;;  %v5123_v62 = vmul.f32 %v5111_v41, %v4608_v46 }
 0x269   : > { %5155 = vst [vmem:[%s12537_s19 + $0x8] sm:$0xff] %v5149_v51  ;;  %v5151_v52 = vmax.f32 %v5145_v61, 0.0  ;;  %v5146_v58 = vadd.f32 %v5134_v43, %v5123_v62 }
 0x26b   : > { %5157 = vst [vmem:[%s12537_s19 + $0x18] sm:$0xff] %v5151_v52  ;;  %v5152_v0 = vmax.f32 %v5146_v58, 0.0 }
 0x26d   : > { %5158 = vst [vmem:[%s12537_s19 + $0x20] sm:$0xff] %v5152_v0  ;;  %v10420_v63 = vpop.f32.mrf.mxu1 }
 0x26f   : > { %v10421_v4 = vpop.f32.mrf.mxu1 }
 0x270   : > { %v10422_v33 = vadd.f32 %v10421_v4, %v10420_v63 }
 0x271   : > { %v10423_v5 = vpop.f32.mrf.mxu1 }
 0x272   : > { %v4686_v41 = vadd.f32 %v10422_v33, %v10400_v36 }
 0x273   : > { %v10424_v7 = vpop.f32.mrf.mxu1 }
 0x274   : > { %v10425_v42 = vadd.f32 %v10424_v7, %v10423_v5 }
 0x276   : > { %v4689_v53 = vadd.f32 %v10425_v42, %v10403_v44 }
 0x27c   : > { %v10442_v6 = vpop.f32.mrf.mxu0 }
 0x27e   : > { %v10443_v9 = vpop.f32.mrf.mxu0 }
 0x27f   : > { %v10444_v37 = vadd.f32 %v10443_v9, %v10442_v6 }
 0x280   : > { %v10445_v11 = vpop.f32.mrf.mxu0 }
 0x281   : > { %v4727_v47 = vadd.f32 %v10444_v37, %v4686_v41 }
 0x282   : > { %v10446_v14 = vpop.f32.mrf.mxu0 }
 0x283   : > { %v10447_v48 = vadd.f32 %v10446_v14, %v10445_v11  ;;  %v5114_v14 = vsub.s32 2, %v14250_v12 }
 0x285   : > { %v4730_v40 = vadd.f32 %v10447_v48, %v4689_v53  ;;  %v5138_v12 = vrot.slane %v14261_v26, %v5114_v14 }
 0x28d   : > { %v10464_v8 = vpop.f32.mrf.mxu1 }
 0x28f   : > { %v10465_v10 = vpop.f32.mrf.mxu1 }
 0x290   : > { %v10466_v43 = vadd.f32 %v10465_v10, %v10464_v8 }
 0x291   : > { %v10467_v13 = vpop.f32.mrf.mxu1 }
 0x292   : > { %v4768_v54 = vadd.f32 %v10466_v43, %v4727_v47 }
 0x293   : > { %v10468_v15 = vpop.f32.mrf.mxu1 }
 0x294   : > { %v10469_v55 = vadd.f32 %v10468_v15, %v10467_v13 }
 0x296   : > { %v4771_v61 = vadd.f32 %v10469_v55, %v4730_v40 }
 0x29c   : > { %v10486_v16 = vpop.f32.mrf.mxu0 }
 0x29e   : > { %v10487_v18 = vpop.f32.mrf.mxu0 }
 0x29f   : > { %v10488_v49 = vadd.f32 %v10487_v18, %v10486_v16 }
 0x2a0   : > { %v10489_v20 = vpop.f32.mrf.mxu0 }
 0x2a1   : > { %v4809_v45 = vadd.f32 %v10488_v49, %v4768_v54 }
 0x2a2   : > { %v10490_v23 = vpop.f32.mrf.mxu0 }
 0x2a3   : > { %v10491_v57 = vadd.f32 %v10490_v23, %v10489_v20 }
 0x2a5   : > { %v4812_v0 = vadd.f32 %v10491_v57, %v4771_v61 }
 0x2ad   : > { %v10508_v17 = vpop.f32.mrf.mxu1 }
 0x2af   : > { %v10509_v19 = vpop.f32.mrf.mxu1 }
 0x2b0   : > { %v10510_v56 = vadd.f32 %v10509_v19, %v10508_v17 }
 0x2b1   : > { %v10511_v21 = vpop.f32.mrf.mxu1 }
 0x2b2   : > { %v4850_v62 = vadd.f32 %v10510_v56, %v4809_v45 }
 0x2b3   : > { %v10512_v24 = vpop.f32.mrf.mxu1 }
 0x2b4   : > { %v10513_v52 = vadd.f32 %v10512_v24, %v10511_v21 }
 0x2b6   : > { %v4853_v4 = vadd.f32 %v10513_v52, %v4812_v0 }
 0x2bc   : > { %v10530_v25 = vpop.f32.mrf.mxu0 }
 0x2be   : > { %v10531_v29 = vpop.f32.mrf.mxu0 }
 0x2bf   : > { %v10532_v60 = vadd.f32 %v10531_v29, %v10530_v25 }
 0x2c0   : > { %v10533_v31 = vpop.f32.mrf.mxu0 }
 0x2c1   : > { %v4891_v1 = vadd.f32 %v10532_v60, %v4850_v62 }
 0x2c2   : > { %v10534_v34 = vpop.f32.mrf.mxu0 }
 0x2c3   : > { %v10535_v3 = vadd.f32 %v10534_v34, %v10533_v31 }
 0x2c5   : > { %v4894_v10 = vadd.f32 %v10535_v3, %v4853_v4 }
 0x2cd   : > { %v10552_v28 = vpop.f32.mrf.mxu1 }
 0x2cf   : > { %v10553_v30 = vpop.f32.mrf.mxu1 }
 0x2d0   : > { %v10554_v58 = vadd.f32 %v10553_v30, %v10552_v28  ;;  %v5115_v28 = vrot.slane %v14256_v22, %v5114_v14 }
 0x2d1   : > { %v10555_v32 = vpop.f32.mrf.mxu1 }
 0x2d2   : > { %v4932_v5 = vadd.f32 %v10554_v58, %v4891_v1 }
 0x2d3   : > { %v10556_v35 = vpop.f32.mrf.mxu1 }
 0x2d4   : > { %v10557_v7 = vadd.f32 %v10556_v35, %v10555_v32 }
 0x2d6   : > { %v4935_v17 = vadd.f32 %v10557_v7, %v4894_v10 }
 0x2dc   : > { %v10574_v38 = vpop.f32.mrf.mxu0 }
 0x2de   : > { %v10575_v27 = vpop.f32.mrf.mxu0 }
 0x2df   : > { %v10576_v59 = vadd.f32 %v10575_v27, %v10574_v38 }
 0x2e0   : > { %v10577_v46 = vpop.f32.mrf.mxu0 }
 0x2e1   : > { %v4973_v11 = vadd.f32 %v10576_v59, %v4932_v5 }
 0x2e2   : > { %v10578_v2 = vpop.f32.mrf.mxu0 }
 0x2e3   : > { %v10579_v13 = vadd.f32 %v10578_v2, %v10577_v46 }
 0x2e5   : > { %v4976_v24 = vadd.f32 %v10579_v13, %v4935_v17 }
 0x2ed   : > { %v10596_v39 = vpop.f32.mrf.mxu1 }
 0x2ef   : > { %v10597_v50 = vpop.f32.mrf.mxu1 }
 0x2f0   : > { %v10598_v6 = vadd.f32 %v10597_v50, %v10596_v39 }
 0x2f1   : > { %v10599_v51 = vpop.f32.mrf.mxu1 }
 0x2f2   : > { %v5014_v18 = vadd.f32 %v10598_v6, %v4973_v11 }
 0x2f3   : > { %v10600_v63 = vpop.f32.mrf.mxu1 }
 0x2f4   : > { %v10601_v19 = vadd.f32 %v10600_v63, %v10599_v51 }
 0x2f6   : > { %v5017_v31 = vadd.f32 %v10601_v19, %v4976_v24 }
 0x2fc   : > { %v10618_v8 = vpop.f32.mrf.mxu0 }
 0x2fd   : > { %v5095_v9 = vpop.f32.mrf.mxu1 }
 0x2fe   : > { %v10619_v15 = vpop.f32.mrf.mxu0 }
 0x2ff   : > { %v10837_v16 = vpop.f32.mrf.mxu1  ;;  %v10620_v20 = vadd.f32 %v10619_v15, %v10618_v8 }
 0x300   : > { %v10621_v21 = vpop.f32.mrf.mxu0 }
 0x301   : > { %v5098_v23 = vpop.f32.mrf.mxu1  ;;  %v5055_v25 = vadd.f32 %v10620_v20, %v5014_v18 }
 0x302   : > { %v10622_v29 = vpop.f32.mrf.mxu0 }
 0x303   : > { %v10838_v30 = vpop.f32.mrf.mxu1  ;;  %v5096_v32 = vadd.f32 %v5095_v9, %v5055_v25  ;;  %v10623_v33 = vadd.f32 %v10622_v29, %v10621_v21 }
 0x305   : > { %v5121_v34 = vmul.f32 %v5115_v28, %v5096_v32  ;;  %v5058_v35 = vadd.f32 %v10623_v33, %v5017_v31 }
 0x307   : > { %v5144_v36 = vadd.f32 %v5138_v12, %v5121_v34  ;;  %v5099_v37 = vadd.f32 %v5098_v23, %v5058_v35 }
 0x309   : > { %v5150_v38 = vmax.f32 %v5144_v36, 0.0  ;;  %v5124_v39 = vmul.f32 %v5115_v28, %v5099_v37 }
 0x30b   : > { %5156 = vst [vmem:[%s12537_s19 + $0x10] sm:$0xff] %v5150_v38  ;;  %v5147_v41 = vadd.f32 %v5138_v12, %v5124_v39 }
 0x30d   : > { %v5153_v42 = vmax.f32 %v5147_v41, 0.0 }
 0x30f   : > { %5159 = vst [vmem:[%s12537_s19 + $0x28] sm:$0xff] %v5153_v42 }
 0x310 PF: > { %p9925_p11 = scmp.ne.s32.totalorder %s12398_s29, 1 }
 0x312   : > { %5163 = sbr.rel (%p9925_p11) target bundleno = 1450 (0x5aa), region = 60 }
 0x317   : > { %v11680_v22 = vld [vmem:[%s15839_s5 + $0xac] ss:$12 sps:$4 sm:$0xff]   ;;  %v11684_v43 = vld [vmem:[%s15839_s5 + $0xa8] ss:$12 sps:$4 sm:$0xff]   ;;  %v11690_v49 = vld [vmem:[%s15839_s5 + $0x90] ss:$12 sps:$4 sm:$0xff]  }
 0x318   : > { %v11682_v26 = vld [vmem:[%s15839_s5 + $0x22c] ss:$12 sps:$4 sm:$0xff]   ;;  %8152 = vmatprep.subr.bf16.mxu0 %v11680_v22  ;;  %v11685_v44 = vld [vmem:[%s15839_s5 + $0x228] ss:$12 sps:$4 sm:$0xff]   ;;  %v11691_v27 = vld [vmem:[%s15839_s5 + $0x210] ss:$12 sps:$4 sm:$0xff]  }
 0x319   : > { %8195 = vmatprep.subr.bf16.mxu1 %v11682_v26  ;;  %v11686_v47 = vld [vmem:[%s15839_s5 + $0x94] ss:$12 sps:$4 sm:$0xff]   ;;  %8153 = vmatpush1.bf16.msra.mxu0 %v11684_v43  ;;  %v11692_v50 = vld [vmem:[%s15839_s5 + $0x7c] ss:$12 sps:$4 sm:$0xff]   ;;  %v11696_v54 = vld [vmem:[%s15839_s5 + $0x78] ss:$12 sps:$4 sm:$0xff]  }
 0x31a   : > { %8196 = vmatpush1.bf16.msra.mxu1 %v11685_v44  ;;  %v11688_v48 = vld [vmem:[%s15839_s5 + $0x214] ss:$12 sps:$4 sm:$0xff]   ;;  %8154 = vmatprep.subr.bf16.mxu0 %v11686_v47  ;;  %v11694_v53 = vld [vmem:[%s15839_s5 + $0x1fc] ss:$12 sps:$4 sm:$0xff]   ;;  %v11697_v55 = vld [vmem:[%s15839_s5 + $0x1f8] ss:$12 sps:$4 sm:$0xff]  }
 0x31b   : > { %8197 = vmatprep.subr.bf16.mxu1 %v11688_v48  ;;  %v11698_v56 = vld [vmem:[%s15839_s5 + $0x64] ss:$12 sps:$4 sm:$0xff]   ;;  %v11702_v45 = vld [vmem:[%s15839_s5 + $0x60] ss:$12 sps:$4 sm:$0xff]   ;;  %v11708_v51 = vld [vmem:[%s15839_s5 + $0x48] ss:$12 sps:$4 sm:$0xff]  }
 0x31c   : > { %v11700_v40 = vld [vmem:[%s15839_s5 + $0x1e4] ss:$12 sps:$4 sm:$0xff]   ;;  %v11703_v57 = vld [vmem:[%s15839_s5 + $0x1e0] ss:$12 sps:$4 sm:$0xff]   ;;  %v11709_v61 = vld [vmem:[%s15839_s5 + $0x1c8] ss:$12 sps:$4 sm:$0xff]  }
 0x31d   : > { %8155 = vmatpush1.bf16.msra.mxu0 %v11690_v49  ;;  %v11704_v60 = vld [vmem:[%s15839_s5 + $0x4c] ss:$12 sps:$4 sm:$0xff]   ;;  %v11710_v62 = vld [vmem:[%s15839_s5 + $0x34] ss:$12 sps:$4 sm:$0xff]   ;;  %v11714_v58 = vld [vmem:[%s15839_s5 + $0x30] ss:$12 sps:$4 sm:$0xff]  }
 0x31e   : > { %8198 = vmatpush1.bf16.msra.mxu1 %v11691_v27  ;;  %8156 = vmatprep.subr.bf16.mxu0 %v11692_v50  ;;  %v11706_v46 = vld [vmem:[%s15839_s5 + $0x1cc] ss:$12 sps:$4 sm:$0xff]   ;;  %v11712_v52 = vld [vmem:[%s15839_s5 + $0x1b4] ss:$12 sps:$4 sm:$0xff]   ;;  %v11715_v0 = vld [vmem:[%s15839_s5 + $0x1b0] ss:$12 sps:$4 sm:$0xff]  }
 0x31f   : > { %8199 = vmatprep.subr.bf16.mxu1 %v11694_v53  ;;  %v11716_v1 = vld [vmem:[%s15839_s5 + $0x1c] ss:$12 sps:$4 sm:$0xff]   ;;  %v11720_v59 = vld [vmem:[%s15839_s5 + $0x18] ss:$12 sps:$4 sm:$0xff]   ;;  %v11726_v5 = vld [vmem:[%s15839_s5] ss:$12 sps:$4 sm:$0xff]  }
 0x320   : > { %v11718_v3 = vld [vmem:[%s15839_s5 + $0x19c] ss:$12 sps:$4 sm:$0xff]   ;;  %v11721_v2 = vld [vmem:[%s15839_s5 + $0x198] ss:$12 sps:$4 sm:$0xff]   ;;  %v11727_v7 = vld [vmem:[%s15839_s5 + $0x180] ss:$12 sps:$4 sm:$0xff]  }
 0x321   : > { %8157 = vmatpush1.bf16.msra.mxu0 %v11696_v54  ;;  %v11722_v63 = vld [vmem:[%s15839_s5 + $0x4] ss:$12 sps:$4 sm:$0xff]   ;;  %v11728_v6 = vld [vmem:[%s15839_s5 + $0x16c] ss:$12 sps:$4 sm:$0xff]   ;;  %v11732_v9 = vld [vmem:[%s15839_s5 + $0x168] ss:$12 sps:$4 sm:$0xff]  }
 0x322   : > { %8200 = vmatpush1.bf16.msra.mxu1 %v11697_v55  ;;  %8158 = vmatprep.subr.bf16.mxu0 %v11698_v56  ;;  %v11724_v4 = vld [vmem:[%s15839_s5 + $0x184] ss:$12 sps:$4 sm:$0xff]   ;;  %v11730_v8 = vld [vmem:[%s15839_s5 + $0x2ec] ss:$12 sps:$4 sm:$0xff]   ;;  %v11733_v10 = vld [vmem:[%s15839_s5 + $0x2e8] ss:$12 sps:$4 sm:$0xff]  }
 0x323   : > { %8201 = vmatprep.subr.bf16.mxu1 %v11700_v40  ;;  %v11734_v11 = vld [vmem:[%s15839_s5 + $0x154] ss:$12 sps:$4 sm:$0xff]   ;;  %v11738_v14 = vld [vmem:[%s15839_s5 + $0x150] ss:$12 sps:$4 sm:$0xff]   ;;  %v11744_v18 = vld [vmem:[%s15839_s5 + $0x138] ss:$12 sps:$4 sm:$0xff]  }
 0x324   : > { %v11736_v13 = vld [vmem:[%s15839_s5 + $0x2d4] ss:$12 sps:$4 sm:$0xff]   ;;  %v11739_v15 = vld [vmem:[%s15839_s5 + $0x2d0] ss:$12 sps:$4 sm:$0xff]   ;;  %v11745_v19 = vld [vmem:[%s15839_s5 + $0x2b8] ss:$12 sps:$4 sm:$0xff]  }
 0x325   : > { %8159 = vmatpush1.bf16.msra.mxu0 %v11702_v45  ;;  %v11740_v16 = vld [vmem:[%s15839_s5 + $0x13c] ss:$12 sps:$4 sm:$0xff]   ;;  %v11746_v20 = vld [vmem:[%s15839_s5 + $0x124] ss:$12 sps:$4 sm:$0xff]   ;;  %v11750_v23 = vld [vmem:[%s15839_s5 + $0x120] ss:$12 sps:$4 sm:$0xff]  }
 0x326   : > { %8202 = vmatpush1.bf16.msra.mxu1 %v11703_v57  ;;  %8160 = vmatprep.subr.bf16.mxu0 %v11704_v60  ;;  %v11742_v17 = vld [vmem:[%s15839_s5 + $0x2bc] ss:$12 sps:$4 sm:$0xff]   ;;  %v11748_v21 = vld [vmem:[%s15839_s5 + $0x2a4] ss:$12 sps:$4 sm:$0xff]   ;;  %v11751_v24 = vld [vmem:[%s15839_s5 + $0x2a0] ss:$12 sps:$4 sm:$0xff]  }
 0x327   : > { %8203 = vmatprep.subr.bf16.mxu1 %v11706_v46  ;;  %v11752_v25 = vld [vmem:[%s15839_s5 + $0x10c] ss:$12 sps:$4 sm:$0xff]   ;;  %v11756_v31 = vld [vmem:[%s15839_s5 + $0x108] ss:$12 sps:$4 sm:$0xff]   ;;  %v11762_v34 = vld [vmem:[%s15839_s5 + $0xf0] ss:$12 sps:$4 sm:$0xff]  }
 0x328   : > { %v11778_v28 = vld [vmem:[%s12535_s18 + $0x4] ss:$72 sps:$4 sm:$0xff]   ;;  %v11757_v32 = vld [vmem:[%s15839_s5 + $0x288] ss:$12 sps:$4 sm:$0xff]   ;;  %v11763_v35 = vld [vmem:[%s15839_s5 + $0x270] ss:$12 sps:$4 sm:$0xff]  }
 0x329   : > { %8161 = vmatpush1.bf16.msra.mxu0 %v11708_v51  ;;  %v11754_v29 = vld [vmem:[%s15839_s5 + $0x28c] ss:$12 sps:$4 sm:$0xff]   ;;  %8184 = vmatprep.mubr.bf16.mxu0 %v11778_v28  ;;  %v11758_v12 = vld [vmem:[%s15839_s5 + $0xf4] ss:$12 sps:$4 sm:$0xff]   ;;  %v11764_v36 = vld [vmem:[%s15839_s5 + $0xdc] ss:$12 sps:$4 sm:$0xff]  }
 0x32a   : > { %8204 = vmatpush1.bf16.msra.mxu1 %v11709_v61  ;;  %8162 = vmatprep.subr.bf16.mxu0 %v11710_v62  ;;  %v11781_v30 = vld [vmem:[%s12535_s18 + $0xc] ss:$72 sps:$4 sm:$0xff]   ;;  %v11766_v37 = vld [vmem:[%s15839_s5 + $0x25c] ss:$12 sps:$4 sm:$0xff]   ;;  %v11768_v38 = vld [vmem:[%s15839_s5 + $0xd8] ss:$12 sps:$4 sm:$0xff]  }
 0x32b   : > { %8205 = vmatprep.subr.bf16.mxu1 %v11712_v52  ;;  %8227 = vmatprep.mubr.bf16.mxu1 %v11781_v30  ;;  %v11760_v33 = vld [vmem:[%s15839_s5 + $0x274] ss:$12 sps:$4 sm:$0xff]   ;;  %v11769_v39 = vld [vmem:[%s15839_s5 + $0x258] ss:$12 sps:$4 sm:$0xff]   ;;  %v11779_v48 = vld [vmem:[%s12535_s18 + $0x8] ss:$72 sps:$4 sm:$0xff]  }
 0x32c   : > { %v11770_v41 = vld [vmem:[%s15839_s5 + $0xc4] ss:$12 sps:$4 sm:$0xff]   ;;  %v11774_v22 = vld [vmem:[%s15839_s5 + $0xc0] ss:$12 sps:$4 sm:$0xff]   ;;  %v11782_v49 = vld [vmem:[%s15839_s5 + $0x3a8] ss:$12 sps:$4 sm:$0xff]  }
 0x32d   : > { %8163 = vmatpush1.bf16.msra.mxu0 %v11714_v58  ;;  %v11772_v42 = vld [vmem:[%s15839_s5 + $0x244] ss:$12 sps:$4 sm:$0xff]   ;;  %v11775_v26 = vld [vmem:[%s15839_s5 + $0x240] ss:$12 sps:$4 sm:$0xff]   ;;  %v11785_v27 = vld [vmem:[%s15839_s5 + $0x528] ss:$12 sps:$4 sm:$0xff]  }
 0x32e   : > { %8206 = vmatpush1.bf16.msra.mxu1 %v11715_v0  ;;  %8164 = vmatprep.subr.bf16.mxu0 %v11716_v1  ;;  %v11784_v43 = vld [vmem:[%s15839_s5 + $0x3ac] ss:$12 sps:$4 sm:$0xff]   ;;  %v11776_v47 = vld [vmem:[%s12535_s18] ss:$72 sps:$4 sm:$0xff]   ;;  %v11788_v54 = vld [vmem:[%s15839_s5 + $0x390] ss:$12 sps:$4 sm:$0xff]  }
 0x32f   : > { %8207 = vmatprep.subr.bf16.mxu1 %v11718_v3  ;;  %v11787_v44 = vld [vmem:[%s15839_s5 + $0x52c] ss:$12 sps:$4 sm:$0xff]   ;;  %v11790_v50 = vld [vmem:[%s15839_s5 + $0x394] ss:$12 sps:$4 sm:$0xff]   ;;  %v11791_v55 = vld [vmem:[%s15839_s5 + $0x510] ss:$12 sps:$4 sm:$0xff]  }
 0x330   : > { %v11793_v53 = vld [vmem:[%s15839_s5 + $0x514] ss:$12 sps:$4 sm:$0xff]   ;;  %v11796_v56 = vld [vmem:[%s15839_s5 + $0x37c] ss:$12 sps:$4 sm:$0xff]   ;;  %v11794_v45 = vld [vmem:[%s15839_s5 + $0x378] ss:$12 sps:$4 sm:$0xff]  }
 0x331   : > { %8165 = vmatpush1.bf16.msra.mxu0 %v11720_v59  ;;  %v11799_v40 = vld [vmem:[%s15839_s5 + $0x4fc] ss:$12 sps:$4 sm:$0xff]   ;;  %v11797_v57 = vld [vmem:[%s15839_s5 + $0x4f8] ss:$12 sps:$4 sm:$0xff]   ;;  %v11800_v51 = vld [vmem:[%s15839_s5 + $0x360] ss:$12 sps:$4 sm:$0xff]  }
 0x332   : > { %8208 = vmatpush1.bf16.msra.mxu1 %v11721_v2  ;;  %8166 = vmatprep.subr.bf16.mxu0 %v11722_v63  ;;  %v11802_v60 = vld [vmem:[%s15839_s5 + $0x364] ss:$12 sps:$4 sm:$0xff]   ;;  %v11803_v61 = vld [vmem:[%s15839_s5 + $0x4e0] ss:$12 sps:$4 sm:$0xff]   ;;  %v11806_v58 = vld [vmem:[%s15839_s5 + $0x348] ss:$12 sps:$4 sm:$0xff]  }
 0x333   : > { %8209 = vmatprep.subr.bf16.mxu1 %v11724_v4  ;;  %v11805_v46 = vld [vmem:[%s15839_s5 + $0x4e4] ss:$12 sps:$4 sm:$0xff]   ;;  %v11808_v62 = vld [vmem:[%s15839_s5 + $0x34c] ss:$12 sps:$4 sm:$0xff]   ;;  %v11809_v0 = vld [vmem:[%s15839_s5 + $0x4c8] ss:$12 sps:$4 sm:$0xff]  }
 0x334   : > { %v11811_v52 = vld [vmem:[%s15839_s5 + $0x4cc] ss:$12 sps:$4 sm:$0xff]   ;;  %v11814_v1 = vld [vmem:[%s15839_s5 + $0x334] ss:$12 sps:$4 sm:$0xff]   ;;  %v11812_v59 = vld [vmem:[%s15839_s5 + $0x330] ss:$12 sps:$4 sm:$0xff]  }
 0x335   : > { %8167 = vmatpush1.bf16.msra.mxu0 %v11726_v5  ;;  %v11817_v3 = vld [vmem:[%s15839_s5 + $0x4b4] ss:$12 sps:$4 sm:$0xff]   ;;  %v11815_v2 = vld [vmem:[%s15839_s5 + $0x4b0] ss:$12 sps:$4 sm:$0xff]   ;;  %v11818_v5 = vld [vmem:[%s15839_s5 + $0x318] ss:$12 sps:$4 sm:$0xff]  }
 0x336   : > { %8210 = vmatpush1.bf16.msra.mxu1 %v11727_v7  ;;  %8168 = vmatprep.subr.bf16.mxu0 %v11728_v6  ;;  %v11820_v63 = vld [vmem:[%s15839_s5 + $0x31c] ss:$12 sps:$4 sm:$0xff]   ;;  %v11821_v7 = vld [vmem:[%s15839_s5 + $0x498] ss:$12 sps:$4 sm:$0xff]  }
 0x337   : > { %8211 = vmatprep.subr.bf16.mxu1 %v11730_v8  ;;  %v11823_v4 = vld [vmem:[%s15839_s5 + $0x49c] ss:$12 sps:$4 sm:$0xff]   ;;  %v11826_v6 = vld [vmem:[%s15839_s5 + $0x304] ss:$12 sps:$4 sm:$0xff]  }
 0x338   : > { %v11829_v8 = vld [vmem:[%s15839_s5 + $0x484] ss:$12 sps:$4 sm:$0xff]  }
 0x339   : > { %8169 = vmatpush2.bf16.msra.mxu0 %v11732_v9  ;;  %v11880_v9 = vld [vmem:[%s12535_s18 + $0x14] ss:$72 sps:$4 sm:$0xff]   ;;  %v11845_v28 = vld [vmem:[%s15839_s5 + $0x5b8] ss:$12 sps:$4 sm:$0xff]  }
 0x33a   : > { %8212 = vmatpush2.bf16.msra.mxu1 %v11733_v10  ;;  %8170 = vmatprep.subr.bf16.mxu0 %v11734_v11  ;;  %v11883_v10 = vld [vmem:[%s12535_s18 + $0x1c] ss:$72 sps:$4 sm:$0xff]   ;;  %v11824_v11 = vld [vmem:[%s15839_s5 + $0x300] ss:$12 sps:$4 sm:$0xff]  }
 0x33b   : > { %8213 = vmatprep.subr.bf16.mxu1 %v11736_v13  ;;  %v11827_v13 = vld [vmem:[%s15839_s5 + $0x480] ss:$12 sps:$4 sm:$0xff]   ;;  %v11853_v30 = vld [vmem:[%s15839_s5 + $0x5a4] ss:$12 sps:$4 sm:$0xff]  }
 0x33d   : > { %8171 = vmatpush2.bf16.msra.mxu0 %v11738_v14  ;;  %v11832_v14 = vld [vmem:[%s15839_s5 + $0x46c] ss:$12 sps:$4 sm:$0xff]  }
 0x33e   : > { %8214 = vmatpush2.bf16.msra.mxu1 %v11739_v15  ;;  %8172 = vmatprep.subr.bf16.mxu0 %v11740_v16  ;;  %v11835_v15 = vld [vmem:[%s15839_s5 + $0x5ec] ss:$12 sps:$4 sm:$0xff]   ;;  %v11830_v16 = vld [vmem:[%s15839_s5 + $0x468] ss:$12 sps:$4 sm:$0xff]  }
 0x33f   : > { %8215 = vmatprep.subr.bf16.mxu1 %v11742_v17  ;;  %v11833_v17 = vld [vmem:[%s15839_s5 + $0x5e8] ss:$12 sps:$4 sm:$0xff]  }
 0x341   : > { %8173 = vmatpush2.bf16.msra.mxu0 %v11744_v18  ;;  %v11838_v18 = vld [vmem:[%s15839_s5 + $0x454] ss:$12 sps:$4 sm:$0xff]  }
 0x342   : > { %8216 = vmatpush2.bf16.msra.mxu1 %v11745_v19  ;;  %8174 = vmatprep.subr.bf16.mxu0 %v11746_v20  ;;  %v11841_v19 = vld [vmem:[%s15839_s5 + $0x5d4] ss:$12 sps:$4 sm:$0xff]   ;;  %v11836_v20 = vld [vmem:[%s15839_s5 + $0x450] ss:$12 sps:$4 sm:$0xff]  }
 0x343   : > { %8217 = vmatprep.subr.bf16.mxu1 %v11748_v21  ;;  %v11839_v21 = vld [vmem:[%s15839_s5 + $0x5d0] ss:$12 sps:$4 sm:$0xff]  }
 0x345   : > { %8175 = vmatpush2.bf16.msra.mxu0 %v11750_v23  ;;  %v11844_v23 = vld [vmem:[%s15839_s5 + $0x43c] ss:$12 sps:$4 sm:$0xff]  }
 0x346   : > { %8218 = vmatpush2.bf16.msra.mxu1 %v11751_v24  ;;  %8176 = vmatprep.subr.bf16.mxu0 %v11752_v25  ;;  %v11847_v24 = vld [vmem:[%s15839_s5 + $0x5bc] ss:$12 sps:$4 sm:$0xff]   ;;  %v11842_v25 = vld [vmem:[%s15839_s5 + $0x438] ss:$12 sps:$4 sm:$0xff]  }
 0x347   : > { %8219 = vmatprep.subr.bf16.mxu1 %v11754_v29  ;;  %v11850_v29 = vld [vmem:[%s15839_s5 + $0x424] ss:$12 sps:$4 sm:$0xff]  }
 0x349   : > { %8177 = vmatpush2.bf16.msra.mxu0 %v11756_v31  ;;  %v11848_v31 = vld [vmem:[%s15839_s5 + $0x420] ss:$12 sps:$4 sm:$0xff]  }
 0x34a   : > { %8220 = vmatpush2.bf16.msra.mxu1 %v11757_v32  ;;  %8178 = vmatprep.subr.bf16.mxu0 %v11758_v12  ;;  %v11851_v32 = vld [vmem:[%s15839_s5 + $0x5a0] ss:$12 sps:$4 sm:$0xff]  }
 0x34b   : > { %8221 = vmatprep.subr.bf16.mxu1 %v11760_v33  ;;  %v11856_v12 = vld [vmem:[%s15839_s5 + $0x40c] ss:$12 sps:$4 sm:$0xff]  }
 0x34c   : > { %v11859_v33 = vld [vmem:[%s15839_s5 + $0x58c] ss:$12 sps:$4 sm:$0xff]  }
 0x34d   : > { %8179 = vmatpush2.bf16.msra.mxu0 %v11762_v34  ;;  %v11854_v34 = vld [vmem:[%s15839_s5 + $0x408] ss:$12 sps:$4 sm:$0xff]  }
 0x34e   : > { %8222 = vmatpush2.bf16.msra.mxu1 %v11763_v35  ;;  %8180 = vmatprep.subr.bf16.mxu0 %v11764_v36  ;;  %v11857_v35 = vld [vmem:[%s15839_s5 + $0x588] ss:$12 sps:$4 sm:$0xff]  }
 0x34f   : > { %8223 = vmatprep.subr.bf16.mxu1 %v11766_v37  ;;  %v11862_v36 = vld [vmem:[%s15839_s5 + $0x3f4] ss:$12 sps:$4 sm:$0xff]  }
 0x350   : > { %v11865_v37 = vld [vmem:[%s15839_s5 + $0x574] ss:$12 sps:$4 sm:$0xff]  }
 0x351   : > { %8181 = vmatpush2.bf16.msra.mxu0 %v11768_v38  ;;  %v11860_v38 = vld [vmem:[%s15839_s5 + $0x3f0] ss:$12 sps:$4 sm:$0xff]  }
 0x352   : > { %8224 = vmatpush2.bf16.msra.mxu1 %v11769_v39  ;;  %8182 = vmatprep.subr.bf16.mxu0 %v11770_v41  ;;  %v11863_v39 = vld [vmem:[%s15839_s5 + $0x570] ss:$12 sps:$4 sm:$0xff]  }
 0x353   : > { %8225 = vmatprep.subr.bf16.mxu1 %v11772_v42  ;;  %v11868_v41 = vld [vmem:[%s15839_s5 + $0x3dc] ss:$12 sps:$4 sm:$0xff]  }
 0x354   : > { %v11871_v42 = vld [vmem:[%s15839_s5 + $0x55c] ss:$12 sps:$4 sm:$0xff]  }
 0x355   : > { %8183 = vmatpush2.bf16.msra.mxu0 %v11774_v22  ;;  %v11866_v22 = vld [vmem:[%s15839_s5 + $0x3d8] ss:$12 sps:$4 sm:$0xff]  }
 0x356   : > { %8226 = vmatpush2.bf16.msra.mxu1 %v11775_v26  ;;  %8238 = vmatprep.subr.bf16.mxu0 %v11784_v43  ;;  %v11869_v26 = vld [vmem:[%s15839_s5 + $0x558] ss:$12 sps:$4 sm:$0xff]  }
 0x357   : > { %8281 = vmatprep.subr.bf16.mxu1 %v11787_v44  ;;  %v11874_v43 = vld [vmem:[%s15839_s5 + $0x3c4] ss:$12 sps:$4 sm:$0xff]  }
 0x358   : > { %8185 = vmatmul.mubr.bf16.vlgmr.msra.gmra.mxu0 %v11776_v47  ;;  %v11877_v44 = vld [vmem:[%s15839_s5 + $0x544] ss:$12 sps:$4 sm:$0xff]   ;;  %v11872_v47 = vld [vmem:[%s15839_s5 + $0x3c0] ss:$12 sps:$4 sm:$0xff]  }
 0x359   : > { %8228 = vmatmul.mubr.bf16.vlgmr.msra.gmra.mxu1 %v11779_v48  ;;  %8239 = vmatpush1.bf16.msra.mxu0 %v11782_v49  ;;  %v11875_v48 = vld [vmem:[%s15839_s5 + $0x540] ss:$12 sps:$4 sm:$0xff]  }
 0x35a   : > { %8282 = vmatpush1.bf16.msra.mxu1 %v11785_v27  ;;  %8240 = vmatprep.subr.bf16.mxu0 %v11790_v50  ;;  %v11886_v49 = vld [vmem:[%s15839_s5 + $0x6ac] ss:$12 sps:$4 sm:$0xff]  }
 0x35b   : > { %8283 = vmatprep.subr.bf16.mxu1 %v11793_v53  ;;  %8270 = vmatprep.mubr.bf16.mxu0 %v11880_v9  ;;  %v11889_v27 = vld [vmem:[%s15839_s5 + $0x82c] ss:$12 sps:$4 sm:$0xff]   ;;  %v11922_v9 = vld [vmem:[%s15839_s5 + $0x61c] ss:$12 sps:$4 sm:$0xff]  }
 0x35c   : > { %8313 = vmatprep.mubr.bf16.mxu1 %v11883_v10  ;;  %v11878_v50 = vld [vmem:[%s12535_s18 + $0x10] ss:$72 sps:$4 sm:$0xff]   ;;  %v11925_v10 = vld [vmem:[%s15839_s5 + $0x79c] ss:$12 sps:$4 sm:$0xff]  }
 0x35d   : > { %8241 = vmatpush1.bf16.msra.mxu0 %v11788_v54  ;;  %v11881_v53 = vld [vmem:[%s12535_s18 + $0x18] ss:$72 sps:$4 sm:$0xff]   ;;  %v11884_v54 = vld [vmem:[%s15839_s5 + $0x6a8] ss:$12 sps:$4 sm:$0xff]  }
 0x35e   : > { %8284 = vmatpush1.bf16.msra.mxu1 %v11791_v55  ;;  %8242 = vmatprep.subr.bf16.mxu0 %v11796_v56  ;;  %v11887_v55 = vld [vmem:[%s15839_s5 + $0x828] ss:$12 sps:$4 sm:$0xff]  }
 0x35f   : > { %8285 = vmatprep.subr.bf16.mxu1 %v11799_v40  ;;  %v11892_v56 = vld [vmem:[%s15839_s5 + $0x694] ss:$12 sps:$4 sm:$0xff]  }
 0x360   : > { %v11895_v40 = vld [vmem:[%s15839_s5 + $0x814] ss:$12 sps:$4 sm:$0xff]  }
 0x361   : > { %8243 = vmatpush1.bf16.msra.mxu0 %v11794_v45  ;;  %v11890_v45 = vld [vmem:[%s15839_s5 + $0x690] ss:$12 sps:$4 sm:$0xff]  }
 0x362   : > { %8286 = vmatpush1.bf16.msra.mxu1 %v11797_v57  ;;  %8244 = vmatprep.subr.bf16.mxu0 %v11802_v60  ;;  %v11893_v57 = vld [vmem:[%s15839_s5 + $0x810] ss:$12 sps:$4 sm:$0xff]  }
 0x363   : > { %8287 = vmatprep.subr.bf16.mxu1 %v11805_v46  ;;  %v11898_v60 = vld [vmem:[%s15839_s5 + $0x67c] ss:$12 sps:$4 sm:$0xff]  }
 0x364   : > { %v11901_v46 = vld [vmem:[%s15839_s5 + $0x7fc] ss:$12 sps:$4 sm:$0xff]  }
 0x365   : > { %8245 = vmatpush1.bf16.msra.mxu0 %v11800_v51  ;;  %v11896_v51 = vld [vmem:[%s15839_s5 + $0x678] ss:$12 sps:$4 sm:$0xff]  }
 0x366   : > { %8288 = vmatpush1.bf16.msra.mxu1 %v11803_v61  ;;  %8246 = vmatprep.subr.bf16.mxu0 %v11808_v62  ;;  %v11982_v61 = vld [vmem:[%s12535_s18 + $0x24] ss:$72 sps:$4 sm:$0xff]  }
 0x367   : > { %8289 = vmatprep.subr.bf16.mxu1 %v11811_v52  ;;  %v11899_v62 = vld [vmem:[%s15839_s5 + $0x7f8] ss:$12 sps:$4 sm:$0xff]   ;;  %v11985_v52 = vld [vmem:[%s12535_s18 + $0x2c] ss:$72 sps:$4 sm:$0xff]  }
 0x369   : > { %8247 = vmatpush1.bf16.msra.mxu0 %v11806_v58  ;;  %v11904_v58 = vld [vmem:[%s15839_s5 + $0x664] ss:$12 sps:$4 sm:$0xff]  }
 0x36a   : > { %8290 = vmatpush1.bf16.msra.mxu1 %v11809_v0  ;;  %8248 = vmatprep.subr.bf16.mxu0 %v11814_v1  ;;  %v11907_v0 = vld [vmem:[%s15839_s5 + $0x7e4] ss:$12 sps:$4 sm:$0xff]   ;;  %v11902_v1 = vld [vmem:[%s15839_s5 + $0x660] ss:$12 sps:$4 sm:$0xff]  }
 0x36b   : > { %8291 = vmatprep.subr.bf16.mxu1 %v11817_v3  ;;  %v11905_v3 = vld [vmem:[%s15839_s5 + $0x7e0] ss:$12 sps:$4 sm:$0xff]  }
 0x36d   : > { %8249 = vmatpush1.bf16.msra.mxu0 %v11812_v59  ;;  %v11910_v59 = vld [vmem:[%s15839_s5 + $0x64c] ss:$12 sps:$4 sm:$0xff]  }
 0x36e   : > { %8292 = vmatpush1.bf16.msra.mxu1 %v11815_v2  ;;  %8250 = vmatprep.subr.bf16.mxu0 %v11820_v63  ;;  %v11913_v2 = vld [vmem:[%s15839_s5 + $0x7cc] ss:$12 sps:$4 sm:$0xff]   ;;  %v11908_v63 = vld [vmem:[%s15839_s5 + $0x648] ss:$12 sps:$4 sm:$0xff]  }
 0x36f   : > { %8293 = vmatprep.subr.bf16.mxu1 %v11823_v4  ;;  %v11911_v4 = vld [vmem:[%s15839_s5 + $0x7c8] ss:$12 sps:$4 sm:$0xff]  }
 0x371   : > { %8251 = vmatpush1.bf16.msra.mxu0 %v11818_v5  ;;  %v11916_v5 = vld [vmem:[%s15839_s5 + $0x634] ss:$12 sps:$4 sm:$0xff]  }
 0x372   : > { %8294 = vmatpush1.bf16.msra.mxu1 %v11821_v7  ;;  %8252 = vmatprep.subr.bf16.mxu0 %v11826_v6  ;;  %v11919_v7 = vld [vmem:[%s15839_s5 + $0x7b4] ss:$12 sps:$4 sm:$0xff]   ;;  %v11914_v6 = vld [vmem:[%s15839_s5 + $0x630] ss:$12 sps:$4 sm:$0xff]  }
 0x373   : > { %8295 = vmatprep.subr.bf16.mxu1 %v11829_v8  ;;  %v11917_v8 = vld [vmem:[%s15839_s5 + $0x7b0] ss:$12 sps:$4 sm:$0xff]  }
 0x375   : > { %8253 = vmatpush1.bf16.msra.mxu0 %v11824_v11  ;;  %v11920_v11 = vld [vmem:[%s15839_s5 + $0x618] ss:$12 sps:$4 sm:$0xff]  }
 0x376   : > { %8296 = vmatpush1.bf16.msra.mxu1 %v11827_v13  ;;  %8254 = vmatprep.subr.bf16.mxu0 %v11832_v14  ;;  %v11923_v13 = vld [vmem:[%s15839_s5 + $0x798] ss:$12 sps:$4 sm:$0xff]  }
 0x377   : > { %8297 = vmatprep.subr.bf16.mxu1 %v11835_v15  ;;  %v11928_v14 = vld [vmem:[%s15839_s5 + $0x604] ss:$12 sps:$4 sm:$0xff]  }
 0x378   : > { %v11931_v15 = vld [vmem:[%s15839_s5 + $0x784] ss:$12 sps:$4 sm:$0xff]  }
 0x379   : > { %8255 = vmatpush2.bf16.msra.mxu0 %v11830_v16  ;;  %v11926_v16 = vld [vmem:[%s15839_s5 + $0x600] ss:$12 sps:$4 sm:$0xff]  }
 0x37a   : > { %8298 = vmatpush2.bf16.msra.mxu1 %v11833_v17  ;;  %8256 = vmatprep.subr.bf16.mxu0 %v11838_v18  ;;  %v11929_v17 = vld [vmem:[%s15839_s5 + $0x780] ss:$12 sps:$4 sm:$0xff]  }
 0x37b   : > { %8299 = vmatprep.subr.bf16.mxu1 %v11841_v19  ;;  %v11934_v18 = vld [vmem:[%s15839_s5 + $0x76c] ss:$12 sps:$4 sm:$0xff]  }
 0x37c   : > { %v11937_v19 = vld [vmem:[%s15839_s5 + $0x8ec] ss:$12 sps:$4 sm:$0xff]  }
 0x37d   : > { %8257 = vmatpush2.bf16.msra.mxu0 %v11836_v20  ;;  %v11932_v20 = vld [vmem:[%s15839_s5 + $0x768] ss:$12 sps:$4 sm:$0xff]  }
 0x37e   : > { %8300 = vmatpush2.bf16.msra.mxu1 %v11839_v21  ;;  %8258 = vmatprep.subr.bf16.mxu0 %v11844_v23  ;;  %v11935_v21 = vld [vmem:[%s15839_s5 + $0x8e8] ss:$12 sps:$4 sm:$0xff]  }
 0x37f   : > { %8301 = vmatprep.subr.bf16.mxu1 %v11847_v24  ;;  %v11940_v23 = vld [vmem:[%s15839_s5 + $0x754] ss:$12 sps:$4 sm:$0xff]  }
 0x380   : > { %v11943_v24 = vld [vmem:[%s15839_s5 + $0x8d4] ss:$12 sps:$4 sm:$0xff]  }
 0x381   : > { %8259 = vmatpush2.bf16.msra.mxu0 %v11842_v25  ;;  %v11938_v25 = vld [vmem:[%s15839_s5 + $0x750] ss:$12 sps:$4 sm:$0xff]  }
 0x382   : > { %8302 = vmatpush2.bf16.msra.mxu1 %v11845_v28  ;;  %8260 = vmatprep.subr.bf16.mxu0 %v11850_v29  ;;  %v11941_v28 = vld [vmem:[%s15839_s5 + $0x8d0] ss:$12 sps:$4 sm:$0xff]  }
 0x383   : > { %8303 = vmatprep.subr.bf16.mxu1 %v11853_v30  ;;  %v11946_v29 = vld [vmem:[%s15839_s5 + $0x73c] ss:$12 sps:$4 sm:$0xff]  }
 0x384   : > { %v11949_v30 = vld [vmem:[%s15839_s5 + $0x8bc] ss:$12 sps:$4 sm:$0xff]  }
 0x385   : > { %8261 = vmatpush2.bf16.msra.mxu0 %v11848_v31  ;;  %v11944_v31 = vld [vmem:[%s15839_s5 + $0x738] ss:$12 sps:$4 sm:$0xff]  }
 0x386   : > { %8304 = vmatpush2.bf16.msra.mxu1 %v11851_v32  ;;  %8262 = vmatprep.subr.bf16.mxu0 %v11856_v12  ;;  %v11947_v32 = vld [vmem:[%s15839_s5 + $0x8b8] ss:$12 sps:$4 sm:$0xff]  }
 0x387   : > { %8305 = vmatprep.subr.bf16.mxu1 %v11859_v33  ;;  %v11952_v12 = vld [vmem:[%s15839_s5 + $0x724] ss:$12 sps:$4 sm:$0xff]  }
 0x388   : > { %v11955_v33 = vld [vmem:[%s15839_s5 + $0x8a4] ss:$12 sps:$4 sm:$0xff]  }
 0x389   : > { %8263 = vmatpush2.bf16.msra.mxu0 %v11854_v34  ;;  %v11950_v34 = vld [vmem:[%s15839_s5 + $0x720] ss:$12 sps:$4 sm:$0xff]  }
 0x38a   : > { %8306 = vmatpush2.bf16.msra.mxu1 %v11857_v35  ;;  %8264 = vmatprep.subr.bf16.mxu0 %v11862_v36  ;;  %v11953_v35 = vld [vmem:[%s15839_s5 + $0x8a0] ss:$12 sps:$4 sm:$0xff]  }
 0x38b   : > { %8307 = vmatprep.subr.bf16.mxu1 %v11865_v37  ;;  %v11958_v36 = vld [vmem:[%s15839_s5 + $0x70c] ss:$12 sps:$4 sm:$0xff]  }
 0x38c   : > { %v11961_v37 = vld [vmem:[%s15839_s5 + $0x88c] ss:$12 sps:$4 sm:$0xff]  }
 0x38d   : > { %8265 = vmatpush2.bf16.msra.mxu0 %v11860_v38  ;;  %v11956_v38 = vld [vmem:[%s15839_s5 + $0x708] ss:$12 sps:$4 sm:$0xff]  }
 0x38e   : > { %8308 = vmatpush2.bf16.msra.mxu1 %v11863_v39  ;;  %8266 = vmatprep.subr.bf16.mxu0 %v11868_v41  ;;  %v11959_v39 = vld [vmem:[%s15839_s5 + $0x888] ss:$12 sps:$4 sm:$0xff]  }
 0x38f   : > { %8309 = vmatprep.subr.bf16.mxu1 %v11871_v42  ;;  %v11964_v41 = vld [vmem:[%s15839_s5 + $0x6f4] ss:$12 sps:$4 sm:$0xff]  }
 0x390   : > { %v11967_v42 = vld [vmem:[%s15839_s5 + $0x874] ss:$12 sps:$4 sm:$0xff]  }
 0x391   : > { %8267 = vmatpush2.bf16.msra.mxu0 %v11866_v22  ;;  %v11962_v22 = vld [vmem:[%s15839_s5 + $0x6f0] ss:$12 sps:$4 sm:$0xff]  }
 0x392   : > { %8310 = vmatpush2.bf16.msra.mxu1 %v11869_v26  ;;  %8268 = vmatprep.subr.bf16.mxu0 %v11874_v43  ;;  %v11965_v26 = vld [vmem:[%s15839_s5 + $0x870] ss:$12 sps:$4 sm:$0xff]  }
 0x393   : > { %8311 = vmatprep.subr.bf16.mxu1 %v11877_v44  ;;  %v11970_v43 = vld [vmem:[%s15839_s5 + $0x6dc] ss:$12 sps:$4 sm:$0xff]  }
 0x394   : > { %v11973_v44 = vld [vmem:[%s15839_s5 + $0x85c] ss:$12 sps:$4 sm:$0xff]  }
 0x395   : > { %8269 = vmatpush2.bf16.msra.mxu0 %v11872_v47  ;;  %v11968_v47 = vld [vmem:[%s15839_s5 + $0x6d8] ss:$12 sps:$4 sm:$0xff]  }
 0x396   : > { %8312 = vmatpush2.bf16.msra.mxu1 %v11875_v48  ;;  %8324 = vmatprep.subr.bf16.mxu0 %v11886_v49  ;;  %v11971_v48 = vld [vmem:[%s15839_s5 + $0x858] ss:$12 sps:$4 sm:$0xff]  }
 0x397   : > { %8367 = vmatprep.subr.bf16.mxu1 %v11889_v27  ;;  %v11976_v49 = vld [vmem:[%s15839_s5 + $0x6c4] ss:$12 sps:$4 sm:$0xff]  }
 0x398   : > { %8271 = vmatmul.mubr.bf16.vlgmr.msra.gmra.mxu0 %v11878_v50  ;;  %v11979_v27 = vld [vmem:[%s15839_s5 + $0x844] ss:$12 sps:$4 sm:$0xff]   ;;  %v11974_v50 = vld [vmem:[%s15839_s5 + $0x6c0] ss:$12 sps:$4 sm:$0xff]  }
 0x399   : > { %8314 = vmatmul.mubr.bf16.vlgmr.msra.gmra.mxu1 %v11881_v53  ;;  %8325 = vmatpush1.bf16.msra.mxu0 %v11884_v54  ;;  %v11977_v53 = vld [vmem:[%s15839_s5 + $0x840] ss:$12 sps:$4 sm:$0xff]  }
 0x39a   : > { %8368 = vmatpush1.bf16.msra.mxu1 %v11887_v55  ;;  %8326 = vmatprep.subr.bf16.mxu0 %v11892_v56  ;;  %v11988_v54 = vld [vmem:[%s15839_s5 + $0x9ac] ss:$12 sps:$4 sm:$0xff]   ;;  %v11980_v55 = vld [vmem:[%s12535_s18 + $0x20] ss:$72 sps:$4 sm:$0xff]  }
 0x39b   : > { %8369 = vmatprep.subr.bf16.mxu1 %v11895_v40  ;;  %8356 = vmatprep.mubr.bf16.mxu0 %v11982_v61  ;;  %v11983_v56 = vld [vmem:[%s12535_s18 + $0x28] ss:$72 sps:$4 sm:$0xff]   ;;  %v11991_v40 = vld [vmem:[%s15839_s5 + $0xb2c] ss:$12 sps:$4 sm:$0xff]   ;;  %v12087_v61 = vld [vmem:[%s12535_s18 + $0x3c] ss:$72 sps:$4 sm:$0xff]  }
 0x39c   : > { %8399 = vmatprep.mubr.bf16.mxu1 %v11985_v52  ;;  %v11995_v52 = vld [vmem:[%s15839_s5 + $0xb10] ss:$12 sps:$4 sm:$0xff]  }
 0x39d   : > { %8327 = vmatpush1.bf16.msra.mxu0 %v11890_v45  ;;  %v11986_v45 = vld [vmem:[%s15839_s5 + $0x9a8] ss:$12 sps:$4 sm:$0xff]  }
 0x39e   : > { %8370 = vmatpush1.bf16.msra.mxu1 %v11893_v57  ;;  %8328 = vmatprep.subr.bf16.mxu0 %v11898_v60  ;;  %v11989_v57 = vld [vmem:[%s15839_s5 + $0xb28] ss:$12 sps:$4 sm:$0xff]  }
 0x39f   : > { %8371 = vmatprep.subr.bf16.mxu1 %v11901_v46  ;;  %v11994_v60 = vld [vmem:[%s15839_s5 + $0x994] ss:$12 sps:$4 sm:$0xff]  }
 0x3a0   : > { %v11997_v46 = vld [vmem:[%s15839_s5 + $0xb14] ss:$12 sps:$4 sm:$0xff]  }
 0x3a1   : > { %8329 = vmatpush1.bf16.msra.mxu0 %v11896_v51  ;;  %v12084_v51 = vld [vmem:[%s12535_s18 + $0x34] ss:$72 sps:$4 sm:$0xff]  }
 0x3a2   : > { %8372 = vmatpush1.bf16.msra.mxu1 %v11899_v62  ;;  %8330 = vmatprep.subr.bf16.mxu0 %v11904_v58  ;;  %v11992_v62 = vld [vmem:[%s15839_s5 + $0x990] ss:$12 sps:$4 sm:$0xff]  }
 0x3a3   : > { %8373 = vmatprep.subr.bf16.mxu1 %v11907_v0  ;;  %v12000_v58 = vld [vmem:[%s15839_s5 + $0x97c] ss:$12 sps:$4 sm:$0xff]  }
 0x3a4   : > { %v12003_v0 = vld [vmem:[%s15839_s5 + $0xafc] ss:$12 sps:$4 sm:$0xff]  }
 0x3a5   : > { %8331 = vmatpush1.bf16.msra.mxu0 %v11902_v1  ;;  %v11998_v1 = vld [vmem:[%s15839_s5 + $0x978] ss:$12 sps:$4 sm:$0xff]  }
 0x3a6   : > { %8374 = vmatpush1.bf16.msra.mxu1 %v11905_v3  ;;  %8332 = vmatprep.subr.bf16.mxu0 %v11910_v59  ;;  %v12001_v3 = vld [vmem:[%s15839_s5 + $0xaf8] ss:$12 sps:$4 sm:$0xff]  }
 0x3a7   : > { %8375 = vmatprep.subr.bf16.mxu1 %v11913_v2  ;;  %v12006_v59 = vld [vmem:[%s15839_s5 + $0x964] ss:$12 sps:$4 sm:$0xff]  }
 0x3a8   : > { %v12009_v2 = vld [vmem:[%s15839_s5 + $0xae4] ss:$12 sps:$4 sm:$0xff]  }
 0x3a9   : > { %8333 = vmatpush1.bf16.msra.mxu0 %v11908_v63  ;;  %v12004_v63 = vld [vmem:[%s15839_s5 + $0x960] ss:$12 sps:$4 sm:$0xff]  }
 0x3aa   : > { %8376 = vmatpush1.bf16.msra.mxu1 %v11911_v4  ;;  %8334 = vmatprep.subr.bf16.mxu0 %v11916_v5  ;;  %v12007_v4 = vld [vmem:[%s15839_s5 + $0xae0] ss:$12 sps:$4 sm:$0xff]  }
 0x3ab   : > { %8377 = vmatprep.subr.bf16.mxu1 %v11919_v7  ;;  %v12012_v5 = vld [vmem:[%s15839_s5 + $0x94c] ss:$12 sps:$4 sm:$0xff]  }
 0x3ac   : > { %v12015_v7 = vld [vmem:[%s15839_s5 + $0xacc] ss:$12 sps:$4 sm:$0xff]  }
 0x3ad   : > { %8335 = vmatpush1.bf16.msra.mxu0 %v11914_v6  ;;  %v12010_v6 = vld [vmem:[%s15839_s5 + $0x948] ss:$12 sps:$4 sm:$0xff]  }
 0x3ae   : > { %8378 = vmatpush1.bf16.msra.mxu1 %v11917_v8  ;;  %8336 = vmatprep.subr.bf16.mxu0 %v11922_v9  ;;  %v12013_v8 = vld [vmem:[%s15839_s5 + $0xac8] ss:$12 sps:$4 sm:$0xff]  }
 0x3af   : > { %8379 = vmatprep.subr.bf16.mxu1 %v11925_v10  ;;  %v12018_v9 = vld [vmem:[%s15839_s5 + $0x934] ss:$12 sps:$4 sm:$0xff]  }
 0x3b0   : > { %v12021_v10 = vld [vmem:[%s15839_s5 + $0xab4] ss:$12 sps:$4 sm:$0xff]  }
 0x3b1   : > { %8337 = vmatpush1.bf16.msra.mxu0 %v11920_v11  ;;  %v12016_v11 = vld [vmem:[%s15839_s5 + $0x930] ss:$12 sps:$4 sm:$0xff]  }
 0x3b2   : > { %8380 = vmatpush1.bf16.msra.mxu1 %v11923_v13  ;;  %8338 = vmatprep.subr.bf16.mxu0 %v11928_v14  ;;  %v12019_v13 = vld [vmem:[%s15839_s5 + $0xab0] ss:$12 sps:$4 sm:$0xff]  }
 0x3b3   : > { %8381 = vmatprep.subr.bf16.mxu1 %v11931_v15  ;;  %v12024_v14 = vld [vmem:[%s15839_s5 + $0x91c] ss:$12 sps:$4 sm:$0xff]  }
 0x3b4   : > { %v12027_v15 = vld [vmem:[%s15839_s5 + $0xa9c] ss:$12 sps:$4 sm:$0xff]  }
 0x3b5   : > { %8339 = vmatpush1.bf16.msra.mxu0 %v11926_v16  ;;  %v12022_v16 = vld [vmem:[%s15839_s5 + $0x918] ss:$12 sps:$4 sm:$0xff]  }
 0x3b6   : > { %8382 = vmatpush1.bf16.msra.mxu1 %v11929_v17  ;;  %8340 = vmatprep.subr.bf16.mxu0 %v11934_v18  ;;  %v12025_v17 = vld [vmem:[%s15839_s5 + $0xa98] ss:$12 sps:$4 sm:$0xff]  }
 0x3b7   : > { %8383 = vmatprep.subr.bf16.mxu1 %v11937_v19  ;;  %v12030_v18 = vld [vmem:[%s15839_s5 + $0x904] ss:$12 sps:$4 sm:$0xff]  }
 0x3b8   : > { %v12033_v19 = vld [vmem:[%s15839_s5 + $0xa84] ss:$12 sps:$4 sm:$0xff]  }
 0x3b9   : > { %8341 = vmatpush2.bf16.msra.mxu0 %v11932_v20  ;;  %v12028_v20 = vld [vmem:[%s15839_s5 + $0x900] ss:$12 sps:$4 sm:$0xff]  }
 0x3ba   : > { %8384 = vmatpush2.bf16.msra.mxu1 %v11935_v21  ;;  %8342 = vmatprep.subr.bf16.mxu0 %v11940_v23  ;;  %v12031_v21 = vld [vmem:[%s15839_s5 + $0xa80] ss:$12 sps:$4 sm:$0xff]  }
 0x3bb   : > { %8385 = vmatprep.subr.bf16.mxu1 %v11943_v24  ;;  %v12036_v23 = vld [vmem:[%s15839_s5 + $0xa6c] ss:$12 sps:$4 sm:$0xff]  }
 0x3bc   : > { %v12039_v24 = vld [vmem:[%s15839_s5 + $0xbec] ss:$12 sps:$4 sm:$0xff]  }
 0x3bd   : > { %8343 = vmatpush2.bf16.msra.mxu0 %v11938_v25  ;;  %v12034_v25 = vld [vmem:[%s15839_s5 + $0xa68] ss:$12 sps:$4 sm:$0xff]  }
 0x3be   : > { %8386 = vmatpush2.bf16.msra.mxu1 %v11941_v28  ;;  %8344 = vmatprep.subr.bf16.mxu0 %v11946_v29  ;;  %v12037_v28 = vld [vmem:[%s15839_s5 + $0xbe8] ss:$12 sps:$4 sm:$0xff]  }
 0x3bf   : > { %8387 = vmatprep.subr.bf16.mxu1 %v11949_v30  ;;  %v12042_v29 = vld [vmem:[%s15839_s5 + $0xa54] ss:$12 sps:$4 sm:$0xff]  }
 0x3c0   : > { %v12045_v30 = vld [vmem:[%s15839_s5 + $0xbd4] ss:$12 sps:$4 sm:$0xff]  }
 0x3c1   : > { %8345 = vmatpush2.bf16.msra.mxu0 %v11944_v31  ;;  %v12040_v31 = vld [vmem:[%s15839_s5 + $0xa50] ss:$12 sps:$4 sm:$0xff]  }
 0x3c2   : > { %8388 = vmatpush2.bf16.msra.mxu1 %v11947_v32  ;;  %8346 = vmatprep.subr.bf16.mxu0 %v11952_v12  ;;  %v12043_v32 = vld [vmem:[%s15839_s5 + $0xbd0] ss:$12 sps:$4 sm:$0xff]  }
 0x3c3   : > { %8389 = vmatprep.subr.bf16.mxu1 %v11955_v33  ;;  %v12048_v12 = vld [vmem:[%s15839_s5 + $0xa3c] ss:$12 sps:$4 sm:$0xff]  }
 0x3c4   : > { %v12051_v33 = vld [vmem:[%s15839_s5 + $0xbbc] ss:$12 sps:$4 sm:$0xff]  }
 0x3c5   : > { %8347 = vmatpush2.bf16.msra.mxu0 %v11950_v34  ;;  %v12046_v34 = vld [vmem:[%s15839_s5 + $0xa38] ss:$12 sps:$4 sm:$0xff]  }
 0x3c6   : > { %8390 = vmatpush2.bf16.msra.mxu1 %v11953_v35  ;;  %8348 = vmatprep.subr.bf16.mxu0 %v11958_v36  ;;  %v12049_v35 = vld [vmem:[%s15839_s5 + $0xbb8] ss:$12 sps:$4 sm:$0xff]  }
 0x3c7   : > { %8391 = vmatprep.subr.bf16.mxu1 %v11961_v37  ;;  %v12054_v36 = vld [vmem:[%s15839_s5 + $0xa24] ss:$12 sps:$4 sm:$0xff]  }
 0x3c8   : > { %v12057_v37 = vld [vmem:[%s15839_s5 + $0xba4] ss:$12 sps:$4 sm:$0xff]  }
 0x3c9   : > { %8349 = vmatpush2.bf16.msra.mxu0 %v11956_v38  ;;  %v12052_v38 = vld [vmem:[%s15839_s5 + $0xa20] ss:$12 sps:$4 sm:$0xff]  }
 0x3ca   : > { %8392 = vmatpush2.bf16.msra.mxu1 %v11959_v39  ;;  %8350 = vmatprep.subr.bf16.mxu0 %v11964_v41  ;;  %v12055_v39 = vld [vmem:[%s15839_s5 + $0xba0] ss:$12 sps:$4 sm:$0xff]  }
 0x3cb   : > { %8393 = vmatprep.subr.bf16.mxu1 %v11967_v42  ;;  %v12060_v41 = vld [vmem:[%s15839_s5 + $0xa0c] ss:$12 sps:$4 sm:$0xff]  }
 0x3cc   : > { %v12063_v42 = vld [vmem:[%s15839_s5 + $0xb8c] ss:$12 sps:$4 sm:$0xff]  }
 0x3cd   : > { %8351 = vmatpush2.bf16.msra.mxu0 %v11962_v22  ;;  %v12058_v22 = vld [vmem:[%s15839_s5 + $0xa08] ss:$12 sps:$4 sm:$0xff]  }
 0x3ce   : > { %8394 = vmatpush2.bf16.msra.mxu1 %v11965_v26  ;;  %8352 = vmatprep.subr.bf16.mxu0 %v11970_v43  ;;  %v12061_v26 = vld [vmem:[%s15839_s5 + $0xb88] ss:$12 sps:$4 sm:$0xff]  }
 0x3cf   : > { %8395 = vmatprep.subr.bf16.mxu1 %v11973_v44  ;;  %v12066_v43 = vld [vmem:[%s15839_s5 + $0x9f4] ss:$12 sps:$4 sm:$0xff]  }
 0x3d0   : > { %v12069_v44 = vld [vmem:[%s15839_s5 + $0xb74] ss:$12 sps:$4 sm:$0xff]  }
 0x3d1   : > { %8353 = vmatpush2.bf16.msra.mxu0 %v11968_v47  ;;  %v12064_v47 = vld [vmem:[%s15839_s5 + $0x9f0] ss:$12 sps:$4 sm:$0xff]  }
 0x3d2   : > { %8396 = vmatpush2.bf16.msra.mxu1 %v11971_v48  ;;  %8354 = vmatprep.subr.bf16.mxu0 %v11976_v49  ;;  %v12067_v48 = vld [vmem:[%s15839_s5 + $0xb70] ss:$12 sps:$4 sm:$0xff]  }
 0x3d3   : > { %8397 = vmatprep.subr.bf16.mxu1 %v11979_v27  ;;  %v12072_v49 = vld [vmem:[%s15839_s5 + $0x9dc] ss:$12 sps:$4 sm:$0xff]  }
 0x3d4   : > { %v12075_v27 = vld [vmem:[%s15839_s5 + $0xb5c] ss:$12 sps:$4 sm:$0xff]  }
 0x3d5   : > { %8355 = vmatpush2.bf16.msra.mxu0 %v11974_v50  ;;  %v12070_v50 = vld [vmem:[%s15839_s5 + $0x9d8] ss:$12 sps:$4 sm:$0xff]  }
 0x3d6   : > { %8398 = vmatpush2.bf16.msra.mxu1 %v11977_v53  ;;  %8410 = vmatprep.subr.bf16.mxu0 %v11988_v54  ;;  %v12073_v53 = vld [vmem:[%s15839_s5 + $0xb58] ss:$12 sps:$4 sm:$0xff]  }
 0x3d7   : > { %8453 = vmatprep.subr.bf16.mxu1 %v11991_v40  ;;  %v12078_v54 = vld [vmem:[%s15839_s5 + $0x9c4] ss:$12 sps:$4 sm:$0xff]   ;;  %v12079_v40 = vld [vmem:[%s15839_s5 + $0xb40] ss:$12 sps:$4 sm:$0xff]  }
 0x3d8   : > { %8357 = vmatmul.mubr.bf16.vlgmr.msra.gmra.mxu0 %v11980_v55  ;;  %v12081_v55 = vld [vmem:[%s15839_s5 + $0xb44] ss:$12 sps:$4 sm:$0xff]  }
 0x3d9   : > { %8400 = vmatmul.mubr.bf16.vlgmr.msra.gmra.mxu1 %v11983_v56  ;;  %8411 = vmatpush1.bf16.msra.mxu0 %v11986_v45  ;;  %v12076_v56 = vld [vmem:[%s15839_s5 + $0x9c0] ss:$12 sps:$4 sm:$0xff]  }
 0x3da   : > { %8454 = vmatpush1.bf16.msra.mxu1 %v11989_v57  ;;  %8412 = vmatprep.subr.bf16.mxu0 %v11994_v60  ;;  %v12090_v45 = vld [vmem:[%s15839_s5 + $0xcac] ss:$12 sps:$4 sm:$0xff]  }
 0x3db   : > { %8455 = vmatprep.subr.bf16.mxu1 %v11997_v46  ;;  %8442 = vmatprep.mubr.bf16.mxu0 %v12084_v51  ;;  %v12082_v57 = vld [vmem:[%s12535_s18 + $0x30] ss:$72 sps:$4 sm:$0xff]   ;;  %v12088_v51 = vld [vmem:[%s15839_s5 + $0xca8] ss:$12 sps:$4 sm:$0xff]  }
 0x3dc   : > { %8485 = vmatprep.mubr.bf16.mxu1 %v12087_v61  ;;  %v12085_v60 = vld [vmem:[%s12535_s18 + $0x38] ss:$72 sps:$4 sm:$0xff]   ;;  %v12091_v46 = vld [vmem:[%s15839_s5 + $0x170] ss:$12 sps:$4 sm:$0xff]  }
 0x3dd   : > { %8413 = vmatpush1.bf16.msra.mxu0 %v11992_v62  ;;  %v12092_v61 = vld [vmem:[%s15839_s5 + $0xb0] ss:$12 sps:$4 sm:$0xff]   ;;  %v12095_v62 = vld [vmem:[%s15839_s5 + $0xc94] ss:$12 sps:$4 sm:$0xff]  }
 0x3de   : > { %8456 = vmatpush1.bf16.msra.mxu1 %v11995_v52  ;;  %8414 = vmatprep.subr.bf16.mxu0 %v12000_v58  ;;  %v12096_v52 = vld [vmem:[%s15839_s5 + $0x158] ss:$12 sps:$4 sm:$0xff]   ;;  %v12093_v58 = vld [vmem:[%s15839_s5 + $0xc90] ss:$12 sps:$4 sm:$0xff]  }
 0x3df   : > { %8457 = vmatprep.subr.bf16.mxu1 %v12003_v0  ;;  %v12170_v0 = vld [vmem:[%s12535_s18 + $0x44] ss:$72 sps:$4 sm:$0xff]  }
 0x3e1   : > { %8415 = vmatpush1.bf16.msra.mxu0 %v11998_v1  ;;  %v12097_v1 = vld [vmem:[%s15839_s5 + $0x98] ss:$12 sps:$4 sm:$0xff]  }
 0x3e2   : > { %8458 = vmatpush1.bf16.msra.mxu1 %v12001_v3  ;;  %8416 = vmatprep.subr.bf16.mxu0 %v12006_v59  ;;  %v12100_v3 = vld [vmem:[%s15839_s5 + $0xc7c] ss:$12 sps:$4 sm:$0xff]   ;;  %v12101_v59 = vld [vmem:[%s15839_s5 + $0x140] ss:$12 sps:$4 sm:$0xff]  }
 0x3e3   : > { %8459 = vmatprep.subr.bf16.mxu1 %v12009_v2  ;;  %v12098_v2 = vld [vmem:[%s15839_s5 + $0xc78] ss:$12 sps:$4 sm:$0xff]  }
 0x3e5   : > { %8417 = vmatpush1.bf16.msra.mxu0 %v12004_v63  ;;  %v12283_v63 = vld [vmem:[%s12535_s18 + $0x4] ss:$72 sps:$4 sm:$0xff]  }
 0x3e6   : > { %8460 = vmatpush1.bf16.msra.mxu1 %v12007_v4  ;;  %8418 = vmatprep.subr.bf16.mxu0 %v12012_v5  ;;  %v12102_v4 = vld [vmem:[%s15839_s5 + $0x80] ss:$12 sps:$4 sm:$0xff]   ;;  %v12105_v5 = vld [vmem:[%s15839_s5 + $0xc64] ss:$12 sps:$4 sm:$0xff]  }
 0x3e7   : > { %8461 = vmatprep.subr.bf16.mxu1 %v12015_v7  ;;  %v12106_v7 = vld [vmem:[%s15839_s5 + $0x128] ss:$12 sps:$4 sm:$0xff]  }
 0x3e9   : > { %8419 = vmatpush1.bf16.msra.mxu0 %v12010_v6  ;;  %v12103_v6 = vld [vmem:[%s15839_s5 + $0xc60] ss:$12 sps:$4 sm:$0xff]  }
 0x3ea   : > { %8462 = vmatpush1.bf16.msra.mxu1 %v12013_v8  ;;  %8420 = vmatprep.subr.bf16.mxu0 %v12018_v9  ;;  %v12107_v8 = vld [vmem:[%s15839_s5 + $0x68] ss:$12 sps:$4 sm:$0xff]   ;;  %v12110_v9 = vld [vmem:[%s15839_s5 + $0xc4c] ss:$12 sps:$4 sm:$0xff]  }
 0x3eb   : > { %8463 = vmatprep.subr.bf16.mxu1 %v12021_v10  ;;  %v12111_v10 = vld [vmem:[%s15839_s5 + $0x110] ss:$12 sps:$4 sm:$0xff]  }
 0x3ed   : > { %8421 = vmatpush1.bf16.msra.mxu0 %v12016_v11  ;;  %v12108_v11 = vld [vmem:[%s15839_s5 + $0xc48] ss:$12 sps:$4 sm:$0xff]  }
 0x3ee   : > { %8464 = vmatpush1.bf16.msra.mxu1 %v12019_v13  ;;  %8422 = vmatprep.subr.bf16.mxu0 %v12024_v14  ;;  %v12112_v13 = vld [vmem:[%s15839_s5 + $0x50] ss:$12 sps:$4 sm:$0xff]   ;;  %v12115_v14 = vld [vmem:[%s15839_s5 + $0xc34] ss:$12 sps:$4 sm:$0xff]  }
 0x3ef   : > { %8465 = vmatprep.subr.bf16.mxu1 %v12027_v15  ;;  %v12116_v15 = vld [vmem:[%s15839_s5 + $0xf8] ss:$12 sps:$4 sm:$0xff]  }
 0x3f1   : > { %8423 = vmatpush1.bf16.msra.mxu0 %v12022_v16  ;;  %v12113_v16 = vld [vmem:[%s15839_s5 + $0xc30] ss:$12 sps:$4 sm:$0xff]  }
 0x3f2   : > { %8466 = vmatpush1.bf16.msra.mxu1 %v12025_v17  ;;  %8424 = vmatprep.subr.bf16.mxu0 %v12030_v18  ;;  %v12117_v17 = vld [vmem:[%s15839_s5 + $0x38] ss:$12 sps:$4 sm:$0xff]   ;;  %v12120_v18 = vld [vmem:[%s15839_s5 + $0xc1c] ss:$12 sps:$4 sm:$0xff]  }
 0x3f3   : > { %8467 = vmatprep.subr.bf16.mxu1 %v12033_v19  ;;  %v12121_v19 = vld [vmem:[%s15839_s5 + $0xe0] ss:$12 sps:$4 sm:$0xff]  }
 0x3f5   : > { %8425 = vmatpush1.bf16.msra.mxu0 %v12028_v20  ;;  %v12118_v20 = vld [vmem:[%s15839_s5 + $0xc18] ss:$12 sps:$4 sm:$0xff]  }
 0x3f6   : > { %8468 = vmatpush1.bf16.msra.mxu1 %v12031_v21  ;;  %8426 = vmatprep.subr.bf16.mxu0 %v12036_v23  ;;  %v12122_v21 = vld [vmem:[%s15839_s5 + $0x20] ss:$12 sps:$4 sm:$0xff]   ;;  %v12125_v23 = vld [vmem:[%s15839_s5 + $0xc04] ss:$12 sps:$4 sm:$0xff]  }
 0x3f7   : > { %8469 = vmatprep.subr.bf16.mxu1 %v12039_v24  ;;  %v12126_v24 = vld [vmem:[%s15839_s5 + $0xc8] ss:$12 sps:$4 sm:$0xff]  }
 0x3f9   : > { %8427 = vmatpush2.bf16.msra.mxu0 %v12034_v25  ;;  %v12123_v25 = vld [vmem:[%s15839_s5 + $0xc00] ss:$12 sps:$4 sm:$0xff]  }
 0x3fa   : > { %8470 = vmatpush2.bf16.msra.mxu1 %v12037_v28  ;;  %8428 = vmatprep.subr.bf16.mxu0 %v12042_v29  ;;  %v12127_v28 = vld [vmem:[%s15839_s5 + $0x8] ss:$12 sps:$4 sm:$0xff]   ;;  %v12130_v29 = vld [vmem:[%s15839_s5 + $0xd6c] ss:$12 sps:$4 sm:$0xff]  }
 0x3fb   : > { %8471 = vmatprep.subr.bf16.mxu1 %v12045_v30  ;;  %v12131_v30 = vld [vmem:[%s15839_s5 + $0x2f0] ss:$12 sps:$4 sm:$0xff]  }
 0x3fd   : > { %8429 = vmatpush2.bf16.msra.mxu0 %v12040_v31  ;;  %v12128_v31 = vld [vmem:[%s15839_s5 + $0xd68] ss:$12 sps:$4 sm:$0xff]  }
 0x3fe   : > { %8472 = vmatpush2.bf16.msra.mxu1 %v12043_v32  ;;  %8430 = vmatprep.subr.bf16.mxu0 %v12048_v12  ;;  %v12132_v32 = vld [vmem:[%s15839_s5 + $0x230] ss:$12 sps:$4 sm:$0xff]   ;;  %v12135_v12 = vld [vmem:[%s15839_s5 + $0xd54] ss:$12 sps:$4 sm:$0xff]  }
 0x3ff   : > { %8473 = vmatprep.subr.bf16.mxu1 %v12051_v33  ;;  %v12136_v33 = vld [vmem:[%s15839_s5 + $0x2d8] ss:$12 sps:$4 sm:$0xff]  }
 0x401   : > { %8431 = vmatpush2.bf16.msra.mxu0 %v12046_v34  ;;  %v12133_v34 = vld [vmem:[%s15839_s5 + $0xd50] ss:$12 sps:$4 sm:$0xff]  }
 0x402   : > { %8474 = vmatpush2.bf16.msra.mxu1 %v12049_v35  ;;  %8432 = vmatprep.subr.bf16.mxu0 %v12054_v36  ;;  %v12284_v35 = vld [vmem:[%s12535_s18] ss:$72 sps:$4 sm:$0xff]   ;;  %v12137_v36 = vld [vmem:[%s15839_s5 + $0x218] ss:$12 sps:$4 sm:$0xff]  }
 0x403   : > { %8475 = vmatprep.subr.bf16.mxu1 %v12057_v37  ;;  %v12140_v37 = vld [vmem:[%s15839_s5 + $0xd3c] ss:$12 sps:$4 sm:$0xff]  }
 0x405   : > { %8433 = vmatpush2.bf16.msra.mxu0 %v12052_v38  ;;  %v12141_v38 = vld [vmem:[%s15839_s5 + $0x2c0] ss:$12 sps:$4 sm:$0xff]  }
 0x406   : > { %8476 = vmatpush2.bf16.msra.mxu1 %v12055_v39  ;;  %8434 = vmatprep.subr.bf16.mxu0 %v12060_v41  ;;  %v12138_v39 = vld [vmem:[%s15839_s5 + $0xd38] ss:$12 sps:$4 sm:$0xff]   ;;  %v12285_v41 = vld [vmem:[%s12535_s18 + $0xc] ss:$72 sps:$4 sm:$0xff]  }
 0x407   : > { %8477 = vmatprep.subr.bf16.mxu1 %v12063_v42  ;;  %v12142_v42 = vld [vmem:[%s15839_s5 + $0x200] ss:$12 sps:$4 sm:$0xff]  }
 0x409   : > { %8435 = vmatpush2.bf16.msra.mxu0 %v12058_v22  ;;  %v12145_v22 = vld [vmem:[%s15839_s5 + $0xd24] ss:$12 sps:$4 sm:$0xff]  }
 0x40a   : > { %8478 = vmatpush2.bf16.msra.mxu1 %v12061_v26  ;;  %8436 = vmatprep.subr.bf16.mxu0 %v12066_v43  ;;  %v12146_v26 = vld [vmem:[%s15839_s5 + $0x2a8] ss:$12 sps:$4 sm:$0xff]   ;;  %v12143_v43 = vld [vmem:[%s15839_s5 + $0xd20] ss:$12 sps:$4 sm:$0xff]  }
 0x40b   : > { %8479 = vmatprep.subr.bf16.mxu1 %v12069_v44  ;;  %v12147_v44 = vld [vmem:[%s15839_s5 + $0x1e8] ss:$12 sps:$4 sm:$0xff]  }
 0x40d   : > { %8437 = vmatpush2.bf16.msra.mxu0 %v12064_v47  ;;  %v12150_v47 = vld [vmem:[%s15839_s5 + $0xd0c] ss:$12 sps:$4 sm:$0xff]  }
 0x40e   : > { %8480 = vmatpush2.bf16.msra.mxu1 %v12067_v48  ;;  %8438 = vmatprep.subr.bf16.mxu0 %v12072_v49  ;;  %v12151_v48 = vld [vmem:[%s15839_s5 + $0x290] ss:$12 sps:$4 sm:$0xff]   ;;  %v12148_v49 = vld [vmem:[%s15839_s5 + $0xd08] ss:$12 sps:$4 sm:$0xff]  }
 0x40f   : > { %8481 = vmatprep.subr.bf16.mxu1 %v12075_v27  ;;  %v12152_v27 = vld [vmem:[%s15839_s5 + $0x1d0] ss:$12 sps:$4 sm:$0xff]  }
 0x411   : > { %8439 = vmatpush2.bf16.msra.mxu0 %v12070_v50  ;;  %v12155_v50 = vld [vmem:[%s15839_s5 + $0xcf4] ss:$12 sps:$4 sm:$0xff]  }
 0x412   : > { %8482 = vmatpush2.bf16.msra.mxu1 %v12073_v53  ;;  %8440 = vmatprep.subr.bf16.mxu0 %v12078_v54  ;;  %v12156_v53 = vld [vmem:[%s15839_s5 + $0x278] ss:$12 sps:$4 sm:$0xff]   ;;  %v12153_v54 = vld [vmem:[%s15839_s5 + $0xcf0] ss:$12 sps:$4 sm:$0xff]  }
 0x413   : > { %8483 = vmatprep.subr.bf16.mxu1 %v12081_v55  ;;  %v12157_v55 = vld [vmem:[%s15839_s5 + $0x1b8] ss:$12 sps:$4 sm:$0xff]  }
 0x415   : > { %8441 = vmatpush2.bf16.msra.mxu0 %v12076_v56  ;;  %v12160_v56 = vld [vmem:[%s15839_s5 + $0xcdc] ss:$12 sps:$4 sm:$0xff]  }
 0x416   : > { %8484 = vmatpush2.bf16.msra.mxu1 %v12079_v40  ;;  %8496 = vmatprep.subr.bf16.mxu0 %v12090_v45  ;;  %v12161_v40 = vld [vmem:[%s15839_s5 + $0x260] ss:$12 sps:$4 sm:$0xff]   ;;  %v12158_v45 = vld [vmem:[%s15839_s5 + $0xcd8] ss:$12 sps:$4 sm:$0xff]  }
 0x417   : > { %10629 = vmatprep.subr.bf16.mxu1 %v12091_v46  ;;  %v12166_v46 = vld [vmem:[%s15839_s5 + $0x248] ss:$12 sps:$4 sm:$0xff]  }
 0x418   : > { %8443 = vmatmul.mubr.bf16.vlgmr.msra.gmra.mxu0 %v12082_v57  ;;  %v12162_v57 = vld [vmem:[%s15839_s5 + $0x1a0] ss:$12 sps:$4 sm:$0xff]  }
 0x419   : > { %8486 = vmatmul.mubr.bf16.vlgmr.msra.gmra.mxu1 %v12085_v60  ;;  %8497 = vmatpush1.bf16.msra.mxu0 %v12088_v51  ;;  %v12165_v60 = vld [vmem:[%s15839_s5 + $0xcc4] ss:$12 sps:$4 sm:$0xff]   ;;  %v12163_v51 = vld [vmem:[%s15839_s5 + $0xcc0] ss:$12 sps:$4 sm:$0xff]  }
 0x41a   : > { %10630 = vmatpush3.bf16.msra.mxu1 %v12092_v61  ;;  %8498 = vmatprep.subr.bf16.mxu0 %v12095_v62  ;;  %v12167_v61 = vld [vmem:[%s15839_s5 + $0x188] ss:$12 sps:$4 sm:$0xff]   ;;  %v12171_v62 = vld [vmem:[%s15839_s5 + $0x470] ss:$12 sps:$4 sm:$0xff]  }
 0x41b   : > { %10631 = vmatprep.subr.bf16.mxu1 %v12096_v52  ;;  %8571 = vmatprep.mubr.bf16.mxu1 %v12283_v63  ;;  %v15262_v52 = vld [vmem:[%s12535_s18 + $0x40] ss:$72 sps:$4 sm:$0xff]  }
 0x41c   : > { %8528 = vmatprep.mubr.bf16.mxu0 %v12170_v0  ;;  %v12172_v0 = vld [vmem:[%s15839_s5 + $0x3b0] ss:$12 sps:$4 sm:$0xff]  }
 0x41d   : > { %8499 = vmatpush1.bf16.msra.mxu0 %v12093_v58  ;;  %v12173_v58 = vld [vmem:[%s15839_s5 + $0x5f0] ss:$12 sps:$4 sm:$0xff]  }
 0x41e   : > { %10632 = vmatpush3.bf16.msra.mxu1 %v12097_v1  ;;  %8500 = vmatprep.subr.bf16.mxu0 %v12100_v3  ;;  %v12174_v1 = vld [vmem:[%s15839_s5 + $0x530] ss:$12 sps:$4 sm:$0xff]   ;;  %v12175_v3 = vld [vmem:[%s15839_s5 + $0x458] ss:$12 sps:$4 sm:$0xff]  }
 0x41f   : > { %10633 = vmatprep.subr.bf16.mxu1 %v12101_v59  ;;  %v12177_v59 = vld [vmem:[%s15839_s5 + $0x5d8] ss:$12 sps:$4 sm:$0xff]   ;;  %v12286_v63 = vld [vmem:[%s12535_s18 + $0x8] ss:$72 sps:$4 sm:$0xff]  }
 0x421   : > { %8501 = vmatpush1.bf16.msra.mxu0 %v12098_v2  ;;  %v12176_v2 = vld [vmem:[%s15839_s5 + $0x398] ss:$12 sps:$4 sm:$0xff]  }
 0x422   : > { %10634 = vmatpush3.bf16.msra.mxu1 %v12102_v4  ;;  %8502 = vmatprep.subr.bf16.mxu0 %v12105_v5  ;;  %v12178_v4 = vld [vmem:[%s15839_s5 + $0x518] ss:$12 sps:$4 sm:$0xff]   ;;  %v12179_v5 = vld [vmem:[%s15839_s5 + $0x440] ss:$12 sps:$4 sm:$0xff]  }
 0x423   : > { %10635 = vmatprep.subr.bf16.mxu1 %v12106_v7  ;;  %v12181_v7 = vld [vmem:[%s15839_s5 + $0x5c0] ss:$12 sps:$4 sm:$0xff]  }
 0x425   : > { %8503 = vmatpush1.bf16.msra.mxu0 %v12103_v6  ;;  %v12180_v6 = vld [vmem:[%s15839_s5 + $0x380] ss:$12 sps:$4 sm:$0xff]  }
 0x426   : > { %10636 = vmatpush3.bf16.msra.mxu1 %v12107_v8  ;;  %8504 = vmatprep.subr.bf16.mxu0 %v12110_v9  ;;  %v12287_v8 = vld [vmem:[%s12535_s18 + $0x14] ss:$72 sps:$4 sm:$0xff]  }
 0x427   : > { %10637 = vmatprep.subr.bf16.mxu1 %v12111_v10  ;;  %v12288_v9 = vld [vmem:[%s12535_s18 + $0x1c] ss:$72 sps:$4 sm:$0xff]   ;;  %v12182_v10 = vld [vmem:[%s15839_s5 + $0x500] ss:$12 sps:$4 sm:$0xff]  }
 0x429   : > { %8505 = vmatpush1.bf16.msra.mxu0 %v12108_v11  ;;  %v12183_v11 = vld [vmem:[%s15839_s5 + $0x428] ss:$12 sps:$4 sm:$0xff]  }
 0x42a   : > { %10638 = vmatpush3.bf16.msra.mxu1 %v12112_v13  ;;  %8506 = vmatprep.subr.bf16.mxu0 %v12115_v14  ;;  %v12185_v13 = vld [vmem:[%s15839_s5 + $0x5a8] ss:$12 sps:$4 sm:$0xff]  }
 0x42b   : > { %10639 = vmatprep.subr.bf16.mxu1 %v12116_v15  ;;  %v12184_v14 = vld [vmem:[%s15839_s5 + $0x368] ss:$12 sps:$4 sm:$0xff]  }
 0x42c   : > { %v12186_v15 = vld [vmem:[%s15839_s5 + $0x4e8] ss:$12 sps:$4 sm:$0xff]  }
 0x42d   : > { %8507 = vmatpush1.bf16.msra.mxu0 %v12113_v16  ;;  %v12187_v16 = vld [vmem:[%s15839_s5 + $0x410] ss:$12 sps:$4 sm:$0xff]  }
 0x42e   : > { %10640 = vmatpush3.bf16.msra.mxu1 %v12117_v17  ;;  %8508 = vmatprep.subr.bf16.mxu0 %v12120_v18  ;;  %v12189_v17 = vld [vmem:[%s15839_s5 + $0x590] ss:$12 sps:$4 sm:$0xff]  }
 0x42f   : > { %10641 = vmatprep.subr.bf16.mxu1 %v12121_v19  ;;  %v12188_v18 = vld [vmem:[%s15839_s5 + $0x350] ss:$12 sps:$4 sm:$0xff]  }
 0x430   : > { %v12190_v19 = vld [vmem:[%s15839_s5 + $0x4d0] ss:$12 sps:$4 sm:$0xff]  }
 0x431   : > { %8509 = vmatpush1.bf16.msra.mxu0 %v12118_v20  ;;  %v12191_v20 = vld [vmem:[%s15839_s5 + $0x3f8] ss:$12 sps:$4 sm:$0xff]  }
 0x432   : > { %10642 = vmatpush3.bf16.msra.mxu1 %v12122_v21  ;;  %8510 = vmatprep.subr.bf16.mxu0 %v12125_v23  ;;  %v12193_v21 = vld [vmem:[%s15839_s5 + $0x578] ss:$12 sps:$4 sm:$0xff]  }
 0x433   : > { %10643 = vmatprep.subr.bf16.mxu1 %v12126_v24  ;;  %v12192_v23 = vld [vmem:[%s15839_s5 + $0x338] ss:$12 sps:$4 sm:$0xff]  }
 0x434   : > { %v12194_v24 = vld [vmem:[%s15839_s5 + $0x4b8] ss:$12 sps:$4 sm:$0xff]  }
 0x435   : > { %8511 = vmatpush1.bf16.msra.mxu0 %v12123_v25  ;;  %v12195_v25 = vld [vmem:[%s15839_s5 + $0x3e0] ss:$12 sps:$4 sm:$0xff]  }
 0x436   : > { %10644 = vmatpush3.bf16.msra.mxu1 %v12127_v28  ;;  %8512 = vmatprep.subr.bf16.mxu0 %v12130_v29  ;;  %v12197_v28 = vld [vmem:[%s15839_s5 + $0x560] ss:$12 sps:$4 sm:$0xff]  }
 0x437   : > { %10651 = vmatprep.subr.bf16.mxu1 %v12131_v30  ;;  %v12196_v29 = vld [vmem:[%s15839_s5 + $0x320] ss:$12 sps:$4 sm:$0xff]  }
 0x438   : > { %v12198_v30 = vld [vmem:[%s15839_s5 + $0x4a0] ss:$12 sps:$4 sm:$0xff]  }
 0x439   : > { %8572 = vmatmul.mubr.bf16.vlgmr.msra.gmra.mxu1 %v12284_v35  ;;  %8513 = vmatpush2.bf16.msra.mxu0 %v12128_v31  ;;  %v12199_v31 = vld [vmem:[%s15839_s5 + $0x3c8] ss:$12 sps:$4 sm:$0xff]   ;;  %v12205_v35 = vld [vmem:[%s15839_s5 + $0x8f0] ss:$12 sps:$4 sm:$0xff]  }
 0x43a   : > { %10652 = vmatpush3.bf16.msra.mxu1 %v12132_v32  ;;  %8514 = vmatprep.subr.bf16.mxu0 %v12135_v12  ;;  %v12201_v32 = vld [vmem:[%s15839_s5 + $0x548] ss:$12 sps:$4 sm:$0xff]  }
 0x43b   : > { %10653 = vmatprep.subr.bf16.mxu1 %v12136_v33  ;;  %8612 = vmatprep.mubr.bf16.mxu1 %v12285_v41  ;;  %v12200_v12 = vld [vmem:[%s15839_s5 + $0x308] ss:$12 sps:$4 sm:$0xff]   ;;  %v12289_v41 = vld [vmem:[%s12535_s18 + $0x10] ss:$72 sps:$4 sm:$0xff]  }
 0x43c   : > { %v12202_v33 = vld [vmem:[%s15839_s5 + $0x488] ss:$12 sps:$4 sm:$0xff]  }
 0x43d   : > { %8515 = vmatpush2.bf16.msra.mxu0 %v12133_v34  ;;  %v12203_v34 = vld [vmem:[%s15839_s5 + $0x770] ss:$12 sps:$4 sm:$0xff]  }
 0x43e   : > { %10654 = vmatpush3.bf16.msra.mxu1 %v12137_v36  ;;  %8516 = vmatprep.subr.bf16.mxu0 %v12140_v37  ;;  %v12204_v36 = vld [vmem:[%s15839_s5 + $0x6b0] ss:$12 sps:$4 sm:$0xff]  }
 0x43f   : > { %10655 = vmatprep.subr.bf16.mxu1 %v12141_v38  ;;  %v12206_v37 = vld [vmem:[%s15839_s5 + $0x830] ss:$12 sps:$4 sm:$0xff]   ;;  %v12207_v38 = vld [vmem:[%s15839_s5 + $0x758] ss:$12 sps:$4 sm:$0xff]  }
 0x441   : > { %8517 = vmatpush2.bf16.msra.mxu0 %v12138_v39  ;;  %v12209_v39 = vld [vmem:[%s15839_s5 + $0x8d8] ss:$12 sps:$4 sm:$0xff]  }
 0x442   : > { %10656 = vmatpush3.bf16.msra.mxu1 %v12142_v42  ;;  %8518 = vmatprep.subr.bf16.mxu0 %v12145_v22  ;;  %v12290_v42 = vld [vmem:[%s12535_s18 + $0x18] ss:$72 sps:$4 sm:$0xff]  }
 0x443   : > { %10657 = vmatprep.subr.bf16.mxu1 %v12146_v26  ;;  %v12208_v22 = vld [vmem:[%s15839_s5 + $0x698] ss:$12 sps:$4 sm:$0xff]  }
 0x444   : > { %v12210_v26 = vld [vmem:[%s15839_s5 + $0x818] ss:$12 sps:$4 sm:$0xff]  }
 0x445   : > { %8519 = vmatpush2.bf16.msra.mxu0 %v12143_v43  ;;  %v12211_v43 = vld [vmem:[%s15839_s5 + $0x740] ss:$12 sps:$4 sm:$0xff]  }
 0x446   : > { %10658 = vmatpush3.bf16.msra.mxu1 %v12147_v44  ;;  %8520 = vmatprep.subr.bf16.mxu0 %v12150_v47  ;;  %v12213_v44 = vld [vmem:[%s15839_s5 + $0x8c0] ss:$12 sps:$4 sm:$0xff]  }
 0x447   : > { %10659 = vmatprep.subr.bf16.mxu1 %v12151_v48  ;;  %v12291_v47 = vld [vmem:[%s12535_s18 + $0x24] ss:$72 sps:$4 sm:$0xff]  }
 0x448   : > { %v12292_v48 = vld [vmem:[%s12535_s18 + $0x2c] ss:$72 sps:$4 sm:$0xff]  }
 0x449   : > { %8521 = vmatpush2.bf16.msra.mxu0 %v12148_v49  ;;  %v12212_v49 = vld [vmem:[%s15839_s5 + $0x680] ss:$12 sps:$4 sm:$0xff]  }
 0x44a   : > { %10660 = vmatpush3.bf16.msra.mxu1 %v12152_v27  ;;  %8522 = vmatprep.subr.bf16.mxu0 %v12155_v50  ;;  %v12214_v27 = vld [vmem:[%s15839_s5 + $0x800] ss:$12 sps:$4 sm:$0xff]   ;;  %v12215_v50 = vld [vmem:[%s15839_s5 + $0x728] ss:$12 sps:$4 sm:$0xff]  }
 0x44b   : > { %10661 = vmatprep.subr.bf16.mxu1 %v12156_v53  ;;  %v12217_v53 = vld [vmem:[%s15839_s5 + $0x8a8] ss:$12 sps:$4 sm:$0xff]  }
 0x44d   : > { %8523 = vmatpush2.bf16.msra.mxu0 %v12153_v54  ;;  %v12216_v54 = vld [vmem:[%s15839_s5 + $0x668] ss:$12 sps:$4 sm:$0xff]  }
 0x44e   : > { %10662 = vmatpush3.bf16.msra.mxu1 %v12157_v55  ;;  %8524 = vmatprep.subr.bf16.mxu0 %v12160_v56  ;;  %v12218_v55 = vld [vmem:[%s15839_s5 + $0x7e8] ss:$12 sps:$4 sm:$0xff]   ;;  %v12219_v56 = vld [vmem:[%s15839_s5 + $0x710] ss:$12 sps:$4 sm:$0xff]  }
 0x44f   : > { %10663 = vmatprep.subr.bf16.mxu1 %v12161_v40  ;;  %v12221_v40 = vld [vmem:[%s15839_s5 + $0x890] ss:$12 sps:$4 sm:$0xff]  }
 0x451   : > { %8525 = vmatpush2.bf16.msra.mxu0 %v12158_v45  ;;  %v12220_v45 = vld [vmem:[%s15839_s5 + $0x650] ss:$12 sps:$4 sm:$0xff]  }
 0x452   : > { %10664 = vmatpush3.bf16.msra.mxu1 %v12162_v57  ;;  %8526 = vmatprep.subr.bf16.mxu0 %v12165_v60  ;;  %v12222_v57 = vld [vmem:[%s15839_s5 + $0x7d0] ss:$12 sps:$4 sm:$0xff]   ;;  %v12223_v60 = vld [vmem:[%s15839_s5 + $0x6f8] ss:$12 sps:$4 sm:$0xff]  }
 0x453   : > { %10665 = vmatprep.subr.bf16.mxu1 %v12166_v46  ;;  %v12225_v46 = vld [vmem:[%s15839_s5 + $0x878] ss:$12 sps:$4 sm:$0xff]  }
 0x455   : > { %8527 = vmatpush2.bf16.msra.mxu0 %v12163_v51  ;;  %v12224_v51 = vld [vmem:[%s15839_s5 + $0x638] ss:$12 sps:$4 sm:$0xff]  }
 0x456   : > { %10666 = vmatpush3.bf16.msra.mxu1 %v12167_v61  ;;  %10673 = vmatprep.subr.bf16.mxu0 %v12171_v62  ;;  %v12226_v61 = vld [vmem:[%s15839_s5 + $0x7b8] ss:$12 sps:$4 sm:$0xff]   ;;  %v12227_v62 = vld [vmem:[%s15839_s5 + $0x6e0] ss:$12 sps:$4 sm:$0xff]  }
 0x457   : > { %10695 = vmatprep.subr.bf16.mxu1 %v12173_v58  ;;  %v12229_v58 = vld [vmem:[%s15839_s5 + $0x860] ss:$12 sps:$4 sm:$0xff]  }
 0x458   : > { %8529 = vmatmul.mubr.bf16.vlgmr.msra.gmra.mxu0 %v15262_v52 }
 0x459   : > { %8613 = vmatmul.mubr.bf16.vlgmr.msra.gmra.mxu1 %v12286_v63  ;;  %10674 = vmatpush3.bf16.msra.mxu0 %v12172_v0  ;;  %v12228_v0 = vld [vmem:[%s15839_s5 + $0x620] ss:$12 sps:$4 sm:$0xff]   ;;  %v12234_v63 = vld [vmem:[%s15839_s5 + $0x788] ss:$12 sps:$4 sm:$0xff]  }
 0x45a   : > { %10696 = vmatpush3.bf16.msra.mxu1 %v12174_v1  ;;  %10675 = vmatprep.subr.bf16.mxu0 %v12175_v3  ;;  %v12230_v1 = vld [vmem:[%s15839_s5 + $0x7a0] ss:$12 sps:$4 sm:$0xff]   ;;  %v12231_v3 = vld [vmem:[%s15839_s5 + $0x6c8] ss:$12 sps:$4 sm:$0xff]  }
 0x45b   : > { %10697 = vmatprep.subr.bf16.mxu1 %v12177_v59  ;;  %8653 = vmatprep.mubr.bf16.mxu0 %v12287_v8  ;;  %v12233_v59 = vld [vmem:[%s15839_s5 + $0x848] ss:$12 sps:$4 sm:$0xff]   ;;  %v12239_v8 = vld [vmem:[%s15839_s5 + $0xa58] ss:$12 sps:$4 sm:$0xff]  }
 0x45c   : > { %8694 = vmatprep.mubr.bf16.mxu1 %v12288_v9  ;;  %v12241_v9 = vld [vmem:[%s15839_s5 + $0xbd8] ss:$12 sps:$4 sm:$0xff]  }
 0x45d   : > { %10676 = vmatpush3.bf16.msra.mxu0 %v12176_v2  ;;  %v12232_v2 = vld [vmem:[%s15839_s5 + $0x608] ss:$12 sps:$4 sm:$0xff]  }
 0x45e   : > { %10698 = vmatpush3.bf16.msra.mxu1 %v12178_v4  ;;  %10677 = vmatprep.subr.bf16.mxu0 %v12179_v5  ;;  %v12235_v4 = vld [vmem:[%s15839_s5 + $0xa70] ss:$12 sps:$4 sm:$0xff]  }
 0x45f   : > { %10699 = vmatprep.subr.bf16.mxu1 %v12181_v7  ;;  %v12237_v5 = vld [vmem:[%s15839_s5 + $0xbf0] ss:$12 sps:$4 sm:$0xff]  }
 0x460   : > { %v12236_v7 = vld [vmem:[%s15839_s5 + $0x9b0] ss:$12 sps:$4 sm:$0xff]  }
 0x461   : > { %10678 = vmatpush3.bf16.msra.mxu0 %v12180_v6  ;;  %v12238_v6 = vld [vmem:[%s15839_s5 + $0xb30] ss:$12 sps:$4 sm:$0xff]  }
 0x462   : > { %10700 = vmatpush3.bf16.msra.mxu1 %v12182_v10  ;;  %10679 = vmatprep.subr.bf16.mxu0 %v12183_v11  ;;  %v12293_v10 = vld [vmem:[%s12535_s18 + $0x20] ss:$72 sps:$4 sm:$0xff]  }
 0x463   : > { %10701 = vmatprep.subr.bf16.mxu1 %v12185_v13  ;;  %v12294_v11 = vld [vmem:[%s12535_s18 + $0x28] ss:$72 sps:$4 sm:$0xff]   ;;  %v12240_v13 = vld [vmem:[%s15839_s5 + $0x998] ss:$12 sps:$4 sm:$0xff]  }
 0x465   : > { %10680 = vmatpush3.bf16.msra.mxu0 %v12184_v14  ;;  %v12242_v14 = vld [vmem:[%s15839_s5 + $0xb18] ss:$12 sps:$4 sm:$0xff]  }
 0x466   : > { %10702 = vmatpush3.bf16.msra.mxu1 %v12186_v15  ;;  %10681 = vmatprep.subr.bf16.mxu0 %v12187_v16  ;;  %v12243_v15 = vld [vmem:[%s15839_s5 + $0xa40] ss:$12 sps:$4 sm:$0xff]  }
 0x467   : > { %10703 = vmatprep.subr.bf16.mxu1 %v12189_v17  ;;  %v12245_v16 = vld [vmem:[%s15839_s5 + $0xbc0] ss:$12 sps:$4 sm:$0xff]   ;;  %v12295_v17 = vld [vmem:[%s12535_s18 + $0x34] ss:$72 sps:$4 sm:$0xff]  }
 0x469   : > { %10682 = vmatpush3.bf16.msra.mxu0 %v12188_v18  ;;  %v12296_v18 = vld [vmem:[%s12535_s18 + $0x3c] ss:$72 sps:$4 sm:$0xff]  }
 0x46a   : > { %10704 = vmatpush3.bf16.msra.mxu1 %v12190_v19  ;;  %10683 = vmatprep.subr.bf16.mxu0 %v12191_v20  ;;  %v12244_v19 = vld [vmem:[%s15839_s5 + $0x980] ss:$12 sps:$4 sm:$0xff]  }
 0x46b   : > { %10705 = vmatprep.subr.bf16.mxu1 %v12193_v21  ;;  %v12246_v20 = vld [vmem:[%s15839_s5 + $0xb00] ss:$12 sps:$4 sm:$0xff]   ;;  %v12247_v21 = vld [vmem:[%s15839_s5 + $0xa28] ss:$12 sps:$4 sm:$0xff]  }
 0x46d   : > { %10684 = vmatpush3.bf16.msra.mxu0 %v12192_v23  ;;  %v12249_v23 = vld [vmem:[%s15839_s5 + $0xba8] ss:$12 sps:$4 sm:$0xff]  }
 0x46e   : > { %10706 = vmatpush3.bf16.msra.mxu1 %v12194_v24  ;;  %10685 = vmatprep.subr.bf16.mxu0 %v12195_v25  ;;  %v12248_v24 = vld [vmem:[%s15839_s5 + $0x968] ss:$12 sps:$4 sm:$0xff]  }
 0x46f   : > { %10707 = vmatprep.subr.bf16.mxu1 %v12197_v28  ;;  %v12250_v25 = vld [vmem:[%s15839_s5 + $0xae8] ss:$12 sps:$4 sm:$0xff]   ;;  %v12251_v28 = vld [vmem:[%s15839_s5 + $0xa10] ss:$12 sps:$4 sm:$0xff]  }
 0x471   : > { %10686 = vmatpush3.bf16.msra.mxu0 %v12196_v29  ;;  %v12253_v29 = vld [vmem:[%s15839_s5 + $0xb90] ss:$12 sps:$4 sm:$0xff]  }
 0x472   : > { %10708 = vmatpush3.bf16.msra.mxu1 %v12198_v30  ;;  %10687 = vmatprep.subr.bf16.mxu0 %v12199_v31  ;;  %v12252_v30 = vld [vmem:[%s15839_s5 + $0x950] ss:$12 sps:$4 sm:$0xff]  }
 0x473   : > { %10709 = vmatprep.subr.bf16.mxu1 %v12201_v32  ;;  %v12254_v31 = vld [vmem:[%s15839_s5 + $0xad0] ss:$12 sps:$4 sm:$0xff]   ;;  %v12255_v32 = vld [vmem:[%s15839_s5 + $0x9f8] ss:$12 sps:$4 sm:$0xff]  }
 0x475   : > { %10688 = vmatpush3.bf16.msra.mxu0 %v12200_v12  ;;  %v12257_v12 = vld [vmem:[%s15839_s5 + $0xb78] ss:$12 sps:$4 sm:$0xff]  }
 0x476   : > { %10710 = vmatpush3.bf16.msra.mxu1 %v12202_v33  ;;  %10717 = vmatprep.subr.bf16.mxu0 %v12203_v34  ;;  %v12256_v33 = vld [vmem:[%s15839_s5 + $0x938] ss:$12 sps:$4 sm:$0xff]  }
 0x477   : > { %10739 = vmatprep.subr.bf16.mxu1 %v12205_v35  ;;  %v12258_v34 = vld [vmem:[%s15839_s5 + $0xab8] ss:$12 sps:$4 sm:$0xff]   ;;  %v12259_v35 = vld [vmem:[%s15839_s5 + $0x9e0] ss:$12 sps:$4 sm:$0xff]  }
 0x478   : > { %8654 = vmatmul.mubr.bf16.vlgmr.msra.gmra.mxu0 %v12289_v41  ;;  %v12265_v41 = vld [vmem:[%s15839_s5 + $0xb48] ss:$12 sps:$4 sm:$0xff]  }
 0x479   : > { %8695 = vmatmul.mubr.bf16.vlgmr.msra.gmra.mxu1 %v12290_v42  ;;  %10718 = vmatpush3.bf16.msra.mxu0 %v12204_v36  ;;  %v12261_v36 = vld [vmem:[%s15839_s5 + $0xb60] ss:$12 sps:$4 sm:$0xff]   ;;  %v12264_v42 = vld [vmem:[%s15839_s5 + $0x908] ss:$12 sps:$4 sm:$0xff]  }
 0x47a   : > { %10740 = vmatpush3.bf16.msra.mxu1 %v12206_v37  ;;  %10719 = vmatprep.subr.bf16.mxu0 %v12207_v38  ;;  %v12260_v37 = vld [vmem:[%s15839_s5 + $0x920] ss:$12 sps:$4 sm:$0xff]  }
 0x47b   : > { %10741 = vmatprep.subr.bf16.mxu1 %v12209_v39  ;;  %8735 = vmatprep.mubr.bf16.mxu0 %v12291_v47  ;;  %v12262_v38 = vld [vmem:[%s15839_s5 + $0xaa0] ss:$12 sps:$4 sm:$0xff]   ;;  %v12263_v39 = vld [vmem:[%s15839_s5 + $0x9c8] ss:$12 sps:$4 sm:$0xff]   ;;  %v12297_v47 = vld [vmem:[%s12535_s18 + $0x30] ss:$72 sps:$4 sm:$0xff]  }
 0x47c   : > { %8776 = vmatprep.mubr.bf16.mxu1 %v12292_v48  ;;  %v12298_v48 = vld [vmem:[%s12535_s18 + $0x38] ss:$72 sps:$4 sm:$0xff]  }
 0x47d   : > { %10720 = vmatpush3.bf16.msra.mxu0 %v12208_v22  ;;  %v12266_v22 = vld [vmem:[%s15839_s5 + $0xa88] ss:$12 sps:$4 sm:$0xff]  }
 0x47e   : > { %10742 = vmatpush3.bf16.msra.mxu1 %v12210_v26  ;;  %10721 = vmatprep.subr.bf16.mxu0 %v12211_v43  ;;  %v12267_v26 = vld [vmem:[%s15839_s5 + $0xd70] ss:$12 sps:$4 sm:$0xff]  }
 0x47f   : > { %10743 = vmatprep.subr.bf16.mxu1 %v12213_v44  ;;  %v12268_v43 = vld [vmem:[%s15839_s5 + $0xcb0] ss:$12 sps:$4 sm:$0xff]   ;;  %v12269_v44 = vld [vmem:[%s15839_s5 + $0xd58] ss:$12 sps:$4 sm:$0xff]  }
 0x481   : > { %10722 = vmatpush3.bf16.msra.mxu0 %v12212_v49  ;;  %v12270_v49 = vld [vmem:[%s15839_s5 + $0xc98] ss:$12 sps:$4 sm:$0xff]  }
 0x482   : > { %10744 = vmatpush3.bf16.msra.mxu1 %v12214_v27  ;;  %10723 = vmatprep.subr.bf16.mxu0 %v12215_v50  ;;  %v12299_v27 = vld [vmem:[%s12535_s18 + $0x44] ss:$72 sps:$4 sm:$0xff]  }
 0x483   : > { %10745 = vmatprep.subr.bf16.mxu1 %v12217_v53  ;;  %v12271_v50 = vld [vmem:[%s15839_s5 + $0xd40] ss:$12 sps:$4 sm:$0xff]  }
 0x484   : > { %v12272_v53 = vld [vmem:[%s15839_s5 + $0xc80] ss:$12 sps:$4 sm:$0xff]  }
 0x485   : > { %10724 = vmatpush3.bf16.msra.mxu0 %v12216_v54  ;;  %v12273_v54 = vld [vmem:[%s15839_s5 + $0xd28] ss:$12 sps:$4 sm:$0xff]  }
 0x486   : > { %10746 = vmatpush3.bf16.msra.mxu1 %v12218_v55  ;;  %10725 = vmatprep.subr.bf16.mxu0 %v12219_v56  ;;  %v12274_v55 = vld [vmem:[%s15839_s5 + $0xc68] ss:$12 sps:$4 sm:$0xff]   ;;  %v12275_v56 = vld [vmem:[%s15839_s5 + $0xd10] ss:$12 sps:$4 sm:$0xff]  }
 0x487   : > { %10747 = vmatprep.subr.bf16.mxu1 %v12221_v40  ;;  %v12276_v40 = vld [vmem:[%s15839_s5 + $0xc50] ss:$12 sps:$4 sm:$0xff]  }
 0x489   : > { %10726 = vmatpush3.bf16.msra.mxu0 %v12220_v45  ;;  %v12277_v45 = vld [vmem:[%s15839_s5 + $0xcf8] ss:$12 sps:$4 sm:$0xff]  }
 0x48a   : > { %10748 = vmatpush3.bf16.msra.mxu1 %v12222_v57  ;;  %10727 = vmatprep.subr.bf16.mxu0 %v12223_v60  ;;  %v12278_v57 = vld [vmem:[%s15839_s5 + $0xc38] ss:$12 sps:$4 sm:$0xff]   ;;  %v12279_v60 = vld [vmem:[%s15839_s5 + $0xce0] ss:$12 sps:$4 sm:$0xff]  }
 0x48b   : > { %10749 = vmatprep.subr.bf16.mxu1 %v12225_v46  ;;  %v12280_v46 = vld [vmem:[%s15839_s5 + $0xc20] ss:$12 sps:$4 sm:$0xff]  }
 0x48d   : > { %10728 = vmatpush3.bf16.msra.mxu0 %v12224_v51  ;;  %v12281_v51 = vld [vmem:[%s15839_s5 + $0xcc8] ss:$12 sps:$4 sm:$0xff]  }
 0x48e   : > { %10750 = vmatpush3.bf16.msra.mxu1 %v12226_v61  ;;  %10729 = vmatprep.subr.bf16.mxu0 %v12227_v62  ;;  %v12282_v61 = vld [vmem:[%s15839_s5 + $0xc08] ss:$12 sps:$4 sm:$0xff]   ;;  %v8186_v62 = vpop.f32.mrf.mxu0 }
 0x48f   : > { %10751 = vmatprep.subr.bf16.mxu1 %v12229_v58  ;;  %v8229_v58 = vpop.f32.mrf.mxu1 }
 0x491   : > { %10730 = vmatpush3.bf16.msra.mxu0 %v12228_v0  ;;  %v8188_v0 = vpop.f32.mrf.mxu0 }
 0x492   : > { %10752 = vmatpush3.bf16.msra.mxu1 %v12230_v1  ;;  %10731 = vmatprep.subr.bf16.mxu0 %v12231_v3  ;;  %v8231_v1 = vpop.f32.mrf.mxu1 }
 0x493   : > { %10753 = vmatprep.subr.bf16.mxu1 %v12233_v59  ;;  %v8190_v3 = vpop.f32.mrf.mxu0 }
 0x494   : > { %v8233_v59 = vpop.f32.mrf.mxu1 }
 0x495   : > { %10732 = vmatpush3.bf16.msra.mxu0 %v12232_v2  ;;  %v8192_v2 = vpop.f32.mrf.mxu0 }
 0x496   : > { %10754 = vmatpush3.bf16.msra.mxu1 %v12234_v63  ;;  %10761 = vmatprep.subr.bf16.mxu0 %v12235_v4  ;;  %v8235_v4 = vpop.f32.mrf.mxu1 }
 0x497   : > { %10783 = vmatprep.subr.bf16.mxu1 %v12237_v5  ;;  %v8272_v63 = vpop.f32.mrf.mxu0 }
 0x498   : > { %8736 = vmatmul.mubr.bf16.vlgmr.msra.gmra.mxu0 %v12293_v10 }
 0x499   : > { %8777 = vmatmul.mubr.bf16.vlgmr.msra.gmra.mxu1 %v12294_v11  ;;  %10762 = vmatpush3.bf16.msra.mxu0 %v12236_v7  ;;  %v8274_v5 = vpop.f32.mrf.mxu0  ;;  %v8315_v7 = vpop.f32.mrf.mxu1 }
 0x49a   : > { %10784 = vmatpush3.bf16.msra.mxu1 %v12238_v6  ;;  %10763 = vmatprep.subr.bf16.mxu0 %v12239_v8 }
 0x49b   : > { %10785 = vmatprep.subr.bf16.mxu1 %v12241_v9  ;;  %8817 = vmatprep.mubr.bf16.mxu0 %v12295_v17  ;;  %v8276_v6 = vpop.f32.mrf.mxu0  ;;  %v8317_v8 = vpop.f32.mrf.mxu1  ;;  %v8230_v17 = vadd.f32 %v8229_v58, %v8186_v62 }
 0x49c   : > { %8858 = vmatprep.mubr.bf16.mxu1 %v12296_v18  ;;  %v8232_v18 = vadd.f32 %v8231_v1, %v8188_v0 }
 0x49d   : > { %10764 = vmatpush3.bf16.msra.mxu0 %v12240_v13  ;;  %v8278_v9 = vpop.f32.mrf.mxu0  ;;  %v8319_v10 = vpop.f32.mrf.mxu1 }
 0x49e   : > { %10786 = vmatpush3.bf16.msra.mxu1 %v12242_v14  ;;  %10765 = vmatprep.subr.bf16.mxu0 %v12243_v15 }
 0x49f   : > { %10787 = vmatprep.subr.bf16.mxu1 %v12245_v16  ;;  %v8358_v11 = vpop.f32.mrf.mxu0  ;;  %v8321_v13 = vpop.f32.mrf.mxu1 }
 0x4a1   : > { %10766 = vmatpush3.bf16.msra.mxu0 %v12244_v19  ;;  %v8360_v14 = vpop.f32.mrf.mxu0  ;;  %v8401_v15 = vpop.f32.mrf.mxu1  ;;  %v8273_v19 = vadd.f32 %v8272_v63, %v8230_v17 }
 0x4a2   : > { %10788 = vmatpush3.bf16.msra.mxu1 %v12246_v20  ;;  %10767 = vmatprep.subr.bf16.mxu0 %v12247_v21 }
 0x4a3   : > { %10789 = vmatprep.subr.bf16.mxu1 %v12249_v23  ;;  %v8403_v16 = vpop.f32.mrf.mxu1  ;;  %v8234_v23 = vadd.f32 %v8233_v59, %v8190_v3 }
 0x4a5   : > { %10768 = vmatpush3.bf16.msra.mxu0 %v12248_v24  ;;  %v8405_v21 = vpop.f32.mrf.mxu1  ;;  %v8275_v24 = vadd.f32 %v8274_v5, %v8232_v18 }
 0x4a6   : > { %10790 = vmatpush3.bf16.msra.mxu1 %v12250_v25  ;;  %10769 = vmatprep.subr.bf16.mxu0 %v12251_v28  ;;  %v8236_v28 = vadd.f32 %v8235_v4, %v8192_v2 }
 0x4a7   : > { %10791 = vmatprep.subr.bf16.mxu1 %v12253_v29  ;;  %v8316_v29 = vadd.f32 %v8315_v7, %v8273_v19 }
 0x4a9   : > { %10770 = vmatpush3.bf16.msra.mxu0 %v12252_v30  ;;  %v8277_v30 = vadd.f32 %v8276_v6, %v8234_v23 }
 0x4aa   : > { %10792 = vmatpush3.bf16.msra.mxu1 %v12254_v31  ;;  %10771 = vmatprep.subr.bf16.mxu0 %v12255_v32  ;;  %v8910_v31 = vlaneseq  ;;  %v8407_v32 = vpop.f32.mrf.mxu1 }
 0x4ab   : > { %10793 = vmatprep.subr.bf16.mxu1 %v12257_v12  ;;  %v8318_v12 = vadd.f32 %v8317_v8, %v8275_v24 }
 0x4ad   : > { %10772 = vmatpush3.bf16.msra.mxu0 %v12256_v33  ;;  %v8279_v33 = vadd.f32 %v8278_v9, %v8236_v28 }
 0x4ae   : > { %10794 = vmatpush3.bf16.msra.mxu1 %v12258_v34  ;;  %10773 = vmatprep.subr.bf16.mxu0 %v12259_v35  ;;  %v8359_v34 = vadd.f32 %v8358_v11, %v8316_v29 }
 0x4af   : > { %10795 = vmatprep.subr.bf16.mxu1 %v12261_v36 }
 0x4b1   : > { %10774 = vmatpush3.bf16.msra.mxu0 %v12260_v37  ;;  %v8320_v37 = vadd.f32 %v8319_v10, %v8277_v30 }
 0x4b2   : > { %10796 = vmatpush3.bf16.msra.mxu1 %v12262_v38  ;;  %10775 = vmatprep.subr.bf16.mxu0 %v12263_v39  ;;  %v8361_v38 = vadd.f32 %v8360_v14, %v8318_v12  ;;  %v15613_v39 = vshrl.u32 %v8910_v31, 7 }
 0x4b3   : > { %10797 = vmatprep.subr.bf16.mxu1 %v12265_v41  ;;  %v8322_v41 = vadd.f32 %v8321_v13, %v8279_v33 }
 0x4b5   : > { %10776 = vmatpush3.bf16.msra.mxu0 %v12264_v42  ;;  %v8402_v42 = vadd.f32 %v8401_v15, %v8359_v34 }
 0x4b6   : > { %10798 = vmatpush3.bf16.msra.mxu1 %v12266_v22  ;;  %10805 = vmatprep.subr.bf16.mxu0 %v12267_v26 }
 0x4b8   : > { %8818 = vmatmul.mubr.bf16.vlgmr.msra.gmra.mxu0 %v12297_v47 }
 0x4b9   : > { %8859 = vmatmul.mubr.bf16.vlgmr.msra.gmra.mxu1 %v12298_v48  ;;  %10806 = vmatpush3.bf16.msra.mxu0 %v12268_v43 }
 0x4ba   : > { %8899 = vmatprep.mubr.bf16.mxu0 %v12299_v27  ;;  %10807 = vmatprep.subr.bf16.mxu0 %v12269_v44  ;;  %v8404_v44 = vadd.f32 %v8403_v16, %v8361_v38  ;;  %v15619_v27 = vld [vmem:[%s15840_s6] sm:$0x7] }
 0x4bd   : > { %10808 = vmatpush3.bf16.msra.mxu0 %v12270_v49  ;;  %v8912_v49 = vsub.s32 0, %v15613_v39 }
 0x4be   : > { %10809 = vmatprep.subr.bf16.mxu0 %v12271_v50 }
 0x4c1   : > { %10810 = vmatpush3.bf16.msra.mxu0 %v12272_v53 }
 0x4c2   : > { %10811 = vmatprep.subr.bf16.mxu0 %v12273_v54  ;;  %v15624_v54 = vld [vmem:[%s15841_s7] sm:$0x7] }
 0x4c5   : > { %10812 = vmatpush3.bf16.msra.mxu0 %v12274_v55  ;;  %v8916_v55 = vsub.s32 1, %v15613_v39 }
 0x4c6   : > { %10813 = vmatprep.subr.bf16.mxu0 %v12275_v56 }
 0x4c7   : > { %v8917_v1 = vrot.slane %v15619_v27, %v8916_v55  ;;  %v8940_v5 = vrot.slane %v15624_v54, %v8916_v55 }
 0x4c9   : > { %10814 = vmatpush3.bf16.msra.mxu0 %v12276_v40 }
 0x4ca   : > { %10815 = vmatprep.subr.bf16.mxu0 %v12277_v45 }
 0x4cd   : > { %10816 = vmatpush3.bf16.msra.mxu0 %v12278_v57 }
 0x4ce   : > { %10817 = vmatprep.subr.bf16.mxu0 %v12279_v60 }
 0x4d1   : > { %10818 = vmatpush3.bf16.msra.mxu0 %v12280_v46  ;;  %v8913_v46 = vrot.slane %v15619_v27, %v8912_v49 }
 0x4d2   : > { %10819 = vmatprep.subr.bf16.mxu0 %v12281_v51 }
 0x4d5   : > { %10820 = vmatpush3.bf16.msra.mxu0 %v12282_v61  ;;  %v8936_v61 = vrot.slane %v15624_v54, %v8912_v49 }
 0x4d8   : > { %8900 = vmatmul.mubr.bf16.vlgmr.msra.gmra.mxu0 %v15262_v52  ;;  %v8362_v52 = vpop.f32.mrf.mxu0 }
 0x4d9   : > { %v8487_v36 = vpop.f32.mrf.mxu1  ;;  %v8363_v22 = vadd.f32 %v8362_v52, %v8320_v37 }
 0x4da   : > { %v8364_v20 = vpop.f32.mrf.mxu0 }
 0x4db   : > { %v8489_v43 = vpop.f32.mrf.mxu1  ;;  %v8365_v47 = vadd.f32 %v8364_v20, %v8322_v41  ;;  %v8406_v50 = vadd.f32 %v8405_v21, %v8363_v22 }
 0x4dc   : > { %v8444_v25 = vpop.f32.mrf.mxu0 }
 0x4dd   : > { %v8445_v48 = vadd.f32 %v8444_v25, %v8402_v42  ;;  %v8491_v40 = vpop.f32.mrf.mxu1  ;;  %v8408_v45 = vadd.f32 %v8407_v32, %v8365_v47 }
 0x4de   : > { %v8446_v35 = vpop.f32.mrf.mxu0 }
 0x4df   : > { %v8447_v53 = vadd.f32 %v8446_v35, %v8404_v44  ;;  %v8488_v57 = vadd.f32 %v8487_v36, %v8445_v48  ;;  %v8493_v3 = vpop.f32.mrf.mxu1 }
 0x4e0   : > { %v8448_v26 = vpop.f32.mrf.mxu0 }
 0x4e1   : > { %v8449_v60 = vadd.f32 %v8448_v26, %v8406_v50  ;;  %v8490_v62 = vadd.f32 %v8489_v43, %v8447_v53 }
 0x4e2   : > { %v8450_v56 = vpop.f32.mrf.mxu0 }
 0x4e3   : > { %v8451_v58 = vadd.f32 %v8450_v56, %v8408_v45  ;;  %v8492_v2 = vadd.f32 %v8491_v40, %v8449_v60 }
 0x4e5   : > { %v8494_v6 = vadd.f32 %v8493_v3, %v8451_v58 }
 0x4f9   : > { %v10645_v23 = vpop.f32.mrf.mxu1 }
 0x4fb   : > { %v10646_v24 = vpop.f32.mrf.mxu1 }
 0x4fc   : > { %v10647_v50 = vadd.f32 %v10646_v24, %v10645_v23 }
 0x4fd   : > { %v10648_v25 = vpop.f32.mrf.mxu1 }
 0x4ff   : > { %v10649_v28 = vpop.f32.mrf.mxu1 }
 0x518   : > { %v8530_v51 = vpop.f32.mrf.mxu0 }
 0x519   : > { %v8531_v0 = vadd.f32 %v8530_v51, %v8488_v57  ;;  %v10667_v29 = vpop.f32.mrf.mxu1  ;;  %v10650_v57 = vadd.f32 %v10649_v28, %v10648_v25 }
 0x51a   : > { %v8532_v59 = vpop.f32.mrf.mxu0 }
 0x51b   : > { %v8925_v63 = vmul.f32 %v8913_v46, %v8531_v0  ;;  %v8533_v4 = vadd.f32 %v8532_v59, %v8490_v62  ;;  %v10668_v30 = vpop.f32.mrf.mxu1 }
 0x51c   : > { %v8534_v7 = vpop.f32.mrf.mxu0  ;;  %v10669_v47 = vadd.f32 %v10668_v30, %v10667_v29 }
 0x51d   : > { %v8948_v8 = vadd.f32 %v8936_v61, %v8925_v63  ;;  %v8926_v9 = vmul.f32 %v8917_v1, %v8533_v4  ;;  %v8535_v10 = vadd.f32 %v8534_v7, %v8492_v2  ;;  %v10670_v31 = vpop.f32.mrf.mxu1 }
 0x51e   : > { %v8536_v11 = vpop.f32.mrf.mxu0  ;;  %v8615_v56 = vadd.f32 %v10669_v47, %v10647_v50 }
 0x51f   : > { %v8954_v13 = vmax.f32 %v8948_v8, 0.0  ;;  %v8949_v14 = vadd.f32 %v8940_v5, %v8926_v9  ;;  %v8928_v15 = vmul.f32 %v8913_v46, %v8535_v10  ;;  %v8537_v52 = vadd.f32 %v8536_v11, %v8494_v6  ;;  %v10671_v12 = vpop.f32.mrf.mxu1 }
 0x520   : > { %v10672_v40 = vadd.f32 %v10671_v12, %v10670_v31 }
 0x521   : > { %8960 = vst [vmem:[%s12537_s19] sm:$0xff] %v8954_v13  ;;  %v8955_v16 = vmax.f32 %v8949_v14, 0.0  ;;  %v8951_v17 = vadd.f32 %v8936_v61, %v8928_v15  ;;  %v8929_v18 = vmul.f32 %v8917_v1, %v8537_v52  ;;  %v8920_v15 = vsub.s32 2, %v15613_v39 }
 0x522   : > { %v8618_v58 = vadd.f32 %v10672_v40, %v10650_v57 }
 0x523   : > { %8961 = vst [vmem:[%s12537_s19 + $0x8] sm:$0xff] %v8955_v16  ;;  %v8957_v19 = vmax.f32 %v8951_v17, 0.0  ;;  %v8952_v20 = vadd.f32 %v8940_v5, %v8929_v18  ;;  %v8921_v23 = vrot.slane %v15619_v27, %v8920_v15 }
 0x525   : > { %8963 = vst [vmem:[%s12537_s19 + $0x18] sm:$0xff] %v8957_v19  ;;  %v8958_v21 = vmax.f32 %v8952_v20, 0.0 }
 0x527   : > { %8964 = vst [vmem:[%s12537_s19 + $0x20] sm:$0xff] %v8958_v21 }
 0x538   : > { %v10689_v32 = vpop.f32.mrf.mxu0 }
 0x539   : > { %v10711_v34 = vpop.f32.mrf.mxu1 }
 0x53a   : > { %v10690_v33 = vpop.f32.mrf.mxu0 }
 0x53b   : > { %v10712_v36 = vpop.f32.mrf.mxu1  ;;  %v10691_v53 = vadd.f32 %v10690_v33, %v10689_v32  ;;  %v8944_v32 = vrot.slane %v15624_v54, %v8920_v15 }
 0x53c   : > { %v10692_v35 = vpop.f32.mrf.mxu0  ;;  %v10713_v46 = vadd.f32 %v10712_v36, %v10711_v34 }
 0x53d   : > { %v10714_v38 = vpop.f32.mrf.mxu1  ;;  %v8656_v60 = vadd.f32 %v10691_v53, %v8615_v56 }
 0x53e   : > { %v10693_v37 = vpop.f32.mrf.mxu0 }
 0x53f   : > { %v10715_v42 = vpop.f32.mrf.mxu1  ;;  %v10694_v51 = vadd.f32 %v10693_v37, %v10692_v35  ;;  %v8697_v1 = vadd.f32 %v10713_v46, %v8656_v60 }
 0x540   : > { %v10716_v59 = vadd.f32 %v10715_v42, %v10714_v38 }
 0x541   : > { %v8659_v3 = vadd.f32 %v10694_v51, %v8618_v58 }
 0x543   : > { %v8700_v6 = vadd.f32 %v10716_v59, %v8659_v3 }
 0x558   : > { %v10733_v41 = vpop.f32.mrf.mxu0 }
 0x559   : > { %v10755_v26 = vpop.f32.mrf.mxu1 }
 0x55a   : > { %v10734_v22 = vpop.f32.mrf.mxu0 }
 0x55b   : > { %v10756_v44 = vpop.f32.mrf.mxu1  ;;  %v10735_v0 = vadd.f32 %v10734_v22, %v10733_v41 }
 0x55c   : > { %v10736_v43 = vpop.f32.mrf.mxu0  ;;  %v10757_v5 = vadd.f32 %v10756_v44, %v10755_v26 }
 0x55d   : > { %v10758_v49 = vpop.f32.mrf.mxu1  ;;  %v8738_v4 = vadd.f32 %v10735_v0, %v8697_v1 }
 0x55e   : > { %v10737_v48 = vpop.f32.mrf.mxu0 }
 0x55f   : > { %v10759_v45 = vpop.f32.mrf.mxu1  ;;  %v10738_v7 = vadd.f32 %v10737_v48, %v10736_v43  ;;  %v8779_v11 = vadd.f32 %v10757_v5, %v8738_v4 }
 0x560   : > { %v10760_v14 = vadd.f32 %v10759_v45, %v10758_v49 }
 0x561   : > { %v8741_v13 = vadd.f32 %v10738_v7, %v8700_v6 }
 0x563   : > { %v8782_v20 = vadd.f32 %v10760_v14, %v8741_v13 }
 0x578   : > { %v10777_v55 = vpop.f32.mrf.mxu0 }
 0x579   : > { %v10799_v62 = vpop.f32.mrf.mxu1 }
 0x57a   : > { %v10778_v61 = vpop.f32.mrf.mxu0 }
 0x57b   : > { %v10800_v63 = vpop.f32.mrf.mxu1  ;;  %v10779_v8 = vadd.f32 %v10778_v61, %v10777_v55 }
 0x57c   : > { %v10780_v2 = vpop.f32.mrf.mxu0  ;;  %v10801_v16 = vadd.f32 %v10800_v63, %v10799_v62 }
 0x57d   : > { %v10802_v10 = vpop.f32.mrf.mxu1  ;;  %v8820_v52 = vadd.f32 %v10779_v8, %v8779_v11 }
 0x57e   : > { %v10781_v9 = vpop.f32.mrf.mxu0 }
 0x57f   : > { %v10782_v17 = vadd.f32 %v10781_v9, %v10780_v2  ;;  %v10803_v18 = vpop.f32.mrf.mxu1  ;;  %v8861_v24 = vadd.f32 %v10801_v16, %v8820_v52 }
 0x580   : > { %v10804_v28 = vadd.f32 %v10803_v18, %v10802_v10 }
 0x581   : > { %v8823_v25 = vadd.f32 %v10782_v17, %v8782_v20 }
 0x583   : > { %v8864_v12 = vadd.f32 %v10804_v28, %v8823_v25 }
 0x598   : > { %v10821_v19 = vpop.f32.mrf.mxu0 }
 0x59a   : > { %v10822_v21 = vpop.f32.mrf.mxu0 }
 0x59b   : > { %v10823_v29 = vadd.f32 %v10822_v21, %v10821_v19 }
 0x59c   : > { %v10824_v30 = vpop.f32.mrf.mxu0 }
 0x59d   : > { %v8902_v31 = vadd.f32 %v10823_v29, %v8861_v24 }
 0x59e   : > { %v10825_v39 = vpop.f32.mrf.mxu0 }
 0x59f   : > { %v8927_v33 = vmul.f32 %v8921_v23, %v8902_v31  ;;  %v10826_v34 = vadd.f32 %v10825_v39, %v10824_v30 }
 0x5a1   : > { %v8950_v35 = vadd.f32 %v8944_v32, %v8927_v33  ;;  %v8905_v36 = vadd.f32 %v10826_v34, %v8864_v12 }
 0x5a3   : > { %v8956_v37 = vmax.f32 %v8950_v35, 0.0  ;;  %v8930_v38 = vmul.f32 %v8921_v23, %v8905_v36 }
 0x5a5   : > { %8962 = vst [vmem:[%s12537_s19 + $0x10] sm:$0xff] %v8956_v37  ;;  %v8953_v27 = vadd.f32 %v8944_v32, %v8930_v38 }
 0x5a7   : > { %v8959_v41 = vmax.f32 %v8953_v27, 0.0 }
 0x5a9   : > { %8965 = vst [vmem:[%s12537_s19 + $0x28] sm:$0xff] %v8959_v41 }
 0x5aa PF: > { %p10376_p12 = scmp.ne.s32.totalorder %s12398_s29, 2 }
 0x5ab   : > { %s12419_s22 = smov (!%p10376_p12), 64  }
 0x5ac   : > { %8969 = sbr.rel (%p10376_p12) target bundleno = 1607 (0x647), region = 64 }
 0x5b1   : > { %v8982_v54 = vld [vmem:[%s12530_s12 + $0x64] sm:$0xff]  ;;  %v8983_v42 = vld [vmem:[%s12530_s12 + $0x10] ss:$92 sps:$4 sm:$0xff]   ;;  %v9041_v48 = vld [vmem:[%s12530_s12 + $0x1c] sm:$0xff]  ;;  %v12420_v16 = vmov 0.0   ;;  %vm9008_vm2 = vcmask 523264  }
 0x5b2   : > { %v8980_v22 = vld [vmem:[%s12530_s12 + $0x8] sm:$0xff]  ;;  %v8988_v26 = vunpack.c.h.bf16 %v8982_v54  ;;  %v8989_v43 = vunpack.c.h.bf16 %v8983_v42  ;;  %v8987_v44 = vunpack.c.l.bf16 %v8982_v54  ;;  %v9045_v50 = vunpack.c.l.bf16 %v9041_v48  ;;  %v9043_v56 = vld [vmem:[%s12530_s12 + $0x78] sm:$0xff]  ;;  %v9044_v40 = vld [vmem:[%s12530_s12 + $0x24] ss:$92 sps:$4 sm:$0xff]   ;;  %9223 = vst [vmem:[%s12537_s19 + $0x10] sm:$0xff] %v12420_v16 }
 0x5b3   : > { %v8984_v47 = vunpack.c.l.bf16 %v8980_v22  ;;  %v8985_v49 = vunpack.c.h.bf16 %v8980_v22  ;;  %v9046_v53 = vunpack.c.h.bf16 %v9041_v48  ;;  %v8986_v55 = vunpack.c.l.bf16 %v8983_v42  ;;  %v9102_v0 = vld [vmem:[%s12530_s12 + $0x38] ss:$92 sps:$4 sm:$0xff]   ;;  %v9103_v1 = vld [vmem:[%s12530_s12 + $0x8c] sm:$0xff]  ;;  %v9161_v6 = vld [vmem:[%s12530_s12 + $0x44] sm:$0xff]  ;;  %9226 = vst [vmem:[%s12537_s19 + $0x28] sm:$0xff] %v12420_v16 }
 0x5b4   : > { %v12310_v45 = vpack.i.bf16 %v8989_v43, %v8988_v26  ;;  %v9049_v46 = vunpack.c.h.bf16 %v9043_v56  ;;  %v9050_v51 = vunpack.c.h.bf16 %v9044_v40  ;;  %v9047_v62 = vunpack.c.l.bf16 %v9044_v40  ;;  %v9101_v3 = vld [vmem:[%s12530_s12 + $0x30] sm:$0xff]  ;;  %v9163_v15 = vld [vmem:[%s12530_s12 + $0xa0] sm:$0xff]  ;;  %v9164_v52 = vld [vmem:[%s12530_s12 + $0x4c] ss:$92 sps:$4 sm:$0xff]  }
 0x5b5   : > { %v12300_v57 = vpack.i.bf16 %v8985_v49, %v8984_v47  ;;  %v12315_v60 = vpack.i.bf16 %v9046_v53, %v9045_v50  ;;  %v12305_v61 = vpack.i.bf16 %v8987_v44, %v8986_v55  ;;  %v9048_v58 = vunpack.c.l.bf16 %v9043_v56  ;;  %v15668_v28 = vld [vmem:[%s12530_s12 + $0x5c] sm:$0xff]  ;;  %v15671_v29 = vld [vmem:[%s12530_s12 + $0x8] ss:$92 sps:$4 sm:$0xff]   ;;  %v15677_v31 = vld [vmem:[%s12530_s12 + $0x14] sm:$0xff] }
 0x5b6   : > { %12311 = vrot.lane.b32.xlu1 %v12310_v45, %s12419_s22  ;;  %v12325_v59 = vpack.i.bf16 %v9050_v51, %v9049_v46  ;;  %v9107_v2 = vunpack.c.l.bf16 %v9102_v0  ;;  %v9108_v63 = vunpack.c.l.bf16 %v9103_v1  ;;  %v9105_v5 = vunpack.c.l.bf16 %v9101_v3  ;;  %v15674_v30 = vld [vmem:[%s12530_s12] sm:$0xff]  ;;  %v15680_v32 = vld [vmem:[%s12530_s12 + $0x70] sm:$0xff]  ;;  %v15683_v39 = vld [vmem:[%s12530_s12 + $0x1c] ss:$92 sps:$4 sm:$0xff]  }
 0x5b7   : > { %12301 = vrot.lane.b32.xlu0 %v12300_v57, %s12419_s22  ;;  %v12320_v4 = vpack.i.bf16 %v9048_v58, %v9047_v62  ;;  %v9106_v7 = vunpack.c.h.bf16 %v9101_v3  ;;  %v9165_v9 = vunpack.c.l.bf16 %v9161_v6  ;;  %v9166_v10 = vunpack.c.h.bf16 %v9161_v6  ;;  %v15687_v33 = vld [vmem:[%s12530_s12 + $0x30] ss:$92 sps:$4 sm:$0xff]   ;;  %v15697_v27 = vld [vmem:[%s12530_s12 + $0x3c] sm:$0xff]  ;;  %v15711_v50 = vld [vmem:[%s12530_s12 + $0x84] sm:$0xff] }
 0x5b8   : > { %v12335_v8 = vpack.i.bf16 %v9108_v63, %v9107_v2  ;;  %v9109_v13 = vunpack.c.h.bf16 %v9103_v1  ;;  %v9110_v14 = vunpack.c.h.bf16 %v9102_v0  ;;  %v9169_v18 = vunpack.c.h.bf16 %v9163_v15  ;;  %v15694_v38 = vld [vmem:[%s12530_s12 + $0x28] sm:$0xff]  ;;  %v15700_v41 = vld [vmem:[%s12530_s12 + $0x50] sm:$0xff]  ;;  %v15714_v53 = vld [vmem:[%s12530_s12 + $0x98] sm:$0xff] }
 0x5b9   : > { %v12330_v11 = vpack.i.bf16 %v9106_v7, %v9105_v5  ;;  %v12345_v17 = vpack.i.bf16 %v9166_v10, %v9165_v9  ;;  %v9170_v19 = vunpack.c.h.bf16 %v9164_v52  ;;  %v9167_v21 = vunpack.c.l.bf16 %v9164_v52  ;;  %v15724_v58 = vld [vmem:[%s12530_s12 + $0x44] ss:$20 sps:$4 sm:$0xff]   ;;  %v15733_v5 = vld [vmem:[%s12530_s12 + $0xac] sm:$0xff] }
 0x5ba   : > { %12316 = vrot.lane.b32.xlu1 %v12315_v60, %s12419_s22  ;;  %v12340_v20 = vpack.i.bf16 %v9110_v14, %v9109_v13  ;;  %v9168_v23 = vunpack.c.l.bf16 %v9163_v15  ;;  %v8978_v12 = vunpack.c.h.bf16 %v15668_v28  ;;  %v8979_v34 = vunpack.c.h.bf16 %v15671_v29  ;;  %v15721_v60 = vld [vmem:[%s12530_s12 + $0xa0] ss:$20 sps:$4 sm:$0xff]  }
 0x5bb   : > { %12306 = vrot.lane.b32.xlu0 %v12305_v61, %s12419_s22  ;;  %v12355_v24 = vpack.i.bf16 %v9170_v19, %v9169_v18  ;;  %v8974_v35 = vunpack.c.l.bf16 %v15674_v30  ;;  %v9029_v36 = vunpack.c.l.bf16 %v15677_v31  ;;  %v8975_v37 = vunpack.c.h.bf16 %v15674_v30 }
 0x5bc   : > { %v12350_v25 = vpack.i.bf16 %v9168_v23, %v9167_v21  ;;  %v8976_v54 = vunpack.c.l.bf16 %v15671_v29  ;;  %v8977_v42 = vunpack.c.l.bf16 %v15668_v28  ;;  %v9033_v22 = vunpack.c.h.bf16 %v15680_v32 }
 0x5bd   : > { %v9034_v26 = vunpack.c.h.bf16 %v15683_v39  ;;  %v9030_v44 = vunpack.c.h.bf16 %v15677_v31  ;;  %v9031_v47 = vunpack.c.l.bf16 %v15683_v39  ;;  %v9032_v48 = vunpack.c.l.bf16 %v15680_v32 }
 0x5be   : > { %12326 = vrot.lane.b32.xlu1 %v12325_v59, %s12419_s22  ;;  %v9091_v49 = vunpack.c.l.bf16 %v15687_v33  ;;  %v9089_v56 = vunpack.c.l.bf16 %v15694_v38  ;;  %v9090_v40 = vunpack.c.h.bf16 %v15694_v38  ;;  %v9149_v45 = vunpack.c.l.bf16 %v15697_v27 }
 0x5bf   : > { %12321 = vrot.lane.b32.xlu0 %v12320_v4, %s12419_s22  ;;  %v9209_v57 = vunpack.c.l.bf16 %v15700_v41  ;;  %v9092_v0 = vunpack.c.l.bf16 %v15711_v50  ;;  %v9093_v1 = vunpack.c.h.bf16 %v15711_v50  ;;  %v9094_v3 = vunpack.c.h.bf16 %v15687_v33 }
 0x5c0   : > { %v9153_v59 = vunpack.c.h.bf16 %v15714_v53  ;;  %v9154_v4 = vunpack.c.l.bf16 %v15721_v60  ;;  %v9214_v7 = vunpack.c.h.bf16 %v15721_v60  ;;  %v9150_v6 = vunpack.c.h.bf16 %v15697_v27 }
 0x5c1   : > { %v9151_v13 = vunpack.c.l.bf16 %v15724_v58  ;;  %v9152_v16 = vunpack.c.l.bf16 %v15714_v53  ;;  %v9213_v19 = vunpack.c.h.bf16 %v15733_v5  ;;  %v9210_v32 = vunpack.c.h.bf16 %v15700_v41 }
 0x5c2   : > { %12336 = vrot.lane.b32.xlu1 %v12335_v8, %s12419_s22 }
 0x5c3   : > { %12331 = vrot.lane.b32.xlu0 %v12330_v11, %s12419_s22 }
 0x5c6   : > { %12346 = vrot.lane.b32.xlu1 %v12345_v17, %s12419_s22 }
 0x5c7   : > { %12341 = vrot.lane.b32.xlu0 %v12340_v20, %s12419_s22  ;;  %v9211_v20 = vunpack.c.h.bf16 %v15724_v58 }
 0x5ca   : > { %12356 = vrot.lane.b32.xlu1 %v12355_v24, %s12419_s22 }
 0x5cb   : > { %12351 = vrot.lane.b32.xlu0 %v12350_v25, %s12419_s22 }
 0x628   : > { %v12312_v43 = vpop.permute.xlu1 %12311 }
 0x629   : > { %v12302_v55 = vpop.permute.xlu0 %12301  ;;  %v12314_v46 = vunpack.i.h.bf16 %v12312_v43  ;;  %v12313_v51 = vunpack.i.l.bf16 %v12312_v43 }
 0x62a   : > { %v12304_v61 = vunpack.i.h.bf16 %v12302_v55  ;;  %v12303_v62 = vunpack.i.l.bf16 %v12302_v55 }
 0x62b   : > { %v9012_v14 = vsel %vm9008_vm2, %v12313_v51, %v12314_v46  ;;  %v9024_v17 = vmax.f32 %v8979_v34, %v12314_v46 }
 0x62c   : > { %v9009_v2 = vsel %vm9008_vm2, %v12303_v62, %v12304_v61  ;;  %v12317_v63 = vpop.permute.xlu1 %12316  ;;  %v9023_v29 = vmax.f32 %v8978_v12, %v9012_v14 }
 0x62d   : > { %v9019_v8 = vmax.f32 %v8974_v35, %v9009_v2  ;;  %v12319_v9 = vunpack.i.h.bf16 %v12317_v63  ;;  %v12318_v10 = vunpack.i.l.bf16 %v12317_v63  ;;  %v12307_v11 = vpop.permute.xlu0 %12306  ;;  %v9040_v62 = vmax.f32 %v9024_v17, %v9034_v26 }
 0x62e   : > { %v12309_v15 = vunpack.i.h.bf16 %v12307_v11  ;;  %v12308_v52 = vunpack.i.l.bf16 %v12307_v11 }
 0x62f   : > { %v9035_v18 = vmax.f32 %v9019_v8, %v9029_v36  ;;  %v9069_v21 = vsel %vm9008_vm2, %v12318_v10, %v12319_v9 }
 0x630   : > { %v9011_v23 = vsel %vm9008_vm2, %v12309_v15, %v12313_v51  ;;  %v9010_v24 = vsel %vm9008_vm2, %v12304_v61, %v12308_v52  ;;  %v9021_v25 = vmax.f32 %v8976_v54, %v12308_v52  ;;  %v12327_v28 = vpop.permute.xlu1 %12326 }
 0x631   : > { %v9020_v30 = vmax.f32 %v8975_v37, %v9010_v24  ;;  %v9022_v31 = vmax.f32 %v8977_v42, %v9011_v23  ;;  %v12329_v39 = vunpack.i.h.bf16 %v12327_v28  ;;  %v12322_v35 = vpop.permute.xlu0 %12321  ;;  %v12328_v43 = vunpack.i.l.bf16 %v12327_v28 }
 0x632   : > { %v12324_v34 = vunpack.i.h.bf16 %v12322_v35  ;;  %v12323_v36 = vunpack.i.l.bf16 %v12322_v35  ;;  %v9037_v55 = vmax.f32 %v9021_v25, %v9031_v47  ;;  %v9079_v46 = vmax.f32 %v9035_v18, %v9069_v21 }
 0x633   : > { %v9036_v2 = vmax.f32 %v9020_v30, %v9030_v44  ;;  %v9038_v63 = vmax.f32 %v9022_v31, %v9032_v48  ;;  %v9072_v8 = vsel %vm9008_vm2, %v12328_v43, %v12329_v39  ;;  %v9039_v37 = vmax.f32 %v9023_v29, %v9033_v22 }
 0x634   : > { %v9071_v51 = vsel %vm9008_vm2, %v12324_v34, %v12328_v43  ;;  %v9070_v54 = vsel %vm9008_vm2, %v12319_v9, %v12323_v36  ;;  %v9081_v61 = vmax.f32 %v9037_v55, %v12323_v36  ;;  %v12337_v12 = vpop.permute.xlu1 %12336  ;;  %v9084_v42 = vmax.f32 %v9040_v62, %v12329_v39 }
 0x635   : > { %v9080_v10 = vmax.f32 %v9036_v2, %v9070_v54  ;;  %v9082_v11 = vmax.f32 %v9038_v63, %v9071_v51  ;;  %v12332_v14 = vpop.permute.xlu0 %12331  ;;  %v12338_v47 = vunpack.i.l.bf16 %v12337_v12  ;;  %v9083_v15 = vmax.f32 %v9039_v37, %v9072_v8 }
 0x636   : > { %v9097_v26 = vmax.f32 %v9081_v61, %v9091_v49  ;;  %v12334_v44 = vunpack.i.h.bf16 %v12332_v14  ;;  %v12333_v48 = vunpack.i.l.bf16 %v12332_v14  ;;  %v9095_v52 = vmax.f32 %v9079_v46, %v9089_v56 }
 0x637   : > { %v9096_v9 = vmax.f32 %v9080_v10, %v9090_v40  ;;  %v9212_v23 = vunpack.c.l.bf16 %v15733_v5  ;;  %v12339_v49 = vunpack.i.h.bf16 %v12337_v12  ;;  %v9098_v38 = vmax.f32 %v9082_v11, %v9092_v0 }
 0x638   : > { %v9141_v22 = vmax.f32 %v9097_v26, %v12338_v47  ;;  %v9130_v17 = vsel %vm9008_vm2, %v12334_v44, %v12338_v47  ;;  %v9129_v18 = vsel %vm9008_vm2, %v12333_v48, %v12334_v44  ;;  %v12347_v21 = vpop.permute.xlu1 %12346  ;;  %v9100_v40 = vmax.f32 %v9084_v42, %v9094_v3 }
 0x639   : > { %v9139_v24 = vmax.f32 %v9095_v52, %v9129_v18  ;;  %v12349_v25 = vunpack.i.h.bf16 %v12347_v21  ;;  %v12348_v28 = vunpack.i.l.bf16 %v12347_v21  ;;  %v12342_v29 = vpop.permute.xlu0 %12341  ;;  %v9140_v31 = vmax.f32 %v9096_v9, %v9130_v17 }
 0x63a   : > { %v12344_v30 = vunpack.i.h.bf16 %v12342_v29  ;;  %v12343_v56 = vunpack.i.l.bf16 %v12342_v29  ;;  %v9099_v43 = vmax.f32 %v9083_v15, %v9093_v1  ;;  %v9157_v0 = vmax.f32 %v9141_v22, %v9151_v13 }
 0x63b   : > { %v9155_v39 = vmax.f32 %v9139_v24, %v9149_v45  ;;  %v9189_v35 = vsel %vm9008_vm2, %v12348_v28, %v12349_v25  ;;  %v9156_v13 = vmax.f32 %v9140_v31, %v9150_v6 }
 0x63c   : > { %v9131_v34 = vsel %vm9008_vm2, %v12339_v49, %v12343_v56  ;;  %v9132_v36 = vsel %vm9008_vm2, %v12343_v56, %v12344_v30  ;;  %v9144_v55 = vmax.f32 %v9100_v40, %v12344_v30  ;;  %v12357_v46 = vpop.permute.xlu1 %12356 }
 0x63d   : > { %v9199_v33 = vmax.f32 %v9155_v39, %v9189_v35  ;;  %v9142_v3 = vmax.f32 %v9098_v38, %v9131_v34  ;;  %v9143_v62 = vmax.f32 %v9099_v43, %v9132_v36  ;;  %v12359_v2 = vunpack.i.h.bf16 %v12357_v46  ;;  %v12352_v45 = vpop.permute.xlu0 %12351 }
 0x63e   : > { %v12358_v63 = vunpack.i.l.bf16 %v12357_v46  ;;  %v9160_v50 = vmax.f32 %v9144_v55, %v9154_v4  ;;  %v12354_v1 = vunpack.i.h.bf16 %v12352_v45  ;;  %v12353_v8 = vunpack.i.l.bf16 %v12352_v45 }
 0x63f   : > { %v9215_v51 = vmax.f32 %v9199_v33, %v9209_v57  ;;  %v9159_v54 = vmax.f32 %v9143_v62, %v9153_v59  ;;  %v9158_v61 = vmax.f32 %v9142_v3, %v9152_v16 }
 0x640   : > { %v9192_v12 = vsel %vm9008_vm2, %v12358_v63, %v12359_v2  ;;  %v9204_v4 = vmax.f32 %v9160_v50, %v12359_v2  ;;  %v9191_v37 = vsel %vm9008_vm2, %v12354_v1, %v12358_v63  ;;  %v9190_v41 = vsel %vm9008_vm2, %v12349_v25, %v12353_v8 }
 0x641   : > { %9227 = vst [vmem:[%s12537_s19] sm:$0xff] %v9215_v51  ;;  %v9203_v57 = vmax.f32 %v9159_v54, %v9192_v12  ;;  %v9200_v59 = vmax.f32 %v9156_v13, %v9190_v41  ;;  %v9201_v27 = vmax.f32 %v9157_v0, %v12353_v8  ;;  %v9202_v6 = vmax.f32 %v9158_v61, %v9191_v37 }
 0x642   : > { %v9220_v53 = vmax.f32 %v9204_v4, %v9214_v7 }
 0x643   : > { %v9219_v16 = vmax.f32 %v9203_v57, %v9213_v19  ;;  %v9216_v42 = vmax.f32 %v9200_v59, %v9210_v32  ;;  %v9217_v10 = vmax.f32 %v9201_v27, %v9211_v20  ;;  %v9218_v11 = vmax.f32 %v9202_v6, %v9212_v23 }
 0x644   : > { %9232 = vst.msk [vmem:[%s12537_s19 + $0x28] sm:$0xff] %vm9008_vm2, %v9220_v53 }
 0x645   : > { %9231 = vst [vmem:[%s12537_s19 + $0x20] sm:$0xff] %v9219_v16  ;;  %9228 = vst [vmem:[%s12537_s19 + $0x8] sm:$0xff] %v9216_v42 }
 0x646   : > { %9229 = vst.msk [vmem:[%s12537_s19 + $0x10] sm:$0xff] %vm9008_vm2, %v9217_v10  ;;  %9230 = vst [vmem:[%s12537_s19 + $0x18] sm:$0xff] %v9218_v11 }
 0x647 PF: > { %9239 = sbr.rel (!%p12512_p5) target bundleno = 1617 (0x651), region = 68 }
 0x648   : > { %s9241_s12 = smul.u32 (%p12512_p5), 3, %s12398_s29  ;;  %v9258_v60 = vld [vmem:[%s12537_s19] sm:$0xff] (%p12512_p5) }
 0x649   : > { %s10842_s24 = smul.u32 (%p12512_p5), 18, %s12402_s30 }
 0x64b   : > { %s9243_s26 = sadd.s32 (%p12512_p5), %s10842_s24, %s9241_s12  ;;  %v9268_v20 = vld [vmem:[%s12537_s19 + $0x28] sm:$0xff] (%p12512_p5) }
 0x64c   : > { %v9260_v58 = vld [vmem:[%s12537_s19 + $0x8] sm:$0xff]  ;;  %v9266_v19 = vld [vmem:[%s12537_s19 + $0x20] sm:$0xff]  ;;  %s10379_s25 = sshll.u32 %s9243_s26, 3 }
 0x64d   : > { %v9262_v5 = vld [vmem:[%s12537_s19 + $0x10] sm:$0xff]  ;;  %v9264_v7 = vld [vmem:[%s12537_s19 + $0x18] sm:$0xff]  ;;  %s9245_s14 = scalar_lea.vmem %s15842_s8, %s10379_s25 }
 0x64e   : > { %9259 = vst [vmem:[%s9245_s14] sm:$0xff] %v9258_v60  ;;  %9261 = vst [vmem:[%s9245_s14 + $0x8] sm:$0xff] %v9260_v58 }
 0x64f   : > { %9263 = vst [vmem:[%s9245_s14 + $0x10] sm:$0xff] %v9262_v5  ;;  %9265 = vst [vmem:[%s9245_s14 + $0x48] sm:$0xff] %v9264_v7 }
 0x650   : > { %9267 = vst [vmem:[%s9245_s14 + $0x50] sm:$0xff] %v9266_v19  ;;  %9269 = vst [vmem:[%s9245_s14 + $0x58] sm:$0xff] %v9268_v20 }
 0x651 PF: > { %s18_s11 = sadd.s32 1, %s12414_s11   ;;  %s15848_s19 = sld [smem:[#allocation3_spill]] }
 0x652   : > { %p15_p13 = scmp.ge.s32.totalorder %s18_s11, 8   ;;  %s15849_s23 = sld [smem:[#allocation4_spill]] }
 0x653   : > { %s15850_s27 = smov %s12394_s28  ;;  %s15851_s28 = smov %s12523_s20 }
 0x654   : > { %s15852_s29 = smov %s12406_s9  ;;  %s15853_s30 = smov %s12410_s10 }
 0x655   :  { %17 = sbr.rel (!%p15_p13) target bundleno = 4 (0x4), region = 120 }
 0x657   : > { %s15854_s9 = smov %s15848_s19 }
 0x658   : > { %s15855_s10 = smov %s15849_s23 }

</bundles_post_ra>
